<compile_context>
chip_gen: v7x
topology: tpu7x:2x2x1
jax: 0.10.0
libtpu: 0.0.40
codegen_flags: <defaults>
</compile_context>

<pallas_src>
import jax
import jax.numpy as jnp
from jax import lax
from jax.experimental import pallas as pl
from jax.experimental.pallas import tpu as pltpu


# ----------------------------------------------------------------------------
# Fused features kernel: 3 x (conv3x3 pad=1 + bias + ReLU + maxpool2x2).
# One image per grid step; all intermediate activations stay in VMEM in a
# lane-dense (H, C, W) layout.
# ----------------------------------------------------------------------------
def _conv_pool_layer(src_ref, dst_ref, wm_ref, b_ref, se_ref, so_ref,
                     n_pairs, w_conv, dst_row_off):
    """One Conv3x3(pad=1) + bias + ReLU + MaxPool2x2 layer.

    src_ref : (H+2, Cin, W+2) padded input (1-pixel zero halo)
    dst_ref : (H/2+2, Cout, W/2+2) padded destination (dst_row_off=1) or the
              unpadded final output block (dst_row_off=0)
    wm_ref  : (Cout, 9*Cin) im2col weights, tap order (dh, dw, c)
    b_ref   : (Cout, 1)
    se_ref  : (W, Wn) 0/1 matrix picking even conv columns (zero halo columns
              when Wn == W/2 + 2); so_ref picks the odd columns.
    """

    def body(p, carry):
        wm = wm_ref[...]
        bias = b_ref[...]
        se = se_ref[...]
        so = so_ref[...]
        r0 = 2 * p                       # top padded row of this output pair

        def patches(row):
            # 9 taps, each (Cin, W).  dh lands on the untiled row axis (free),
            # dw is a small static lane shift, and the concat along sublanes is
            # aligned because Cin is a multiple of 8.
            slabs = [src_ref[row + dh, :, pl.ds(dw, w_conv)]
                     for dh in range(3) for dw in range(3)]
            return jnp.concatenate(slabs, axis=0)          # (9*Cin, W)

        conv0 = jnp.dot(wm, patches(r0), preferred_element_type=jnp.float32)
        conv1 = jnp.dot(wm, patches(r0 + 1), preferred_element_type=jnp.float32)
        # H-direction pool first (free elementwise max of the row pair), then
        # bias + ReLU (bias is uniform over the pool window, ReLU is monotone).
        h = jnp.maximum(jnp.maximum(conv0, conv1) + bias, 0.0)  # (Cout, W)
        # W-direction pool: exact 0/1 selection matmuls (no strided lane reads);
        # their zero columns also produce the next layer's column halo.
        he = jnp.dot(h, se, preferred_element_type=jnp.float32,
                     precision=lax.Precision.HIGHEST)
        ho = jnp.dot(h, so, preferred_element_type=jnp.float32,
                     precision=lax.Precision.HIGHEST)
        dst_ref[dst_row_off + p] = jnp.maximum(he, ho)     # (Cout, Wn)
        return carry

    lax.fori_loop(0, n_pairs, body, 0)


def _features_kernel(x_ref, w1_ref, b1_ref, w2_ref, b2_ref, w3_ref, b3_ref,
                     s1e_ref, s1o_ref, s2e_ref, s2o_ref, s3e_ref, s3o_ref,
                     out_ref, xp2, xp3):
    # Zero only the 4 thin halo ROWS of the padded intermediates (column halos
    # come from the selection matrices), every step -> no cross-step state and
    # the batch grid axis can stay "parallel".
    xp2[0] = jnp.zeros((16, 66), jnp.float32)
    xp2[65] = jnp.zeros((16, 66), jnp.float32)
    xp3[0] = jnp.zeros((32, 34), jnp.float32)
    xp3[33] = jnp.zeros((32, 34), jnp.float32)

    # conv1: 8(=3 zero-padded) -> 16, 128x128 -> 64x64
    _conv_pool_layer(x_ref, xp2, w1_ref, b1_ref, s1e_ref, s1o_ref,
                     n_pairs=64, w_conv=128, dst_row_off=1)
    # conv2: 16 -> 32, 64x64 -> 32x32
    _conv_pool_layer(xp2, xp3, w2_ref, b2_ref, s2e_ref, s2o_ref,
                     n_pairs=32, w_conv=64, dst_row_off=1)
    # conv3: 32 -> 64, 32x32 -> 16x16, written straight into the output block.
    _conv_pool_layer(xp3, out_ref, w3_ref, b3_ref, s3e_ref, s3o_ref,
                     n_pairs=16, w_conv=32, dst_row_off=0)


def fused_features(x_padded, q):
    """x_padded: (N, 130, 8, 130) f32, layout (n, h, c, w), zero halo/channels."""
    N = x_padded.shape[0]
    const = lambda n: (0, 0)
    return pl.pallas_call(
        _features_kernel,
        out_shape=jax.ShapeDtypeStruct((N, 16, 64, 16), jnp.float32),  # (n,h,c,w)
        grid_spec=pltpu.PrefetchScalarGridSpec(
            num_scalar_prefetch=0,
            grid=(N,),
            in_specs=[
                pl.BlockSpec((None, 130, 8, 130), lambda n: (n, 0, 0, 0)),
                pl.BlockSpec((16, 72), const),    # conv weights / biases stay
                pl.BlockSpec((16, 1), const),     # resident (constant index_map
                pl.BlockSpec((32, 144), const),   # -> no re-DMA per image)
                pl.BlockSpec((32, 1), const),
                pl.BlockSpec((64, 288), const),
                pl.BlockSpec((64, 1), const),
                pl.BlockSpec((128, 66), const),   # pooling selection matrices
                pl.BlockSpec((128, 66), const),
                pl.BlockSpec((64, 34), const),
                pl.BlockSpec((64, 34), const),
                pl.BlockSpec((32, 16), const),
                pl.BlockSpec((32, 16), const),
            ],
            out_specs=pl.BlockSpec((None, 16, 64, 16), lambda n: (n, 0, 0, 0)),
            scratch_shapes=[
                pltpu.VMEM((66, 16, 66), jnp.float32),   # padded act1 (H,C,W)
                pltpu.VMEM((34, 32, 34), jnp.float32),   # padded act2 (H,C,W)
            ],
        ),
        compiler_params=pltpu.CompilerParams(
            dimension_semantics=("parallel",),           # no cross-step state
        ),
    )(x_padded, q["w1"], q["b1"], q["w2"], q["b2"], q["w3"], q["b3"],
      q["s1e"], q["s1o"], q["s2e"], q["s2o"], q["s3e"], q["s3o"])


# ----------------------------------------------------------------------------
# Classifier: Linear(16384,128)+ReLU+[Dropout=identity]+Linear(128,1)+Sigmoid,
# tiled over the batch; w_fc1 stays resident in VMEM.
# ----------------------------------------------------------------------------
def _classifier_kernel(x_ref, w1_ref, b1_ref, w2_ref, b2_ref, out_ref):
    h = jnp.dot(x_ref[...], w1_ref[...], preferred_element_type=jnp.float32)
    h = jnp.maximum(h + b1_ref[...], 0.0)
    # nn.Dropout(0.3) is identity at inference (eval mode).
    z = jnp.dot(h, w2_ref[...], preferred_element_type=jnp.float32) + b2_ref[...]
    out_ref[...] = 1.0 / (1.0 + jnp.exp(-z))


def classifier(x_flat, w1, b1, w2, b2, block_rows=128):
    N, K = x_flat.shape
    tb = min(block_rows, N)
    return pl.pallas_call(
        _classifier_kernel,
        out_shape=jax.ShapeDtypeStruct((N, 1), jnp.float32),
        grid_spec=pltpu.PrefetchScalarGridSpec(
            num_scalar_prefetch=0,
            grid=(pl.cdiv(N, tb),),
            in_specs=[
                pl.BlockSpec((tb, K), lambda i: (i, 0)),
                pl.BlockSpec((K, 128), lambda i: (0, 0)),   # w_fc1 resident
                pl.BlockSpec((1, 128), lambda i: (0, 0)),
                pl.BlockSpec((128, 1), lambda i: (0, 0)),
                pl.BlockSpec((1, 1), lambda i: (0, 0)),
            ],
            out_specs=pl.BlockSpec((tb, 1), lambda i: (i, 0)),
        ),
        compiler_params=pltpu.CompilerParams(
            dimension_semantics=("parallel",),
            vmem_limit_bytes=48 * 1024 * 1024,
        ),
    )(x_flat, w1, b1, w2, b2)


# ----------------------------------------------------------------------------
# Parameter / input preparation (one-time, host side) and full forward
# ----------------------------------------------------------------------------
def _pool_selectors(w, halo):
    """0/1 matrices (w, wn) selecting even / odd conv columns; when `halo` the
    first and last output column are all-zero (they form the next layer's
    column halo)."""
    wn = w // 2 + (2 if halo else 0)
    off = 1 if halo else 0
    row = jnp.arange(w)[:, None]
    col = jnp.arange(wn)[None, :]
    se = (row == 2 * (col - off)).astype(jnp.float32)
    so = (row == 2 * (col - off) + 1).astype(jnp.float32)
    return se, so


def prepare_params(p):
    """Convert HelmetCNN parameters (HWIO / (in,out) layout) to kernel layout."""
    q = {}
    # Layer-1 input channels are zero-padded 3 -> 8 so tap concatenation is
    # sublane-aligned; pad the weight rows to match (exact, zeros contribute 0).
    w1 = jnp.pad(p["w_conv1"], ((0, 0), (0, 0), (0, 5), (0, 0)))   # (3,3,8,16)
    q["w1"] = w1.reshape(9 * 8, 16).T                               # (16, 72)
    q["b1"] = p["b_conv1"].reshape(16, 1)
    q["w2"] = p["w_conv2"].reshape(9 * 16, 32).T                    # (32, 144)
    q["b2"] = p["b_conv2"].reshape(32, 1)
    q["w3"] = p["w_conv3"].reshape(9 * 32, 64).T                    # (64, 288)
    q["b3"] = p["b_conv3"].reshape(64, 1)
    q["s1e"], q["s1o"] = _pool_selectors(128, halo=True)            # (128, 66)
    q["s2e"], q["s2o"] = _pool_selectors(64, halo=True)             # (64, 34)
    q["s3e"], q["s3o"] = _pool_selectors(32, halo=False)            # (32, 16)
    # PyTorch flattens NCHW as (c, h, w); the fused kernel emits (h, c, w), so
    # permute the fc1 weight rows once here.  Everything stays f32.
    w_fc1 = p["w_fc1"].reshape(64, 16, 16, 128).transpose(1, 0, 2, 3)
    q["w_fc1"] = w_fc1.reshape(16384, 128)
    q["b_fc1"] = p["b_fc1"].reshape(1, 128)
    q["w_fc2"] = p["w_fc2"]                                          # (128, 1)
    q["b_fc2"] = p["b_fc2"].reshape(1, 1)
    return q


def helmet_cnn_forward(x_nchw, q):
    # (N,C,H,W) -> (N,H,C,W), then zero-pad: H/W 1-pixel halo, channels 3 -> 8.
    x = jnp.transpose(x_nchw, (0, 2, 1, 3))
    x = jnp.pad(x, ((0, 0), (1, 1), (0, 5), (1, 1)))       # (N, 130, 8, 130)
    feat = fused_features(x, q)                             # (N, 16, 64, 16) f32
    N = feat.shape[0]
    x_flat = feat.reshape(N, 16 * 64 * 16)                  # (h, c, w) order
    return classifier(x_flat, q["w_fc1"], q["b_fc1"], q["w_fc2"], q["b_fc2"])


# ----------------------------------------------------------------------------
# Deterministic parameter init (shapes from HelmetCNN.__init__) and reference
# ----------------------------------------------------------------------------
def init_params(key):
    ks = jax.random.split(key, 10)

    def conv_w(k, cin, cout):
        return jax.random.normal(k, (3, 3, cin, cout), jnp.float32) / jnp.sqrt(9.0 * cin)

    def lin_w(k, din, dout):
        return jax.random.normal(k, (din, dout), jnp.float32) / jnp.sqrt(float(din))

    return {
        "w_conv1": conv_w(ks[0], 3, 16),
        "b_conv1": 0.01 * jax.random.normal(ks[1], (16,), jnp.float32),
        "w_conv2": conv_w(ks[2], 16, 32),
        "b_conv2": 0.01 * jax.random.normal(ks[3], (32,), jnp.float32),
        "w_conv3": conv_w(ks[4], 32, 64),
        "b_conv3": 0.01 * jax.random.normal(ks[5], (64,), jnp.float32),
        "w_fc1": lin_w(ks[6], 64 * 16 * 16, 128),
        "b_fc1": 0.01 * jax.random.normal(ks[7], (128,), jnp.float32),
        "w_fc2": lin_w(ks[8], 128, 1),
        "b_fc2": 0.01 * jax.random.normal(ks[9], (1,), jnp.float32),
    }


def reference_forward(x_nchw, p):
    """Pure-JAX f32 reference matching the PyTorch module."""
    x = jnp.transpose(x_nchw, (0, 2, 3, 1))
    for i in (1, 2, 3):
        w, b = p[f"w_conv{i}"], p[f"b_conv{i}"]
        x = lax.conv_general_dilated(x, w, (1, 1), "SAME",
                                     dimension_numbers=("NHWC", "HWIO", "NHWC")) + b
        x = jnp.maximum(x, 0.0)
        x = lax.reduce_window(x, -jnp.inf, lax.max, (1, 2, 2, 1), (1, 2, 2, 1), "VALID")
    N = x.shape[0]
    xf = jnp.transpose(x, (0, 3, 1, 2)).reshape(N, -1)      # NCHW flatten (nn.Flatten)
    h = jnp.maximum(xf @ p["w_fc1"] + p["b_fc1"], 0.0)
    z = h @ p["w_fc2"] + p["b_fc2"]
    return 1.0 / (1.0 + jnp.exp(-z))


if __name__ == "__main__":
    key = jax.random.PRNGKey(0)
    pkey, xkey = jax.random.split(key)
    params = init_params(pkey)
    # Linear(64*16*16, 128) implies 128x128 spatial input (three 2x pools: 128->16).
    x = jax.random.normal(xkey, (2, 3, 128, 128), jnp.float32)

    q = prepare_params(params)
    forward = jax.jit(helmet_cnn_forward)
    out = jax.block_until_ready(forward(x, q))
    assert out.shape == (2, 1)

    ref = reference_forward(x, params)
    assert bool(jnp.allclose(out, ref, atol=2e-3, rtol=2e-3)), (out, ref)
    print("KERNEL_OK")
</pallas_src>

<mosaic_0001>
module attributes {stable_mosaic.version = 11 : i64} {
  func.func @_features_kernel(%arg0: i32, %arg1: memref<1x130x8x130xf32, #tpu.memory_space<vmem>>, %arg2: memref<16x72xf32, #tpu.memory_space<vmem>>, %arg3: memref<16x1xf32, #tpu.memory_space<vmem>>, %arg4: memref<32x144xf32, #tpu.memory_space<vmem>>, %arg5: memref<32x1xf32, #tpu.memory_space<vmem>>, %arg6: memref<64x288xf32, #tpu.memory_space<vmem>>, %arg7: memref<64x1xf32, #tpu.memory_space<vmem>>, %arg8: memref<128x66xf32, #tpu.memory_space<vmem>>, %arg9: memref<128x66xf32, #tpu.memory_space<vmem>>, %arg10: memref<64x34xf32, #tpu.memory_space<vmem>>, %arg11: memref<64x34xf32, #tpu.memory_space<vmem>>, %arg12: memref<32x16xf32, #tpu.memory_space<vmem>>, %arg13: memref<32x16xf32, #tpu.memory_space<vmem>>, %arg14: memref<1x16x64x16xf32, #tpu.memory_space<vmem>>, %arg15: memref<66x16x66xf32, #tpu.memory_space<vmem>>, %arg16: memref<34x32x34xf32, #tpu.memory_space<vmem>>) attributes {dimension_semantics = [#tpu.dimension_semantics<parallel>], iteration_bounds = array<i64: 2>, scalar_prefetch = 0 : i64, scratch_operands = 2 : i64, tpu.core_type = #tpu.core_type<tc>, window_params = [{transform_indices = @transform_0, window_bounds = array<i64: 1, 130, 8, 130>}, {pipeline_mode = #tpu.pipeline_mode<synchronous>, transform_indices = @transform_1, window_bounds = array<i64: 16, 72>}, {pipeline_mode = #tpu.pipeline_mode<synchronous>, transform_indices = @transform_2, window_bounds = array<i64: 16, 1>}, {pipeline_mode = #tpu.pipeline_mode<synchronous>, transform_indices = @transform_3, window_bounds = array<i64: 32, 144>}, {pipeline_mode = #tpu.pipeline_mode<synchronous>, transform_indices = @transform_4, window_bounds = array<i64: 32, 1>}, {pipeline_mode = #tpu.pipeline_mode<synchronous>, transform_indices = @transform_5, window_bounds = array<i64: 64, 288>}, {pipeline_mode = #tpu.pipeline_mode<synchronous>, transform_indices = @transform_6, window_bounds = array<i64: 64, 1>}, {pipeline_mode = #tpu.pipeline_mode<synchronous>, transform_indices = @transform_7, window_bounds = array<i64: 128, 66>}, {pipeline_mode = #tpu.pipeline_mode<synchronous>, transform_indices = @transform_8, window_bounds = array<i64: 128, 66>}, {pipeline_mode = #tpu.pipeline_mode<synchronous>, transform_indices = @transform_9, window_bounds = array<i64: 64, 34>}, {pipeline_mode = #tpu.pipeline_mode<synchronous>, transform_indices = @transform_10, window_bounds = array<i64: 64, 34>}, {pipeline_mode = #tpu.pipeline_mode<synchronous>, transform_indices = @transform_11, window_bounds = array<i64: 32, 16>}, {pipeline_mode = #tpu.pipeline_mode<synchronous>, transform_indices = @transform_12, window_bounds = array<i64: 32, 16>}, {transform_indices = @transform_13, window_bounds = array<i64: 1, 16, 64, 16>}]} {
    %cst = arith.constant 0.000000e+00 : f32
    %0 = vector.broadcast %cst : f32 to vector<16x66xf32>
    %c0 = arith.constant 0 : index
    %c0_0 = arith.constant 0 : index
    %c0_1 = arith.constant 0 : index
    %1 = vector.load %arg15[%c0, %c0_0, %c0_1] : memref<66x16x66xf32, #tpu.memory_space<vmem>>, vector<1x16x66xf32>
    %2 = vector.shape_cast %1 : vector<1x16x66xf32> to vector<16x66xf32>
    %3 = vector.shape_cast %0 : vector<16x66xf32> to vector<1x16x66xf32>
    tpu.vector_store %arg15[%c0, %c0_0, %c0_1], %3 {strides = array<i32>} : memref<66x16x66xf32, #tpu.memory_space<vmem>>, vector<1x16x66xf32>,
    %cst_2 = arith.constant 0.000000e+00 : f32
    %4 = vector.broadcast %cst_2 : f32 to vector<16x66xf32>
    %c65 = arith.constant 65 : index
    %c0_3 = arith.constant 0 : index
    %c0_4 = arith.constant 0 : index
    %5 = vector.load %arg15[%c65, %c0_3, %c0_4] : memref<66x16x66xf32, #tpu.memory_space<vmem>>, vector<1x16x66xf32>
    %6 = vector.shape_cast %5 : vector<1x16x66xf32> to vector<16x66xf32>
    %7 = vector.shape_cast %4 : vector<16x66xf32> to vector<1x16x66xf32>
    tpu.vector_store %arg15[%c65, %c0_3, %c0_4], %7 {strides = array<i32>} : memref<66x16x66xf32, #tpu.memory_space<vmem>>, vector<1x16x66xf32>,
    %cst_5 = arith.constant 0.000000e+00 : f32
    %8 = vector.broadcast %cst_5 : f32 to vector<32x34xf32>
    %c0_6 = arith.constant 0 : index
    %c0_7 = arith.constant 0 : index
    %c0_8 = arith.constant 0 : index
    %9 = vector.load %arg16[%c0_6, %c0_7, %c0_8] : memref<34x32x34xf32, #tpu.memory_space<vmem>>, vector<1x32x34xf32>
    %10 = vector.shape_cast %9 : vector<1x32x34xf32> to vector<32x34xf32>
    %11 = vector.shape_cast %8 : vector<32x34xf32> to vector<1x32x34xf32>
    tpu.vector_store %arg16[%c0_6, %c0_7, %c0_8], %11 {strides = array<i32>} : memref<34x32x34xf32, #tpu.memory_space<vmem>>, vector<1x32x34xf32>,
    %cst_9 = arith.constant 0.000000e+00 : f32
    %12 = vector.broadcast %cst_9 : f32 to vector<32x34xf32>
    %c33 = arith.constant 33 : index
    %c0_10 = arith.constant 0 : index
    %c0_11 = arith.constant 0 : index
    %13 = vector.load %arg16[%c33, %c0_10, %c0_11] : memref<34x32x34xf32, #tpu.memory_space<vmem>>, vector<1x32x34xf32>
    %14 = vector.shape_cast %13 : vector<1x32x34xf32> to vector<32x34xf32>
    %15 = vector.shape_cast %12 : vector<32x34xf32> to vector<1x32x34xf32>
    tpu.vector_store %arg16[%c33, %c0_10, %c0_11], %15 {strides = array<i32>} : memref<34x32x34xf32, #tpu.memory_space<vmem>>, vector<1x32x34xf32>,
    %c0_i32 = arith.constant 0 : i32
    %c64_i32 = arith.constant 64 : i32
    %16 = arith.addi %c0_i32, %c64_i32 : i32
    %c1_i32 = arith.constant 1 : i32
    scf.for %arg17 = %c0_i32 to %16 step %c1_i32  : i32 {
      %c0_19 = arith.constant 0 : index
      %c0_20 = arith.constant 0 : index
      %19 = vector.load %arg2[%c0_19, %c0_20] : memref<16x72xf32, #tpu.memory_space<vmem>>, vector<16x72xf32>
      %c0_21 = arith.constant 0 : index
      %c0_22 = arith.constant 0 : index
      %20 = vector.load %arg3[%c0_21, %c0_22] : memref<16x1xf32, #tpu.memory_space<vmem>>, vector<16x1xf32>
      %c0_23 = arith.constant 0 : index
      %c0_24 = arith.constant 0 : index
      %21 = vector.load %arg8[%c0_23, %c0_24] : memref<128x66xf32, #tpu.memory_space<vmem>>, vector<128x66xf32>
      %c0_25 = arith.constant 0 : index
      %c0_26 = arith.constant 0 : index
      %22 = vector.load %arg9[%c0_25, %c0_26] : memref<128x66xf32, #tpu.memory_space<vmem>>, vector<128x66xf32>
      %c2_i32 = arith.constant 2 : i32
      %23 = arith.muli %c2_i32, %arg17 : i32
      %c0_i32_27 = arith.constant 0 : i32
      %24 = arith.addi %23, %c0_i32_27 : i32
      %c0_28 = arith.constant 0 : index
      %25 = arith.index_cast %24 : i32 to index
      %c0_29 = arith.constant 0 : index
      %c0_30 = arith.constant 0 : index
      %26 = vector.load %arg1[%c0_28, %25, %c0_29, %c0_30] : memref<1x130x8x130xf32, #tpu.memory_space<vmem>>, vector<1x1x8x128xf32>
      %27 = vector.shape_cast %26 : vector<1x1x8x128xf32> to vector<8x128xf32>
      %c0_i32_31 = arith.constant 0 : i32
      %28 = arith.addi %23, %c0_i32_31 : i32
      %c0_32 = arith.constant 0 : index
      %29 = arith.index_cast %28 : i32 to index
      %c0_33 = arith.constant 0 : index
      %c1 = arith.constant 1 : index
      %30 = vector.load %arg1[%c0_32, %29, %c0_33, %c1] : memref<1x130x8x130xf32, #tpu.memory_space<vmem>>, vector<1x1x8x128xf32>
      %31 = vector.shape_cast %30 : vector<1x1x8x128xf32> to vector<8x128xf32>
      %c0_i32_34 = arith.constant 0 : i32
      %32 = arith.addi %23, %c0_i32_34 : i32
      %c0_35 = arith.constant 0 : index
      %33 = arith.index_cast %32 : i32 to index
      %c0_36 = arith.constant 0 : index
      %c2 = arith.constant 2 : index
      %34 = vector.load %arg1[%c0_35, %33, %c0_36, %c2] : memref<1x130x8x130xf32, #tpu.memory_space<vmem>>, vector<1x1x8x128xf32>
      %35 = vector.shape_cast %34 : vector<1x1x8x128xf32> to vector<8x128xf32>
      %c1_i32_37 = arith.constant 1 : i32
      %36 = arith.addi %23, %c1_i32_37 : i32
      %c0_38 = arith.constant 0 : index
      %37 = arith.index_cast %36 : i32 to index
      %c0_39 = arith.constant 0 : index
      %c0_40 = arith.constant 0 : index
      %38 = vector.load %arg1[%c0_38, %37, %c0_39, %c0_40] : memref<1x130x8x130xf32, #tpu.memory_space<vmem>>, vector<1x1x8x128xf32>
      %39 = vector.shape_cast %38 : vector<1x1x8x128xf32> to vector<8x128xf32>
      %c1_i32_41 = arith.constant 1 : i32
      %40 = arith.addi %23, %c1_i32_41 : i32
      %c0_42 = arith.constant 0 : index
      %41 = arith.index_cast %40 : i32 to index
      %c0_43 = arith.constant 0 : index
      %c1_44 = arith.constant 1 : index
      %42 = vector.load %arg1[%c0_42, %41, %c0_43, %c1_44] : memref<1x130x8x130xf32, #tpu.memory_space<vmem>>, vector<1x1x8x128xf32>
      %43 = vector.shape_cast %42 : vector<1x1x8x128xf32> to vector<8x128xf32>
      %c1_i32_45 = arith.constant 1 : i32
      %44 = arith.addi %23, %c1_i32_45 : i32
      %c0_46 = arith.constant 0 : index
      %45 = arith.index_cast %44 : i32 to index
      %c0_47 = arith.constant 0 : index
      %c2_48 = arith.constant 2 : index
      %46 = vector.load %arg1[%c0_46, %45, %c0_47, %c2_48] : memref<1x130x8x130xf32, #tpu.memory_space<vmem>>, vector<1x1x8x128xf32>
      %47 = vector.shape_cast %46 : vector<1x1x8x128xf32> to vector<8x128xf32>
      %c2_i32_49 = arith.constant 2 : i32
      %48 = arith.addi %23, %c2_i32_49 : i32
      %c0_50 = arith.constant 0 : index
      %49 = arith.index_cast %48 : i32 to index
      %c0_51 = arith.constant 0 : index
      %c0_52 = arith.constant 0 : index
      %50 = vector.load %arg1[%c0_50, %49, %c0_51, %c0_52] : memref<1x130x8x130xf32, #tpu.memory_space<vmem>>, vector<1x1x8x128xf32>
      %51 = vector.shape_cast %50 : vector<1x1x8x128xf32> to vector<8x128xf32>
      %c2_i32_53 = arith.constant 2 : i32
      %52 = arith.addi %23, %c2_i32_53 : i32
      %c0_54 = arith.constant 0 : index
      %53 = arith.index_cast %52 : i32 to index
      %c0_55 = arith.constant 0 : index
      %c1_56 = arith.constant 1 : index
      %54 = vector.load %arg1[%c0_54, %53, %c0_55, %c1_56] : memref<1x130x8x130xf32, #tpu.memory_space<vmem>>, vector<1x1x8x128xf32>
      %55 = vector.shape_cast %54 : vector<1x1x8x128xf32> to vector<8x128xf32>
      %c2_i32_57 = arith.constant 2 : i32
      %56 = arith.addi %23, %c2_i32_57 : i32
      %c0_58 = arith.constant 0 : index
      %57 = arith.index_cast %56 : i32 to index
      %c0_59 = arith.constant 0 : index
      %c2_60 = arith.constant 2 : index
      %58 = vector.load %arg1[%c0_58, %57, %c0_59, %c2_60] : memref<1x130x8x130xf32, #tpu.memory_space<vmem>>, vector<1x1x8x128xf32>
      %59 = vector.shape_cast %58 : vector<1x1x8x128xf32> to vector<8x128xf32>
      %60 = tpu.concatenate %27, %31, %35, %39, %43, %47, %51, %55, %59 in 0 : vector<8x128xf32>, vector<8x128xf32>, vector<8x128xf32>, vector<8x128xf32>, vector<8x128xf32>, vector<8x128xf32>, vector<8x128xf32>, vector<8x128xf32>, vector<8x128xf32> -> vector<72x128xf32>
      %cst_61 = arith.constant dense<0.000000e+00> : vector<16x128xf32>
      %61 = tpu.matmul %19, %60, %cst_61 {dimension_numbers = #tpu.dot_dimension_numbers<[1], [0], [0], [1], [0, 0, 1, 1], [], []>} : vector<16x72xf32>, vector<72x128xf32>, vector<16x128xf32> -> vector<16x128xf32>
      %c1_i32_62 = arith.constant 1 : i32
      %62 = arith.addi %23, %c1_i32_62 : i32
      %c0_i32_63 = arith.constant 0 : i32
      %63 = arith.addi %62, %c0_i32_63 : i32
      %c0_64 = arith.constant 0 : index
      %64 = arith.index_cast %63 : i32 to index
      %c0_65 = arith.constant 0 : index
      %c0_66 = arith.constant 0 : index
      %65 = vector.load %arg1[%c0_64, %64, %c0_65, %c0_66] : memref<1x130x8x130xf32, #tpu.memory_space<vmem>>, vector<1x1x8x128xf32>
      %66 = vector.shape_cast %65 : vector<1x1x8x128xf32> to vector<8x128xf32>
      %c0_i32_67 = arith.constant 0 : i32
      %67 = arith.addi %62, %c0_i32_67 : i32
      %c0_68 = arith.constant 0 : index
      %68 = arith.index_cast %67 : i32 to index
      %c0_69 = arith.constant 0 : index
      %c1_70 = arith.constant 1 : index
      %69 = vector.load %arg1[%c0_68, %68, %c0_69, %c1_70] : memref<1x130x8x130xf32, #tpu.memory_space<vmem>>, vector<1x1x8x128xf32>
      %70 = vector.shape_cast %69 : vector<1x1x8x128xf32> to vector<8x128xf32>
      %c0_i32_71 = arith.constant 0 : i32
      %71 = arith.addi %62, %c0_i32_71 : i32
      %c0_72 = arith.constant 0 : index
      %72 = arith.index_cast %71 : i32 to index
      %c0_73 = arith.constant 0 : index
      %c2_74 = arith.constant 2 : index
      %73 = vector.load %arg1[%c0_72, %72, %c0_73, %c2_74] : memref<1x130x8x130xf32, #tpu.memory_space<vmem>>, vector<1x1x8x128xf32>
      %74 = vector.shape_cast %73 : vector<1x1x8x128xf32> to vector<8x128xf32>
      %c1_i32_75 = arith.constant 1 : i32
      %75 = arith.addi %62, %c1_i32_75 : i32
      %c0_76 = arith.constant 0 : index
      %76 = arith.index_cast %75 : i32 to index
      %c0_77 = arith.constant 0 : index
      %c0_78 = arith.constant 0 : index
      %77 = vector.load %arg1[%c0_76, %76, %c0_77, %c0_78] : memref<1x130x8x130xf32, #tpu.memory_space<vmem>>, vector<1x1x8x128xf32>
      %78 = vector.shape_cast %77 : vector<1x1x8x128xf32> to vector<8x128xf32>
      %c1_i32_79 = arith.constant 1 : i32
      %79 = arith.addi %62, %c1_i32_79 : i32
      %c0_80 = arith.constant 0 : index
      %80 = arith.index_cast %79 : i32 to index
      %c0_81 = arith.constant 0 : index
      %c1_82 = arith.constant 1 : index
      %81 = vector.load %arg1[%c0_80, %80, %c0_81, %c1_82] : memref<1x130x8x130xf32, #tpu.memory_space<vmem>>, vector<1x1x8x128xf32>
      %82 = vector.shape_cast %81 : vector<1x1x8x128xf32> to vector<8x128xf32>
      %c1_i32_83 = arith.constant 1 : i32
      %83 = arith.addi %62, %c1_i32_83 : i32
      %c0_84 = arith.constant 0 : index
      %84 = arith.index_cast %83 : i32 to index
      %c0_85 = arith.constant 0 : index
      %c2_86 = arith.constant 2 : index
      %85 = vector.load %arg1[%c0_84, %84, %c0_85, %c2_86] : memref<1x130x8x130xf32, #tpu.memory_space<vmem>>, vector<1x1x8x128xf32>
      %86 = vector.shape_cast %85 : vector<1x1x8x128xf32> to vector<8x128xf32>
      %c2_i32_87 = arith.constant 2 : i32
      %87 = arith.addi %62, %c2_i32_87 : i32
      %c0_88 = arith.constant 0 : index
      %88 = arith.index_cast %87 : i32 to index
      %c0_89 = arith.constant 0 : index
      %c0_90 = arith.constant 0 : index
      %89 = vector.load %arg1[%c0_88, %88, %c0_89, %c0_90] : memref<1x130x8x130xf32, #tpu.memory_space<vmem>>, vector<1x1x8x128xf32>
      %90 = vector.shape_cast %89 : vector<1x1x8x128xf32> to vector<8x128xf32>
      %c2_i32_91 = arith.constant 2 : i32
      %91 = arith.addi %62, %c2_i32_91 : i32
      %c0_92 = arith.constant 0 : index
      %92 = arith.index_cast %91 : i32 to index
      %c0_93 = arith.constant 0 : index
      %c1_94 = arith.constant 1 : index
      %93 = vector.load %arg1[%c0_92, %92, %c0_93, %c1_94] : memref<1x130x8x130xf32, #tpu.memory_space<vmem>>, vector<1x1x8x128xf32>
      %94 = vector.shape_cast %93 : vector<1x1x8x128xf32> to vector<8x128xf32>
      %c2_i32_95 = arith.constant 2 : i32
      %95 = arith.addi %62, %c2_i32_95 : i32
      %c0_96 = arith.constant 0 : index
      %96 = arith.index_cast %95 : i32 to index
      %c0_97 = arith.constant 0 : index
      %c2_98 = arith.constant 2 : index
      %97 = vector.load %arg1[%c0_96, %96, %c0_97, %c2_98] : memref<1x130x8x130xf32, #tpu.memory_space<vmem>>, vector<1x1x8x128xf32>
      %98 = vector.shape_cast %97 : vector<1x1x8x128xf32> to vector<8x128xf32>
      %99 = tpu.concatenate %66, %70, %74, %78, %82, %86, %90, %94, %98 in 0 : vector<8x128xf32>, vector<8x128xf32>, vector<8x128xf32>, vector<8x128xf32>, vector<8x128xf32>, vector<8x128xf32>, vector<8x128xf32>, vector<8x128xf32>, vector<8x128xf32> -> vector<72x128xf32>
      %cst_99 = arith.constant dense<0.000000e+00> : vector<16x128xf32>
      %100 = tpu.matmul %19, %99, %cst_99 {dimension_numbers = #tpu.dot_dimension_numbers<[1], [0], [0], [1], [0, 0, 1, 1], [], []>} : vector<16x72xf32>, vector<72x128xf32>, vector<16x128xf32> -> vector<16x128xf32>
      %101 = arith.maximumf %61, %100 : vector<16x128xf32>
      %102 = vector.broadcast %20 : vector<16x1xf32> to vector<16x128xf32>
      %103 = arith.addf %101, %102 : vector<16x128xf32>
      %cst_100 = arith.constant 0.000000e+00 : f32
      %104 = vector.broadcast %cst_100 : f32 to vector<16x128xf32>
      %105 = arith.maximumf %103, %104 : vector<16x128xf32>
      %cst_101 = arith.constant dense<0.000000e+00> : vector<16x66xf32>
      %106 = tpu.matmul %105, %21, %cst_101 {dimension_numbers = #tpu.dot_dimension_numbers<[1], [0], [0], [1], [0, 0, 1, 1], [], []>, precision = #tpu.contract_precision<fp32>} : vector<16x128xf32>, vector<128x66xf32>, vector<16x66xf32> -> vector<16x66xf32>
      %cst_102 = arith.constant dense<0.000000e+00> : vector<16x66xf32>
      %107 = tpu.matmul %105, %22, %cst_102 {dimension_numbers = #tpu.dot_dimension_numbers<[1], [0], [0], [1], [0, 0, 1, 1], [], []>, precision = #tpu.contract_precision<fp32>} : vector<16x128xf32>, vector<128x66xf32>, vector<16x66xf32> -> vector<16x66xf32>
      %108 = arith.maximumf %106, %107 : vector<16x66xf32>
      %c1_i32_103 = arith.constant 1 : i32
      %109 = arith.addi %c1_i32_103, %arg17 : i32
      %110 = arith.index_cast %109 : i32 to index
      %c0_104 = arith.constant 0 : index
      %c0_105 = arith.constant 0 : index
      %111 = vector.load %arg15[%110, %c0_104, %c0_105] : memref<66x16x66xf32, #tpu.memory_space<vmem>>, vector<1x16x66xf32>
      %112 = vector.shape_cast %111 : vector<1x16x66xf32> to vector<16x66xf32>
      %113 = vector.shape_cast %108 : vector<16x66xf32> to vector<1x16x66xf32>
      tpu.vector_store %arg15[%110, %c0_104, %c0_105], %113 {strides = array<i32>} : memref<66x16x66xf32, #tpu.memory_space<vmem>>, vector<1x16x66xf32>,
    }
    %c64_i32_12 = arith.constant 64 : i32
    %c0_i32_13 = arith.constant 0 : i32
    %c32_i32 = arith.constant 32 : i32
    %17 = arith.addi %c0_i32_13, %c32_i32 : i32
    %c1_i32_14 = arith.constant 1 : i32
    scf.for %arg17 = %c0_i32_13 to %17 step %c1_i32_14  : i32 {
      %c0_19 = arith.constant 0 : index
      %c0_20 = arith.constant 0 : index
      %19 = vector.load %arg4[%c0_19, %c0_20] : memref<32x144xf32, #tpu.memory_space<vmem>>, vector<32x144xf32>
      %c0_21 = arith.constant 0 : index
      %c0_22 = arith.constant 0 : index
      %20 = vector.load %arg5[%c0_21, %c0_22] : memref<32x1xf32, #tpu.memory_space<vmem>>, vector<32x1xf32>
      %c0_23 = arith.constant 0 : index
      %c0_24 = arith.constant 0 : index
      %21 = vector.load %arg10[%c0_23, %c0_24] : memref<64x34xf32, #tpu.memory_space<vmem>>, vector<64x34xf32>
      %c0_25 = arith.constant 0 : index
      %c0_26 = arith.constant 0 : index
      %22 = vector.load %arg11[%c0_25, %c0_26] : memref<64x34xf32, #tpu.memory_space<vmem>>, vector<64x34xf32>
      %c2_i32 = arith.constant 2 : i32
      %23 = arith.muli %c2_i32, %arg17 : i32
      %c0_i32_27 = arith.constant 0 : i32
      %24 = arith.addi %23, %c0_i32_27 : i32
      %25 = arith.index_cast %24 : i32 to index
      %c0_28 = arith.constant 0 : index
      %c0_29 = arith.constant 0 : index
      %26 = vector.load %arg15[%25, %c0_28, %c0_29] : memref<66x16x66xf32, #tpu.memory_space<vmem>>, vector<1x16x64xf32>
      %27 = vector.shape_cast %26 : vector<1x16x64xf32> to vector<16x64xf32>
      %c0_i32_30 = arith.constant 0 : i32
      %28 = arith.addi %23, %c0_i32_30 : i32
      %29 = arith.index_cast %28 : i32 to index
      %c0_31 = arith.constant 0 : index
      %c1 = arith.constant 1 : index
      %30 = vector.load %arg15[%29, %c0_31, %c1] : memref<66x16x66xf32, #tpu.memory_space<vmem>>, vector<1x16x64xf32>
      %31 = vector.shape_cast %30 : vector<1x16x64xf32> to vector<16x64xf32>
      %c0_i32_32 = arith.constant 0 : i32
      %32 = arith.addi %23, %c0_i32_32 : i32
      %33 = arith.index_cast %32 : i32 to index
      %c0_33 = arith.constant 0 : index
      %c2 = arith.constant 2 : index
      %34 = vector.load %arg15[%33, %c0_33, %c2] : memref<66x16x66xf32, #tpu.memory_space<vmem>>, vector<1x16x64xf32>
      %35 = vector.shape_cast %34 : vector<1x16x64xf32> to vector<16x64xf32>
      %c1_i32_34 = arith.constant 1 : i32
      %36 = arith.addi %23, %c1_i32_34 : i32
      %37 = arith.index_cast %36 : i32 to index
      %c0_35 = arith.constant 0 : index
      %c0_36 = arith.constant 0 : index
      %38 = vector.load %arg15[%37, %c0_35, %c0_36] : memref<66x16x66xf32, #tpu.memory_space<vmem>>, vector<1x16x64xf32>
      %39 = vector.shape_cast %38 : vector<1x16x64xf32> to vector<16x64xf32>
      %c1_i32_37 = arith.constant 1 : i32
      %40 = arith.addi %23, %c1_i32_37 : i32
      %41 = arith.index_cast %40 : i32 to index
      %c0_38 = arith.constant 0 : index
      %c1_39 = arith.constant 1 : index
      %42 = vector.load %arg15[%41, %c0_38, %c1_39] : memref<66x16x66xf32, #tpu.memory_space<vmem>>, vector<1x16x64xf32>
      %43 = vector.shape_cast %42 : vector<1x16x64xf32> to vector<16x64xf32>
      %c1_i32_40 = arith.constant 1 : i32
      %44 = arith.addi %23, %c1_i32_40 : i32
      %45 = arith.index_cast %44 : i32 to index
      %c0_41 = arith.constant 0 : index
      %c2_42 = arith.constant 2 : index
      %46 = vector.load %arg15[%45, %c0_41, %c2_42] : memref<66x16x66xf32, #tpu.memory_space<vmem>>, vector<1x16x64xf32>
      %47 = vector.shape_cast %46 : vector<1x16x64xf32> to vector<16x64xf32>
      %c2_i32_43 = arith.constant 2 : i32
      %48 = arith.addi %23, %c2_i32_43 : i32
      %49 = arith.index_cast %48 : i32 to index
      %c0_44 = arith.constant 0 : index
      %c0_45 = arith.constant 0 : index
      %50 = vector.load %arg15[%49, %c0_44, %c0_45] : memref<66x16x66xf32, #tpu.memory_space<vmem>>, vector<1x16x64xf32>
      %51 = vector.shape_cast %50 : vector<1x16x64xf32> to vector<16x64xf32>
      %c2_i32_46 = arith.constant 2 : i32
      %52 = arith.addi %23, %c2_i32_46 : i32
      %53 = arith.index_cast %52 : i32 to index
      %c0_47 = arith.constant 0 : index
      %c1_48 = arith.constant 1 : index
      %54 = vector.load %arg15[%53, %c0_47, %c1_48] : memref<66x16x66xf32, #tpu.memory_space<vmem>>, vector<1x16x64xf32>
      %55 = vector.shape_cast %54 : vector<1x16x64xf32> to vector<16x64xf32>
      %c2_i32_49 = arith.constant 2 : i32
      %56 = arith.addi %23, %c2_i32_49 : i32
      %57 = arith.index_cast %56 : i32 to index
      %c0_50 = arith.constant 0 : index
      %c2_51 = arith.constant 2 : index
      %58 = vector.load %arg15[%57, %c0_50, %c2_51] : memref<66x16x66xf32, #tpu.memory_space<vmem>>, vector<1x16x64xf32>
      %59 = vector.shape_cast %58 : vector<1x16x64xf32> to vector<16x64xf32>
      %60 = tpu.concatenate %27, %31, %35, %39, %43, %47, %51, %55, %59 in 0 : vector<16x64xf32>, vector<16x64xf32>, vector<16x64xf32>, vector<16x64xf32>, vector<16x64xf32>, vector<16x64xf32>, vector<16x64xf32>, vector<16x64xf32>, vector<16x64xf32> -> vector<144x64xf32>
      %cst_52 = arith.constant dense<0.000000e+00> : vector<32x64xf32>
      %61 = tpu.matmul %19, %60, %cst_52 {dimension_numbers = #tpu.dot_dimension_numbers<[1], [0], [0], [1], [0, 0, 1, 1], [], []>} : vector<32x144xf32>, vector<144x64xf32>, vector<32x64xf32> -> vector<32x64xf32>
      %c1_i32_53 = arith.constant 1 : i32
      %62 = arith.addi %23, %c1_i32_53 : i32
      %c0_i32_54 = arith.constant 0 : i32
      %63 = arith.addi %62, %c0_i32_54 : i32
      %64 = arith.index_cast %63 : i32 to index
      %c0_55 = arith.constant 0 : index
      %c0_56 = arith.constant 0 : index
      %65 = vector.load %arg15[%64, %c0_55, %c0_56] : memref<66x16x66xf32, #tpu.memory_space<vmem>>, vector<1x16x64xf32>
      %66 = vector.shape_cast %65 : vector<1x16x64xf32> to vector<16x64xf32>
      %c0_i32_57 = arith.constant 0 : i32
      %67 = arith.addi %62, %c0_i32_57 : i32
      %68 = arith.index_cast %67 : i32 to index
      %c0_58 = arith.constant 0 : index
      %c1_59 = arith.constant 1 : index
      %69 = vector.load %arg15[%68, %c0_58, %c1_59] : memref<66x16x66xf32, #tpu.memory_space<vmem>>, vector<1x16x64xf32>
      %70 = vector.shape_cast %69 : vector<1x16x64xf32> to vector<16x64xf32>
      %c0_i32_60 = arith.constant 0 : i32
      %71 = arith.addi %62, %c0_i32_60 : i32
      %72 = arith.index_cast %71 : i32 to index
      %c0_61 = arith.constant 0 : index
      %c2_62 = arith.constant 2 : index
      %73 = vector.load %arg15[%72, %c0_61, %c2_62] : memref<66x16x66xf32, #tpu.memory_space<vmem>>, vector<1x16x64xf32>
      %74 = vector.shape_cast %73 : vector<1x16x64xf32> to vector<16x64xf32>
      %c1_i32_63 = arith.constant 1 : i32
      %75 = arith.addi %62, %c1_i32_63 : i32
      %76 = arith.index_cast %75 : i32 to index
      %c0_64 = arith.constant 0 : index
      %c0_65 = arith.constant 0 : index
      %77 = vector.load %arg15[%76, %c0_64, %c0_65] : memref<66x16x66xf32, #tpu.memory_space<vmem>>, vector<1x16x64xf32>
      %78 = vector.shape_cast %77 : vector<1x16x64xf32> to vector<16x64xf32>
      %c1_i32_66 = arith.constant 1 : i32
      %79 = arith.addi %62, %c1_i32_66 : i32
      %80 = arith.index_cast %79 : i32 to index
      %c0_67 = arith.constant 0 : index
      %c1_68 = arith.constant 1 : index
      %81 = vector.load %arg15[%80, %c0_67, %c1_68] : memref<66x16x66xf32, #tpu.memory_space<vmem>>, vector<1x16x64xf32>
      %82 = vector.shape_cast %81 : vector<1x16x64xf32> to vector<16x64xf32>
      %c1_i32_69 = arith.constant 1 : i32
      %83 = arith.addi %62, %c1_i32_69 : i32
      %84 = arith.index_cast %83 : i32 to index
      %c0_70 = arith.constant 0 : index
      %c2_71 = arith.constant 2 : index
      %85 = vector.load %arg15[%84, %c0_70, %c2_71] : memref<66x16x66xf32, #tpu.memory_space<vmem>>, vector<1x16x64xf32>
      %86 = vector.shape_cast %85 : vector<1x16x64xf32> to vector<16x64xf32>
      %c2_i32_72 = arith.constant 2 : i32
      %87 = arith.addi %62, %c2_i32_72 : i32
      %88 = arith.index_cast %87 : i32 to index
      %c0_73 = arith.constant 0 : index
      %c0_74 = arith.constant 0 : index
      %89 = vector.load %arg15[%88, %c0_73, %c0_74] : memref<66x16x66xf32, #tpu.memory_space<vmem>>, vector<1x16x64xf32>
      %90 = vector.shape_cast %89 : vector<1x16x64xf32> to vector<16x64xf32>
      %c2_i32_75 = arith.constant 2 : i32
      %91 = arith.addi %62, %c2_i32_75 : i32
      %92 = arith.index_cast %91 : i32 to index
      %c0_76 = arith.constant 0 : index
      %c1_77 = arith.constant 1 : index
      %93 = vector.load %arg15[%92, %c0_76, %c1_77] : memref<66x16x66xf32, #tpu.memory_space<vmem>>, vector<1x16x64xf32>
      %94 = vector.shape_cast %93 : vector<1x16x64xf32> to vector<16x64xf32>
      %c2_i32_78 = arith.constant 2 : i32
      %95 = arith.addi %62, %c2_i32_78 : i32
      %96 = arith.index_cast %95 : i32 to index
      %c0_79 = arith.constant 0 : index
      %c2_80 = arith.constant 2 : index
      %97 = vector.load %arg15[%96, %c0_79, %c2_80] : memref<66x16x66xf32, #tpu.memory_space<vmem>>, vector<1x16x64xf32>
      %98 = vector.shape_cast %97 : vector<1x16x64xf32> to vector<16x64xf32>
      %99 = tpu.concatenate %66, %70, %74, %78, %82, %86, %90, %94, %98 in 0 : vector<16x64xf32>, vector<16x64xf32>, vector<16x64xf32>, vector<16x64xf32>, vector<16x64xf32>, vector<16x64xf32>, vector<16x64xf32>, vector<16x64xf32>, vector<16x64xf32> -> vector<144x64xf32>
      %cst_81 = arith.constant dense<0.000000e+00> : vector<32x64xf32>
      %100 = tpu.matmul %19, %99, %cst_81 {dimension_numbers = #tpu.dot_dimension_numbers<[1], [0], [0], [1], [0, 0, 1, 1], [], []>} : vector<32x144xf32>, vector<144x64xf32>, vector<32x64xf32> -> vector<32x64xf32>
      %101 = arith.maximumf %61, %100 : vector<32x64xf32>
      %102 = vector.broadcast %20 : vector<32x1xf32> to vector<32x64xf32>
      %103 = arith.addf %101, %102 : vector<32x64xf32>
      %cst_82 = arith.constant 0.000000e+00 : f32
      %104 = vector.broadcast %cst_82 : f32 to vector<32x64xf32>
      %105 = arith.maximumf %103, %104 : vector<32x64xf32>
      %cst_83 = arith.constant dense<0.000000e+00> : vector<32x34xf32>
      %106 = tpu.matmul %105, %21, %cst_83 {dimension_numbers = #tpu.dot_dimension_numbers<[1], [0], [0], [1], [0, 0, 1, 1], [], []>, precision = #tpu.contract_precision<fp32>} : vector<32x64xf32>, vector<64x34xf32>, vector<32x34xf32> -> vector<32x34xf32>
      %cst_84 = arith.constant dense<0.000000e+00> : vector<32x34xf32>
      %107 = tpu.matmul %105, %22, %cst_84 {dimension_numbers = #tpu.dot_dimension_numbers<[1], [0], [0], [1], [0, 0, 1, 1], [], []>, precision = #tpu.contract_precision<fp32>} : vector<32x64xf32>, vector<64x34xf32>, vector<32x34xf32> -> vector<32x34xf32>
      %108 = arith.maximumf %106, %107 : vector<32x34xf32>
      %c1_i32_85 = arith.constant 1 : i32
      %109 = arith.addi %c1_i32_85, %arg17 : i32
      %110 = arith.index_cast %109 : i32 to index
      %c0_86 = arith.constant 0 : index
      %c0_87 = arith.constant 0 : index
      %111 = vector.load %arg16[%110, %c0_86, %c0_87] : memref<34x32x34xf32, #tpu.memory_space<vmem>>, vector<1x32x34xf32>
      %112 = vector.shape_cast %111 : vector<1x32x34xf32> to vector<32x34xf32>
      %113 = vector.shape_cast %108 : vector<32x34xf32> to vector<1x32x34xf32>
      tpu.vector_store %arg16[%110, %c0_86, %c0_87], %113 {strides = array<i32>} : memref<34x32x34xf32, #tpu.memory_space<vmem>>, vector<1x32x34xf32>,
    }
    %c32_i32_15 = arith.constant 32 : i32
    %c0_i32_16 = arith.constant 0 : i32
    %c16_i32 = arith.constant 16 : i32
    %18 = arith.addi %c0_i32_16, %c16_i32 : i32
    %c1_i32_17 = arith.constant 1 : i32
    scf.for %arg17 = %c0_i32_16 to %18 step %c1_i32_17  : i32 {
      %c0_19 = arith.constant 0 : index
      %c0_20 = arith.constant 0 : index
      %19 = vector.load %arg6[%c0_19, %c0_20] : memref<64x288xf32, #tpu.memory_space<vmem>>, vector<64x288xf32>
      %c0_21 = arith.constant 0 : index
      %c0_22 = arith.constant 0 : index
      %20 = vector.load %arg7[%c0_21, %c0_22] : memref<64x1xf32, #tpu.memory_space<vmem>>, vector<64x1xf32>
      %c0_23 = arith.constant 0 : index
      %c0_24 = arith.constant 0 : index
      %21 = vector.load %arg12[%c0_23, %c0_24] : memref<32x16xf32, #tpu.memory_space<vmem>>, vector<32x16xf32>
      %c0_25 = arith.constant 0 : index
      %c0_26 = arith.constant 0 : index
      %22 = vector.load %arg13[%c0_25, %c0_26] : memref<32x16xf32, #tpu.memory_space<vmem>>, vector<32x16xf32>
      %c2_i32 = arith.constant 2 : i32
      %23 = arith.muli %c2_i32, %arg17 : i32
      %c0_i32_27 = arith.constant 0 : i32
      %24 = arith.addi %23, %c0_i32_27 : i32
      %25 = arith.index_cast %24 : i32 to index
      %c0_28 = arith.constant 0 : index
      %c0_29 = arith.constant 0 : index
      %26 = vector.load %arg16[%25, %c0_28, %c0_29] : memref<34x32x34xf32, #tpu.memory_space<vmem>>, vector<1x32x32xf32>
      %27 = vector.shape_cast %26 : vector<1x32x32xf32> to vector<32x32xf32>
      %c0_i32_30 = arith.constant 0 : i32
      %28 = arith.addi %23, %c0_i32_30 : i32
      %29 = arith.index_cast %28 : i32 to index
      %c0_31 = arith.constant 0 : index
      %c1 = arith.constant 1 : index
      %30 = vector.load %arg16[%29, %c0_31, %c1] : memref<34x32x34xf32, #tpu.memory_space<vmem>>, vector<1x32x32xf32>
      %31 = vector.shape_cast %30 : vector<1x32x32xf32> to vector<32x32xf32>
      %c0_i32_32 = arith.constant 0 : i32
      %32 = arith.addi %23, %c0_i32_32 : i32
      %33 = arith.index_cast %32 : i32 to index
      %c0_33 = arith.constant 0 : index
      %c2 = arith.constant 2 : index
      %34 = vector.load %arg16[%33, %c0_33, %c2] : memref<34x32x34xf32, #tpu.memory_space<vmem>>, vector<1x32x32xf32>
      %35 = vector.shape_cast %34 : vector<1x32x32xf32> to vector<32x32xf32>
      %c1_i32_34 = arith.constant 1 : i32
      %36 = arith.addi %23, %c1_i32_34 : i32
      %37 = arith.index_cast %36 : i32 to index
      %c0_35 = arith.constant 0 : index
      %c0_36 = arith.constant 0 : index
      %38 = vector.load %arg16[%37, %c0_35, %c0_36] : memref<34x32x34xf32, #tpu.memory_space<vmem>>, vector<1x32x32xf32>
      %39 = vector.shape_cast %38 : vector<1x32x32xf32> to vector<32x32xf32>
      %c1_i32_37 = arith.constant 1 : i32
      %40 = arith.addi %23, %c1_i32_37 : i32
      %41 = arith.index_cast %40 : i32 to index
      %c0_38 = arith.constant 0 : index
      %c1_39 = arith.constant 1 : index
      %42 = vector.load %arg16[%41, %c0_38, %c1_39] : memref<34x32x34xf32, #tpu.memory_space<vmem>>, vector<1x32x32xf32>
      %43 = vector.shape_cast %42 : vector<1x32x32xf32> to vector<32x32xf32>
      %c1_i32_40 = arith.constant 1 : i32
      %44 = arith.addi %23, %c1_i32_40 : i32
      %45 = arith.index_cast %44 : i32 to index
      %c0_41 = arith.constant 0 : index
      %c2_42 = arith.constant 2 : index
      %46 = vector.load %arg16[%45, %c0_41, %c2_42] : memref<34x32x34xf32, #tpu.memory_space<vmem>>, vector<1x32x32xf32>
      %47 = vector.shape_cast %46 : vector<1x32x32xf32> to vector<32x32xf32>
      %c2_i32_43 = arith.constant 2 : i32
      %48 = arith.addi %23, %c2_i32_43 : i32
      %49 = arith.index_cast %48 : i32 to index
      %c0_44 = arith.constant 0 : index
      %c0_45 = arith.constant 0 : index
      %50 = vector.load %arg16[%49, %c0_44, %c0_45] : memref<34x32x34xf32, #tpu.memory_space<vmem>>, vector<1x32x32xf32>
      %51 = vector.shape_cast %50 : vector<1x32x32xf32> to vector<32x32xf32>
      %c2_i32_46 = arith.constant 2 : i32
      %52 = arith.addi %23, %c2_i32_46 : i32
      %53 = arith.index_cast %52 : i32 to index
      %c0_47 = arith.constant 0 : index
      %c1_48 = arith.constant 1 : index
      %54 = vector.load %arg16[%53, %c0_47, %c1_48] : memref<34x32x34xf32, #tpu.memory_space<vmem>>, vector<1x32x32xf32>
      %55 = vector.shape_cast %54 : vector<1x32x32xf32> to vector<32x32xf32>
      %c2_i32_49 = arith.constant 2 : i32
      %56 = arith.addi %23, %c2_i32_49 : i32
      %57 = arith.index_cast %56 : i32 to index
      %c0_50 = arith.constant 0 : index
      %c2_51 = arith.constant 2 : index
      %58 = vector.load %arg16[%57, %c0_50, %c2_51] : memref<34x32x34xf32, #tpu.memory_space<vmem>>, vector<1x32x32xf32>
      %59 = vector.shape_cast %58 : vector<1x32x32xf32> to vector<32x32xf32>
      %60 = tpu.concatenate %27, %31, %35, %39, %43, %47, %51, %55, %59 in 0 : vector<32x32xf32>, vector<32x32xf32>, vector<32x32xf32>, vector<32x32xf32>, vector<32x32xf32>, vector<32x32xf32>, vector<32x32xf32>, vector<32x32xf32>, vector<32x32xf32> -> vector<288x32xf32>
      %cst_52 = arith.constant dense<0.000000e+00> : vector<64x32xf32>
      %61 = tpu.matmul %19, %60, %cst_52 {dimension_numbers = #tpu.dot_dimension_numbers<[1], [0], [0], [1], [0, 0, 1, 1], [], []>} : vector<64x288xf32>, vector<288x32xf32>, vector<64x32xf32> -> vector<64x32xf32>
      %c1_i32_53 = arith.constant 1 : i32
      %62 = arith.addi %23, %c1_i32_53 : i32
      %c0_i32_54 = arith.constant 0 : i32
      %63 = arith.addi %62, %c0_i32_54 : i32
      %64 = arith.index_cast %63 : i32 to index
      %c0_55 = arith.constant 0 : index
      %c0_56 = arith.constant 0 : index
      %65 = vector.load %arg16[%64, %c0_55, %c0_56] : memref<34x32x34xf32, #tpu.memory_space<vmem>>, vector<1x32x32xf32>
      %66 = vector.shape_cast %65 : vector<1x32x32xf32> to vector<32x32xf32>
      %c0_i32_57 = arith.constant 0 : i32
      %67 = arith.addi %62, %c0_i32_57 : i32
      %68 = arith.index_cast %67 : i32 to index
      %c0_58 = arith.constant 0 : index
      %c1_59 = arith.constant 1 : index
      %69 = vector.load %arg16[%68, %c0_58, %c1_59] : memref<34x32x34xf32, #tpu.memory_space<vmem>>, vector<1x32x32xf32>
      %70 = vector.shape_cast %69 : vector<1x32x32xf32> to vector<32x32xf32>
      %c0_i32_60 = arith.constant 0 : i32
      %71 = arith.addi %62, %c0_i32_60 : i32
      %72 = arith.index_cast %71 : i32 to index
      %c0_61 = arith.constant 0 : index
      %c2_62 = arith.constant 2 : index
      %73 = vector.load %arg16[%72, %c0_61, %c2_62] : memref<34x32x34xf32, #tpu.memory_space<vmem>>, vector<1x32x32xf32>
      %74 = vector.shape_cast %73 : vector<1x32x32xf32> to vector<32x32xf32>
      %c1_i32_63 = arith.constant 1 : i32
      %75 = arith.addi %62, %c1_i32_63 : i32
      %76 = arith.index_cast %75 : i32 to index
      %c0_64 = arith.constant 0 : index
      %c0_65 = arith.constant 0 : index
      %77 = vector.load %arg16[%76, %c0_64, %c0_65] : memref<34x32x34xf32, #tpu.memory_space<vmem>>, vector<1x32x32xf32>
      %78 = vector.shape_cast %77 : vector<1x32x32xf32> to vector<32x32xf32>
      %c1_i32_66 = arith.constant 1 : i32
      %79 = arith.addi %62, %c1_i32_66 : i32
      %80 = arith.index_cast %79 : i32 to index
      %c0_67 = arith.constant 0 : index
      %c1_68 = arith.constant 1 : index
      %81 = vector.load %arg16[%80, %c0_67, %c1_68] : memref<34x32x34xf32, #tpu.memory_space<vmem>>, vector<1x32x32xf32>
      %82 = vector.shape_cast %81 : vector<1x32x32xf32> to vector<32x32xf32>
      %c1_i32_69 = arith.constant 1 : i32
      %83 = arith.addi %62, %c1_i32_69 : i32
      %84 = arith.index_cast %83 : i32 to index
      %c0_70 = arith.constant 0 : index
      %c2_71 = arith.constant 2 : index
      %85 = vector.load %arg16[%84, %c0_70, %c2_71] : memref<34x32x34xf32, #tpu.memory_space<vmem>>, vector<1x32x32xf32>
      %86 = vector.shape_cast %85 : vector<1x32x32xf32> to vector<32x32xf32>
      %c2_i32_72 = arith.constant 2 : i32
      %87 = arith.addi %62, %c2_i32_72 : i32
      %88 = arith.index_cast %87 : i32 to index
      %c0_73 = arith.constant 0 : index
      %c0_74 = arith.constant 0 : index
      %89 = vector.load %arg16[%88, %c0_73, %c0_74] : memref<34x32x34xf32, #tpu.memory_space<vmem>>, vector<1x32x32xf32>
      %90 = vector.shape_cast %89 : vector<1x32x32xf32> to vector<32x32xf32>
      %c2_i32_75 = arith.constant 2 : i32
      %91 = arith.addi %62, %c2_i32_75 : i32
      %92 = arith.index_cast %91 : i32 to index
      %c0_76 = arith.constant 0 : index
      %c1_77 = arith.constant 1 : index
      %93 = vector.load %arg16[%92, %c0_76, %c1_77] : memref<34x32x34xf32, #tpu.memory_space<vmem>>, vector<1x32x32xf32>
      %94 = vector.shape_cast %93 : vector<1x32x32xf32> to vector<32x32xf32>
      %c2_i32_78 = arith.constant 2 : i32
      %95 = arith.addi %62, %c2_i32_78 : i32
      %96 = arith.index_cast %95 : i32 to index
      %c0_79 = arith.constant 0 : index
      %c2_80 = arith.constant 2 : index
      %97 = vector.load %arg16[%96, %c0_79, %c2_80] : memref<34x32x34xf32, #tpu.memory_space<vmem>>, vector<1x32x32xf32>
      %98 = vector.shape_cast %97 : vector<1x32x32xf32> to vector<32x32xf32>
      %99 = tpu.concatenate %66, %70, %74, %78, %82, %86, %90, %94, %98 in 0 : vector<32x32xf32>, vector<32x32xf32>, vector<32x32xf32>, vector<32x32xf32>, vector<32x32xf32>, vector<32x32xf32>, vector<32x32xf32>, vector<32x32xf32>, vector<32x32xf32> -> vector<288x32xf32>
      %cst_81 = arith.constant dense<0.000000e+00> : vector<64x32xf32>
      %100 = tpu.matmul %19, %99, %cst_81 {dimension_numbers = #tpu.dot_dimension_numbers<[1], [0], [0], [1], [0, 0, 1, 1], [], []>} : vector<64x288xf32>, vector<288x32xf32>, vector<64x32xf32> -> vector<64x32xf32>
      %101 = arith.maximumf %61, %100 : vector<64x32xf32>
      %102 = vector.broadcast %20 : vector<64x1xf32> to vector<64x32xf32>
      %103 = arith.addf %101, %102 : vector<64x32xf32>
      %cst_82 = arith.constant 0.000000e+00 : f32
      %104 = vector.broadcast %cst_82 : f32 to vector<64x32xf32>
      %105 = arith.maximumf %103, %104 : vector<64x32xf32>
      %cst_83 = arith.constant dense<0.000000e+00> : vector<64x16xf32>
      %106 = tpu.matmul %105, %21, %cst_83 {dimension_numbers = #tpu.dot_dimension_numbers<[1], [0], [0], [1], [0, 0, 1, 1], [], []>, precision = #tpu.contract_precision<fp32>} : vector<64x32xf32>, vector<32x16xf32>, vector<64x16xf32> -> vector<64x16xf32>
      %cst_84 = arith.constant dense<0.000000e+00> : vector<64x16xf32>
      %107 = tpu.matmul %105, %22, %cst_84 {dimension_numbers = #tpu.dot_dimension_numbers<[1], [0], [0], [1], [0, 0, 1, 1], [], []>, precision = #tpu.contract_precision<fp32>} : vector<64x32xf32>, vector<32x16xf32>, vector<64x16xf32> -> vector<64x16xf32>
      %108 = arith.maximumf %106, %107 : vector<64x16xf32>
      %c0_i32_85 = arith.constant 0 : i32
      %109 = arith.addi %c0_i32_85, %arg17 : i32
      %c0_86 = arith.constant 0 : index
      %110 = arith.index_cast %109 : i32 to index
      %c0_87 = arith.constant 0 : index
      %c0_88 = arith.constant 0 : index
      %111 = vector.load %arg14[%c0_86, %110, %c0_87, %c0_88] : memref<1x16x64x16xf32, #tpu.memory_space<vmem>>, vector<1x1x64x16xf32>
      %112 = vector.shape_cast %111 : vector<1x1x64x16xf32> to vector<64x16xf32>
      %113 = vector.shape_cast %108 : vector<64x16xf32> to vector<1x1x64x16xf32>
      tpu.vector_store %arg14[%c0_86, %110, %c0_87, %c0_88], %113 {strides = array<i32>} : memref<1x16x64x16xf32, #tpu.memory_space<vmem>>, vector<1x1x64x16xf32>,
    }
    %c16_i32_18 = arith.constant 16 : i32
    return
  }
  func.func @transform_0(%arg0: i32) -> (i32, i32, i32, i32) {
    %c0_i32 = arith.constant 0 : i32
    %c0_i32_0 = arith.constant 0 : i32
    %c0_i32_1 = arith.constant 0 : i32
    %c0_i32_2 = arith.constant 0 : i32
    return %arg0, %c0_i32, %c0_i32_0, %c0_i32_1 : i32, i32, i32, i32
  }
  func.func @transform_1(%arg0: i32) -> (i32, i32) {
    %c0_i32 = arith.constant 0 : i32
    %c0_i32_0 = arith.constant 0 : i32
    %c0_i32_1 = arith.constant 0 : i32
    return %c0_i32, %c0_i32_0 : i32, i32
  }
  func.func @transform_2(%arg0: i32) -> (i32, i32) {
    %c0_i32 = arith.constant 0 : i32
    %c0_i32_0 = arith.constant 0 : i32
    %c0_i32_1 = arith.constant 0 : i32
    return %c0_i32, %c0_i32_0 : i32, i32
  }
  func.func @transform_3(%arg0: i32) -> (i32, i32) {
    %c0_i32 = arith.constant 0 : i32
    %c0_i32_0 = arith.constant 0 : i32
    %c0_i32_1 = arith.constant 0 : i32
    return %c0_i32, %c0_i32_0 : i32, i32
  }
  func.func @transform_4(%arg0: i32) -> (i32, i32) {
    %c0_i32 = arith.constant 0 : i32
    %c0_i32_0 = arith.constant 0 : i32
    %c0_i32_1 = arith.constant 0 : i32
    return %c0_i32, %c0_i32_0 : i32, i32
  }
  func.func @transform_5(%arg0: i32) -> (i32, i32) {
    %c0_i32 = arith.constant 0 : i32
    %c0_i32_0 = arith.constant 0 : i32
    %c0_i32_1 = arith.constant 0 : i32
    return %c0_i32, %c0_i32_0 : i32, i32
  }
  func.func @transform_6(%arg0: i32) -> (i32, i32) {
    %c0_i32 = arith.constant 0 : i32
    %c0_i32_0 = arith.constant 0 : i32
    %c0_i32_1 = arith.constant 0 : i32
    return %c0_i32, %c0_i32_0 : i32, i32
  }
  func.func @transform_7(%arg0: i32) -> (i32, i32) {
    %c0_i32 = arith.constant 0 : i32
    %c0_i32_0 = arith.constant 0 : i32
    %c0_i32_1 = arith.constant 0 : i32
    return %c0_i32, %c0_i32_0 : i32, i32
  }
  func.func @transform_8(%arg0: i32) -> (i32, i32) {
    %c0_i32 = arith.constant 0 : i32
    %c0_i32_0 = arith.constant 0 : i32
    %c0_i32_1 = arith.constant 0 : i32
    return %c0_i32, %c0_i32_0 : i32, i32
  }
  func.func @transform_9(%arg0: i32) -> (i32, i32) {
    %c0_i32 = arith.constant 0 : i32
    %c0_i32_0 = arith.constant 0 : i32
    %c0_i32_1 = arith.constant 0 : i32
    return %c0_i32, %c0_i32_0 : i32, i32
  }
  func.func @transform_10(%arg0: i32) -> (i32, i32) {
    %c0_i32 = arith.constant 0 : i32
    %c0_i32_0 = arith.constant 0 : i32
    %c0_i32_1 = arith.constant 0 : i32
    return %c0_i32, %c0_i32_0 : i32, i32
  }
  func.func @transform_11(%arg0: i32) -> (i32, i32) {
    %c0_i32 = arith.constant 0 : i32
    %c0_i32_0 = arith.constant 0 : i32
    %c0_i32_1 = arith.constant 0 : i32
    return %c0_i32, %c0_i32_0 : i32, i32
  }
  func.func @transform_12(%arg0: i32) -> (i32, i32) {
    %c0_i32 = arith.constant 0 : i32
    %c0_i32_0 = arith.constant 0 : i32
    %c0_i32_1 = arith.constant 0 : i32
    return %c0_i32, %c0_i32_0 : i32, i32
  }
  func.func @transform_13(%arg0: i32) -> (i32, i32, i32, i32) {
    %c0_i32 = arith.constant 0 : i32
    %c0_i32_0 = arith.constant 0 : i32
    %c0_i32_1 = arith.constant 0 : i32
    %c0_i32_2 = arith.constant 0 : i32
    return %arg0, %c0_i32, %c0_i32_0, %c0_i32_1 : i32, i32, i32, i32
  }
}

module attributes {stable_mosaic.version = 11 : i64} {
  func.func @_classifier_kernel(%arg0: i32, %arg1: memref<2x16384xf32, #tpu.memory_space<vmem>>, %arg2: memref<16384x128xf32, #tpu.memory_space<vmem>>, %arg3: memref<1x128xf32, #tpu.memory_space<vmem>>, %arg4: memref<128x1xf32, #tpu.memory_space<vmem>>, %arg5: memref<1x1xf32, #tpu.memory_space<vmem>>, %arg6: memref<2x1xf32, #tpu.memory_space<vmem>>) attributes {dimension_semantics = [#tpu.dimension_semantics<parallel>], iteration_bounds = array<i64: 1>, scalar_prefetch = 0 : i64, scratch_operands = 0 : i64, tpu.core_type = #tpu.core_type<tc>, window_params = [{transform_indices = @transform_0, window_bounds = array<i64: 2, 16384>}, {pipeline_mode = #tpu.pipeline_mode<synchronous>, transform_indices = @transform_1, window_bounds = array<i64: 16384, 128>}, {pipeline_mode = #tpu.pipeline_mode<synchronous>, transform_indices = @transform_2, window_bounds = array<i64: 1, 128>}, {pipeline_mode = #tpu.pipeline_mode<synchronous>, transform_indices = @transform_3, window_bounds = array<i64: 128, 1>}, {pipeline_mode = #tpu.pipeline_mode<synchronous>, transform_indices = @transform_4, window_bounds = array<i64: 1, 1>}, {transform_indices = @transform_5, window_bounds = array<i64: 2, 1>}]} {
    %c0 = arith.constant 0 : index
    %c0_0 = arith.constant 0 : index
    %0 = vector.load %arg1[%c0, %c0_0] : memref<2x16384xf32, #tpu.memory_space<vmem>>, vector<2x16384xf32>
    %c0_1 = arith.constant 0 : index
    %c0_2 = arith.constant 0 : index
    %1 = vector.load %arg2[%c0_1, %c0_2] : memref<16384x128xf32, #tpu.memory_space<vmem>>, vector<16384x128xf32>
    %cst = arith.constant dense<0.000000e+00> : vector<2x128xf32>
    %2 = tpu.matmul %0, %1, %cst {dimension_numbers = #tpu.dot_dimension_numbers<[1], [0], [0], [1], [0, 0, 1, 1], [], []>} : vector<2x16384xf32>, vector<16384x128xf32>, vector<2x128xf32> -> vector<2x128xf32>
    %c0_3 = arith.constant 0 : index
    %c0_4 = arith.constant 0 : index
    %3 = vector.load %arg3[%c0_3, %c0_4] : memref<1x128xf32, #tpu.memory_space<vmem>>, vector<1x128xf32>
    %4 = vector.broadcast %3 : vector<1x128xf32> to vector<2x128xf32>
    %5 = arith.addf %2, %4 : vector<2x128xf32>
    %cst_5 = arith.constant 0.000000e+00 : f32
    %6 = vector.broadcast %cst_5 : f32 to vector<2x128xf32>
    %7 = arith.maximumf %5, %6 : vector<2x128xf32>
    %c0_6 = arith.constant 0 : index
    %c0_7 = arith.constant 0 : index
    %8 = vector.load %arg4[%c0_6, %c0_7] : memref<128x1xf32, #tpu.memory_space<vmem>>, vector<128x1xf32>
    %cst_8 = arith.constant dense<0.000000e+00> : vector<2x1xf32>
    %9 = tpu.matmul %7, %8, %cst_8 {dimension_numbers = #tpu.dot_dimension_numbers<[1], [0], [0], [1], [0, 0, 1, 1], [], []>} : vector<2x128xf32>, vector<128x1xf32>, vector<2x1xf32> -> vector<2x1xf32>
    %c0_9 = arith.constant 0 : index
    %c0_10 = arith.constant 0 : index
    %10 = vector.load %arg5[%c0_9, %c0_10] : memref<1x1xf32, #tpu.memory_space<vmem>>, vector<1x1xf32>
    %11 = vector.broadcast %10 : vector<1x1xf32> to vector<2x1xf32>
    %12 = arith.addf %9, %11 : vector<2x1xf32>
    %cst_11 = arith.constant 0.000000e+00 : f32
    %13 = vector.broadcast %cst_11 : f32 to vector<2x1xf32>
    %14 = arith.subf %13, %12 : vector<2x1xf32>
    %15 = math.exp %14 : vector<2x1xf32>
    %cst_12 = arith.constant 1.000000e+00 : f32
    %16 = vector.broadcast %cst_12 : f32 to vector<2x1xf32>
    %17 = arith.addf %16, %15 : vector<2x1xf32>
    %cst_13 = arith.constant 1.000000e+00 : f32
    %18 = vector.broadcast %cst_13 : f32 to vector<2x1xf32>
    %19 = arith.divf %18, %17 : vector<2x1xf32>
    %c0_14 = arith.constant 0 : index
    %c0_15 = arith.constant 0 : index
    %20 = vector.load %arg6[%c0_14, %c0_15] : memref<2x1xf32, #tpu.memory_space<vmem>>, vector<2x1xf32>
    tpu.vector_store %arg6[%c0_14, %c0_15], %19 {strides = array<i32>} : memref<2x1xf32, #tpu.memory_space<vmem>>, vector<2x1xf32>,
    return
  }
  func.func @transform_0(%arg0: i32) -> (i32, i32) {
    %c0_i32 = arith.constant 0 : i32
    %c0_i32_0 = arith.constant 0 : i32
    return %arg0, %c0_i32 : i32, i32
  }
  func.func @transform_1(%arg0: i32) -> (i32, i32) {
    %c0_i32 = arith.constant 0 : i32
    %c0_i32_0 = arith.constant 0 : i32
    %c0_i32_1 = arith.constant 0 : i32
    return %c0_i32, %c0_i32_0 : i32, i32
  }
  func.func @transform_2(%arg0: i32) -> (i32, i32) {
    %c0_i32 = arith.constant 0 : i32
    %c0_i32_0 = arith.constant 0 : i32
    %c0_i32_1 = arith.constant 0 : i32
    return %c0_i32, %c0_i32_0 : i32, i32
  }
  func.func @transform_3(%arg0: i32) -> (i32, i32) {
    %c0_i32 = arith.constant 0 : i32
    %c0_i32_0 = arith.constant 0 : i32
    %c0_i32_1 = arith.constant 0 : i32
    return %c0_i32, %c0_i32_0 : i32, i32
  }
  func.func @transform_4(%arg0: i32) -> (i32, i32) {
    %c0_i32 = arith.constant 0 : i32
    %c0_i32_0 = arith.constant 0 : i32
    %c0_i32_1 = arith.constant 0 : i32
    return %c0_i32, %c0_i32_0 : i32, i32
  }
  func.func @transform_5(%arg0: i32) -> (i32, i32) {
    %c0_i32 = arith.constant 0 : i32
    %c0_i32_0 = arith.constant 0 : i32
    return %arg0, %c0_i32 : i32, i32
  }
}

</mosaic_0001>

<bundles_post_ra>
// kernel: helmet_cnn_forward.2
= control target key start
LH: loop header
LB: loop body
LE: loop exit
PB: predicated region body
PF: predicated region fallthrough
CT: control target
= control target key end

     0   :  { %s11568_s0 = inlined_call_operand.vmem [shape: f32[2,130,8,130], index: 0, kind: input, shape index: {}]   ;;  %s11569_s1 = inlined_call_operand.hbm [shape: f32[16,72], index: 1, kind: input, shape index: {}]   ;;  %s11570_s2 = inlined_call_operand.vmem [shape: f32[16,1], index: 2, kind: input, shape index: {}]   ;;  %s11571_s3 = inlined_call_operand.hbm [shape: f32[32,144], index: 3, kind: input, shape index: {}]   ;;  %s11572_s4 = inlined_call_operand.vmem [shape: f32[32,1], index: 4, kind: input, shape index: {}]   ;;  %s11573_s5 = inlined_call_operand.hbm [shape: f32[64,288], index: 5, kind: input, shape index: {}]   ;;  %s11574_s6 = inlined_call_operand.vmem [shape: f32[64,1], index: 6, kind: input, shape index: {}]   ;;  %s11575_s7 = inlined_call_operand.vmem [shape: f32[128,66], index: 7, kind: input, shape index: {}]   ;;  %s11576_s8 = inlined_call_operand.vmem [shape: f32[128,66], index: 8, kind: input, shape index: {}]   ;;  %s11577_s9 = inlined_call_operand.vmem [shape: f32[64,34], index: 9, kind: input, shape index: {}]   ;;  %s11578_s10 = inlined_call_operand.vmem [shape: f32[64,34], index: 10, kind: input, shape index: {}]   ;;  %s11579_s11 = inlined_call_operand.vmem [shape: f32[32,16], index: 11, kind: input, shape index: {}]   ;;  %s11580_s12 = inlined_call_operand.vmem [shape: f32[32,16], index: 12, kind: input, shape index: {}]   ;;  %s11581_s13 = inlined_call_operand.vmem [shape: f32[2,16,64,16], index: 13, kind: output, shape index: {}]  }
   0x1   :  { %11680 = sst [smem:[#allocation46_spill]] %s11580_s12 }
   0x2   :  { %18 = vsyncpa [#allocation5], 0 }
   0x3   :  { %19 = vsyncpa [#allocation7], 0  ;;  %s9532_s25 = smov 0  }
   0x4 LB: > { %11681 = sst [smem:[#allocation11_spill]] %s9428_s25  ;;  %s9442_s26 = smov [#allocation6]   ;;  %s9428_s25 = sphi %s9532_s25, %s25_s25  }
   0x5   : > { %s362_s27 = sshll.u32 %s9442_s26, 4  ;;  %s9538_s28 = sadd.s32 4294967295, %s9428_s25   ;;  %s9543_s27 = int_to_ptr.vmem [resolvable:$true] %s362_s27 }
   0x6   : > { %p6317_p0 = scmp.ge.s32.totalorder %s9428_s25, 1  ;;  %p334_p1 = scmp.lt.s32.totalorder %s9428_s25, 3 }
   0x7   : > { %p11584_p2 = scmp.eq.s32.totalorder %s9538_s28, 0  ;;  %s9443_s30 = smov [#allocation4]  }
   0x8   : > { %p9545_p3 = pnand %p6317_p0, %p334_p1  ;;  %s346_s14 = sshll.u32 %s9443_s30, 4  ;;  %s9551_s14 = int_to_ptr.vmem [resolvable:$true] %s346_s14 }
   0x9   : > { %s9444_s16 = smov [#allocation8]   ;;  %s9318_s20 = scalar_lea.hbm %s11571_s3, 1024 }
   0xa   : > { %s11682_s29 = scalar_select %p9545_p3, 1, 0 }
   0xb   : > { %p9094_p4 = pneg %p9545_p3  ;;  %s9559_s17 = sshll.u32 %s9444_s16, 4  ;;  %s379_s17 = int_to_ptr.vmem [resolvable:$true] %s9559_s17 }
   0xc   : > { %p9319_p6 = scmp.ne.s32.totalorder %s11571_s3, %s9318_s20  ;;  %p9325_p10 = scmp.lt.u32.totalorder %s9318_s20, %s11571_s3 }
   0xd   : > { %p9555_p5 = pnand %p11584_p2, %p9094_p4 }
   0xf   : > { %p9569_p7 = pneg %p9555_p5 }
  0x11   : > { %p9321_p8 = pnand %p9569_p7, %p9319_p6 }
  0x13   : > { %p9322_p9 = pneg %p9321_p8 }
  0x15   : > { %p9327_p11 = pnand %p9325_p10, %p9322_p9 }
  0x17   : > { %9330 = shalt.err (!%p9327_p11)
}
  0x18   : > { %s9331_s30 = scalar_lea.vmem %s9543_s27, 1024  ;;  %p9339_p1 = scmp.lt.s32.totalorder %s9543_s27, %s9543_s27 }
  0x19   : > { %p9332_p12 = scmp.ne.s32.totalorder %s9543_s27, %s9331_s30  ;;  %p9340_p4 = scmp.lt.s32.totalorder %s9331_s30, %s9331_s30 }
  0x1b   : > { %p9334_p13 = pnand %p9332_p12, %p9569_p7  ;;  %p9341_p6 = por %p9340_p4, %p9339_p1 }
  0x1d   : > { %p9335_p0 = pneg %p9334_p13 }
  0x1f   : > { %p9342_p8 = pnand %p9341_p6, %p9335_p0 }
  0x21   : > { %9345 = shalt.err (!%p9342_p8)
}
  0x22   : > { %s9445_s16 = smov 256   ;;  %s9446_s18 = smov 16  }
  0x23   : > { %9100 = dma.hbm_to_vmem [thread:$0]  (!%p9555_p5), %s11571_s3, 1024, %s9543_s27, [#allocation7], %s9445_s16, %s9445_s16, %s9446_s18  }
  0x24   : > { %s9346_s24 = scalar_lea.hbm %s11569_s1, 256 }
  0x25   : > { %p9347_p9 = scmp.ne.s32.totalorder %s11569_s1, %s9346_s24  ;;  %p9353_p12 = scmp.lt.u32.totalorder %s9346_s24, %s11569_s1 }
  0x27   : > { %p9349_p10 = pnand %p9347_p9, %p9569_p7 }
  0x29   : > { %p9350_p11 = pneg %p9349_p10 }
  0x2b   : > { %p9355_p13 = pnand %p9353_p12, %p9350_p11 }
  0x2d   : > { %9358 = shalt.err (!%p9355_p13)
}
  0x2e   : > { %s9359_s27 = scalar_lea.vmem %s9551_s14, 256  ;;  %p9367_p6 = scmp.lt.s32.totalorder %s9551_s14, %s9551_s14 }
  0x2f   : > { %p9360_p0 = scmp.ne.s32.totalorder %s9551_s14, %s9359_s27  ;;  %p9368_p8 = scmp.lt.s32.totalorder %s9359_s27, %s9359_s27 }
  0x31   : > { %p9362_p1 = pnand %p9360_p0, %p9569_p7  ;;  %p9369_p9 = por %p9368_p8, %p9367_p6 }
  0x33   : > { %p9363_p4 = pneg %p9362_p1 }
  0x35   : > { %p9370_p10 = pnand %p9369_p9, %p9363_p4 }
  0x37   : > { %9373 = shalt.err (!%p9370_p10)
}
  0x38   : > { %s9447_s25 = smov 128   ;;  %s9448_s12 = smov 8  }
  0x39   : > { %9097 = dma.hbm_to_vmem [thread:$0]  (!%p9555_p5), %s11569_s1, 256, %s9551_s14, [#allocation5], %s9447_s25, %s9447_s25, %s9448_s12  }
  0x3a   : > { %s9374_s21 = scalar_lea.hbm %s11573_s5, 3072 }
  0x3b   : > { %p9375_p11 = scmp.ne.s32.totalorder %s11573_s5, %s9374_s21  ;;  %p9381_p0 = scmp.lt.u32.totalorder %s9374_s21, %s11573_s5 }
  0x3d   : > { %p9377_p12 = pnand %p9375_p11, %p9569_p7 }
  0x3f   : > { %p9378_p13 = pneg %p9377_p12 }
  0x41   : > { %p9383_p1 = pnand %p9381_p0, %p9378_p13 }
  0x43   : > { %9386 = shalt.err (!%p9383_p1)
}
  0x44   : > { %s9387_s27 = scalar_lea.vmem %s379_s17, 3072  ;;  %p9395_p9 = scmp.lt.s32.totalorder %s379_s17, %s379_s17 }
  0x45   : > { %p9388_p4 = scmp.ne.s32.totalorder %s379_s17, %s9387_s27  ;;  %p9396_p10 = scmp.lt.s32.totalorder %s9387_s27, %s9387_s27 }
  0x47   : > { %p9390_p6 = pnand %p9388_p4, %p9569_p7  ;;  %p9397_p2 = por %p9396_p10, %p9395_p9 }
  0x49   : > { %p9391_p8 = pneg %p9390_p6 }
  0x4b   : > { %p9398_p3 = pnand %p9397_p2, %p9391_p8 }
  0x4d   : > { %9401 = shalt.err (!%p9398_p3)
}
  0x4e   : > { %s9449_s14 = smov 384   ;;  %s9450_s25 = smov 24  }
  0x4f   : > { %9103 = dma.hbm_to_vmem [thread:$0]  (!%p9555_p5), %s11573_s5, 3072, %s379_s17, [#allocation7], %s9449_s14, %s9449_s14, %s9450_s25  }
  0x50   : > { %p11685_p11 = scmp.ne.s32.totalorder %s11682_s29, 0 }
  0x51   : > { %p11686_p12 = scmp.eq.s32.totalorder (!%p11685_p11), %s9538_s28, 0 }
  0x52   : > { %423 = sbr.rel (%p11685_p11) target bundleno = 2297 (0x8f9), region = 72 }
  0x59   : > { %9419 = dma.done.wait (%p11686_p12), [#allocation5], 256   ;;  %p11687_p7 = pmov %p11686_p12 }
  0x5b   : > { %9421 = vsyncadd (%p11687_p7), [#allocation5], 4294967040  ;;  %p11688_p2 = pmov %p11687_p7 }
  0x5d   : > { %9423 = dma.done.wait (%p11688_p2), [#allocation7], 4096   ;;  %p11689_p3 = pmov %p11688_p2 }
  0x5e   : > { %p475_p13 = scmp.lt.s32.totalorder %s9538_s28, 1  ;;  %vm485_vm0 = vcmask 539648   ;;  %vm491_vm1 = vcmask 277504   ;;  %v9451_v0 = vmov 0.0   ;;  %s9668_s22 = smov 0  }
  0x5f   : > { %9425 = vsyncadd (%p11689_p3), [#allocation7], 4294963200  ;;  %486 = vst.msk [vmem:[#allocation2] sm:$0xff] %vm485_vm0, %v9451_v0 }
  0x60   : > { %487 = vst.msk [vmem:[#allocation2 + $0x8] sm:$0xff] %vm485_vm0, %v9451_v0  ;;  %489 = vst.msk [vmem:[#allocation2 + $0x410] sm:$0xff] %vm485_vm0, %v9451_v0  ;;  %s11827_s28 = smov (!%p475_p13, %s9538_s28), 1 }
  0x61   : > { %490 = vst.msk [vmem:[#allocation2 + $0x418] sm:$0xff] %vm485_vm0, %v9451_v0  ;;  %s9081_s29 = smul.u32 2080, %s11827_s28  ;;  %s6417_s15 = sshll.u32 %s11827_s28, 10 }
  0x62   : > { %492 = vst.msk [vmem:[#allocation3] sm:$0xff] %vm491_vm1, %v9451_v0  ;;  %493 = vst.msk [vmem:[#allocation3 + $0x8] sm:$0xff] %vm491_vm1, %v9451_v0  ;;  %s9661_s18 = scalar_lea.vmem %s11581_s13, %s6417_s15 }
  0x63   : > { %494 = vst.msk [vmem:[#allocation3 + $0x10] sm:$0xff] %vm491_vm1, %v9451_v0  ;;  %495 = vst.msk [vmem:[#allocation3 + $0x18] sm:$0xff] %vm491_vm1, %v9451_v0  ;;  %s9666_s21 = scalar_lea.vmem %s11568_s0, %s9081_s29 }
  0x64   : > { %497 = vst.msk [vmem:[#allocation3 + $0x420] sm:$0xff] %vm491_vm1, %v9451_v0  ;;  %498 = vst.msk [vmem:[#allocation3 + $0x428] sm:$0xff] %vm491_vm1, %v9451_v0 }
  0x65   : > { %499 = vst.msk [vmem:[#allocation3 + $0x430] sm:$0xff] %vm491_vm1, %v9451_v0  ;;  %500 = vst.msk [vmem:[#allocation3 + $0x438] sm:$0xff] %vm491_vm1, %v9451_v0 }
  0x66 LB: >> { %s6419_s28 = sshll.u32 %s9432_s22, 5  ;;  %s9452_s26 = smov 126   ;;  %v507_v13 = vld [vmem:[#allocation4] sm:$0xff]  ;;  %vm605_vm2 = vcmask 588800   ;;  %v9454_v14 = vmov 0   ;;  %v510_v15 = vld [vmem:[%s11570_s2 + $0x8] sm:$0xff]  ;;  %s9432_s22 = sphi %s9668_s22, %s506_s22  }
  0x67   : >> { %s546_s24 = scalar_lea.vmem %s9666_s21, %s6419_s28  ;;  %s9453_s30 = smov 127   ;;  %7111 = vmatprep.mubr.msk.f32.mxu0 %vm605_vm2, %v507_v13  ;;  %7132 = vmatprep.mubr.msk.f32.mxu1 %vm605_vm2, %v507_v13  ;;  %v509_v16 = vld [vmem:[%s11570_s2] sm:$0xff]  ;;  %vm567_vm3 = vcmask 1039360   ;;  %vm574_vm4 = vcmask 1031168   ;;  %v9707_v51 = vld [vmem:[%s11575_s7 + $0x8] sm:$0xff]  ;;  %v9714_v54 = vld [vmem:[%s11575_s7 + $0x10] sm:$0xff] }
  0x68   : >> { %v547_v1 = vld [vmem:[%s546_s24] sm:$0xff]  ;;  %v548_v2 = vld [vmem:[%s546_s24 + $0x8] sm:$0xff]  ;;  %v6334_v3 = vld [vmem:[%s546_s24 + $0x10] sm:$0xff]  ;;  %9193 = vset.pattern.permute.xlu1 %v9454_v14  ;;  %9192 = vset.pattern.permute.xlu0 %v9454_v14  ;;  %v802_v57 = vand.u32 4294901760, %v9707_v51  ;;  %v11597_v62 = vand.u32 4294901760, %v9714_v54  ;;  %s6348_s23 = sshll.u32 %s9432_s22, 4 }
  0x69   : >> { %v9172_v4 = vpack.i.bf16 %v548_v2, %v547_v1  ;;  %v6335_v5 = vld [vmem:[%s546_s24 + $0x18] sm:$0xff]  ;;  %v9675_v7 = vld [vmem:[%s546_s24 + $0x20] sm:$0xff]  ;;  %v6339_v8 = vld [vmem:[%s546_s24 + $0x28] sm:$0xff]  ;;  %s6214_s19 = scalar_lea.vmem [#allocation2], %s6348_s23  ;;  %s506_s22 = sadd.s32 1, %s9432_s22  }
  0x6a   : >> { %v9177_v6 = vpack.i.bf16 %v6335_v5, %v6334_v3  ;;  %v9182_v9 = vpack.i.bf16 %v6339_v8, %v9675_v7  ;;  %v9678_v10 = vld [vmem:[%s546_s24 + $0x30] sm:$0xff]  ;;  %v6345_v11 = vld [vmem:[%s546_s24 + $0x38] sm:$0xff]  ;;  %v9702_v50 = vld [vmem:[%s11575_s7] sm:$0xff]  ;;  %p503_p5 = scmp.ge.s32.totalorder %s506_s22, 64  }
  0x6b   : >> { %9173 = vrot.lane.b32.xlu1 %v9172_v4, %s9452_s26  ;;  %9163 = vrot.lane.b32.xlu0 %v9172_v4, %s9453_s30  ;;  %v9187_v12 = vpack.i.bf16 %v6345_v11, %v9678_v10  ;;  %v9719_v55 = vld [vmem:[%s11575_s7 + $0x18] sm:$0xff]  ;;  %v799_v56 = vand.u32 4294901760, %v9702_v50  ;;  %v9726_v58 = vld [vmem:[%s11576_s8] sm:$0xff]  ;;  %s10598_s20 = smov (%p503_p5), 0  }
  0x6c   : >> { %v9731_v59 = vld [vmem:[%s11576_s8 + $0x8] sm:$0xff]  ;;  %v11596_v63 = vand.u32 4294901760, %v9719_v55  ;;  %v9738_v0 = vld [vmem:[%s11576_s8 + $0x10] sm:$0xff]  ;;  %v1483_v2 = vand.u32 4294901760, %v9726_v58  ;;  %v9750_v4 = vld [vmem:[%s11575_s7 + $0x20] sm:$0xff] }
  0x6d   : >> { %v9755_v5 = vld [vmem:[%s11575_s7 + $0x28] sm:$0xff]  ;;  %v9777_v14 = vld [vmem:[%s11576_s8 + $0x20] sm:$0xff] }
  0x6e   : >> { %v11592_v13 = vand.u32 4294901760, %v9755_v5 }
  0x6f   : >> { %9178 = vrot.lane.b32.xlu1 %v9177_v6, %s9452_s26  ;;  %9168 = vrot.lane.b32.xlu0 %v9177_v6, %s9453_s30 }
  0x73   : >> { %9183 = vrot.lane.b32.xlu0 %v9182_v9, %s9453_s30  ;;  %599 = vrot.lane.b32.xlu1 %v9675_v7, %s9452_s26  ;;  %v11595_v9 = vand.u32 4294901760, %v9738_v0 }
  0x77   : >> { %601 = vrot.lane.b32.xlu0 %v6339_v8, %s9452_s26  ;;  %9188 = vrot.lane.b32.xlu1 %v9187_v12, %s9453_s30  ;;  %v9762_v8 = vpack.c.bf16 %v802_v57, %v799_v56  ;;  %v11593_v12 = vand.u32 4294901760, %v9750_v4 }
  0x7b   : >> { %703 = vrot.lane.b32.xlu1 %v6345_v11, %s9452_s26  ;;  %701 = vrot.lane.b32.xlu0 %v9678_v10, %s9452_s26  ;;  %v9770_v11 = vpack.c.bf16 %v11596_v63, %v11597_v62 }
  0x7f   : >> { %791 = vperm.xlu1 %9193, %v510_v15   ;;  %786 = vperm.xlu0 %9192, %v509_v16   ;;  %v9782_v15 = vld [vmem:[%s11576_s8 + $0x28] sm:$0xff] }
  0xdd   : >> { %v9174_v17 = vpop.permute.xlu1 %9173  ;;  %v9164_v18 = vpop.permute.xlu0 %9163 }
  0xde   : >> { %v9176_v19 = vunpack.i.h.bf16 %v9174_v17  ;;  %v9175_v20 = vunpack.i.l.bf16 %v9174_v17  ;;  %v9166_v21 = vunpack.i.h.bf16 %v9164_v18  ;;  %v9165_v22 = vunpack.i.l.bf16 %v9164_v18  ;;  %v9794_v17 = vld [vmem:[%s11575_s7 + $0x30] sm:$0xff]  ;;  %v9799_v18 = vld [vmem:[%s11575_s7 + $0x38] sm:$0xff] }
  0xe0   : >> { %v568_v23 = vsel %vm567_vm3, %v9165_v22, %v9166_v21  ;;  %v575_v24 = vsel %vm574_vm4, %v9175_v20, %v9176_v19  ;;  %v11591_v20 = vand.u32 4294901760, %v9777_v14  ;;  %v11590_v21 = vand.u32 4294901760, %v9782_v15 }
  0xe1   : >> { %v9179_v25 = vpop.permute.xlu1 %9178  ;;  %v9169_v26 = vpop.permute.xlu0 %9168  ;;  %v8099_v27 = vpack.c.bf16 %v568_v23, %v547_v1  ;;  %v8103_v28 = vpack.c.bf16 %v6334_v3, %v575_v24  ;;  %v9743_v1 = vld [vmem:[%s11576_s8 + $0x18] sm:$0xff]  ;;  %v9816_v22 = vpack.c.bf16 %v11592_v13, %v11593_v12  ;;  %v11589_v23 = vand.u32 4294901760, %v9794_v17 }
  0xe2   : >> { %v9181_v29 = vunpack.i.h.bf16 %v9179_v25  ;;  %v9180_v30 = vunpack.i.l.bf16 %v9179_v25  ;;  %v9171_v31 = vunpack.i.h.bf16 %v9169_v26  ;;  %v9170_v32 = vunpack.i.l.bf16 %v9169_v26  ;;  %v9823_v25 = vld [vmem:[%s11576_s8 + $0x30] sm:$0xff]  ;;  %v9828_v26 = vld [vmem:[%s11576_s8 + $0x38] sm:$0xff] }
  0xe3   : >> { %8100 = vmatprep.subr.bf16.mxu0 %v8099_v27  ;;  %11691 = vst [vmem:[#allocation13_spill] sm:$0xff] %v9816_v22  ;;  %v11588_v24 = vand.u32 4294901760, %v9799_v18  ;;  %v9982_v13 = vsub.f32 %v9707_v51, %v802_v57  ;;  %v9987_v12 = vsub.f32 %v9726_v58, %v1483_v2  ;;  %v10003_v51 = vld [vmem:[%s11575_s7 + $0x78] sm:$0xff] }
  0xe4   : >> { %8102 = vmatpush3.bf16.msra.mxu0 %v8099_v27  ;;  %v583_v33 = vsel %vm567_vm3, %v9170_v32, %v9171_v31  ;;  %v589_v34 = vsel %vm574_vm4, %v9180_v30, %v9181_v29  ;;  %v9839_v27 = vpack.c.bf16 %v11590_v21, %v11591_v20  ;;  %v11586_v29 = vand.u32 4294901760, %v9828_v26  ;;  %v9867_v32 = vld [vmem:[%s11575_s7 + $0x40] sm:$0xff] }
  0xe5   : >> { %v9184_v35 = vpop.permute.xlu0 %9183  ;;  %8104 = vmatprep.subr.bf16.mxu0 %v8103_v28  ;;  %v8115_v36 = vpack.c.bf16 %v583_v33, %v6334_v3  ;;  %v600_v37 = vpop.permute.xlu1 %599  ;;  %v8119_v38 = vpack.c.bf16 %v9675_v7, %v589_v34  ;;  %v8107_v41 = vpack.c.bf16 %v589_v34, %v583_v33  ;;  %v1486_v3 = vand.u32 4294901760, %v9731_v59  ;;  %v9872_v33 = vld [vmem:[%s11575_s7 + $0x48] sm:$0xff]  ;;  %v9877_v34 = vld [vmem:[%s11576_s8 + $0x40] sm:$0xff]  ;;  %11701 = vst [vmem:[#allocation23_spill] sm:$0xff] %v9982_v13 }
  0xe6   : >> { %v9186_v39 = vunpack.i.h.bf16 %v9184_v35  ;;  %v9185_v40 = vunpack.i.l.bf16 %v9184_v35  ;;  %11692 = vst [vmem:[#allocation14_spill] sm:$0xff] %v9839_v27  ;;  %v9848_v30 = vpack.c.bf16 %v11588_v24, %v11589_v23  ;;  %v823_v35 = vand.u32 4294901760, %v9867_v32  ;;  %11702 = vst [vmem:[#allocation24_spill] sm:$0xff] %v9987_v12 }
  0xe7   : >> { %8116 = vmatprep.subr.bf16.mxu1 %v8115_v36  ;;  %v9789_v16 = vpack.c.bf16 %v1486_v3, %v1483_v2  ;;  %v9977_v20 = vsub.f32 %v9702_v50, %v799_v56  ;;  %v9998_v50 = vld [vmem:[%s11575_s7 + $0x70] sm:$0xff]  ;;  %v10013_v57 = vsub.f32 %v9731_v59, %v1486_v3  ;;  %v11605_v2 = vand.u32 4294901760, %v10003_v51 }
  0xe8   : >> { %8106 = vmatpush3.bf16.msra.mxu0 %v8103_v28  ;;  %8118 = vmatpush3.bf16.msra.mxu1 %v8115_v36  ;;  %v597_v42 = vsel %vm567_vm3, %v9185_v40, %v9186_v39  ;;  %v11587_v28 = vand.u32 4294901760, %v9823_v25  ;;  %11693 = vst [vmem:[#allocation15_spill] sm:$0xff] %v9848_v30  ;;  %v826_v36 = vand.u32 4294901760, %v9872_v33  ;;  %v10008_v56 = vld [vmem:[%s11576_s8 + $0x70] sm:$0xff]  ;;  %v11609_v58 = vand.u32 4294901760, %v9998_v50 }
  0xe9   : >> { %v602_v43 = vpop.permute.xlu0 %601  ;;  %8108 = vmatprep.subr.bf16.mxu0 %v8107_v41  ;;  %8120 = vmatprep.subr.bf16.mxu1 %v8119_v38  ;;  %v9189_v44 = vpop.permute.xlu1 %9188  ;;  %v8111_v45 = vpack.c.bf16 %v597_v42, %v9675_v7  ;;  %v508_v7 = vld [vmem:[#allocation4 + $0x8] sm:$0xff]  ;;  %11700 = vst [vmem:[#allocation22_spill] sm:$0xff] %v9977_v20  ;;  %11704 = vst [vmem:[#allocation26_spill] sm:$0xff] %v10013_v57  ;;  %v11608_v63 = vand.u32 4294901760, %v10008_v56  ;;  %v11606_v62 = vand.u32 4294901760, %v9977_v20  ;;  %v11610_v3 = vand.u32 4294901760, %v9982_v13 }
  0xea   : >> { %v603_v46 = vsel %vm574_vm4, %v600_v37, %v602_v43  ;;  %v9191_v47 = vunpack.i.h.bf16 %v9189_v44  ;;  %v9190_v48 = vunpack.i.l.bf16 %v9189_v44  ;;  %v9857_v31 = vpack.c.bf16 %v11586_v29, %v11587_v28  ;;  %v9884_v37 = vld [vmem:[%s11576_s8 + $0x48] sm:$0xff]  ;;  %v9908_v43 = vld [vmem:[%s11575_s7 + $0x58] sm:$0xff]  ;;  %v9913_v44 = vld [vmem:[%s11576_s8 + $0x50] sm:$0xff] }
  0xeb   : >> { %v8123_v49 = vpack.c.bf16 %v603_v46, %v597_v42  ;;  %v1510_v39 = vand.u32 4294901760, %v9884_v37  ;;  %v9892_v40 = vpack.c.bf16 %v826_v36, %v823_v35  ;;  %v9903_v42 = vld [vmem:[%s11575_s7 + $0x50] sm:$0xff]  ;;  %v9961_v28 = vld [vmem:[%s11576_s8 + $0x68] sm:$0xff] }
  0xec   : >> { %8110 = vmatpush3.bf16.msra.mxu0 %v8107_v41  ;;  %8122 = vmatpush3.bf16.msra.mxu1 %v8119_v38  ;;  %v699_v52 = vsel %vm567_vm3, %v9190_v48, %v9191_v47  ;;  %11694 = vst [vmem:[#allocation16_spill] sm:$0xff] %v9857_v31  ;;  %v1507_v38 = vand.u32 4294901760, %v9877_v34  ;;  %v9921_v47 = vld [vmem:[%s11576_s8 + $0x58] sm:$0xff]  ;;  %v11603_v48 = vand.u32 4294901760, %v9913_v44  ;;  %v11598_v23 = vand.u32 4294901760, %v9961_v28 }
  0xed   : >> { %8112 = vmatprep.subr.bf16.mxu0 %v8111_v45  ;;  %8124 = vmatprep.subr.bf16.mxu1 %v8123_v49  ;;  %v8127_v53 = vpack.c.bf16 %v699_v52, %v9678_v10  ;;  %v704_v60 = vpop.permute.xlu1 %703  ;;  %v702_v61 = vpop.permute.xlu0 %701  ;;  %v11594_v10 = vand.u32 4294901760, %v9743_v1  ;;  %11695 = vst [vmem:[#allocation17_spill] sm:$0xff] %v9892_v40 }
  0xee   : >> { %v705_v6 = vsel %vm574_vm4, %v702_v61, %v704_v60  ;;  %v9898_v41 = vpack.c.bf16 %v1510_v39, %v1507_v38  ;;  %v9943_v60 = vld [vmem:[%s11575_s7 + $0x60] sm:$0xff]  ;;  %v9948_v61 = vld [vmem:[%s11575_s7 + $0x68] sm:$0xff] }
  0xef   : >> { %v9807_v19 = vpack.c.bf16 %v11594_v10, %v11595_v9  ;;  %v11600_v29 = vand.u32 4294901760, %v9948_v61  ;;  %v10021_v9 = vld [vmem:[%s11576_s8 + $0x78] sm:$0xff] }
  0xf0   : >> { %8114 = vmatpush3.bf16.msra.mxu0 %v8111_v45  ;;  %8126 = vmatpush3.bf16.msra.mxu1 %v8123_v49  ;;  %11696 = vst [vmem:[#allocation18_spill] sm:$0xff] %v9898_v41  ;;  %v11611_v45 = vand.u32 4294901760, %v9903_v42  ;;  %v11602_v49 = vand.u32 4294901760, %v9921_v47  ;;  %v11607_v59 = vand.u32 4294901760, %v10021_v9 }
  0xf1   : >> { %7109 = vmatprep.subr.mxu0 %v603_v46  ;;  %8128 = vmatprep.subr.bf16.mxu1 %v8127_v53  ;;  %11690 = vst [vmem:[#allocation12_spill] sm:$0xff] %v9807_v19 }
  0xf4   : >> { %7110 = vmatpush3.msra.mxu0 %v603_v46  ;;  %8130 = vmatpush3.bf16.msra.mxu1 %v8127_v53  ;;  %v11604_v46 = vand.u32 4294901760, %v9908_v43  ;;  %v9938_v53 = vpack.c.bf16 %v11602_v49, %v11603_v48  ;;  %v10045_v49 = vpack.c.bf16 %v11607_v59, %v11608_v63  ;;  %v910_v48 = vsub.f32 %v9982_v13, %v11610_v3 }
  0xf5   : >> { %7130 = vmatprep.subr.mxu1 %v705_v6  ;;  %7112 = vmatmul.mubr.msk.f32.vlgmr.msra.gmra.mrb[0].mxu0 %vm605_vm2, %v508_v7 }
  0xf6   : >> { %8132 = vmatprep.subr.bf16.mxu0 %v9762_v8  ;;  %v9932_v52 = vpack.c.bf16 %v11604_v46, %v11611_v45  ;;  %11698 = vst [vmem:[#allocation20_spill] sm:$0xff] %v9938_v53  ;;  %11706 = vst [vmem:[#allocation28_spill] sm:$0xff] %v10045_v49  ;;  %v911_v59 = vand.u32 4294901760, %v910_v48 }
  0xf7   : >> { %8134 = vmatpush3.bf16.msra.mxu0 %v9762_v8 }
  0xf8   : >> { %7131 = vmatpush3.msra.mxu1 %v705_v6  ;;  %8136 = vmatprep.subr.bf16.mxu0 %v9770_v11  ;;  %11697 = vst [vmem:[#allocation19_spill] sm:$0xff] %v9932_v52  ;;  %v9953_v6 = vld [vmem:[%s11576_s8 + $0x60] sm:$0xff] }
  0xf9   : >> { %7133 = vmatmul.mubr.msk.f32.vlgmr.msra.gmra.mrb[0].mxu1 %vm605_vm2, %v508_v7  ;;  %8324 = vmatprep.subr.bf16.mxu1 %v9789_v16  ;;  %v11601_v7 = vand.u32 4294901760, %v9943_v60  ;;  %v11599_v24 = vand.u32 4294901760, %v9953_v6 }
  0xfa   : >> { %8326 = vmatpush3.bf16.msra.mxu1 %v9789_v16 }
  0xfb   : >> { %8328 = vmatprep.subr.bf16.mxu1 %v9807_v19  ;;  %8138 = vmatpush3.bf16.msra.mxu0 %v9770_v11  ;;  %v9972_v21 = vpack.c.bf16 %v11600_v29, %v11601_v7  ;;  %v9993_v10 = vpack.c.bf16 %v11598_v23, %v11599_v24  ;;  %v11616_v23 = vand.u32 4294901760, %v9987_v12  ;;  %v11612_v24 = vand.u32 4294901760, %v10013_v57 }
  0xfc   : >> { %8140 = vmatprep.subr.bf16.mxu0 %v9816_v22  ;;  %v10036_v29 = vpack.c.bf16 %v11605_v2, %v11609_v58  ;;  %v903_v7 = vsub.f32 %v9977_v20, %v11606_v62 }
  0xfd   : >> { %11699 = vst [vmem:[#allocation21_spill] sm:$0xff] %v9972_v21  ;;  %11703 = vst [vmem:[#allocation25_spill] sm:$0xff] %v9993_v10  ;;  %v1587_v46 = vsub.f32 %v9987_v12, %v11616_v23  ;;  %v1594_v2 = vsub.f32 %v10013_v57, %v11612_v24 }
  0xfe   : >> { %8330 = vmatpush3.bf16.msra.mxu1 %v9807_v19  ;;  %11705 = vst [vmem:[#allocation27_spill] sm:$0xff] %v10036_v29  ;;  %v904_v62 = vand.u32 4294901760, %v903_v7  ;;  %v10069_v7 = vsub.f32 %v9867_v32, %v823_v35  ;;  %v10089_v32 = vsub.f32 %v9884_v37, %v1510_v39  ;;  %v11713_v39 = vand.u32 4294901760, %v9908_v43 }
  0xff   : >> { %8332 = vmatprep.subr.bf16.mxu1 %v9839_v27  ;;  %8142 = vmatpush3.bf16.msra.mxu0 %v9816_v22  ;;  %v1588_v63 = vand.u32 4294901760, %v1587_v46  ;;  %v1595_v58 = vand.u32 4294901760, %v1594_v2  ;;  %v10075_v46 = vsub.f32 %v9872_v33, %v826_v36  ;;  %v11711_v33 = vand.u32 4294901760, %v9903_v42 }
 0x100   : >> { %8144 = vmatprep.subr.bf16.mxu0 %v9848_v30  ;;  %v10060_v3 = vpack.c.bf16 %v911_v59, %v904_v62  ;;  %11707 = vst [vmem:[#allocation29_spill] sm:$0xff] %v10069_v7  ;;  %v11614_v24 = vand.u32 4294901760, %v10069_v7  ;;  %v10080_v62 = vsub.f32 %v9877_v34, %v1507_v38  ;;  %11710 = vst [vmem:[#allocation32_spill] sm:$0xff] %v10089_v32 }
 0x101   : >> { %v10062_v45 = vpack.c.bf16 %v1595_v58, %v1588_v63  ;;  %11708 = vst [vmem:[#allocation30_spill] sm:$0xff] %v10075_v46  ;;  %v11613_v48 = vand.u32 4294901760, %v10075_v46  ;;  %v10095_v36 = vsub.f32 %v9903_v42, %v11711_v33  ;;  %v11619_v58 = vand.u32 4294901760, %v10089_v32 }
 0x102   : >> { %8334 = vmatpush3.bf16.msra.mxu1 %v9839_v27  ;;  %11709 = vst [vmem:[#allocation31_spill] sm:$0xff] %v10080_v62  ;;  %v959_v63 = vsub.f32 %v10069_v7, %v11614_v24  ;;  %v11615_v35 = vand.u32 4294901760, %v10080_v62  ;;  %v10108_v59 = vsub.f32 %v9908_v43, %v11713_v39  ;;  %v11715_v42 = vand.u32 4294901760, %v9913_v44 }
 0x103   : >> { %8336 = vmatprep.subr.bf16.mxu1 %v9857_v31  ;;  %8146 = vmatpush3.bf16.msra.mxu0 %v9848_v30  ;;  %11712 = vst [vmem:[#allocation33_spill] sm:$0xff] %v10095_v36  ;;  %v966_v38 = vsub.f32 %v10075_v46, %v11613_v48  ;;  %v11623_v37 = vand.u32 4294901760, %v10095_v36  ;;  %v1650_v48 = vsub.f32 %v10089_v32, %v11619_v58  ;;  %v11717_v24 = vand.u32 4294901760, %v9921_v47 }
 0x104   : >> { %8148 = vmatprep.subr.bf16.mxu0 %v9892_v40  ;;  %v960_v34 = vand.u32 4294901760, %v959_v63  ;;  %v1643_v2 = vsub.f32 %v10080_v62, %v11615_v35  ;;  %11714 = vst [vmem:[#allocation34_spill] sm:$0xff] %v10108_v59  ;;  %v10113_v63 = vsub.f32 %v9913_v44, %v11715_v42  ;;  %v11622_v39 = vand.u32 4294901760, %v10108_v59 }
 0x105   : >> { %v967_v33 = vand.u32 4294901760, %v966_v38  ;;  %v10121_v35 = vsub.f32 %v9921_v47, %v11717_v24  ;;  %v973_v43 = vsub.f32 %v10095_v36, %v11623_v37  ;;  %v1651_v38 = vand.u32 4294901760, %v1650_v48 }
 0x106   : >> { %8338 = vmatpush3.bf16.msra.mxu1 %v9857_v31  ;;  %11716 = vst [vmem:[#allocation35_spill] sm:$0xff] %v10113_v63  ;;  %v1644_v23 = vand.u32 4294901760, %v1643_v2  ;;  %v11624_v44 = vand.u32 4294901760, %v10113_v63  ;;  %v11719_v58 = vand.u32 4294901760, %v9943_v60  ;;  %v980_v47 = vsub.f32 %v10108_v59, %v11622_v39 }
 0x107   : >> { %8340 = vmatprep.subr.bf16.mxu1 %v9898_v41  ;;  %8150 = vmatpush3.bf16.msra.mxu0 %v9892_v40  ;;  %11718 = vst [vmem:[#allocation36_spill] sm:$0xff] %v10121_v35  ;;  %v10128_v42 = vpack.c.bf16 %v967_v33, %v960_v34  ;;  %v974_v24 = vand.u32 4294901760, %v973_v43  ;;  %v11721_v34 = vand.u32 4294901760, %v9948_v61  ;;  %v11723_v43 = vand.u32 4294901760, %v9953_v6 }
 0x108   : >> { %8152 = vmatprep.subr.bf16.mxu0 %v9932_v52  ;;  %v1657_v2 = vsub.f32 %v10113_v63, %v11624_v44  ;;  %v10147_v33 = vpack.c.bf16 %v1651_v38, %v1644_v23  ;;  %v981_v37 = vand.u32 4294901760, %v980_v47 }
 0x109   : >> { %v10145_v48 = vsub.f32 %v9948_v61, %v11721_v34  ;;  %v10156_v39 = vsub.f32 %v9953_v6, %v11723_v43  ;;  %v11725_v61 = vand.u32 4294901760, %v9961_v28 }
 0x10a   : >> { %8342 = vmatpush3.bf16.msra.mxu1 %v9898_v41  ;;  %v1658_v44 = vand.u32 4294901760, %v1657_v2  ;;  %v10173_v47 = vpack.c.bf16 %v981_v37, %v974_v24 }
 0x10b   : >> { %8344 = vmatprep.subr.bf16.mxu1 %v9938_v53  ;;  %8154 = vmatpush3.bf16.msra.mxu0 %v9932_v52  ;;  %11722 = vst [vmem:[#allocation38_spill] sm:$0xff] %v10145_v48  ;;  %11724 = vst [vmem:[#allocation39_spill] sm:$0xff] %v10156_v39  ;;  %v10162_v23 = vsub.f32 %v9961_v28, %v11725_v61 }
 0x10c   : >> { %8156 = vmatprep.subr.bf16.mxu0 %v9972_v21 }
 0x10d   : >> { %11726 = vst [vmem:[#allocation40_spill] sm:$0xff] %v10162_v23  ;;  %v11634_v28 = vand.u32 4294901760, %v10162_v23 }
 0x10e   : >> { %8346 = vmatpush3.bf16.msra.mxu1 %v9938_v53  ;;  %v11731_v53 = vand.u32 4294901760, %v10008_v56 }
 0x10f   : >> { %8348 = vmatprep.subr.bf16.mxu1 %v9993_v10  ;;  %8158 = vmatpush3.bf16.msra.mxu0 %v9972_v21  ;;  %v11727_v21 = vand.u32 4294901760, %v9998_v50  ;;  %v1678_v24 = vsub.f32 %v10162_v23, %v11634_v28 }
 0x110   : >> { %8160 = vmatprep.subr.bf16.mxu0 %v10036_v29 }
 0x111   : >> { %v10171_v6 = vsub.f32 %v9998_v50, %v11727_v21  ;;  %v1679_v28 = vand.u32 4294901760, %v1678_v24 }
 0x112   : >> { %8350 = vmatpush3.bf16.msra.mxu1 %v9993_v10  ;;  %v11631_v10 = vand.u32 4294901760, %v10145_v48 }
 0x113   : >> { %8352 = vmatprep.subr.bf16.mxu1 %v10045_v49  ;;  %8162 = vmatpush3.bf16.msra.mxu0 %v10036_v29  ;;  %v10134_v29 = vsub.f32 %v9943_v60, %v11719_v58  ;;  %11728 = vst [vmem:[#allocation41_spill] sm:$0xff] %v10171_v6  ;;  %v11638_v50 = vand.u32 4294901760, %v10171_v6 }
 0x114   : >> { %8164 = vmatprep.subr.bf16.mxu0 %v10060_v3  ;;  %v994_v2 = vsub.f32 %v10145_v48, %v11631_v10 }
 0x115   : >> { %11720 = vst [vmem:[#allocation37_spill] sm:$0xff] %v10134_v29  ;;  %v11630_v58 = vand.u32 4294901760, %v10134_v29 }
 0x116   : >> { %8354 = vmatpush3.bf16.msra.mxu1 %v10045_v49  ;;  %v11627_v49 = vand.u32 4294901760, %v10121_v35  ;;  %v995_v37 = vand.u32 4294901760, %v994_v2 }
 0x117   : >> { %8356 = vmatprep.subr.bf16.mxu1 %v10062_v45  ;;  %v987_v34 = vsub.f32 %v10134_v29, %v11630_v58 }
 0x118   : >> { %v1664_v60 = vsub.f32 %v10121_v35, %v11627_v49  ;;  %v11635_v49 = vand.u32 4294901760, %v10156_v39 }
 0x119   : >> { %v988_v58 = vand.u32 4294901760, %v987_v34  ;;  %v11733_v34 = vand.u32 4294901760, %v10021_v9 }
 0x11a   : >> { %v1665_v38 = vand.u32 4294901760, %v1664_v60  ;;  %v11729_v60 = vand.u32 4294901760, %v10003_v51  ;;  %v1671_v21 = vsub.f32 %v10156_v39, %v11635_v49 }
 0x11b   : >> { %v10205_v2 = vsub.f32 %v10021_v9, %v11733_v34 }
 0x11c   : >> { %v10182_v43 = vsub.f32 %v10003_v51, %v11729_v60  ;;  %v10184_v61 = vpack.c.bf16 %v1665_v38, %v1658_v44  ;;  %v10197_v51 = vsub.f32 %v10008_v56, %v11731_v53  ;;  %v1672_v44 = vand.u32 4294901760, %v1671_v21 }
 0x11d   : >> { %v1001_v38 = vsub.f32 %v10171_v6, %v11638_v50  ;;  %11734 = vst [vmem:[#allocation44_spill] sm:$0xff] %v10205_v2  ;;  %v10207_v60 = vpack.c.bf16 %v995_v37, %v988_v58  ;;  %v11639_v21 = vand.u32 4294901760, %v10205_v2 }
 0x11e   : >> { %11730 = vst [vmem:[#allocation42_spill] sm:$0xff] %v10182_v43  ;;  %v11641_v10 = vand.u32 4294901760, %v10182_v43  ;;  %11732 = vst [vmem:[#allocation43_spill] sm:$0xff] %v10197_v51  ;;  %v11640_v53 = vand.u32 4294901760, %v10197_v51  ;;  %v10214_v52 = vpack.c.bf16 %v1679_v28, %v1672_v44  ;;  %v10230_v28 = vpack.c.bf16 %v10013_v57, %v9987_v12 }
 0x11f   : >> { %v1002_v56 = vand.u32 4294901760, %v1001_v38  ;;  %v1692_v58 = vsub.f32 %v10205_v2, %v11639_v21  ;;  %v10226_v38 = vpack.c.bf16 %v9982_v13, %v9977_v20  ;;  %v10236_v44 = vpack.c.bf16 %v10075_v46, %v10069_v7 }
 0x120   : >> { %v1008_v49 = vsub.f32 %v10182_v43, %v11641_v10  ;;  %v1685_v9 = vsub.f32 %v10197_v51, %v11640_v53  ;;  %v10264_v21 = vpack.c.bf16 %v10205_v2, %v10197_v51  ;;  %v11737_v2 = vand.u32 4294901760, %v9738_v0 }
 0x121   : >> { %v1693_v34 = vand.u32 4294901760, %v1692_v58  ;;  %v10252_v58 = vpack.c.bf16 %v10145_v48, %v10134_v29  ;;  %v792_v29 = vpop.permute.xlu1 %791 }
 0x122   : >> { %v1009_v50 = vand.u32 4294901760, %v1008_v49  ;;  %v1686_v24 = vand.u32 4294901760, %v1685_v9  ;;  %v10248_v9 = vpack.c.bf16 %v10121_v35, %v10113_v63  ;;  %v11735_v35 = vand.u32 4294901760, %v9714_v54 }
 0x123   : >> { %v10279_v51 = vsub.f32 %v9738_v0, %v11737_v2  ;;  %v11741_v2 = vand.u32 4294901760, %v9777_v14 }
 0x124   : >> { %v10222_v37 = vpack.c.bf16 %v1009_v50, %v1002_v56  ;;  %v10232_v49 = vpack.c.bf16 %v1693_v34, %v1686_v24  ;;  %v10240_v50 = vpack.c.bf16 %v10089_v32, %v10080_v62  ;;  %v10244_v56 = vpack.c.bf16 %v10108_v59, %v10095_v36 }
 0x125   : >> { %v10256_v24 = vpack.c.bf16 %v10162_v23, %v10156_v39  ;;  %v10260_v34 = vpack.c.bf16 %v10182_v43, %v10171_v6  ;;  %v10269_v63 = vsub.f32 %v9714_v54, %v11735_v35  ;;  %v787_v39 = vpop.permute.xlu0 %786  ;;  %v11736_v43 = vand.u32 4294901760, %v9719_v55 }
 0x126   : >> { %v11738_v32 = vand.u32 4294901760, %v9743_v1 }
 0x127   : >> { %v10274_v6 = vsub.f32 %v9719_v55, %v11736_v43  ;;  %v11740_v55 = vand.u32 4294901760, %v9755_v5 }
 0x128   : >> { %v10284_v54 = vsub.f32 %v9743_v1, %v11738_v32  ;;  %v11742_v1 = vand.u32 4294901760, %v9782_v15 }
 0x129   : >> { %v10295_v43 = vsub.f32 %v9755_v5, %v11740_v55 }
 0x12b   : >> { %v11751_v62 = vand.u32 4294901760, %v10295_v43 }
 0x1c8   : >> { %v7113_v53 = vpop.f32.mrb[0].mxu0 }
 0x1c9   : >> { %v678_v10 = vpop.f32.mrb[1].mxu0 }
 0x1cc   : >> { %v7134_v48 = vpop.f32.mrb[0].mxu1 }
 0x1cd   : >> { %v783_v59 = vmax.f32 %v7113_v53, %v7134_v48  ;;  %v773_v23 = vpop.f32.mrb[1].mxu1  ;;  %v11655_v48 = vand.u32 4294901760, %v10269_v63  ;;  %v10300_v53 = vsub.f32 %v9777_v14, %v11741_v2  ;;  %v11743_v2 = vand.u32 4294901760, %v9794_v17 }
 0x1ce   : >> { %v782_v36 = vmax.f32 %v678_v10, %v773_v23  ;;  %v11739_v10 = vand.u32 4294901760, %v9750_v4 }
 0x1cf   : >> { %v795_v35 = vadd.f32 %v792_v29, %v783_v59  ;;  %v10305_v29 = vsub.f32 %v9782_v15, %v11742_v1  ;;  %v917_v14 = vsub.f32 %v10269_v63, %v11655_v48  ;;  %v10324_v1 = vsub.f32 %v9794_v17, %v11743_v2 }
 0x1d0   : >> { %v10290_v23 = vsub.f32 %v9750_v4, %v11739_v10  ;;  %v794_v0 = vadd.f32 %v787_v39, %v782_v36  ;;  %v11657_v4 = vand.u32 4294901760, %v10274_v6  ;;  %v11744_v48 = vand.u32 4294901760, %v9799_v18 }
 0x1d1   : >> { %v797_v32 = vmax.f32 %v795_v35, 0.0  ;;  %v11745_v39 = vand.u32 4294901760, %v9823_v25  ;;  %v11748_v2 = vand.u32 4294901760, %v10284_v54  ;;  %v11754_v22 = vand.u32 4294901760, %v10324_v1 }
 0x1d2   : >> { %v796_v59 = vmax.f32 %v794_v0, 0.0  ;;  %v10332_v36 = vsub.f32 %v9799_v18, %v11744_v48  ;;  %v11746_v0 = vand.u32 4294901760, %v9828_v26  ;;  %v11747_v18 = vand.u32 4294901760, %v10279_v51 }
 0x1d3   : >> { %v10310_v55 = vand.u32 4294901760, %v797_v32  ;;  %v10337_v10 = vsub.f32 %v9823_v25, %v11745_v39  ;;  %v1608_v25 = vsub.f32 %v10284_v54, %v11748_v2  ;;  %v11753_v2 = vand.u32 4294901760, %v10305_v29 }
 0x1d4   : >> { %v10317_v15 = vand.u32 4294901760, %v796_v59  ;;  %v10342_v35 = vsub.f32 %v9828_v26, %v11746_v0  ;;  %v1601_v48 = vsub.f32 %v10279_v51, %v11747_v18  ;;  %v918_v26 = vand.u32 4294901760, %v917_v14 }
 0x1d5   : >> { %v10327_v5 = vsub.f32 %v797_v32, %v10310_v55  ;;  %v924_v32 = vsub.f32 %v10274_v6, %v11657_v4  ;;  %v11750_v0 = vand.u32 4294901760, %v10290_v23  ;;  %v938_v4 = vsub.f32 %v10295_v43, %v11751_v62 }
 0x1d6   : >> { %v10345_v17 = vsub.f32 %v796_v59, %v10317_v15  ;;  %v11752_v18 = vand.u32 4294901760, %v10300_v53  ;;  %v1622_v57 = vsub.f32 %v10305_v29, %v11753_v2  ;;  %v1609_v40 = vand.u32 4294901760, %v1608_v25 }
 0x1d7   : >> { %v10357_v39 = vand.u32 4294901760, %v10327_v5  ;;  %v931_v59 = vsub.f32 %v10290_v23, %v11750_v0  ;;  %v925_v41 = vand.u32 4294901760, %v924_v32  ;;  %v939_v30 = vand.u32 4294901760, %v938_v4 }
 0x1d8   : >> { %v10366_v46 = vand.u32 4294901760, %v10345_v17  ;;  %v1615_v7 = vsub.f32 %v10300_v53, %v11752_v18  ;;  %v1602_v18 = vand.u32 4294901760, %v1601_v48  ;;  %v1623_v14 = vand.u32 4294901760, %v1622_v57 }
 0x1d9   : >> { %11749 = vst [vmem:[#allocation45_spill] sm:$0xff] %v10357_v39  ;;  %v892_v0 = vsub.f32 %v10327_v5, %v10357_v39  ;;  %v932_v31 = vand.u32 4294901760, %v931_v59  ;;  %v945_v39 = vsub.f32 %v10324_v1, %v11754_v22  ;;  %v11755_v62 = vand.u32 4294901760, %v10332_v36 }
 0x1da   : >> { %v882_v20 = vsub.f32 %v10345_v17, %v10366_v46  ;;  %v1616_v27 = vand.u32 4294901760, %v1615_v7  ;;  %v11756_v19 = vand.u32 4294901760, %v10337_v10  ;;  %v11757_v48 = vand.u32 4294901760, %v10342_v35 }
 0x1db   : >> { %v893_v12 = vand.u32 4294901760, %v892_v0  ;;  %v952_v13 = vsub.f32 %v10332_v36, %v11755_v62  ;;  %v8359_v57 = vpack.c.bf16 %v1609_v40, %v1602_v18  ;;  %v8171_v22 = vpack.c.bf16 %v939_v30, %v932_v31 }
 0x1dc   : >> { %v883_v2 = vand.u32 4294901760, %v882_v20  ;;  %v1629_v32 = vsub.f32 %v10337_v10, %v11756_v19  ;;  %v1636_v4 = vsub.f32 %v10342_v35, %v11757_v48  ;;  %v8167_v20 = vpack.c.bf16 %v925_v41, %v918_v26 }
 0x1dd   : >> { %v8363_v7 = vpack.c.bf16 %v1623_v14, %v1616_v27  ;;  %v946_v19 = vand.u32 4294901760, %v945_v39  ;;  %v953_v25 = vand.u32 4294901760, %v952_v13  ;;  %v8199_v13 = vpack.c.bf16 %v10274_v6, %v10269_v63 }
 0x1de   : >> { %7167 = vmatprep.mubr.f32.mxu0 %v883_v2  ;;  %7377 = vmatprep.mubr.f32.mxu1 %v883_v2  ;;  %v1630_v59 = vand.u32 4294901760, %v1629_v32  ;;  %v1637_v0 = vand.u32 4294901760, %v1636_v4  ;;  %v8391_v27 = vpack.c.bf16 %v10284_v54, %v10279_v51  ;;  %v8203_v30 = vpack.c.bf16 %v10295_v43, %v10290_v23 }
 0x1df   : >> { %7168 = vmatmul.mubr.f32.vlgmr.msra.gmra.mrb[2].mxu0 %v893_v12  ;;  %7378 = vmatmul.mubr.f32.vlgmr.msra.gmra.mrb[2].mxu1 %v893_v12  ;;  %v8175_v12 = vpack.c.bf16 %v953_v25, %v946_v19  ;;  %v8395_v31 = vpack.c.bf16 %v10305_v29, %v10300_v53  ;;  %v8207_v41 = vpack.c.bf16 %v10332_v36, %v10324_v1  ;;  %v11779_v26 = vand.u32 4294901760, %v10269_v63  ;;  %v11794_v25 = vld [vmem:[#allocation30_spill] sm:$0xff] }
 0x1e0   : >> { %8166 = vmatpush3.bf16.msra.mxu0 %v10060_v3  ;;  %8358 = vmatpush3.bf16.msra.mxu1 %v10062_v45  ;;  %v8367_v40 = vpack.c.bf16 %v1637_v0, %v1630_v59  ;;  %v8399_v45 = vpack.c.bf16 %v10342_v35, %v10337_v10  ;;  %v11759_v3 = vld [vmem:[#allocation13_spill] sm:$0xff]  ;;  %v11780_v14 = vand.u32 4294901760, %v10274_v6  ;;  %v11782_v2 = vand.u32 4294901760, %v10279_v51 }
 0x1e1   : >> { %7202 = vmatprep.mubr.f32.mxu0 %v10317_v15  ;;  %7412 = vmatprep.mubr.f32.mxu1 %v10317_v15  ;;  %v11781_v18 = vld [vmem:[#allocation45_spill] sm:$0xff]  ;;  %v11783_v32 = vand.u32 4294901760, %v10284_v54  ;;  %v11784_v4 = vand.u32 4294901760, %v10290_v23  ;;  %v11785_v63 = vand.u32 4294901760, %v10295_v43  ;;  %v11786_v6 = vand.u32 4294901760, %v10300_v53 }
 0x1e2   : >> { %8168 = vmatprep.subr.bf16.mxu0 %v8167_v20  ;;  %8360 = vmatprep.subr.bf16.mxu1 %v8359_v57  ;;  %v8263_v62 = vpack.c.bf16 %v11780_v14, %v11779_v26  ;;  %v11787_v51 = vand.u32 4294901760, %v10305_v29  ;;  %v11790_v43 = vand.u32 4294901760, %v10337_v10  ;;  %v11792_v53 = vld [vmem:[#allocation29_spill] sm:$0xff]  ;;  %v11795_v59 = vand.u32 4294901760, %v11794_v25  ;;  %v11814_v26 = vld [vmem:[#allocation40_spill] sm:$0xff] }
 0x1e3   : >> { %v8455_v48 = vpack.c.bf16 %v11783_v32, %v11782_v2  ;;  %v11793_v29 = vand.u32 4294901760, %v11792_v53  ;;  %v11800_v10 = vld [vmem:[#allocation33_spill] sm:$0xff]  ;;  %v11815_v14 = vand.u32 4294901760, %v11814_v26  ;;  %v11818_v32 = vld [vmem:[#allocation42_spill] sm:$0xff] }
 0x1e4   : >> { %8170 = vmatpush3.bf16.msra.mxu0 %v8167_v20  ;;  %8362 = vmatpush3.bf16.msra.mxu1 %v8359_v57  ;;  %v8267_v20 = vpack.c.bf16 %v11785_v63, %v11784_v4  ;;  %v8459_v54 = vpack.c.bf16 %v11787_v51, %v11786_v6  ;;  %v11788_v57 = vand.u32 4294901760, %v10324_v1  ;;  %v11820_v63 = vld [vmem:[#allocation43_spill] sm:$0xff]  ;;  %v11822_v6 = vld [vmem:[#allocation44_spill] sm:$0xff] }
 0x1e5   : >> { %8172 = vmatprep.subr.bf16.mxu0 %v8171_v22  ;;  %8364 = vmatprep.subr.bf16.mxu1 %v8363_v7  ;;  %v8275_v0 = vpack.c.bf16 %v11795_v59, %v11793_v29  ;;  %v11823_v51 = vand.u32 4294901760, %v11822_v6 }
 0x1e8   : >> { %8174 = vmatpush3.bf16.msra.mxu0 %v8171_v22  ;;  %8366 = vmatpush3.bf16.msra.mxu1 %v8363_v7  ;;  %v11789_v22 = vand.u32 4294901760, %v10332_v36  ;;  %v11791_v7 = vand.u32 4294901760, %v10342_v35  ;;  %v11801_v35 = vand.u32 4294901760, %v11800_v10 }
 0x1e9   : >> { %8176 = vmatprep.subr.bf16.mxu0 %v8175_v12  ;;  %8368 = vmatprep.subr.bf16.mxu1 %v8367_v40 }
 0x1ea   : >> { %v8271_v23 = vpack.c.bf16 %v11789_v22, %v11788_v57  ;;  %v8463_v19 = vpack.c.bf16 %v11791_v7, %v11790_v43 }
 0x1ec   : >> { %8178 = vmatpush3.bf16.msra.mxu0 %v8175_v12  ;;  %8370 = vmatpush3.bf16.msra.mxu1 %v8367_v40  ;;  %v11796_v12 = vld [vmem:[#allocation31_spill] sm:$0xff]  ;;  %v11798_v40 = vld [vmem:[#allocation32_spill] sm:$0xff] }
 0x1ed   : >> { %8180 = vmatprep.subr.bf16.mxu0 %v10128_v42  ;;  %8372 = vmatprep.subr.bf16.mxu1 %v10147_v33  ;;  %v11797_v1 = vand.u32 4294901760, %v11796_v12  ;;  %v11799_v36 = vand.u32 4294901760, %v11798_v40 }
 0x1f0   : >> { %8182 = vmatpush3.bf16.msra.mxu0 %v10128_v42  ;;  %8374 = vmatpush3.bf16.msra.mxu1 %v10147_v33  ;;  %v11760_v42 = vld [vmem:[#allocation14_spill] sm:$0xff]  ;;  %v11761_v33 = vld [vmem:[#allocation15_spill] sm:$0xff] }
 0x1f1   : >> { %8184 = vmatprep.subr.bf16.mxu0 %v10173_v47  ;;  %8376 = vmatprep.subr.bf16.mxu1 %v10184_v61 }
 0x1f4   : >> { %8186 = vmatpush3.bf16.msra.mxu0 %v10173_v47  ;;  %8378 = vmatpush3.bf16.msra.mxu1 %v10184_v61  ;;  %v11762_v47 = vld [vmem:[#allocation16_spill] sm:$0xff]  ;;  %v11764_v61 = vld [vmem:[#allocation18_spill] sm:$0xff] }
 0x1f5   : >> { %8188 = vmatprep.subr.bf16.mxu0 %v10207_v60  ;;  %8380 = vmatprep.subr.bf16.mxu1 %v10214_v52 }
 0x1f8   : >> { %8190 = vmatpush3.bf16.msra.mxu0 %v10207_v60  ;;  %8382 = vmatpush3.bf16.msra.mxu1 %v10214_v52  ;;  %v11758_v52 = vld [vmem:[#allocation12_spill] sm:$0xff]  ;;  %v11765_v60 = vld [vmem:[#allocation19_spill] sm:$0xff] }
 0x1f9   : >> { %8192 = vmatprep.subr.bf16.mxu0 %v10222_v37  ;;  %8384 = vmatprep.subr.bf16.mxu1 %v10232_v49 }
 0x1fc   : >> { %8194 = vmatpush3.bf16.msra.mxu0 %v10222_v37  ;;  %8386 = vmatpush3.bf16.msra.mxu1 %v10232_v49  ;;  %v11767_v37 = vld [vmem:[#allocation21_spill] sm:$0xff]  ;;  %v11770_v49 = vld [vmem:[#allocation22_spill] sm:$0xff] }
 0x1fd   : >> { %8196 = vmatprep.subr.bf16.mxu0 %v10226_v38  ;;  %8388 = vmatprep.subr.bf16.mxu1 %v10230_v28 }
 0x1ff   : >> { %7203 = vmatmul.mubr.f32.vlgmr.msra.gmra.mrb[2].mxu0 %v10310_v55  ;;  %7413 = vmatmul.mubr.f32.vlgmr.msra.gmra.mrb[2].mxu1 %v10310_v55 }
 0x200   : >> { %8198 = vmatpush3.bf16.msra.mxu0 %v10226_v38  ;;  %7237 = vmatprep.mubr.f32.mxu0 %v10345_v17  ;;  %v11768_v38 = vld [vmem:[#allocation25_spill] sm:$0xff] }
 0x201   : >> { %8390 = vmatpush3.bf16.msra.mxu1 %v10230_v28  ;;  %7447 = vmatprep.mubr.f32.mxu1 %v10345_v17  ;;  %v11769_v28 = vld [vmem:[#allocation27_spill] sm:$0xff] }
 0x202   : >> { %8200 = vmatprep.subr.bf16.mxu0 %v8199_v13  ;;  %8392 = vmatprep.subr.bf16.mxu1 %v8391_v27 }
 0x204   : >> { %8202 = vmatpush3.bf16.msra.mxu0 %v8199_v13  ;;  %v8467_v13 = vpack.c.bf16 %v11799_v36, %v11797_v1 }
 0x205   : >> { %8394 = vmatpush3.bf16.msra.mxu1 %v8391_v27  ;;  %8204 = vmatprep.subr.bf16.mxu0 %v8203_v30  ;;  %v11802_v27 = vld [vmem:[#allocation34_spill] sm:$0xff] }
 0x206   : >> { %8396 = vmatprep.subr.bf16.mxu1 %v8395_v31 }
 0x208   : >> { %8206 = vmatpush3.bf16.msra.mxu0 %v8203_v30  ;;  %v11803_v30 = vand.u32 4294901760, %v11802_v27 }
 0x209   : >> { %8398 = vmatpush3.bf16.msra.mxu1 %v8395_v31  ;;  %8208 = vmatprep.subr.bf16.mxu0 %v8207_v41 }
 0x20a   : >> { %8400 = vmatprep.subr.bf16.mxu1 %v8399_v45  ;;  %v8279_v31 = vpack.c.bf16 %v11803_v30, %v11801_v35 }
 0x20c   : >> { %8210 = vmatpush3.bf16.msra.mxu0 %v8207_v41  ;;  %v11804_v41 = vld [vmem:[#allocation35_spill] sm:$0xff] }
 0x20d   : >> { %8402 = vmatpush3.bf16.msra.mxu1 %v8399_v45  ;;  %8212 = vmatprep.subr.bf16.mxu0 %v10236_v44  ;;  %v11805_v45 = vand.u32 4294901760, %v11804_v41 }
 0x20e   : >> { %8404 = vmatprep.subr.bf16.mxu1 %v10240_v50 }
 0x210   : >> { %8214 = vmatpush3.bf16.msra.mxu0 %v10236_v44  ;;  %v11771_v44 = vand.u32 4294901760, %v11770_v49  ;;  %v11806_v49 = vld [vmem:[#allocation36_spill] sm:$0xff] }
 0x211   : >> { %8406 = vmatpush3.bf16.msra.mxu1 %v10240_v50  ;;  %8216 = vmatprep.subr.bf16.mxu0 %v10244_v56  ;;  %v11772_v50 = vld [vmem:[#allocation23_spill] sm:$0xff] }
 0x212   : >> { %8408 = vmatprep.subr.bf16.mxu1 %v10248_v9 }
 0x214   : >> { %8218 = vmatpush3.bf16.msra.mxu0 %v10244_v56  ;;  %v11773_v56 = vand.u32 4294901760, %v11772_v50 }
 0x215   : >> { %8410 = vmatpush3.bf16.msra.mxu1 %v10248_v9  ;;  %8220 = vmatprep.subr.bf16.mxu0 %v10252_v58 }
 0x216   : >> { %8412 = vmatprep.subr.bf16.mxu1 %v10256_v24  ;;  %v8259_v9 = vpack.c.bf16 %v11773_v56, %v11771_v44  ;;  %v11807_v44 = vand.u32 4294901760, %v11806_v49  ;;  %v11808_v56 = vld [vmem:[#allocation37_spill] sm:$0xff] }
 0x218   : >> { %8222 = vmatpush3.bf16.msra.mxu0 %v10252_v58  ;;  %v11774_v58 = vld [vmem:[#allocation28_spill] sm:$0xff]  ;;  %v8471_v50 = vpack.c.bf16 %v11807_v44, %v11805_v45 }
 0x219   : >> { %8414 = vmatpush3.bf16.msra.mxu1 %v10256_v24  ;;  %8224 = vmatprep.subr.bf16.mxu0 %v10260_v34  ;;  %v11775_v24 = vld [vmem:[#allocation24_spill] sm:$0xff] }
 0x21a   : >> { %8416 = vmatprep.subr.bf16.mxu1 %v10264_v21 }
 0x21c   : >> { %8226 = vmatpush3.bf16.msra.mxu0 %v10260_v34  ;;  %v11776_v34 = vand.u32 4294901760, %v11775_v24  ;;  %v11810_v24 = vld [vmem:[#allocation38_spill] sm:$0xff] }
 0x21d   : >> { %8418 = vmatpush3.bf16.msra.mxu1 %v10264_v21  ;;  %8228 = vmatprep.subr.bf16.mxu0 %v9762_v8  ;;  %v11766_v21 = vld [vmem:[#allocation20_spill] sm:$0xff] }
 0x21e   : >> { %8420 = vmatprep.subr.bf16.mxu1 %v9789_v16 }
 0x21f   : >> { %7238 = vmatmul.mubr.f32.vlgmr.msra.gmra.mrb[2].mxu0 %v10327_v5 }
 0x220   : >> { %7448 = vmatmul.mubr.f32.vlgmr.msra.gmra.mrb[2].mxu1 %v10327_v5  ;;  %8230 = vmatpush3.bf16.msra.mxu0 %v9762_v8  ;;  %v11777_v5 = vld [vmem:[#allocation26_spill] sm:$0xff] }
 0x221   : >> { %7272 = vmatprep.mubr.f32.mxu0 %v10366_v46  ;;  %8422 = vmatpush3.bf16.msra.mxu1 %v9789_v16  ;;  %v11778_v17 = vand.u32 4294901760, %v11777_v5 }
 0x222   : >> { %7482 = vmatprep.mubr.f32.mxu1 %v10366_v46  ;;  %8232 = vmatprep.subr.bf16.mxu0 %v9770_v11  ;;  %v11763_v46 = vld [vmem:[#allocation17_spill] sm:$0xff] }
 0x223   : >> { %8424 = vmatprep.subr.bf16.mxu1 %v11758_v52  ;;  %v8451_v39 = vpack.c.bf16 %v11778_v17, %v11776_v34  ;;  %v11811_v34 = vand.u32 4294901760, %v11810_v24  ;;  %v11812_v17 = vld [vmem:[#allocation39_spill] sm:$0xff] }
 0x224   : >> { %8234 = vmatpush3.bf16.msra.mxu0 %v9770_v11 }
 0x225   : >> { %8426 = vmatpush3.bf16.msra.mxu1 %v11758_v52  ;;  %8236 = vmatprep.subr.bf16.mxu0 %v11759_v3 }
 0x226   : >> { %8428 = vmatprep.subr.bf16.mxu1 %v11760_v42 }
 0x228   : >> { %8238 = vmatpush3.bf16.msra.mxu0 %v11759_v3 }
 0x229   : >> { %8430 = vmatpush3.bf16.msra.mxu1 %v11760_v42  ;;  %8240 = vmatprep.subr.bf16.mxu0 %v11761_v33 }
 0x22a   : >> { %8432 = vmatprep.subr.bf16.mxu1 %v11762_v47 }
 0x22c   : >> { %8242 = vmatpush3.bf16.msra.mxu0 %v11761_v33 }
 0x22d   : >> { %8434 = vmatpush3.bf16.msra.mxu1 %v11762_v47  ;;  %8244 = vmatprep.subr.bf16.mxu0 %v11763_v46 }
 0x22e   : >> { %8436 = vmatprep.subr.bf16.mxu1 %v11764_v61 }
 0x230   : >> { %8246 = vmatpush3.bf16.msra.mxu0 %v11763_v46 }
 0x231   : >> { %8438 = vmatpush3.bf16.msra.mxu1 %v11764_v61  ;;  %8248 = vmatprep.subr.bf16.mxu0 %v11765_v60 }
 0x232   : >> { %8440 = vmatprep.subr.bf16.mxu1 %v11766_v21 }
 0x234   : >> { %8250 = vmatpush3.bf16.msra.mxu0 %v11765_v60 }
 0x235   : >> { %8442 = vmatpush3.bf16.msra.mxu1 %v11766_v21  ;;  %8252 = vmatprep.subr.bf16.mxu0 %v11767_v37 }
 0x236   : >> { %8444 = vmatprep.subr.bf16.mxu1 %v11768_v38 }
 0x238   : >> { %8254 = vmatpush3.bf16.msra.mxu0 %v11767_v37 }
 0x239   : >> { %8446 = vmatpush3.bf16.msra.mxu1 %v11768_v38  ;;  %8256 = vmatprep.subr.bf16.mxu0 %v11769_v28 }
 0x23a   : >> { %8448 = vmatprep.subr.bf16.mxu1 %v11774_v58 }
 0x23c   : >> { %8258 = vmatpush3.bf16.msra.mxu0 %v11769_v28 }
 0x23d   : >> { %8450 = vmatpush3.bf16.msra.mxu1 %v11774_v58  ;;  %8260 = vmatprep.subr.bf16.mxu0 %v8259_v9 }
 0x23e   : >> { %8452 = vmatprep.subr.bf16.mxu1 %v8451_v39 }
 0x23f   : >> { %7273 = vmatmul.mubr.f32.vlgmr.msra.gmra.mrb[2].mxu0 %v11781_v18 }
 0x240   : >> { %7483 = vmatmul.mubr.f32.vlgmr.msra.gmra.mrb[2].mxu1 %v11781_v18  ;;  %8262 = vmatpush3.bf16.msra.mxu0 %v8259_v9  ;;  %v11809_v9 = vand.u32 4294901760, %v11808_v56  ;;  %v11816_v18 = vld [vmem:[#allocation41_spill] sm:$0xff] }
 0x241   : >> { %7307 = vmatprep.mubr.f32.mxu0 %v10317_v15  ;;  %8454 = vmatpush3.bf16.msra.mxu1 %v8451_v39  ;;  %v11813_v39 = vand.u32 4294901760, %v11812_v17  ;;  %v11817_v2 = vand.u32 4294901760, %v11816_v18 }
 0x242   : >> { %7517 = vmatprep.mubr.f32.mxu1 %v10317_v15  ;;  %8264 = vmatprep.subr.bf16.mxu0 %v8263_v62  ;;  %v8283_v5 = vpack.c.bf16 %v11811_v34, %v11809_v9 }
 0x243   : >> { %8456 = vmatprep.subr.bf16.mxu1 %v8455_v48 }
 0x244   : >> { %8266 = vmatpush3.bf16.msra.mxu0 %v8263_v62  ;;  %v8475_v62 = vpack.c.bf16 %v11815_v14, %v11813_v39 }
 0x245   : >> { %8458 = vmatpush3.bf16.msra.mxu1 %v8455_v48  ;;  %8268 = vmatprep.subr.bf16.mxu0 %v8267_v20  ;;  %v11819_v48 = vand.u32 4294901760, %v11818_v32 }
 0x246   : >> { %8460 = vmatprep.subr.bf16.mxu1 %v8459_v54 }
 0x247   : >> { %v8287_v4 = vpack.c.bf16 %v11819_v48, %v11817_v2 }
 0x248   : >> { %8270 = vmatpush3.bf16.msra.mxu0 %v8267_v20  ;;  %v11821_v20 = vand.u32 4294901760, %v11820_v63 }
 0x249   : >> { %8462 = vmatpush3.bf16.msra.mxu1 %v8459_v54  ;;  %8272 = vmatprep.subr.bf16.mxu0 %v8271_v23 }
 0x24a   : >> { %8464 = vmatprep.subr.bf16.mxu1 %v8463_v19  ;;  %v8479_v54 = vpack.c.bf16 %v11823_v51, %v11821_v20 }
 0x24c   : >> { %8274 = vmatpush3.bf16.msra.mxu0 %v8271_v23 }
 0x24d   : >> { %8466 = vmatpush3.bf16.msra.mxu1 %v8463_v19  ;;  %8276 = vmatprep.subr.bf16.mxu0 %v8275_v0 }
 0x24e   : >> { %8468 = vmatprep.subr.bf16.mxu1 %v8467_v13 }
 0x250   : >> { %8278 = vmatpush3.bf16.msra.mxu0 %v8275_v0 }
 0x251   : >> { %8470 = vmatpush3.bf16.msra.mxu1 %v8467_v13  ;;  %8280 = vmatprep.subr.bf16.mxu0 %v8279_v31 }
 0x252   : >> { %8472 = vmatprep.subr.bf16.mxu1 %v8471_v50 }
 0x254   : >> { %8282 = vmatpush3.bf16.msra.mxu0 %v8279_v31 }
 0x255   : >> { %8474 = vmatpush3.bf16.msra.mxu1 %v8471_v50  ;;  %8284 = vmatprep.subr.bf16.mxu0 %v8283_v5 }
 0x256   : >> { %8476 = vmatprep.subr.bf16.mxu1 %v8475_v62 }
 0x258   : >> { %8286 = vmatpush3.bf16.msra.mxu0 %v8283_v5 }
 0x259   : >> { %8478 = vmatpush3.bf16.msra.mxu1 %v8475_v62  ;;  %8288 = vmatprep.subr.bf16.mxu0 %v8287_v4 }
 0x25a   : >> { %8480 = vmatprep.subr.bf16.mxu1 %v8479_v54 }
 0x25c   : >> { %8290 = vmatpush3.bf16.msra.mxu0 %v8287_v4 }
 0x25d   : >> { %8482 = vmatpush3.bf16.msra.mxu1 %v8479_v54  ;;  %8292 = vmatprep.subr.bf16.mxu0 %v9762_v8 }
 0x25e   : >> { %8484 = vmatprep.subr.bf16.mxu1 %v9789_v16 }
 0x25f   : >> { %7308 = vmatmul.mubr.f32.vlgmr.msra.gmra.mrb[2].mxu0 %v10310_v55 }
 0x260   : >> { %7518 = vmatmul.mubr.f32.vlgmr.msra.gmra.mrb[2].mxu1 %v10310_v55  ;;  %8294 = vmatpush3.bf16.msra.mxu0 %v9762_v8 }
 0x261   : >> { %7342 = vmatprep.mubr.f32.mxu0 %v10317_v15  ;;  %8486 = vmatpush3.bf16.msra.mxu1 %v9789_v16 }
 0x262   : >> { %7552 = vmatprep.mubr.f32.mxu1 %v10317_v15  ;;  %8296 = vmatprep.subr.bf16.mxu0 %v9770_v11 }
 0x263   : >> { %8488 = vmatprep.subr.bf16.mxu1 %v11758_v52 }
 0x264   : >> { %8298 = vmatpush3.bf16.msra.mxu0 %v9770_v11 }
 0x265   : >> { %8490 = vmatpush3.bf16.msra.mxu1 %v11758_v52  ;;  %8300 = vmatprep.subr.bf16.mxu0 %v11759_v3 }
 0x266   : >> { %8492 = vmatprep.subr.bf16.mxu1 %v11760_v42 }
 0x268   : >> { %8302 = vmatpush3.bf16.msra.mxu0 %v11759_v3 }
 0x269   : >> { %8494 = vmatpush3.bf16.msra.mxu1 %v11760_v42  ;;  %8304 = vmatprep.subr.bf16.mxu0 %v11761_v33 }
 0x26a   : >> { %8496 = vmatprep.subr.bf16.mxu1 %v11762_v47 }
 0x26c   : >> { %8306 = vmatpush3.bf16.msra.mxu0 %v11761_v33 }
 0x26d   : >> { %8498 = vmatpush3.bf16.msra.mxu1 %v11762_v47  ;;  %8308 = vmatprep.subr.bf16.mxu0 %v11763_v46 }
 0x26e   : >> { %8500 = vmatprep.subr.bf16.mxu1 %v11764_v61 }
 0x270   : >> { %8310 = vmatpush3.bf16.msra.mxu0 %v11763_v46 }
 0x271   : >> { %8502 = vmatpush3.bf16.msra.mxu1 %v11764_v61  ;;  %8312 = vmatprep.subr.bf16.mxu0 %v11765_v60 }
 0x272   : >> { %8504 = vmatprep.subr.bf16.mxu1 %v11766_v21 }
 0x274   : >> { %8314 = vmatpush3.bf16.msra.mxu0 %v11765_v60 }
 0x275   : >> { %8506 = vmatpush3.bf16.msra.mxu1 %v11766_v21  ;;  %8316 = vmatprep.subr.bf16.mxu0 %v11767_v37 }
 0x276   : >> { %8508 = vmatprep.subr.bf16.mxu1 %v11768_v38 }
 0x278   : >> { %8318 = vmatpush3.bf16.msra.mxu0 %v11767_v37 }
 0x279   : >> { %8510 = vmatpush3.bf16.msra.mxu1 %v11768_v38  ;;  %8320 = vmatprep.subr.bf16.mxu0 %v11769_v28 }
 0x27a   : >> { %8512 = vmatprep.subr.bf16.mxu1 %v11774_v58 }
 0x27c   : >> { %8322 = vmatpush3.bf16.msra.mxu0 %v11769_v28 }
 0x27d   : >> { %8514 = vmatpush3.bf16.msra.mxu1 %v11774_v58 }
 0x27f   : >> { %7343 = vmatmul.mubr.f32.vlgmr.msra.gmra.mrb[2].mxu0 %v10310_v55 }
 0x280   : >> { %7553 = vmatmul.mubr.f32.vlgmr.msra.gmra.mrb[2].mxu1 %v10310_v55 }
 0x351   : > { %505 = sbr.rel (!%p503_p5) target bundleno = 102 (0x66), region = 153 }
 0x352   : >> { %v7344_v8 = vpop.f32.mrb[2].mxu0 }
 0x353   : >> { %v7554_v11 = vpop.f32.mrb[2].mxu1  ;;  %v1472_v16 = vpop.f32.mrb[3].mxu0 }
 0x354   : >> { %v2167_v15 = vmax.f32 %v7344_v8, %v7554_v11  ;;  %v2156_v52 = vpop.f32.mrb[3].mxu1 }
 0x355   : >> { %v2166_v3 = vmax.f32 %v1472_v16, %v2156_v52 }
 0x356   : >> { %6350 = vst.msk [vmem:[%s6214_s19 + $0x18] sm:$0xff] %vm485_vm0, %v2167_v15 }
 0x357   : >> { %6349 = vst.msk [vmem:[%s6214_s19 + $0x10] sm:$0xff] %vm485_vm0, %v2166_v3 }
 0x358 LB: >> { %v9455_v55 = vmov 0.0|0.0   ;;  %s6423_s28 = sshll.u32 %s9436_s20, 5  ;;  %s9456_s21 = smov 127   ;;  %v2180_v19 = vld [vmem:[#allocation6 + $0x8] sm:$0xff]  ;;  %vm2264_vm5 = vcmask 130048   ;;  %v2187_v53 = vld [vmem:[%s11572_s4] sm:$0xff]  ;;  %s9436_s20 = sphi %s10598_s20, %s2178_s20  }
 0x359   : >> { %8515 = vmatprep.subr.bf16.mxu0 %v9455_v55  ;;  %8542 = vmatprep.subr.bf16.mxu1 %v9455_v55  ;;  %s2209_s24 = scalar_lea.vmem [#allocation2], %s6423_s28  ;;  %s9457_s22 = smov 126   ;;  %v2188_v29 = vld [vmem:[%s11572_s4 + $0x8] sm:$0xff]  ;;  %v9458_v25 = vmov 0   ;;  %v2190_v59 = vld [vmem:[%s11572_s4 + $0x18] sm:$0xff]  ;;  %v2189_v0 = vld [vmem:[%s11572_s4 + $0x10] sm:$0xff] }
 0x35a   : >> { %6361 = vmatprep.mubr.msk.f32.mxu0 %vm2264_vm5, %v2180_v19  ;;  %6369 = vmatprep.mubr.msk.f32.mxu1 %vm2264_vm5, %v2180_v19  ;;  %v2179_v6 = vld [vmem:[#allocation6] sm:$0xff]  ;;  %v2182_v51 = vld [vmem:[#allocation6 + $0x18] sm:$0xff]  ;;  %v2181_v54 = vld [vmem:[#allocation6 + $0x10] sm:$0xff]  ;;  %vm2498_vm6 = vcmask 523264   ;;  %s6231_s23 = scalar_lea.vmem [#allocation3], %s6423_s28  ;;  %s2178_s20 = sadd.s32 1, %s9436_s20  }
 0x35b   : >> { %9234 = vset.pattern.permute.xlu0 %v9458_v25  ;;  %9235 = vset.pattern.permute.xlu1 %v9458_v25  ;;  %v2184_v8 = vld [vmem:[#allocation6 + $0x28] sm:$0xff]  ;;  %v2183_v11 = vld [vmem:[#allocation6 + $0x20] sm:$0xff]  ;;  %v2186_v16 = vld [vmem:[#allocation6 + $0x38] sm:$0xff]  ;;  %p2175_p0 = scmp.ge.s32.totalorder %s2178_s20, 32  }
 0x35c   : >> { %v2185_v15 = vld [vmem:[#allocation6 + $0x30] sm:$0xff]  ;;  %v2192_v3 = vld [vmem:[%s11577_s9 + $0x8] sm:$0xff]  ;;  %s11038_s28 = smov (%p2175_p0), 0  }
 0x35d   : >> { %v2191_v52 = vld [vmem:[%s11577_s9] sm:$0xff] }
 0x35e   : >> { %v2210_v42 = vld [vmem:[%s2209_s24] sm:$0xff]  ;;  %v2211_v33 = vld [vmem:[%s2209_s24 + $0x8] sm:$0xff]  ;;  %v6355_v47 = vld [vmem:[%s2209_s24 + $0x10] sm:$0xff] }
 0x35f   : >> { %v9194_v46 = vpack.i.bf16 %v2211_v33, %v2210_v42  ;;  %v6356_v61 = vld [vmem:[%s2209_s24 + $0x18] sm:$0xff]  ;;  %v8516_v60 = vpack.c.bf16 %v2211_v33, %v2210_v42  ;;  %v6359_v37 = vld [vmem:[%s2209_s24 + $0x20] sm:$0xff]  ;;  %v6360_v38 = vld [vmem:[%s2209_s24 + $0x28] sm:$0xff]  ;;  %v2512_v42 = vand.u32 4294901760, %v2191_v52  ;;  %v2515_v33 = vand.u32 4294901760, %v2192_v3 }
 0x360   : >> { %v9199_v21 = vpack.i.bf16 %v6356_v61, %v6355_v47  ;;  %v8525_v28 = vpack.c.bf16 %v6356_v61, %v6355_v47  ;;  %v10608_v58 = vpack.c.bf16 %v6360_v38, %v6359_v37  ;;  %v9214_v57 = vpack.i.bf16 %v6360_v38, %v6359_v37  ;;  %v10612_v22 = vld [vmem:[%s2209_s24 + $0x30] sm:$0xff]  ;;  %v10614_v23 = vld [vmem:[%s2209_s24 + $0x38] sm:$0xff]  ;;  %v2200_v47 = vld [vmem:[%s11578_s10 + $0x8] sm:$0xff] }
 0x361   : >> { %9195 = vrot.lane.b32.xlu0 %v9194_v46, %s9456_s21  ;;  %9205 = vrot.lane.b32.xlu1 %v9194_v46, %s9457_s22  ;;  %v9224_v43 = vpack.i.bf16 %v10614_v23, %v10612_v22  ;;  %v8561_v7 = vpack.c.bf16 %v10614_v23, %v10612_v22  ;;  %v3181_v61 = vand.u32 4294901760, %v2200_v47  ;;  %v2193_v37 = vld [vmem:[%s11577_s9 + $0x10] sm:$0xff]  ;;  %v2194_v38 = vld [vmem:[%s11577_s9 + $0x18] sm:$0xff] }
 0x362   : >> { %8517 = vmatpush1.bf16.msra.mxu0 %v8516_v60  ;;  %8544 = vmatpush1.bf16.msra.mxu1 %v8525_v28  ;;  %v10671_v60 = vpack.c.bf16 %v2515_v33, %v2512_v42  ;;  %v2202_v22 = vld [vmem:[%s11578_s10 + $0x18] sm:$0xff]  ;;  %v10704_v25 = vld [vmem:[%s11578_s10 + $0x20] sm:$0xff] }
 0x363   : >> { %8518 = vmatprep.subr.bf16.mxu0 %v9455_v55  ;;  %8545 = vmatprep.subr.bf16.mxu1 %v9455_v55 }
 0x365   : >> { %9200 = vrot.lane.b32.xlu0 %v9199_v21, %s9456_s21  ;;  %9210 = vrot.lane.b32.xlu1 %v9199_v21, %s9457_s22 }
 0x369   : >> { %9215 = vrot.lane.b32.xlu0 %v9214_v57, %s9456_s21  ;;  %9220 = vrot.lane.b32.xlu1 %v9214_v57, %s9457_s22  ;;  %v2521_v57 = vand.u32 4294901760, %v2194_v38 }
 0x36d   : >> { %9225 = vrot.lane.b32.xlu0 %v9224_v43, %s9456_s21  ;;  %9230 = vrot.lane.b32.xlu1 %v9224_v43, %s9457_s22  ;;  %v3187_v43 = vand.u32 4294901760, %v2202_v22 }
 0x371   : >> { %2472 = vperm.xlu0 %9234, %v2187_v53   ;;  %2477 = vperm.xlu1 %9235, %v2188_v29   ;;  %v2195_v53 = vld [vmem:[%s11577_s9 + $0x20] sm:$0xff]  ;;  %v2196_v29 = vld [vmem:[%s11577_s9 + $0x28] sm:$0xff] }
 0x375   : >> { %2487 = vperm.xlu0 %9234, %v2190_v59   ;;  %2482 = vperm.xlu1 %9235, %v2189_v0   ;;  %v2524_v59 = vand.u32 4294901760, %v2195_v53  ;;  %v2527_v0 = vand.u32 4294901760, %v2196_v29 }
 0x3d3   : >> { %v9196_v12 = vpop.permute.xlu0 %9195  ;;  %v9206_v1 = vpop.permute.xlu1 %9205 }
 0x3d4   : >> { %v9198_v40 = vunpack.i.h.bf16 %v9196_v12  ;;  %v9197_v36 = vunpack.i.l.bf16 %v9196_v12  ;;  %v9208_v13 = vunpack.i.h.bf16 %v9206_v1  ;;  %v9207_v10 = vunpack.i.l.bf16 %v9206_v1  ;;  %v2204_v12 = vld [vmem:[%s11578_s10 + $0x28] sm:$0xff] }
 0x3d5   : >> { %v3190_v1 = vand.u32 4294901760, %v10704_v25 }
 0x3d6   : >> { %v8519_v35 = vpack.c.bf16 %v9198_v40, %v9197_v36  ;;  %v8522_v27 = vpack.c.bf16 %v9208_v13, %v9207_v10  ;;  %v3193_v40 = vand.u32 4294901760, %v2204_v12  ;;  %v10714_v36 = vpack.c.bf16 %v2527_v0, %v2524_v59 }
 0x3d7   : >> { %v9201_v30 = vpop.permute.xlu0 %9200  ;;  %v9211_v31 = vpop.permute.xlu1 %9210  ;;  %v10716_v13 = vsub.f32 %v2191_v52, %v2512_v42  ;;  %v10718_v10 = vsub.f32 %v2192_v3, %v2515_v33 }
 0x3d8   : >> { %v9203_v41 = vunpack.i.h.bf16 %v9201_v30  ;;  %v9202_v45 = vunpack.i.l.bf16 %v9201_v30  ;;  %8520 = vmatpush1.bf16.msra.mxu0 %v8519_v35  ;;  %v9213_v49 = vunpack.i.h.bf16 %v9211_v31  ;;  %v9212_v44 = vunpack.i.l.bf16 %v9211_v31  ;;  %v2197_v30 = vld [vmem:[%s11577_s9 + $0x30] sm:$0xff]  ;;  %v2198_v31 = vld [vmem:[%s11577_s9 + $0x38] sm:$0xff] }
 0x3d9   : >> { %8521 = vmatprep.subr.bf16.mxu0 %v9455_v55 }
 0x3da   : >> { %v8528_v50 = vpack.c.bf16 %v9203_v41, %v9202_v45  ;;  %v8531_v56 = vpack.c.bf16 %v9213_v49, %v9212_v44  ;;  %v10733_v41 = vld [vmem:[%s11578_s10 + $0x30] sm:$0xff]  ;;  %v10735_v45 = vsub.f32 %v2200_v47, %v3181_v61  ;;  %v2530_v49 = vand.u32 4294901760, %v2197_v30 }
 0x3db   : >> { %v9216_v9 = vpop.permute.xlu0 %9215  ;;  %v9221_v5 = vpop.permute.xlu1 %9220  ;;  %v2533_v44 = vand.u32 4294901760, %v2198_v31 }
 0x3dc   : >> { %8523 = vmatpush1.bf16.msra.mxu0 %v8522_v27  ;;  %8547 = vmatpush1.bf16.msra.mxu1 %v8528_v50  ;;  %v9218_v24 = vunpack.i.h.bf16 %v9216_v9  ;;  %v9217_v34 = vunpack.i.l.bf16 %v9216_v9  ;;  %v9223_v39 = vunpack.i.h.bf16 %v9221_v5  ;;  %v9222_v26 = vunpack.i.l.bf16 %v9221_v5 }
 0x3dd   : >> { %8524 = vmatprep.subr.bf16.mxu0 %v9455_v55  ;;  %8548 = vmatprep.subr.bf16.mxu1 %v9455_v55  ;;  %v10722_v27 = vpack.c.bf16 %v3193_v40, %v3190_v1  ;;  %v2627_v9 = vand.u32 4294901760, %v10716_v13 }
 0x3de   : >> { %v8537_v17 = vpack.c.bf16 %v9218_v24, %v9217_v34  ;;  %v8540_v14 = vpack.c.bf16 %v9223_v39, %v9222_v26  ;;  %v2634_v34 = vand.u32 4294901760, %v10718_v10  ;;  %v10752_v39 = vpack.c.bf16 %v2533_v44, %v2530_v49 }
 0x3df   : >> { %v9226_v62 = vpop.permute.xlu0 %9225  ;;  %v9231_v32 = vpop.permute.xlu1 %9230  ;;  %v2628_v26 = vsub.f32 %v10716_v13, %v2627_v9 }
 0x3e0   : >> { %8526 = vmatpush1.bf16.msra.mxu0 %v8525_v28  ;;  %8550 = vmatpush1.bf16.msra.mxu1 %v8531_v56  ;;  %v9228_v18 = vunpack.i.h.bf16 %v9226_v62  ;;  %v9227_v2 = vunpack.i.l.bf16 %v9226_v62  ;;  %v9233_v4 = vunpack.i.h.bf16 %v9231_v32  ;;  %v9232_v63 = vunpack.i.l.bf16 %v9231_v32  ;;  %v2201_v28 = vld [vmem:[%s11578_s10 + $0x10] sm:$0xff] }
 0x3e1   : >> { %8527 = vmatprep.subr.bf16.mxu0 %v9455_v55  ;;  %8551 = vmatprep.subr.bf16.mxu1 %v9455_v55  ;;  %v3184_v23 = vand.u32 4294901760, %v2201_v28  ;;  %v2635_v62 = vsub.f32 %v10718_v10, %v2634_v34  ;;  %v2629_v32 = vand.u32 4294901760, %v2628_v26 }
 0x3e2   : >> { %v8564_v48 = vpack.c.bf16 %v9228_v18, %v9227_v2  ;;  %v8567_v20 = vpack.c.bf16 %v9233_v4, %v9232_v63  ;;  %v10773_v4 = vsub.f32 %v2194_v38, %v2521_v57  ;;  %v3320_v38 = vsub.f32 %v10704_v25, %v3190_v1 }
 0x3e3   : >> { %v10693_v19 = vpack.c.bf16 %v3187_v43, %v3184_v23  ;;  %v10775_v63 = vsub.f32 %v2201_v28, %v3184_v23  ;;  %v3327_v28 = vsub.f32 %v2204_v12, %v3193_v40 }
 0x3e4   : >> { %8529 = vmatpush1.bf16.msra.mxu0 %v8528_v50  ;;  %8553 = vmatpush1.bf16.msra.mxu1 %v10608_v58  ;;  %v10741_v50 = vld [vmem:[%s11578_s10 + $0x38] sm:$0xff] }
 0x3e5   : >> { %8530 = vmatprep.subr.bf16.mxu0 %v9455_v55  ;;  %8554 = vmatprep.subr.bf16.mxu1 %v9455_v55  ;;  %v3199_v24 = vand.u32 4294901760, %v10741_v50  ;;  %v3328_v26 = vand.u32 4294901760, %v3327_v28 }
 0x3e8   : >> { %8532 = vmatpush1.bf16.msra.mxu0 %v8531_v56  ;;  %8556 = vmatpush1.bf16.msra.mxu1 %v8537_v17  ;;  %v3196_v56 = vand.u32 4294901760, %v10733_v41 }
 0x3e9   : >> { %8533 = vmatprep.subr.bf16.mxu0 %v9455_v55  ;;  %8557 = vmatprep.subr.bf16.mxu1 %v9455_v55 }
 0x3ea   : >> { %v3334_v40 = vsub.f32 %v10733_v41, %v3196_v56 }
 0x3ec   : >> { %8535 = vmatpush1.bf16.msra.mxu0 %v10608_v58  ;;  %8559 = vmatpush1.bf16.msra.mxu1 %v8540_v14  ;;  %v2518_v58 = vand.u32 4294901760, %v2193_v37 }
 0x3ed   : >> { %8536 = vmatprep.subr.bf16.mxu0 %v9455_v55  ;;  %8560 = vmatprep.subr.bf16.mxu1 %v9455_v55 }
 0x3f0   : >> { %8538 = vmatpush1.bf16.msra.mxu0 %v8537_v17  ;;  %8562 = vmatpush1.bf16.msra.mxu1 %v8561_v7  ;;  %v10691_v7 = vpack.c.bf16 %v2521_v57, %v2518_v58  ;;  %v3300_v17 = vand.u32 4294901760, %v10735_v45 }
 0x3f1   : >> { %8539 = vmatprep.subr.bf16.mxu0 %v9455_v55  ;;  %8563 = vmatprep.subr.bf16.mxu1 %v9455_v55 }
 0x3f2   : >> { %v3301_v2 = vsub.f32 %v10735_v45, %v3300_v17 }
 0x3f4   : >> { %8541 = vmatpush1.bf16.msra.mxu0 %v8540_v14  ;;  %8565 = vmatpush1.bf16.msra.mxu1 %v8564_v48  ;;  %v10759_v14 = vpack.c.bf16 %v3199_v24, %v3196_v56  ;;  %v10771_v48 = vsub.f32 %v2193_v37, %v2518_v58 }
 0x3f5   : >> { %8566 = vmatprep.subr.bf16.mxu1 %v9455_v55  ;;  %v2199_v55 = vld [vmem:[%s11578_s10] sm:$0xff]  ;;  %8570 = vmatprep.subr.bf16.mxu0 %v10671_v60 }
 0x3f6   : >> { %v3178_v46 = vand.u32 4294901760, %v2199_v55 }
 0x3f7   : >> { %2342 = vmatmul.mubr.f32.vlgmr.msra.gmra.mrb[0].mxu0 %v2179_v6 }
 0x3f8   : >> { %8568 = vmatpush1.bf16.msra.mxu1 %v8567_v20  ;;  %6362 = vmatprep.mubr.msk.f32.mxu0 %vm2264_vm5, %v2182_v51  ;;  %v10673_v21 = vpack.c.bf16 %v3181_v61, %v3178_v46  ;;  %v10720_v35 = vsub.f32 %v2199_v55, %v3178_v46  ;;  %v2636_v20 = vand.u32 4294901760, %v2635_v62  ;;  %v2654_v55 = vsub.f32 %v2195_v53, %v2524_v59 }
 0x3f9   : >> { %8572 = vmatpush3.bf16.msra.mxu0 %v10671_v60  ;;  %v2661_v46 = vsub.f32 %v2196_v29, %v2527_v0  ;;  %v3321_v59 = vand.u32 4294901760, %v3320_v38  ;;  %v2668_v0 = vsub.f32 %v2197_v30, %v2530_v49  ;;  %v3335_v49 = vand.u32 4294901760, %v3334_v40 }
 0x3fa   : >> { %8666 = vmatprep.subr.bf16.mxu1 %v10673_v21  ;;  %8574 = vmatprep.subr.bf16.mxu0 %v10691_v7  ;;  %v3293_v5 = vand.u32 4294901760, %v10720_v35  ;;  %v2655_v37 = vand.u32 4294901760, %v2654_v55 }
 0x3fb   : >> { %2446 = vmatmul.mubr.f32.vlgmr.msra.gmra.mrb[0].mxu1 %v2179_v6  ;;  %2347 = vmatmul.mubr.f32.gmra.mrb[2].mxu0 %v2181_v54  ;;  %v2662_v23 = vand.u32 4294901760, %v2661_v46  ;;  %v2669_v12 = vand.u32 4294901760, %v2668_v0 }
 0x3fc   : >> { %6370 = vmatprep.mubr.msk.f32.mxu1 %vm2264_vm5, %v2182_v51  ;;  %6363 = vmatprep.mubr.msk.f32.mxu0 %vm2264_vm5, %v2184_v8  ;;  %v3294_v18 = vsub.f32 %v10720_v35, %v3293_v5  ;;  %v3302_v51 = vand.u32 4294901760, %v3301_v2  ;;  %v2656_v53 = vsub.f32 %v2654_v55, %v2655_v37 }
 0x3fd   : >> { %8668 = vmatpush3.bf16.msra.mxu1 %v10673_v21  ;;  %8576 = vmatpush3.bf16.msra.mxu0 %v10691_v7  ;;  %v2663_v29 = vsub.f32 %v2661_v46, %v2662_v23  ;;  %v2670_v30 = vsub.f32 %v2668_v0, %v2669_v12 }
 0x3fe   : >> { %8670 = vmatprep.subr.bf16.mxu1 %v10693_v19  ;;  %8578 = vmatprep.subr.bf16.mxu0 %v10714_v36  ;;  %v3295_v6 = vand.u32 4294901760, %v3294_v18  ;;  %v2675_v18 = vsub.f32 %v2198_v31, %v2533_v44 }
 0x3ff   : >> { %2451 = vmatmul.mubr.f32.gmra.mrb[2].mxu1 %v2181_v54  ;;  %2352 = vmatmul.mubr.f32.gmra.mrb[4].mxu0 %v2183_v11  ;;  %v10779_v54 = vsub.f32 %v2202_v22, %v3187_v43  ;;  %v2664_v25 = vand.u32 4294901760, %v2663_v29 }
 0x400   : >> { %6371 = vmatprep.mubr.msk.f32.mxu1 %vm2264_vm5, %v2184_v8  ;;  %6364 = vmatprep.mubr.msk.f32.mxu0 %vm2264_vm5, %v2186_v16  ;;  %v2641_v8 = vand.u32 4294901760, %v10771_v48  ;;  %v10787_v52 = vpack.c.bf16 %v3302_v51, %v3295_v6  ;;  %v3329_v6 = vsub.f32 %v3327_v28, %v3328_v26  ;;  %v2676_v1 = vand.u32 4294901760, %v2675_v18 }
 0x401   : >> { %8672 = vmatpush3.bf16.msra.mxu1 %v10693_v19  ;;  %8580 = vmatpush3.bf16.msra.mxu0 %v10714_v36  ;;  %v3314_v3 = vand.u32 4294901760, %v10779_v54 }
 0x402   : >> { %8674 = vmatprep.subr.bf16.mxu1 %v10722_v27  ;;  %8582 = vmatprep.subr.bf16.mxu0 %v10752_v39  ;;  %v2642_v42 = vsub.f32 %v10771_v48, %v2641_v8  ;;  %v2677_v31 = vsub.f32 %v2675_v18, %v2676_v1 }
 0x403   : >> { %2456 = vmatmul.mubr.f32.gmra.mrb[4].mxu1 %v2183_v11  ;;  %2357 = vmatmul.mubr.f32.gmra.mrb[6].mxu0 %v2185_v15  ;;  %v2648_v11 = vand.u32 4294901760, %v10773_v4  ;;  %v3315_v61 = vsub.f32 %v10779_v54, %v3314_v3 }
 0x404   : >> { %6372 = vmatprep.mubr.msk.f32.mxu1 %vm2264_vm5, %v2186_v16  ;;  %v3307_v16 = vand.u32 4294901760, %v10775_v63  ;;  %v2643_v58 = vand.u32 4294901760, %v2642_v42  ;;  %v3330_v42 = vand.u32 4294901760, %v3329_v6  ;;  %v10835_v6 = vpack.c.bf16 %v2661_v46, %v2654_v55 }
 0x405   : >> { %8676 = vmatpush3.bf16.msra.mxu1 %v10722_v27  ;;  %8584 = vmatpush3.bf16.msra.mxu0 %v10752_v39  ;;  %v2649_v33 = vsub.f32 %v10773_v4, %v2648_v11  ;;  %v3316_v43 = vand.u32 4294901760, %v3315_v61  ;;  %v10859_v55 = vpack.c.bf16 %v2648_v11, %v2641_v8 }
 0x406   : >> { %8678 = vmatprep.subr.bf16.mxu1 %v10759_v14  ;;  %v3308_v47 = vsub.f32 %v10775_v63, %v3307_v16  ;;  %v10863_v46 = vpack.c.bf16 %v3314_v3, %v3307_v16 }
 0x407   : >> { %2461 = vmatmul.mubr.f32.gmra.mrb[6].mxu1 %v2185_v15  ;;  %v10785_v15 = vpack.c.bf16 %v2636_v20, %v2629_v32  ;;  %v2650_v57 = vand.u32 4294901760, %v2649_v33  ;;  %v2657_v32 = vand.u32 4294901760, %v2656_v53  ;;  %v3322_v20 = vsub.f32 %v3320_v38, %v3321_v59 }
 0x408   : >> { %v3309_v22 = vand.u32 4294901760, %v3308_v47  ;;  %v3341_v33 = vsub.f32 %v10741_v50, %v3199_v24  ;;  %v10821_v50 = vpack.c.bf16 %v10718_v10, %v10716_v13  ;;  %v10825_v24 = vpack.c.bf16 %v10735_v45, %v10720_v35 }
 0x409   : >> { %8680 = vmatpush3.bf16.msra.mxu1 %v10759_v14  ;;  %8586 = vmatprep.subr.bf16.mxu0 %v10785_v15  ;;  %v10803_v62 = vpack.c.bf16 %v2650_v57, %v2643_v58  ;;  %v3323_v51 = vand.u32 4294901760, %v3322_v20  ;;  %v10811_v47 = vpack.c.bf16 %v2664_v25, %v2657_v32  ;;  %v2671_v58 = vand.u32 4294901760, %v2670_v30 }
 0x40a   : >> { %8682 = vmatprep.subr.bf16.mxu1 %v10787_v52  ;;  %v10805_v2 = vpack.c.bf16 %v3316_v43, %v3309_v22  ;;  %v3342_v61 = vand.u32 4294901760, %v3341_v33  ;;  %v2678_v57 = vand.u32 4294901760, %v2677_v31  ;;  %v3336_v22 = vsub.f32 %v3334_v40, %v3335_v49 }
 0x40b   : >> { %v10813_v44 = vpack.c.bf16 %v3330_v42, %v3323_v51  ;;  %v10829_v32 = vpack.c.bf16 %v10773_v4, %v10771_v48  ;;  %v10833_v20 = vpack.c.bf16 %v10779_v54, %v10775_v63  ;;  %v10837_v25 = vpack.c.bf16 %v3327_v28, %v3320_v38  ;;  %v2478_v63 = vpop.permute.xlu1 %2477 }
 0x40c   : >> { %v3343_v43 = vsub.f32 %v3341_v33, %v3342_v61  ;;  %v10815_v53 = vpack.c.bf16 %v2678_v57, %v2671_v58  ;;  %v3337_v29 = vand.u32 4294901760, %v3336_v22  ;;  %v10839_v51 = vpack.c.bf16 %v2675_v18, %v2668_v0 }
 0x40d   : >> { %v10841_v42 = vpack.c.bf16 %v3341_v33, %v3334_v40  ;;  %v10847_v30 = vpack.c.bf16 %v2634_v34, %v2627_v9  ;;  %v10853_v54 = vpack.c.bf16 %v3300_v17, %v3293_v5  ;;  %v10865_v13 = vpack.c.bf16 %v2662_v23, %v2655_v37  ;;  %v2473_v5 = vpop.permute.xlu0 %2472 }
 0x40e   : >> { %v3344_v41 = vand.u32 4294901760, %v3343_v43  ;;  %v10867_v10 = vpack.c.bf16 %v3328_v26, %v3321_v59  ;;  %v10869_v9 = vpack.c.bf16 %v2676_v1, %v2669_v12  ;;  %v10871_v35 = vpack.c.bf16 %v3342_v61, %v3335_v49 }
 0x40f   : >> { %v2483_v58 = vpop.permute.xlu1 %2482 }
 0x410   : >> { %v10817_v56 = vpack.c.bf16 %v3344_v41, %v3337_v29 }
 0x4ca   : >> { %v2343_v45 = vpop.f32.mrb[0].mxu0 }
 0x4cb   : >> { %v2345_v34 = vpop.f32.mrb[1].mxu0 }
 0x4ce   : >> { %v2447_v17 = vpop.f32.mrb[0].mxu1  ;;  %v2348_v48 = vpop.f32.mrb[2].mxu0 }
 0x4cf   : >> { %v2466_v4 = vmax.f32 %v2343_v45, %v2447_v17  ;;  %v2449_v8 = vpop.f32.mrb[1].mxu1  ;;  %v2350_v11 = vpop.f32.mrb[3].mxu0 }
 0x4d1   : >> { %v2490_v38 = vadd.f32 %v2473_v5, %v2466_v4 }
 0x4d2   : >> { %v2452_v16 = vpop.f32.mrb[2].mxu1  ;;  %v2353_v3 = vpop.f32.mrb[4].mxu0 }
 0x4d3   : >> { %v2494_v37 = vmax.f32 %v2490_v38, 0.0  ;;  %v2467_v28 = vmax.f32 %v2348_v48, %v2452_v16  ;;  %v2454_v23 = vpop.f32.mrb[3].mxu1  ;;  %v2355_v59 = vpop.f32.mrb[5].mxu0 }
 0x4d4   : >> { %v2488_v48 = vpop.permute.xlu0 %2487 }
 0x4d5   : >> { %v2500_v26 = vsel %vm2498_vm6, %v2494_v37, 0  ;;  %v2491_v0 = vadd.f32 %v2478_v63, %v2467_v28 }
 0x4d6   : >> { %v10874_v18 = vand.u32 4294901760, %v2500_v26  ;;  %v2457_v12 = vpop.f32.mrb[4].mxu1  ;;  %v2358_v1 = vpop.f32.mrb[6].mxu0 }
 0x4d7   : >> { %v2495_v40 = vmax.f32 %v2491_v0, 0.0  ;;  %v2468_v33 = vmax.f32 %v2353_v3, %v2457_v12  ;;  %v2459_v31 = vpop.f32.mrb[5].mxu1  ;;  %v2360_v49 = vpop.f32.mrb[7].mxu0 }
 0x4d8   : >> { %v10877_v61 = vsub.f32 %v2500_v26, %v10874_v18 }
 0x4d9   : >> { %v2503_v57 = vsel %vm2498_vm6, %v2495_v40, 0  ;;  %v2492_v22 = vadd.f32 %v2483_v58, %v2468_v33 }
 0x4da   : >> { %v10880_v43 = vand.u32 4294901760, %v2503_v57  ;;  %v2462_v29 = vpop.f32.mrb[6].mxu1  ;;  %v10883_v41 = vand.u32 4294901760, %v10877_v61 }
 0x4db   : >> { %v2496_v45 = vmax.f32 %v2492_v22, 0.0  ;;  %v2469_v34 = vmax.f32 %v2358_v1, %v2462_v29  ;;  %v2464_v5 = vpop.f32.mrb[7].mxu1 }
 0x4dc   : >> { %v10886_v17 = vsub.f32 %v2503_v57, %v10880_v43  ;;  %v2587_v4 = vsub.f32 %v10877_v61, %v10883_v41 }
 0x4dd   : >> { %v2506_v8 = vsel %vm2498_vm6, %v2496_v45, 0  ;;  %v2493_v11 = vadd.f32 %v2488_v48, %v2469_v34 }
 0x4de   : >> { %v10892_v38 = vand.u32 4294901760, %v10886_v17  ;;  %v10894_v63 = vand.u32 4294901760, %v2506_v8  ;;  %v2588_v16 = vand.u32 4294901760, %v2587_v4 }
 0x4df   : >> { %v2497_v3 = vmax.f32 %v2493_v11, 0.0 }
 0x4e0   : >> { %v10897_v37 = vsub.f32 %v2506_v8, %v10894_v63  ;;  %7571 = vmatprep.mubr.f32.mxu0 %v2588_v16  ;;  %7703 = vmatprep.mubr.f32.mxu1 %v2588_v16  ;;  %v2597_v28 = vsub.f32 %v10886_v17, %v10892_v38 }
 0x4e1   : >> { %v2509_v23 = vsel %vm2498_vm6, %v2497_v3, 0 }
 0x4e2   : >> { %v10902_v59 = vand.u32 4294901760, %v2509_v23  ;;  %v2598_v26 = vand.u32 4294901760, %v2597_v28  ;;  %v10905_v0 = vand.u32 4294901760, %v10897_v37 }
 0x4e4   : >> { %v2615_v12 = vsub.f32 %v2509_v23, %v10902_v59  ;;  %7572 = vmatmul.mubr.f32.vlgmr.msra.gmra.mrb[8].mxu0 %v2598_v26  ;;  %7704 = vmatmul.mubr.f32.vlgmr.msra.gmra.mrb[8].mxu1 %v2598_v26  ;;  %v2607_v1 = vsub.f32 %v10897_v37, %v10905_v0 }
 0x4e5   : >> { %8588 = vmatpush3.bf16.msra.mxu0 %v10785_v15  ;;  %8684 = vmatpush3.bf16.msra.mxu1 %v10787_v52 }
 0x4e6   : >> { %8590 = vmatprep.subr.bf16.mxu0 %v10803_v62  ;;  %8686 = vmatprep.subr.bf16.mxu1 %v10805_v2  ;;  %v2608_v40 = vand.u32 4294901760, %v2607_v1  ;;  %v10914_v33 = vand.u32 4294901760, %v2615_v12 }
 0x4e8   : >> { %7574 = vmatprep.mubr.f32.mxu0 %v2608_v40  ;;  %7706 = vmatprep.mubr.f32.mxu1 %v2608_v40  ;;  %v2617_v31 = vsub.f32 %v2615_v12, %v10914_v33 }
 0x4e9   : >> { %8592 = vmatpush3.bf16.msra.mxu0 %v10803_v62  ;;  %8688 = vmatpush3.bf16.msra.mxu1 %v10805_v2 }
 0x4ea   : >> { %8594 = vmatprep.subr.bf16.mxu0 %v10811_v47  ;;  %8690 = vmatprep.subr.bf16.mxu1 %v10813_v44  ;;  %v2618_v15 = vand.u32 4294901760, %v2617_v31 }
 0x4ec   : >> { %7575 = vmatmul.mubr.f32.gmra.mrb[10].mxu0 %v2618_v15  ;;  %7707 = vmatmul.mubr.f32.gmra.mrb[10].mxu1 %v2618_v15 }
 0x4ed   : >> { %8596 = vmatpush3.bf16.msra.mxu0 %v10811_v47  ;;  %8692 = vmatpush3.bf16.msra.mxu1 %v10813_v44 }
 0x4ee   : >> { %7593 = vmatprep.mubr.f32.mxu0 %v10874_v18  ;;  %7725 = vmatprep.mubr.f32.mxu1 %v10874_v18 }
 0x4ef   : >> { %8598 = vmatprep.subr.bf16.mxu0 %v10815_v53  ;;  %8694 = vmatprep.subr.bf16.mxu1 %v10817_v56 }
 0x4f1   : >> { %8600 = vmatpush3.bf16.msra.mxu0 %v10815_v53  ;;  %8696 = vmatpush3.bf16.msra.mxu1 %v10817_v56 }
 0x4f2   : >> { %8602 = vmatprep.subr.bf16.mxu0 %v10821_v50  ;;  %8698 = vmatprep.subr.bf16.mxu1 %v10825_v24 }
 0x4f4   : >> { %7594 = vmatmul.mubr.f32.vlgmr.msra.gmra.mrb[8].mxu0 %v10880_v43  ;;  %7726 = vmatmul.mubr.f32.vlgmr.msra.gmra.mrb[8].mxu1 %v10880_v43 }
 0x4f5   : >> { %7596 = vmatprep.mubr.f32.mxu0 %v10894_v63  ;;  %8604 = vmatpush3.bf16.msra.mxu0 %v10821_v50 }
 0x4f6   : >> { %7728 = vmatprep.mubr.f32.mxu1 %v10894_v63  ;;  %8700 = vmatpush3.bf16.msra.mxu1 %v10825_v24 }
 0x4f7   : >> { %8606 = vmatprep.subr.bf16.mxu0 %v10829_v32  ;;  %8702 = vmatprep.subr.bf16.mxu1 %v10833_v20 }
 0x4f8   : >> { %7597 = vmatmul.mubr.f32.gmra.mrb[10].mxu0 %v10902_v59  ;;  %7729 = vmatmul.mubr.f32.gmra.mrb[10].mxu1 %v10902_v59 }
 0x4f9   : >> { %8608 = vmatpush3.bf16.msra.mxu0 %v10829_v32  ;;  %7615 = vmatprep.mubr.f32.mxu0 %v10877_v61 }
 0x4fa   : >> { %8704 = vmatpush3.bf16.msra.mxu1 %v10833_v20  ;;  %7747 = vmatprep.mubr.f32.mxu1 %v10877_v61 }
 0x4fb   : >> { %8610 = vmatprep.subr.bf16.mxu0 %v10835_v6  ;;  %8706 = vmatprep.subr.bf16.mxu1 %v10837_v25 }
 0x4fd   : >> { %8612 = vmatpush3.bf16.msra.mxu0 %v10835_v6 }
 0x4fe   : >> { %8708 = vmatpush3.bf16.msra.mxu1 %v10837_v25  ;;  %8614 = vmatprep.subr.bf16.mxu0 %v10839_v51 }
 0x4ff   : >> { %8710 = vmatprep.subr.bf16.mxu1 %v10841_v42 }
 0x501   : >> { %8616 = vmatpush3.bf16.msra.mxu0 %v10839_v51 }
 0x502   : >> { %8712 = vmatpush3.bf16.msra.mxu1 %v10841_v42  ;;  %8618 = vmatprep.subr.bf16.mxu0 %v10671_v60 }
 0x503   : >> { %8714 = vmatprep.subr.bf16.mxu1 %v10673_v21 }
 0x504   : >> { %7616 = vmatmul.mubr.f32.vlgmr.msra.gmra.mrb[8].mxu0 %v10886_v17 }
 0x505   : >> { %7748 = vmatmul.mubr.f32.vlgmr.msra.gmra.mrb[8].mxu1 %v10886_v17  ;;  %7618 = vmatprep.mubr.f32.mxu0 %v10897_v37 }
 0x506   : >> { %8620 = vmatpush3.bf16.msra.mxu0 %v10671_v60  ;;  %7750 = vmatprep.mubr.f32.mxu1 %v10897_v37 }
 0x507   : >> { %8716 = vmatpush3.bf16.msra.mxu1 %v10673_v21  ;;  %8622 = vmatprep.subr.bf16.mxu0 %v10691_v7 }
 0x508   : >> { %7619 = vmatmul.mubr.f32.gmra.mrb[10].mxu0 %v2615_v12  ;;  %8718 = vmatprep.subr.bf16.mxu1 %v10693_v19 }
 0x509   : >> { %7751 = vmatmul.mubr.f32.gmra.mrb[10].mxu1 %v2615_v12  ;;  %7637 = vmatprep.mubr.f32.mxu0 %v10883_v41 }
 0x50a   : >> { %8624 = vmatpush3.bf16.msra.mxu0 %v10691_v7  ;;  %7769 = vmatprep.mubr.f32.mxu1 %v10883_v41 }
 0x50b   : >> { %8720 = vmatpush3.bf16.msra.mxu1 %v10693_v19  ;;  %8626 = vmatprep.subr.bf16.mxu0 %v10714_v36 }
 0x50c   : >> { %8722 = vmatprep.subr.bf16.mxu1 %v10722_v27 }
 0x50e   : >> { %8628 = vmatpush3.bf16.msra.mxu0 %v10714_v36 }
 0x50f   : >> { %8724 = vmatpush3.bf16.msra.mxu1 %v10722_v27  ;;  %8630 = vmatprep.subr.bf16.mxu0 %v10752_v39 }
 0x510   : >> { %8726 = vmatprep.subr.bf16.mxu1 %v10759_v14 }
 0x512   : >> { %8632 = vmatpush3.bf16.msra.mxu0 %v10752_v39 }
 0x513   : >> { %8728 = vmatpush3.bf16.msra.mxu1 %v10759_v14  ;;  %8634 = vmatprep.subr.bf16.mxu0 %v10847_v30 }
 0x514   : >> { %8730 = vmatprep.subr.bf16.mxu1 %v10853_v54 }
 0x515   : >> { %7638 = vmatmul.mubr.f32.vlgmr.msra.gmra.mrb[8].mxu0 %v10892_v38 }
 0x516   : >> { %7770 = vmatmul.mubr.f32.vlgmr.msra.gmra.mrb[8].mxu1 %v10892_v38  ;;  %7640 = vmatprep.mubr.f32.mxu0 %v10905_v0 }
 0x517   : >> { %8636 = vmatpush3.bf16.msra.mxu0 %v10847_v30  ;;  %7772 = vmatprep.mubr.f32.mxu1 %v10905_v0 }
 0x518   : >> { %8732 = vmatpush3.bf16.msra.mxu1 %v10853_v54  ;;  %8638 = vmatprep.subr.bf16.mxu0 %v10859_v55 }
 0x519   : >> { %7641 = vmatmul.mubr.f32.gmra.mrb[10].mxu0 %v10914_v33  ;;  %8734 = vmatprep.subr.bf16.mxu1 %v10863_v46 }
 0x51a   : >> { %7773 = vmatmul.mubr.f32.gmra.mrb[10].mxu1 %v10914_v33  ;;  %7659 = vmatprep.mubr.f32.mxu0 %v10874_v18 }
 0x51b   : >> { %8640 = vmatpush3.bf16.msra.mxu0 %v10859_v55  ;;  %7791 = vmatprep.mubr.f32.mxu1 %v10874_v18 }
 0x51c   : >> { %8736 = vmatpush3.bf16.msra.mxu1 %v10863_v46  ;;  %8642 = vmatprep.subr.bf16.mxu0 %v10865_v13 }
 0x51d   : >> { %8738 = vmatprep.subr.bf16.mxu1 %v10867_v10 }
 0x51f   : >> { %8644 = vmatpush3.bf16.msra.mxu0 %v10865_v13 }
 0x520   : >> { %8740 = vmatpush3.bf16.msra.mxu1 %v10867_v10  ;;  %8646 = vmatprep.subr.bf16.mxu0 %v10869_v9 }
 0x521   : >> { %8742 = vmatprep.subr.bf16.mxu1 %v10871_v35 }
 0x523   : >> { %8648 = vmatpush3.bf16.msra.mxu0 %v10869_v9 }
 0x524   : >> { %8744 = vmatpush3.bf16.msra.mxu1 %v10871_v35  ;;  %8650 = vmatprep.subr.bf16.mxu0 %v10671_v60 }
 0x525   : >> { %8746 = vmatprep.subr.bf16.mxu1 %v10673_v21 }
 0x526   : >> { %7660 = vmatmul.mubr.f32.vlgmr.msra.gmra.mrb[8].mxu0 %v10880_v43 }
 0x527   : >> { %7792 = vmatmul.mubr.f32.vlgmr.msra.gmra.mrb[8].mxu1 %v10880_v43  ;;  %7662 = vmatprep.mubr.f32.mxu0 %v10894_v63 }
 0x528   : >> { %8652 = vmatpush3.bf16.msra.mxu0 %v10671_v60  ;;  %7794 = vmatprep.mubr.f32.mxu1 %v10894_v63 }
 0x529   : >> { %8748 = vmatpush3.bf16.msra.mxu1 %v10673_v21  ;;  %8654 = vmatprep.subr.bf16.mxu0 %v10691_v7 }
 0x52a   : >> { %7663 = vmatmul.mubr.f32.gmra.mrb[10].mxu0 %v10902_v59  ;;  %8750 = vmatprep.subr.bf16.mxu1 %v10693_v19 }
 0x52b   : >> { %7795 = vmatmul.mubr.f32.gmra.mrb[10].mxu1 %v10902_v59  ;;  %7681 = vmatprep.mubr.f32.mxu0 %v10874_v18 }
 0x52c   : >> { %8656 = vmatpush3.bf16.msra.mxu0 %v10691_v7  ;;  %7813 = vmatprep.mubr.f32.mxu1 %v10874_v18 }
 0x52d   : >> { %8752 = vmatpush3.bf16.msra.mxu1 %v10693_v19  ;;  %8658 = vmatprep.subr.bf16.mxu0 %v10714_v36 }
 0x52e   : >> { %8754 = vmatprep.subr.bf16.mxu1 %v10722_v27 }
 0x530   : >> { %8660 = vmatpush3.bf16.msra.mxu0 %v10714_v36 }
 0x531   : >> { %8756 = vmatpush3.bf16.msra.mxu1 %v10722_v27  ;;  %8662 = vmatprep.subr.bf16.mxu0 %v10752_v39 }
 0x532   : >> { %8758 = vmatprep.subr.bf16.mxu1 %v10759_v14 }
 0x534   : >> { %8664 = vmatpush3.bf16.msra.mxu0 %v10752_v39 }
 0x535   : >> { %8760 = vmatpush3.bf16.msra.mxu1 %v10759_v14 }
 0x537   : >> { %7682 = vmatmul.mubr.f32.vlgmr.msra.gmra.mrb[8].mxu0 %v10880_v43 }
 0x538   : >> { %7814 = vmatmul.mubr.f32.vlgmr.msra.gmra.mrb[8].mxu1 %v10880_v43  ;;  %7684 = vmatprep.mubr.f32.mxu0 %v10894_v63 }
 0x539   : >> { %7816 = vmatprep.mubr.f32.mxu1 %v10894_v63 }
 0x53b   : >> { %7685 = vmatmul.mubr.f32.gmra.mrb[10].mxu0 %v10902_v59 }
 0x53c   : >> { %7817 = vmatmul.mubr.f32.gmra.mrb[10].mxu1 %v10902_v59 }
 0x60a   : >> { %v7683_v60 = vpop.f32.mrb[8].mxu0 }
 0x60b   : >> { %v7815_v21 = vpop.f32.mrb[8].mxu1  ;;  %v3155_v7 = vpop.f32.mrb[9].mxu0 }
 0x60c   : >> { %v3844_v19 = vmax.f32 %v7683_v60, %v7815_v21  ;;  %v3821_v36 = vpop.f32.mrb[9].mxu1 }
 0x60d   : >> { %v3843_v27 = vmax.f32 %v3155_v7, %v3821_v36  ;;  %2177 = sbr.rel (!%p2175_p0) target bundleno = 856 (0x358), region = 164 }
 0x60e   : >> { %6375 = vst.msk [vmem:[%s6231_s23 + $0x28] sm:$0xff] %vm491_vm1, %v3844_v19  ;;  %v7686_v39 = vpop.f32.mrb[10].mxu0 }
 0x60f   : >> { %6374 = vst.msk [vmem:[%s6231_s23 + $0x20] sm:$0xff] %vm491_vm1, %v3843_v27  ;;  %v7818_v14 = vpop.f32.mrb[10].mxu1  ;;  %v3167_v52 = vpop.f32.mrb[11].mxu0 }
 0x610   : >> { %v3846_v62 = vmax.f32 %v7686_v39, %v7818_v14  ;;  %v3833_v2 = vpop.f32.mrb[11].mxu1 }
 0x611   : >> { %v3845_v47 = vmax.f32 %v3167_v52, %v3833_v2 }
 0x612   : >> { %6377 = vst.msk [vmem:[%s6231_s23 + $0x38] sm:$0xff] %vm491_vm1, %v3846_v62 }
 0x613   : >> { %6376 = vst.msk [vmem:[%s6231_s23 + $0x30] sm:$0xff] %vm491_vm1, %v3845_v47 }
 0x614 LB: >> { %s6427_s19 = sshll.u32 %s9440_s28, 6  ;;  %s9459_s20 = smov 126   ;;  %v11080_v49 = vld [vmem:[#allocation8 + $0x10] sm:$0xff]  ;;  %vm4005_vm7 = vcmask 261120   ;;  %v11116_v17 = vld [vmem:[#allocation8 + $0x8] sm:$0xff]  ;;  %v3885_v8 = vld [vmem:[%s11574_s6 + $0x8] sm:$0xff]  ;;  %s9440_s28 = sphi %s11038_s28, %s3859_s28  }
 0x615   : >> { %s11046_s24 = scalar_lea.vmem [#allocation3], %s6427_s19  ;;  %s9460_s21 = smov 127   ;;  %7827 = vmatprep.mubr.msk.f32.mxu1 %vm4005_vm7, %v11080_v49  ;;  %4094 = vmatprep.mubr.f32.mxu0 %v11116_v17  ;;  %v3884_v11 = vld [vmem:[%s11574_s6] sm:$0xff]  ;;  %v9461_v38 = vmov 0   ;;  %v3886_v63 = vld [vmem:[%s11574_s6 + $0x10] sm:$0xff]  ;;  %v3887_v16 = vld [vmem:[%s11574_s6 + $0x18] sm:$0xff] }
 0x616   : >> { %9317 = vset.pattern.permute.xlu1 %v9461_v38  ;;  %9316 = vset.pattern.permute.xlu0 %v9461_v38  ;;  %v3888_v3 = vld [vmem:[%s11574_s6 + $0x20] sm:$0xff]  ;;  %v3889_v37 = vld [vmem:[%s11574_s6 + $0x28] sm:$0xff]  ;;  %v3890_v28 = vld [vmem:[%s11574_s6 + $0x30] sm:$0xff]  ;;  %s11824_s16 = sld [smem:[#allocation46_spill]]  ;;  %s11544_s27 = scalar_lea.vmem %s9661_s18, %s6427_s19 }
 0x617   : >> { %v3891_v23 = vld [vmem:[%s11574_s6 + $0x38] sm:$0xff]  ;;  %s3859_s28 = sadd.s32 1, %s9440_s28  }
 0x618   : >> { %p3856_p1 = scmp.ge.s32.totalorder %s3859_s28, 16  }
 0x61a   : >> { %v6388_v44 = vld [vmem:[%s11046_s24 + $0x40] sm:$0xff]  ;;  %v6389_v53 = vld [vmem:[%s11046_s24 + $0x48] sm:$0xff]  ;;  %v6384_v32 = vld [vmem:[%s11046_s24 + $0x30] sm:$0xff] }
 0x61b   : >> { %v6382_v56 = vld [vmem:[%s11046_s24 + $0x20] sm:$0xff]  ;;  %v9246_v50 = vpack.i.bf16 %v6389_v53, %v6388_v44  ;;  %v6383_v24 = vld [vmem:[%s11046_s24 + $0x28] sm:$0xff]  ;;  %v6385_v20 = vld [vmem:[%s11046_s24 + $0x38] sm:$0xff]  ;;  %v11082_v61 = vpack.c.bf16 %v6389_v53, %v6388_v44 }
 0x61c   : >> { %v9236_v6 = vpack.i.bf16 %v6383_v24, %v6382_v56  ;;  %v11054_v25 = vpack.c.bf16 %v6383_v24, %v6382_v56  ;;  %v6390_v51 = vld [vmem:[%s11046_s24 + $0x50] sm:$0xff]  ;;  %v6391_v42 = vld [vmem:[%s11046_s24 + $0x58] sm:$0xff]  ;;  %v11060_v30 = vld [vmem:[%s11046_s24] sm:$0xff]  ;;  %v9241_v54 = vpack.i.bf16 %v6385_v20, %v6384_v32  ;;  %v11092_v22 = vpack.c.bf16 %v6385_v20, %v6384_v32 }
 0x61d   : >> { %9247 = vrot.lane.b32.xlu1 %v9246_v50, %s9459_s20  ;;  %v11064_v55 = vld [vmem:[%s11046_s24 + $0x8] sm:$0xff]  ;;  %v11067_v46 = vld [vmem:[%s11046_s24 + $0x10] sm:$0xff]  ;;  %v11070_v13 = vld [vmem:[%s11046_s24 + $0x18] sm:$0xff]  ;;  %v9261_v35 = vpack.i.bf16 %v6391_v42, %v6390_v51  ;;  %v11090_v57 = vpack.c.bf16 %v6391_v42, %v6390_v51 }
 0x61e   : >> { %9237 = vrot.lane.b32.xlu0 %v9236_v6, %s9460_s21  ;;  %v8763_v10 = vpack.c.bf16 %v11064_v55, %v11060_v30  ;;  %v8767_v9 = vpack.c.bf16 %v11070_v13, %v11067_v46  ;;  %v9256_v18 = vpack.i.bf16 %v11064_v55, %v11060_v30  ;;  %v9271_v58 = vpack.i.bf16 %v11070_v13, %v11067_v46  ;;  %v11099_v43 = vld [vmem:[%s11046_s24 + $0x70] sm:$0xff]  ;;  %v11102_v29 = vld [vmem:[%s11046_s24 + $0x78] sm:$0xff]  ;;  %v11105_v41 = vld [vmem:[%s11046_s24 + $0x60] sm:$0xff] }
 0x61f   : >> { %v11108_v45 = vld [vmem:[%s11046_s24 + $0x68] sm:$0xff]  ;;  %v9301_v34 = vpack.i.bf16 %v11102_v29, %v11099_v43  ;;  %v8821_v4 = vpack.c.bf16 %v11102_v29, %v11099_v43  ;;  %v11174_v42 = vld [vmem:[#allocation8 + $0x28] sm:$0xff]  ;;  %v3872_v29 = vld [vmem:[#allocation8 + $0x60] sm:$0xff] }
 0x620   : >> { %v9296_v5 = vpack.i.bf16 %v11108_v45, %v11105_v41  ;;  %v8817_v48 = vpack.c.bf16 %v11108_v45, %v11105_v41  ;;  %v3866_v41 = vld [vmem:[#allocation8 + $0x30] sm:$0xff]  ;;  %v3873_v43 = vld [vmem:[#allocation8 + $0x68] sm:$0xff] }
 0x621   : >> { %9252 = vrot.lane.b32.xlu1 %v9236_v6, %s9459_s20 }
 0x622   : >> { %9242 = vrot.lane.b32.xlu0 %v9241_v54, %s9460_s21 }
 0x625   : >> { %9262 = vrot.lane.b32.xlu1 %v9261_v35, %s9459_s20 }
 0x626   : >> { %9257 = vrot.lane.b32.xlu0 %v9256_v18, %s9460_s21 }
 0x629   : >> { %9272 = vrot.lane.b32.xlu1 %v9271_v58, %s9460_s21 }
 0x62a   : >> { %9267 = vrot.lane.b32.xlu0 %v9241_v54, %s9459_s20  ;;  %v11176_v54 = vld [vmem:[#allocation8 + $0x40] sm:$0xff] }
 0x62d   : >> { %9282 = vrot.lane.b32.xlu1 %v9256_v18, %s9459_s20 }
 0x62e   : >> { %9277 = vrot.lane.b32.xlu0 %v9246_v50, %s9460_s21 }
 0x631   : >> { %9292 = vrot.lane.b32.xlu1 %v9271_v58, %s9459_s20  ;;  %v11185_v58 = vld [vmem:[#allocation8 + $0x58] sm:$0xff] }
 0x632   : >> { %9287 = vrot.lane.b32.xlu0 %v9261_v35, %s9460_s21 }
 0x635   : >> { %9302 = vrot.lane.b32.xlu1 %v9301_v34, %s9460_s21 }
 0x636   : >> { %9297 = vrot.lane.b32.xlu0 %v9296_v5, %s9460_s21 }
 0x639   : >> { %9312 = vrot.lane.b32.xlu1 %v9301_v34, %s9459_s20 }
 0x63a   : >> { %9307 = vrot.lane.b32.xlu0 %v9296_v5, %s9459_s20  ;;  %v11187_v5 = vld [vmem:[#allocation8 + $0x70] sm:$0xff] }
 0x63d   : >> { %4500 = vperm.xlu1 %9317, %v3885_v8  }
 0x63e   : >> { %4495 = vperm.xlu0 %9316, %v3884_v11  }
 0x641   : >> { %4505 = vperm.xlu1 %9317, %v3886_v63  }
 0x642   : >> { %4510 = vperm.xlu0 %9316, %v3887_v16  }
 0x645   : >> { %4515 = vperm.xlu1 %9317, %v3888_v3  }
 0x646   : >> { %4520 = vperm.xlu0 %9316, %v3889_v37  }
 0x649   : >> { %4525 = vperm.xlu1 %9317, %v3890_v28   ;;  %v11194_v28 = vld [vmem:[#allocation8 + $0x88] sm:$0xff] }
 0x64a   : >> { %4530 = vperm.xlu0 %9316, %v3891_v23  }
 0x68f   : >> { %v9248_v59 = vpop.permute.xlu1 %9247 }
 0x690   : >> { %v9250_v26 = vunpack.i.h.bf16 %v9248_v59  ;;  %v9249_v0 = vunpack.i.l.bf16 %v9248_v59  ;;  %v9238_v12 = vpop.permute.xlu0 %9237  ;;  %v11197_v59 = vld [vmem:[#allocation8 + $0xa0] sm:$0xff] }
 0x691   : >> { %v9240_v1 = vunpack.i.h.bf16 %v9238_v12  ;;  %v9239_v40 = vunpack.i.l.bf16 %v9238_v12 }
 0x692   : >> { %v11151_v33 = vpack.c.bf16 %v9250_v26, %v9249_v0 }
 0x693   : >> { %v9253_v31 = vpop.permute.xlu1 %9252  ;;  %v11153_v15 = vpack.c.bf16 %v9240_v1, %v9239_v40  ;;  %v11204_v1 = vld [vmem:[#allocation8 + $0xb8] sm:$0xff] }
 0x694   : >> { %v9255_v60 = vunpack.i.h.bf16 %v9253_v31  ;;  %v9254_v21 = vunpack.i.l.bf16 %v9253_v31  ;;  %v9243_v7 = vpop.permute.xlu0 %9242  ;;  %8794 = vmatprep.subr.bf16.mxu1 %v11151_v33 }
 0x695   : >> { %v9245_v19 = vunpack.i.h.bf16 %v9243_v7  ;;  %v9244_v36 = vunpack.i.l.bf16 %v9243_v7  ;;  %8762 = vmatprep.subr.bf16.mxu0 %v11153_v15  ;;  %8796 = vmatpush3.bf16.msra.mxu1 %v11151_v33 }
 0x696   : >> { %8764 = vmatpush3.bf16.msra.mxu0 %v8763_v10  ;;  %v11161_v27 = vpack.c.bf16 %v9255_v60, %v9254_v21 }
 0x697   : >> { %v11163_v39 = vpack.c.bf16 %v9245_v19, %v9244_v36  ;;  %v9263_v14 = vpop.permute.xlu1 %9262 }
 0x698   : >> { %v9265_v52 = vunpack.i.h.bf16 %v9263_v14  ;;  %v9264_v62 = vunpack.i.l.bf16 %v9263_v14  ;;  %v9258_v2 = vpop.permute.xlu0 %9257 }
 0x699   : >> { %v9260_v47 = vunpack.i.h.bf16 %v9258_v2  ;;  %v9259_v44 = vunpack.i.l.bf16 %v9258_v2  ;;  %8766 = vmatprep.subr.bf16.mxu0 %v11163_v39  ;;  %v3867_v2 = vld [vmem:[#allocation8 + $0x38] sm:$0xff] }
 0x69a   : >> { %v11166_v53 = vpack.c.bf16 %v9265_v52, %v9264_v62  ;;  %8768 = vmatpush3.bf16.msra.mxu0 %v8767_v9 }
 0x69b   : >> { %v8771_v56 = vpack.c.bf16 %v9260_v47, %v9259_v44  ;;  %8770 = vmatprep.subr.bf16.mxu0 %v11161_v27  ;;  %v9273_v50 = vpop.permute.xlu1 %9272  ;;  %v3875_v47 = vld [vmem:[#allocation8 + $0x78] sm:$0xff] }
 0x69c   : >> { %v9268_v24 = vpop.permute.xlu0 %9267  ;;  %8798 = vmatprep.subr.bf16.mxu1 %v11166_v53  ;;  %v9275_v32 = vunpack.i.h.bf16 %v9273_v50  ;;  %v9274_v20 = vunpack.i.l.bf16 %v9273_v50  ;;  %v3879_v44 = vld [vmem:[#allocation8 + $0x98] sm:$0xff] }
 0x69d   : >> { %v9270_v6 = vunpack.i.h.bf16 %v9268_v24  ;;  %v9269_v51 = vunpack.i.l.bf16 %v9268_v24  ;;  %8800 = vmatpush3.bf16.msra.mxu1 %v11166_v53 }
 0x69e   : >> { %v8775_v30 = vpack.c.bf16 %v9275_v32, %v9274_v20  ;;  %8772 = vmatpush3.bf16.msra.mxu0 %v8771_v56  ;;  %v3893_v56 = vld [vmem:[%s11579_s11 + $0x8] sm:$0xff]  ;;  %v3896_v20 = vld [vmem:[%s11824_s16] sm:$0xff] }
 0x69f   : >> { %v11178_v55 = vpack.c.bf16 %v9270_v6, %v9269_v51  ;;  %v9283_v46 = vpop.permute.xlu1 %9282  ;;  %v4577_v24 = vand.u32 4294901760, %v3893_v56  ;;  %v3897_v6 = vld [vmem:[%s11824_s16 + $0x8] sm:$0xff]  ;;  %v5360_v51 = vand.u32 4294901760, %v3896_v20 }
 0x6a0   : >> { %v9278_v13 = vpop.permute.xlu0 %9277  ;;  %v9285_v10 = vunpack.i.h.bf16 %v9283_v46  ;;  %v9284_v9 = vunpack.i.l.bf16 %v9283_v46  ;;  %7828 = vmatmul.mubr.msk.f32.vlgmr.msra.gmra.mrb[0].mxu1 %vm4005_vm7, %v11174_v42 }
 0x6a1   : >> { %v9280_v35 = vunpack.i.h.bf16 %v9278_v13  ;;  %v9279_v18 = vunpack.i.l.bf16 %v9278_v13  ;;  %8774 = vmatprep.subr.bf16.mxu0 %v11178_v55  ;;  %7830 = vmatprep.mubr.msk.f32.mxu1 %vm4005_vm7, %v11176_v54 }
 0x6a2   : >> { %v8779_v34 = vpack.c.bf16 %v9285_v10, %v9284_v9  ;;  %8776 = vmatpush3.bf16.msra.mxu0 %v8775_v30  ;;  %v3894_v30 = vld [vmem:[%s11579_s11 + $0x10] sm:$0xff]  ;;  %v3899_v9 = vld [vmem:[%s11824_s16 + $0x18] sm:$0xff] }
 0x6a3   : >> { %v8785_v8 = vpack.c.bf16 %v9280_v35, %v9279_v18  ;;  %v9293_v11 = vpop.permute.xlu1 %9292  ;;  %8778 = vmatprep.subr.bf16.mxu0 %v11082_v61  ;;  %v4580_v46 = vand.u32 4294901760, %v3894_v30  ;;  %v3898_v10 = vld [vmem:[%s11824_s16 + $0x10] sm:$0xff]  ;;  %v5369_v18 = vand.u32 4294901760, %v3899_v9 }
 0x6a4   : >> { %v9288_v38 = vpop.permute.xlu0 %9287  ;;  %v9295_v63 = vunpack.i.h.bf16 %v9293_v11  ;;  %v9294_v16 = vunpack.i.l.bf16 %v9293_v11  ;;  %7831 = vmatmul.mubr.msk.f32.gmra.mrb[2].mxu1 %vm4005_vm7, %v11185_v58  ;;  %v5366_v35 = vand.u32 4294901760, %v3898_v10 }
 0x6a5   : >> { %v9290_v3 = vunpack.i.h.bf16 %v9288_v38  ;;  %v9289_v37 = vunpack.i.l.bf16 %v9288_v38  ;;  %8802 = vmatprep.subr.bf16.mxu1 %v8785_v8  ;;  %7833 = vmatprep.mubr.msk.f32.mxu1 %vm4005_vm7, %v11187_v5 }
 0x6a6   : >> { %v8783_v23 = vpack.c.bf16 %v9295_v63, %v9294_v16  ;;  %8780 = vmatpush3.bf16.msra.mxu0 %v8779_v34  ;;  %8804 = vmatpush3.bf16.msra.mxu1 %v11054_v25  ;;  %v11276_v34 = vpack.c.bf16 %v5369_v18, %v5366_v35 }
 0x6a7   : >> { %v8789_v26 = vpack.c.bf16 %v9290_v3, %v9289_v37  ;;  %8782 = vmatprep.subr.bf16.mxu0 %v11090_v57  ;;  %v9303_v12 = vpop.permute.xlu1 %9302  ;;  %v5524_v3 = vsub.f32 %v3898_v10, %v5366_v35  ;;  %v5531_v37 = vsub.f32 %v3899_v9, %v5369_v18 }
 0x6a8   : >> { %v9298_v0 = vpop.permute.xlu0 %9297  ;;  %7834 = vmatmul.mubr.msk.f32.gmra.mrb[4].mxu1 %vm4005_vm7, %v11194_v28 }
 0x6a9   : >> { %8806 = vmatprep.subr.bf16.mxu1 %v8789_v26  ;;  %7836 = vmatprep.mubr.msk.f32.mxu1 %vm4005_vm7, %v11197_v59  ;;  %v9300_v14 = vunpack.i.h.bf16 %v9298_v0  ;;  %v9299_v52 = vunpack.i.l.bf16 %v9298_v0  ;;  %v5525_v0 = vand.u32 4294901760, %v5524_v3 }
 0x6aa   : >> { %8784 = vmatpush3.bf16.msra.mxu0 %v8783_v23  ;;  %8808 = vmatpush3.bf16.msra.mxu1 %v11092_v22  ;;  %v4731_v23 = vsub.f32 %v3893_v56, %v4577_v24 }
 0x6ab   : >> { %8786 = vmatprep.subr.bf16.mxu0 %v8785_v8  ;;  %8810 = vmatprep.subr.bf16.mxu1 %v11151_v33  ;;  %v9313_v21 = vpop.permute.xlu1 %9312  ;;  %v3860_v33 = vld [vmem:[#allocation8] sm:$0xff]  ;;  %v8825_v62 = vpack.c.bf16 %v9300_v14, %v9299_v52 }
 0x6ac   : >> { %v9308_v40 = vpop.permute.xlu0 %9307  ;;  %7837 = vmatmul.mubr.msk.f32.gmra.mrb[6].mxu1 %vm4005_vm7, %v11204_v1  ;;  %v9315_v19 = vunpack.i.h.bf16 %v9313_v21  ;;  %v9314_v36 = vunpack.i.l.bf16 %v9313_v21 }
 0x6ad   : >> { %v9310_v31 = vunpack.i.h.bf16 %v9308_v40  ;;  %v9309_v60 = vunpack.i.l.bf16 %v9308_v40  ;;  %4339 = vmatprep.mubr.f32.mxu1 %v11116_v17  ;;  %v4732_v40 = vand.u32 4294901760, %v4731_v23 }
 0x6ae   : >> { %8788 = vmatpush3.bf16.msra.mxu0 %v11054_v25  ;;  %8812 = vmatpush3.bf16.msra.mxu1 %v11153_v15  ;;  %v3864_v25 = vld [vmem:[#allocation8 + $0x20] sm:$0xff]  ;;  %v8837_v17 = vpack.c.bf16 %v9315_v19, %v9314_v36  ;;  %v3863_v15 = vld [vmem:[#allocation8 + $0x18] sm:$0xff]  ;;  %v4738_v36 = vsub.f32 %v3894_v30, %v4580_v46 }
 0x6af   : >> { %8790 = vmatprep.subr.bf16.mxu0 %v8789_v26  ;;  %8814 = vmatprep.subr.bf16.mxu1 %v11166_v53  ;;  %v8833_v7 = vpack.c.bf16 %v9310_v31, %v9309_v60  ;;  %v3882_v53 = vld [vmem:[#allocation8 + $0xb0] sm:$0xff]  ;;  %v5526_v60 = vsub.f32 %v5524_v3, %v5525_v0  ;;  %v4733_v19 = vsub.f32 %v4731_v23, %v4732_v40 }
 0x6b1   : >> { %v5527_v14 = vand.u32 4294901760, %v5526_v60 }
 0x6b2   : >> { %8792 = vmatpush3.bf16.msra.mxu0 %v11092_v22  ;;  %8816 = vmatpush3.bf16.msra.mxu1 %v11163_v39  ;;  %v9305_v22 = vunpack.i.h.bf16 %v9303_v12  ;;  %v9304_v39 = vunpack.i.l.bf16 %v9303_v12  ;;  %v5532_v12 = vand.u32 4294901760, %v5531_v37 }
 0x6b3   : >> { %8818 = vmatprep.subr.bf16.mxu1 %v8817_v48  ;;  %8834 = vmatprep.subr.bf16.mxu0 %v8833_v7  ;;  %v3870_v48 = vld [vmem:[#allocation8 + $0x50] sm:$0xff] }
 0x6b4   : >> { %v8829_v45 = vpack.c.bf16 %v9305_v22, %v9304_v39  ;;  %v5533_v21 = vsub.f32 %v5531_v37, %v5532_v12  ;;  %v11306_v56 = vpack.c.bf16 %v5532_v12, %v5525_v0 }
 0x6b5   : >> { %4095 = vmatmul.mubr.f32.vlgmr.msra.gmra.mrb[0].mxu0 %v3860_v33 }
 0x6b6   : >> { %8820 = vmatpush3.bf16.msra.mxu1 %v11161_v27  ;;  %8836 = vmatpush3.bf16.msra.mxu0 %v8833_v7  ;;  %v3869_v27 = vld [vmem:[#allocation8 + $0x48] sm:$0xff]  ;;  %v5534_v52 = vand.u32 4294901760, %v5533_v21 }
 0x6b7   : >> { %4099 = vmatprep.mubr.f32.mxu0 %v3864_v25  ;;  %8822 = vmatprep.subr.bf16.mxu1 %v8821_v4  ;;  %v3876_v4 = vld [vmem:[#allocation8 + $0x80] sm:$0xff] }
 0x6b8   : >> { %8838 = vmatprep.subr.bf16.mxu0 %v8837_v17  ;;  %v11285_v22 = vpack.c.bf16 %v5534_v52, %v5527_v14 }
 0x6b9   : >> { %4100 = vmatmul.mubr.f32.gmra.mrb[2].mxu0 %v3863_v15 }
 0x6ba   : >> { %8824 = vmatpush3.bf16.msra.mxu1 %v11178_v55  ;;  %4104 = vmatprep.mubr.f32.mxu0 %v3867_v2 }
 0x6bb   : >> { %8826 = vmatprep.subr.bf16.mxu1 %v8825_v62  ;;  %8840 = vmatpush3.bf16.msra.mxu0 %v8837_v17  ;;  %v4734_v17 = vand.u32 4294901760, %v4733_v19 }
 0x6bd   : >> { %4105 = vmatmul.mubr.f32.gmra.mrb[4].mxu0 %v3866_v41 }
 0x6be   : >> { %8828 = vmatpush3.bf16.msra.mxu1 %v11082_v61  ;;  %4109 = vmatprep.mubr.f32.mxu0 %v3870_v48  ;;  %v3878_v61 = vld [vmem:[#allocation8 + $0x90] sm:$0xff] }
 0x6bf   : >> { %8830 = vmatprep.subr.bf16.mxu1 %v8829_v45 }
 0x6c1   : >> { %4110 = vmatmul.mubr.f32.gmra.mrb[6].mxu0 %v3869_v27 }
 0x6c2   : >> { %8832 = vmatpush3.bf16.msra.mxu1 %v11090_v57  ;;  %4114 = vmatprep.mubr.f32.mxu0 %v3873_v43  ;;  %v3881_v57 = vld [vmem:[#allocation8 + $0xa8] sm:$0xff] }
 0x6c5   : >> { %4115 = vmatmul.mubr.f32.gmra.mrb[8].mxu0 %v3872_v29  ;;  %4340 = vmatmul.mubr.f32.vlgmr.msra.gmra.mrb[8].mxu1 %v3860_v33 }
 0x6c6   : >> { %4119 = vmatprep.mubr.f32.mxu0 %v3876_v4  ;;  %4344 = vmatprep.mubr.f32.mxu1 %v3864_v25 }
 0x6c9   : >> { %4120 = vmatmul.mubr.f32.gmra.mrb[10].mxu0 %v3875_v47  ;;  %4345 = vmatmul.mubr.f32.gmra.mrb[10].mxu1 %v3863_v15  ;;  %v4739_v15 = vand.u32 4294901760, %v4738_v36 }
 0x6ca   : >> { %4124 = vmatprep.mubr.f32.mxu0 %v3879_v44  ;;  %4349 = vmatprep.mubr.f32.mxu1 %v3867_v2 }
 0x6cb   : >> { %v4740_v2 = vsub.f32 %v4738_v36, %v4739_v15 }
 0x6cd   : >> { %4125 = vmatmul.mubr.f32.gmra.mrb[12].mxu0 %v3878_v61  ;;  %4350 = vmatmul.mubr.f32.gmra.mrb[12].mxu1 %v3866_v41  ;;  %v4741_v45 = vand.u32 4294901760, %v4740_v2  ;;  %v4501_v2 = vpop.permute.xlu1 %4500 }
 0x6ce   : >> { %4129 = vmatprep.mubr.f32.mxu0 %v3882_v53  ;;  %4354 = vmatprep.mubr.f32.mxu1 %v3870_v48 }
 0x6d1   : >> { %4130 = vmatmul.mubr.f32.gmra.mrb[14].mxu0 %v3881_v57  ;;  %4355 = vmatmul.mubr.f32.gmra.mrb[14].mxu1 %v3869_v27 }
 0x6d2   : >> { %4359 = vmatprep.mubr.f32.mxu1 %v3873_v43  ;;  %7847 = vmatprep.mubr.msk.f32.mxu0 %vm4005_vm7, %v11080_v49  ;;  %v3892_v49 = vld [vmem:[%s11579_s11] sm:$0xff] }
 0x6d3   : >> { %v4574_v50 = vand.u32 4294901760, %v3892_v49 }
 0x6d5   : >> { %4360 = vmatmul.mubr.f32.gmra.mrb[16].mxu1 %v3872_v29  ;;  %7848 = vmatmul.mubr.msk.f32.vlgmr.msra.gmra.mrb[16].mxu0 %vm4005_vm7, %v11174_v42  ;;  %v11248_v32 = vpack.c.bf16 %v4577_v24, %v4574_v50  ;;  %v5363_v42 = vand.u32 4294901760, %v3897_v6 }
 0x6d6   : >> { %4364 = vmatprep.mubr.f32.mxu1 %v3876_v4  ;;  %7850 = vmatprep.mubr.msk.f32.mxu0 %vm4005_vm7, %v11176_v54  ;;  %v3895_v54 = vld [vmem:[%s11579_s11 + $0x18] sm:$0xff] }
 0x6d7   : >> { %8842 = vmatprep.subr.bf16.mxu1 %v11248_v32  ;;  %v11264_v55 = vpack.c.bf16 %v5363_v42, %v5360_v51  ;;  %v4583_v13 = vand.u32 4294901760, %v3895_v54  ;;  %v5517_v8 = vsub.f32 %v3897_v6, %v5363_v42 }
 0x6d8   : >> { %8844 = vmatpush3.bf16.msra.mxu1 %v11248_v32 }
 0x6d9   : >> { %4365 = vmatmul.mubr.f32.gmra.mrb[18].mxu1 %v3875_v47  ;;  %7851 = vmatmul.mubr.msk.f32.gmra.mrb[18].mxu0 %vm4005_vm7, %v11185_v58  ;;  %v11273_v58 = vpack.c.bf16 %v4583_v13, %v4580_v46  ;;  %v5518_v38 = vand.u32 4294901760, %v5517_v8  ;;  %v4745_v33 = vsub.f32 %v3895_v54, %v4583_v13  ;;  %v11298_v47 = vpack.c.bf16 %v5531_v37, %v5524_v3 }
 0x6da   : >> { %4369 = vmatprep.mubr.f32.mxu1 %v3879_v44  ;;  %7853 = vmatprep.mubr.msk.f32.mxu0 %vm4005_vm7, %v11187_v5  ;;  %v5510_v5 = vsub.f32 %v3896_v20, %v5360_v51 }
 0x6db   : >> { %8890 = vmatprep.subr.bf16.mxu0 %v11264_v55  ;;  %8846 = vmatprep.subr.bf16.mxu1 %v11273_v58  ;;  %v5519_v16 = vsub.f32 %v5517_v8, %v5518_v38  ;;  %v4746_v62 = vand.u32 4294901760, %v4745_v33  ;;  %v11296_v4 = vpack.c.bf16 %v4745_v33, %v4738_v36 }
 0x6dc   : >> { %8892 = vmatpush3.bf16.msra.mxu0 %v11264_v55  ;;  %8848 = vmatpush3.bf16.msra.mxu1 %v11273_v58  ;;  %v5511_v11 = vand.u32 4294901760, %v5510_v5  ;;  %v11294_v29 = vpack.c.bf16 %v5517_v8, %v5510_v5 }
 0x6dd   : >> { %4370 = vmatmul.mubr.f32.gmra.mrb[20].mxu1 %v3878_v61  ;;  %7854 = vmatmul.mubr.msk.f32.gmra.mrb[20].mxu0 %vm4005_vm7, %v11194_v28  ;;  %v4724_v28 = vsub.f32 %v3892_v49, %v4574_v50  ;;  %v5520_v26 = vand.u32 4294901760, %v5519_v16  ;;  %v4747_v41 = vsub.f32 %v4745_v33, %v4746_v62  ;;  %v11304_v49 = vpack.c.bf16 %v4746_v62, %v4739_v15 }
 0x6de   : >> { %4374 = vmatprep.mubr.f32.mxu1 %v3882_v53  ;;  %7856 = vmatprep.mubr.msk.f32.mxu0 %vm4005_vm7, %v11197_v59  ;;  %v5512_v63 = vsub.f32 %v5510_v5, %v5511_v11  ;;  %v11302_v61 = vpack.c.bf16 %v5518_v38, %v5511_v11 }
 0x6df   : >> { %8894 = vmatprep.subr.bf16.mxu0 %v11276_v34  ;;  %v4748_v48 = vand.u32 4294901760, %v4747_v41  ;;  %v11292_v43 = vpack.c.bf16 %v4731_v23, %v4724_v28  ;;  %v4496_v41 = vpop.permute.xlu0 %4495 }
 0x6e0   : >> { %8896 = vmatpush3.bf16.msra.mxu0 %v11276_v34  ;;  %v5513_v59 = vand.u32 4294901760, %v5512_v63 }
 0x6e1   : >> { %4375 = vmatmul.mubr.f32.gmra.mrb[22].mxu1 %v3881_v57  ;;  %7857 = vmatmul.mubr.msk.f32.gmra.mrb[22].mxu0 %vm4005_vm7, %v11204_v1  ;;  %v4725_v1 = vand.u32 4294901760, %v4724_v28  ;;  %v11290_v27 = vpack.c.bf16 %v4748_v48, %v4741_v45 }
 0x6e2   : >> { %v11282_v31 = vpack.c.bf16 %v5520_v26, %v5513_v59 }
 0x6e3   : >> { %v4726_v7 = vsub.f32 %v4724_v28, %v4725_v1  ;;  %v11300_v44 = vpack.c.bf16 %v4732_v40, %v4725_v1 }
 0x6e4   : >> { %8898 = vmatprep.subr.bf16.mxu0 %v11282_v31 }
 0x6e5   : >> { %v4727_v25 = vand.u32 4294901760, %v4726_v7 }
 0x6e7   : >> { %v11287_v39 = vpack.c.bf16 %v4734_v17, %v4727_v25 }
 0x6e9   : >> { %8850 = vmatprep.subr.bf16.mxu1 %v11287_v39 }
 0x773   : >> { %v7829_v53 = vpop.f32.mrb[0].mxu1 }
 0x774   : >> { %v4201_v57 = vpop.f32.mrb[1].mxu1 }
 0x777   : >> { %v7832_v50 = vpop.f32.mrb[2].mxu1 }
 0x778   : >> { %v4211_v24 = vpop.f32.mrb[3].mxu1 }
 0x77b   : >> { %v7835_v20 = vpop.f32.mrb[4].mxu1 }
 0x77c   : >> { %v4221_v6 = vpop.f32.mrb[5].mxu1 }
 0x77f   : >> { %v7838_v51 = vpop.f32.mrb[6].mxu1 }
 0x780   : >> { %v4231_v42 = vpop.f32.mrb[7].mxu1 }
 0x788   : >> { %v6845_v30 = vpop.f32.mrb[0].mxu0 }
 0x789   : >> { %v6846_v54 = vpop.f32.mrb[1].mxu0 }
 0x78a   : >> { %v6847_v46 = vadd.f32 %v6846_v54, %v6845_v30 }
 0x78c   : >> { %v4202_v13 = vadd.f32 %v6847_v46, %v4201_v57  ;;  %v6848_v10 = vpop.f32.mrb[2].mxu0 }
 0x78d   : >> { %v6849_v9 = vpop.f32.mrb[3].mxu0 }
 0x78e   : >> { %v6850_v35 = vadd.f32 %v6849_v9, %v6848_v10 }
 0x790   : >> { %v4207_v18 = vadd.f32 %v7829_v53, %v6850_v35  ;;  %v6851_v5 = vpop.f32.mrb[4].mxu0 }
 0x791   : >> { %v6852_v8 = vpop.f32.mrb[5].mxu0 }
 0x792   : >> { %v6853_v11 = vadd.f32 %v6852_v8, %v6851_v5  ;;  %v4506_v8 = vpop.permute.xlu1 %4505 }
 0x794   : >> { %v11308_v38 = vadd.f32 %v6853_v11, %v4211_v24  ;;  %v6854_v63 = vpop.f32.mrb[6].mxu0  ;;  %v4511_v11 = vpop.permute.xlu0 %4510 }
 0x795   : >> { %v6855_v16 = vpop.f32.mrb[7].mxu0 }
 0x796   : >> { %v6856_v3 = vadd.f32 %v6855_v16, %v6854_v63 }
 0x798   : >> { %v4217_v37 = vadd.f32 %v7832_v50, %v6856_v3  ;;  %v6857_v28 = vpop.f32.mrb[8].mxu0  ;;  %v6913_v23 = vpop.f32.mrb[8].mxu1 }
 0x799   : >> { %v6858_v59 = vpop.f32.mrb[9].mxu0  ;;  %v6914_v26 = vpop.f32.mrb[9].mxu1 }
 0x79a   : >> { %v6859_v0 = vadd.f32 %v6858_v59, %v6857_v28  ;;  %v6915_v12 = vadd.f32 %v6914_v26, %v6913_v23 }
 0x79c   : >> { %v11310_v1 = vadd.f32 %v6859_v0, %v4221_v6  ;;  %v6860_v40 = vpop.f32.mrb[10].mxu0  ;;  %v6916_v60 = vpop.f32.mrb[10].mxu1 }
 0x79d   : >> { %v6861_v21 = vpop.f32.mrb[11].mxu0  ;;  %v6917_v7 = vpop.f32.mrb[11].mxu1 }
 0x79e   : >> { %v6862_v19 = vadd.f32 %v6861_v21, %v6860_v40  ;;  %v6918_v36 = vadd.f32 %v6917_v7, %v6916_v60 }
 0x7a0   : >> { %v11312_v33 = vadd.f32 %v7835_v20, %v6862_v19  ;;  %v6863_v14 = vpop.f32.mrb[12].mxu0  ;;  %v6919_v52 = vpop.f32.mrb[12].mxu1 }
 0x7a1   : >> { %v6864_v25 = vpop.f32.mrb[13].mxu0  ;;  %v6920_v17 = vpop.f32.mrb[13].mxu1 }
 0x7a2   : >> { %v6865_v15 = vadd.f32 %v6864_v25, %v6863_v14  ;;  %v6921_v62 = vadd.f32 %v6920_v17, %v6919_v52 }
 0x7a4   : >> { %v11314_v45 = vadd.f32 %v6865_v15, %v4231_v42  ;;  %v6866_v48 = vpop.f32.mrb[14].mxu0  ;;  %v6922_v53 = vpop.f32.mrb[14].mxu1 }
 0x7a5   : >> { %v6867_v57 = vpop.f32.mrb[15].mxu0  ;;  %v6923_v50 = vpop.f32.mrb[15].mxu1 }
 0x7a6   : >> { %v6868_v24 = vadd.f32 %v6867_v57, %v6866_v48  ;;  %v6924_v6 = vadd.f32 %v6923_v50, %v6922_v53  ;;  %v4521_v48 = vpop.permute.xlu0 %4520 }
 0x7a8   : >> { %v11316_v30 = vadd.f32 %v7838_v51, %v6868_v24  ;;  %v6925_v20 = vpop.f32.mrb[16].mxu1  ;;  %v7849_v54 = vpop.f32.mrb[16].mxu0 }
 0x7a9   : >> { %v4452_v46 = vadd.f32 %v7849_v54, %v6918_v36  ;;  %v6926_v10 = vpop.f32.mrb[17].mxu1  ;;  %v4446_v9 = vpop.f32.mrb[17].mxu0 }
 0x7aa   : >> { %v6927_v35 = vadd.f32 %v6926_v10, %v6925_v20  ;;  %v4447_v5 = vadd.f32 %v6915_v12, %v4446_v9 }
 0x7ab   : >> { %v4486_v63 = vmax.f32 %v4207_v18, %v4452_v46 }
 0x7ac   : >> { %v4485_v42 = vmax.f32 %v4202_v13, %v4447_v5  ;;  %v6928_v16 = vpop.f32.mrb[18].mxu1  ;;  %v7852_v3 = vpop.f32.mrb[18].mxu0 }
 0x7ad   : >> { %v4534_v28 = vadd.f32 %v4501_v2, %v4486_v63  ;;  %v4462_v23 = vadd.f32 %v7852_v3, %v6924_v6  ;;  %v6929_v59 = vpop.f32.mrb[19].mxu1  ;;  %v4456_v26 = vpop.f32.mrb[19].mxu0 }
 0x7ae   : >> { %v4533_v0 = vadd.f32 %v4496_v41, %v4485_v42  ;;  %v6930_v51 = vadd.f32 %v6929_v59, %v6928_v16  ;;  %v4457_v40 = vadd.f32 %v6921_v62, %v4456_v26 }
 0x7af   : >> { %v4542_v60 = vmax.f32 %v4534_v28, 0.0  ;;  %v4488_v21 = vmax.f32 %v4217_v37, %v4462_v23  ;;  %v4516_v37 = vpop.permute.xlu1 %4515 }
 0x7b0   : >> { %v4541_v7 = vmax.f32 %v4533_v0, 0.0  ;;  %v4487_v19 = vmax.f32 %v11308_v38, %v4457_v40  ;;  %v6931_v36 = vpop.f32.mrb[20].mxu1  ;;  %v7855_v12 = vpop.f32.mrb[20].mxu0 }
 0x7b1   : >> { %v4553_v14 = vsel %vm4005_vm7, %v4542_v60, 0  ;;  %v4536_v18 = vadd.f32 %v4511_v11, %v4488_v21  ;;  %v4472_v13 = vadd.f32 %v7855_v12, %v6930_v51  ;;  %v6932_v52 = vpop.f32.mrb[21].mxu1  ;;  %v4466_v25 = vpop.f32.mrb[21].mxu0 }
 0x7b2   : >> { %v11320_v17 = vand.u32 4294901760, %v4553_v14  ;;  %v4550_v15 = vsel %vm4005_vm7, %v4541_v7, 0  ;;  %v4535_v2 = vadd.f32 %v4506_v8, %v4487_v19  ;;  %v6933_v41 = vadd.f32 %v6932_v52, %v6931_v36  ;;  %v4531_v12 = vpop.permute.xlu0 %4530 }
 0x7b3   : >> { %v11323_v62 = vand.u32 4294901760, %v4550_v15  ;;  %v4544_v53 = vmax.f32 %v4536_v18, 0.0  ;;  %v4490_v38 = vmax.f32 %v11312_v33, %v4472_v13  ;;  %v4467_v57 = vadd.f32 %v6927_v35, %v4466_v25  ;;  %v4526_v21 = vpop.permute.xlu1 %4525 }
 0x7b4   : >> { %v11327_v50 = vsub.f32 %v4553_v14, %v11320_v17  ;;  %v4543_v24 = vmax.f32 %v4535_v2, 0.0  ;;  %v6934_v6 = vpop.f32.mrb[22].mxu1  ;;  %v7858_v20 = vpop.f32.mrb[22].mxu0 }
 0x7b5   : >> { %v11330_v54 = vsub.f32 %v4550_v15, %v11323_v62  ;;  %v4559_v46 = vsel %vm4005_vm7, %v4544_v53, 0  ;;  %v4538_v10 = vadd.f32 %v4521_v48, %v4490_v38  ;;  %v4489_v9 = vmax.f32 %v11310_v1, %v4467_v57  ;;  %v6935_v5 = vpop.f32.mrb[23].mxu1  ;;  %v4476_v8 = vpop.f32.mrb[23].mxu0 }
 0x7b6   : >> { %v11335_v11 = vand.u32 4294901760, %v11327_v50  ;;  %v11337_v33 = vand.u32 4294901760, %v4559_v46  ;;  %v4556_v35 = vsel %vm4005_vm7, %v4543_v24, 0  ;;  %v6936_v63 = vadd.f32 %v6935_v5, %v6934_v6 }
 0x7b7   : >> { %v11340_v42 = vand.u32 4294901760, %v4556_v35  ;;  %v4546_v16 = vmax.f32 %v4538_v10, 0.0  ;;  %v4537_v3 = vadd.f32 %v4516_v37, %v4489_v9  ;;  %v4477_v28 = vadd.f32 %v6933_v41, %v4476_v8 }
 0x7b8   : >> { %v11343_v23 = vsub.f32 %v4559_v46, %v11337_v33  ;;  %v4482_v59 = vadd.f32 %v7858_v20, %v6936_v63  ;;  %v11346_v1 = vand.u32 4294901760, %v11330_v54  ;;  %v4655_v26 = vsub.f32 %v11327_v50, %v11335_v11 }
 0x7b9   : >> { %v11351_v0 = vsub.f32 %v4556_v35, %v11340_v42  ;;  %v4565_v51 = vsel %vm4005_vm7, %v4546_v16, 0  ;;  %v4545_v40 = vmax.f32 %v4537_v3, 0.0  ;;  %v4491_v60 = vmax.f32 %v11314_v45, %v4477_v28 }
 0x7ba   : >> { %v11355_v7 = vand.u32 4294901760, %v4565_v51  ;;  %v4492_v19 = vmax.f32 %v11316_v30, %v4482_v59  ;;  %v4645_v36 = vsub.f32 %v11330_v54, %v11346_v1  ;;  %v11365_v52 = vand.u32 4294901760, %v11343_v23 }
 0x7bb   : >> { %v4562_v14 = vsel %vm4005_vm7, %v4545_v40, 0  ;;  %v4539_v18 = vadd.f32 %v4526_v21, %v4491_v60  ;;  %v11362_v13 = vand.u32 4294901760, %v11351_v0  ;;  %v4656_v41 = vand.u32 4294901760, %v4655_v26 }
 0x7bc   : >> { %v11368_v45 = vsub.f32 %v4565_v51, %v11355_v7  ;;  %v11370_v25 = vand.u32 4294901760, %v4562_v14  ;;  %v4540_v15 = vadd.f32 %v4531_v12, %v4492_v19  ;;  %v4646_v30 = vand.u32 4294901760, %v4645_v36 }
 0x7bd   : >> { %v4547_v2 = vmax.f32 %v4539_v18, 0.0  ;;  %v4665_v37 = vsub.f32 %v11351_v0, %v11362_v13  ;;  %v4675_v48 = vsub.f32 %v11343_v23, %v11365_v52 }
 0x7be   : >> { %v11377_v53 = vsub.f32 %v4562_v14, %v11370_v25  ;;  %v4548_v38 = vmax.f32 %v4540_v15, 0.0  ;;  %7867 = vmatprep.mubr.f32.mxu1 %v4646_v30  ;;  %7987 = vmatprep.mubr.f32.mxu0 %v4646_v30  ;;  %v11380_v57 = vand.u32 4294901760, %v11368_v45 }
 0x7bf   : >> { %v4568_v24 = vsel %vm4005_vm7, %v4547_v2, 0  ;;  %7868 = vmatmul.mubr.f32.vlgmr.msra.gmra.mrb[24].mxu1 %v4656_v41  ;;  %7988 = vmatmul.mubr.f32.vlgmr.msra.gmra.mrb[24].mxu0 %v4656_v41  ;;  %v4666_v6 = vand.u32 4294901760, %v4665_v37  ;;  %v4676_v5 = vand.u32 4294901760, %v4675_v48 }
 0x7c0   : >> { %v4571_v20 = vsel %vm4005_vm7, %v4548_v38, 0  ;;  %v11384_v46 = vand.u32 4294901760, %v4568_v24  ;;  %8852 = vmatpush3.bf16.msra.mxu1 %v11287_v39  ;;  %8900 = vmatpush3.bf16.msra.mxu0 %v11282_v31  ;;  %v11389_v10 = vand.u32 4294901760, %v11377_v53  ;;  %v4695_v8 = vsub.f32 %v11368_v45, %v11380_v57 }
 0x7c1   : >> { %v11391_v9 = vand.u32 4294901760, %v4571_v20  ;;  %7870 = vmatprep.mubr.f32.mxu1 %v4666_v6  ;;  %7990 = vmatprep.mubr.f32.mxu0 %v4666_v6 }
 0x7c2   : >> { %v11396_v35 = vsub.f32 %v4568_v24, %v11384_v46  ;;  %v4685_v63 = vsub.f32 %v11377_v53, %v11389_v10  ;;  %8854 = vmatprep.subr.bf16.mxu1 %v11290_v27  ;;  %8902 = vmatprep.subr.bf16.mxu0 %v11285_v22  ;;  %v4696_v3 = vand.u32 4294901760, %v4695_v8 }
 0x7c3   : >> { %v11403_v31 = vsub.f32 %v4571_v20, %v11391_v9  ;;  %7871 = vmatmul.mubr.f32.gmra.mrb[26].mxu1 %v4676_v5  ;;  %7991 = vmatmul.mubr.f32.gmra.mrb[26].mxu0 %v4676_v5 }
 0x7c4   : >> { %v4686_v39 = vand.u32 4294901760, %v4685_v63  ;;  %8856 = vmatpush3.bf16.msra.mxu1 %v11290_v27  ;;  %8904 = vmatpush3.bf16.msra.mxu0 %v11285_v22  ;;  %v11408_v16 = vand.u32 4294901760, %v11396_v35 }
 0x7c5   : >> { %v11411_v28 = vand.u32 4294901760, %v11403_v31  ;;  %8858 = vmatprep.subr.bf16.mxu1 %v11292_v43  ;;  %8906 = vmatprep.subr.bf16.mxu0 %v11294_v29 }
 0x7c6   : >> { %7873 = vmatprep.mubr.f32.mxu1 %v4686_v39  ;;  %7993 = vmatprep.mubr.f32.mxu0 %v4686_v39  ;;  %v4705_v59 = vsub.f32 %v11396_v35, %v11408_v16 }
 0x7c7   : >> { %7874 = vmatmul.mubr.f32.gmra.mrb[28].mxu1 %v4696_v3  ;;  %7994 = vmatmul.mubr.f32.gmra.mrb[28].mxu0 %v4696_v3  ;;  %v4715_v22 = vsub.f32 %v11403_v31, %v11411_v28 }
 0x7c8   : >> { %8007 = vmatprep.mubr.f32.mxu0 %v11323_v62  ;;  %v11420_v27 = vand.u32 4294901760, %v4705_v59 }
 0x7c9   : >> { %v11422_v26 = vand.u32 4294901760, %v4715_v22 }
 0x7ca   : >> { %7876 = vmatprep.mubr.f32.mxu1 %v11420_v27 }
 0x7cb   : >> { %8008 = vmatmul.mubr.f32.vlgmr.msra.gmra.mrb[24].mxu0 %v11320_v17  ;;  %7877 = vmatmul.mubr.f32.gmra.mrb[30].mxu1 %v11422_v26 }
 0x7cc   : >> { %8010 = vmatprep.mubr.f32.mxu0 %v11340_v42  ;;  %7887 = vmatprep.mubr.f32.mxu1 %v11323_v62 }
 0x7cd   : >> { %8908 = vmatpush3.bf16.msra.mxu0 %v11294_v29 }
 0x7ce   : >> { %8910 = vmatprep.subr.bf16.mxu0 %v11298_v47 }
 0x7cf   : >> { %8011 = vmatmul.mubr.f32.gmra.mrb[26].mxu0 %v11337_v33  ;;  %7888 = vmatmul.mubr.f32.vlgmr.msra.gmra.mrb[24].mxu1 %v11320_v17 }
 0x7d0   : >> { %8860 = vmatpush3.bf16.msra.mxu1 %v11292_v43  ;;  %8013 = vmatprep.mubr.f32.mxu0 %v11370_v25 }
 0x7d1   : >> { %7890 = vmatprep.mubr.f32.mxu1 %v11340_v42  ;;  %8862 = vmatprep.subr.bf16.mxu1 %v11296_v4 }
 0x7d2   : >> { %8912 = vmatpush3.bf16.msra.mxu0 %v11298_v47 }
 0x7d3   : >> { %8014 = vmatmul.mubr.f32.gmra.mrb[28].mxu0 %v11355_v7  ;;  %7891 = vmatmul.mubr.f32.gmra.mrb[26].mxu1 %v11337_v33 }
 0x7d4   : >> { %8016 = vmatprep.mubr.f32.mxu0 %v11384_v46  ;;  %7893 = vmatprep.mubr.f32.mxu1 %v11370_v25 }
 0x7d5   : >> { %8864 = vmatpush3.bf16.msra.mxu1 %v11296_v4  ;;  %8914 = vmatprep.subr.bf16.mxu0 %v11264_v55 }
 0x7d6   : >> { %8866 = vmatprep.subr.bf16.mxu1 %v11248_v32 }
 0x7d7   : >> { %8017 = vmatmul.mubr.f32.gmra.mrb[30].mxu0 %v11391_v9  ;;  %7894 = vmatmul.mubr.f32.gmra.mrb[28].mxu1 %v11355_v7 }
 0x7d8   : >> { %8027 = vmatprep.mubr.f32.mxu0 %v11330_v54  ;;  %7896 = vmatprep.mubr.f32.mxu1 %v11384_v46 }
 0x7db   : >> { %8028 = vmatmul.mubr.f32.vlgmr.msra.gmra.mrb[24].mxu0 %v11327_v50  ;;  %7897 = vmatmul.mubr.f32.gmra.mrb[30].mxu1 %v11391_v9 }
 0x7dc   : >> { %8030 = vmatprep.mubr.f32.mxu0 %v11351_v0  ;;  %7907 = vmatprep.mubr.f32.mxu1 %v11330_v54 }
 0x7dd   : >> { %8916 = vmatpush3.bf16.msra.mxu0 %v11264_v55 }
 0x7de   : >> { %8918 = vmatprep.subr.bf16.mxu0 %v11276_v34 }
 0x7df   : >> { %8031 = vmatmul.mubr.f32.gmra.mrb[26].mxu0 %v11343_v23  ;;  %7908 = vmatmul.mubr.f32.vlgmr.msra.gmra.mrb[24].mxu1 %v11327_v50 }
 0x7e0   : >> { %8868 = vmatpush3.bf16.msra.mxu1 %v11248_v32  ;;  %8033 = vmatprep.mubr.f32.mxu0 %v11377_v53 }
 0x7e1   : >> { %7910 = vmatprep.mubr.f32.mxu1 %v11351_v0  ;;  %8870 = vmatprep.subr.bf16.mxu1 %v11273_v58 }
 0x7e2   : >> { %8920 = vmatpush3.bf16.msra.mxu0 %v11276_v34 }
 0x7e3   : >> { %8034 = vmatmul.mubr.f32.gmra.mrb[28].mxu0 %v11368_v45  ;;  %7911 = vmatmul.mubr.f32.gmra.mrb[26].mxu1 %v11343_v23 }
 0x7e4   : >> { %8036 = vmatprep.mubr.f32.mxu0 %v11396_v35  ;;  %7913 = vmatprep.mubr.f32.mxu1 %v11377_v53 }
 0x7e5   : >> { %8872 = vmatpush3.bf16.msra.mxu1 %v11273_v58  ;;  %8922 = vmatprep.subr.bf16.mxu0 %v11302_v61 }
 0x7e6   : >> { %8874 = vmatprep.subr.bf16.mxu1 %v11300_v44 }
 0x7e7   : >> { %8037 = vmatmul.mubr.f32.gmra.mrb[30].mxu0 %v11403_v31  ;;  %7914 = vmatmul.mubr.f32.gmra.mrb[28].mxu1 %v11368_v45 }
 0x7e8   : >> { %8047 = vmatprep.mubr.f32.mxu0 %v11346_v1  ;;  %7916 = vmatprep.mubr.f32.mxu1 %v11396_v35 }
 0x7eb   : >> { %8048 = vmatmul.mubr.f32.vlgmr.msra.gmra.mrb[24].mxu0 %v11335_v11  ;;  %7917 = vmatmul.mubr.f32.gmra.mrb[30].mxu1 %v11403_v31 }
 0x7ec   : >> { %8050 = vmatprep.mubr.f32.mxu0 %v11362_v13  ;;  %7927 = vmatprep.mubr.f32.mxu1 %v11346_v1 }
 0x7ed   : >> { %8924 = vmatpush3.bf16.msra.mxu0 %v11302_v61 }
 0x7ee   : >> { %8926 = vmatprep.subr.bf16.mxu0 %v11306_v56 }
 0x7ef   : >> { %8051 = vmatmul.mubr.f32.gmra.mrb[26].mxu0 %v11365_v52  ;;  %7928 = vmatmul.mubr.f32.vlgmr.msra.gmra.mrb[24].mxu1 %v11335_v11 }
 0x7f0   : >> { %8876 = vmatpush3.bf16.msra.mxu1 %v11300_v44  ;;  %8053 = vmatprep.mubr.f32.mxu0 %v11389_v10 }
 0x7f1   : >> { %7930 = vmatprep.mubr.f32.mxu1 %v11362_v13  ;;  %8878 = vmatprep.subr.bf16.mxu1 %v11304_v49 }
 0x7f2   : >> { %8928 = vmatpush3.bf16.msra.mxu0 %v11306_v56 }
 0x7f3   : >> { %8054 = vmatmul.mubr.f32.gmra.mrb[28].mxu0 %v11380_v57  ;;  %7931 = vmatmul.mubr.f32.gmra.mrb[26].mxu1 %v11365_v52 }
 0x7f4   : >> { %8056 = vmatprep.mubr.f32.mxu0 %v11408_v16  ;;  %7933 = vmatprep.mubr.f32.mxu1 %v11389_v10 }
 0x7f5   : >> { %8880 = vmatpush3.bf16.msra.mxu1 %v11304_v49  ;;  %8930 = vmatprep.subr.bf16.mxu0 %v11264_v55 }
 0x7f6   : >> { %8882 = vmatprep.subr.bf16.mxu1 %v11248_v32 }
 0x7f7   : >> { %8057 = vmatmul.mubr.f32.gmra.mrb[30].mxu0 %v11411_v28  ;;  %7934 = vmatmul.mubr.f32.gmra.mrb[28].mxu1 %v11380_v57 }
 0x7f8   : >> { %8067 = vmatprep.mubr.f32.mxu0 %v11323_v62  ;;  %7936 = vmatprep.mubr.f32.mxu1 %v11408_v16 }
 0x7fb   : >> { %8068 = vmatmul.mubr.f32.vlgmr.msra.gmra.mrb[24].mxu0 %v11320_v17  ;;  %7937 = vmatmul.mubr.f32.gmra.mrb[30].mxu1 %v11411_v28 }
 0x7fc   : >> { %8070 = vmatprep.mubr.f32.mxu0 %v11340_v42  ;;  %7947 = vmatprep.mubr.f32.mxu1 %v11323_v62 }
 0x7fd   : >> { %8932 = vmatpush3.bf16.msra.mxu0 %v11264_v55 }
 0x7fe   : >> { %8934 = vmatprep.subr.bf16.mxu0 %v11276_v34 }
 0x7ff   : >> { %8071 = vmatmul.mubr.f32.gmra.mrb[26].mxu0 %v11337_v33  ;;  %7948 = vmatmul.mubr.f32.vlgmr.msra.gmra.mrb[24].mxu1 %v11320_v17 }
 0x800   : >> { %8884 = vmatpush3.bf16.msra.mxu1 %v11248_v32  ;;  %8073 = vmatprep.mubr.f32.mxu0 %v11370_v25 }
 0x801   : >> { %7950 = vmatprep.mubr.f32.mxu1 %v11340_v42  ;;  %8886 = vmatprep.subr.bf16.mxu1 %v11273_v58 }
 0x802   : >> { %8936 = vmatpush3.bf16.msra.mxu0 %v11276_v34 }
 0x803   : >> { %8074 = vmatmul.mubr.f32.gmra.mrb[28].mxu0 %v11355_v7  ;;  %7951 = vmatmul.mubr.f32.gmra.mrb[26].mxu1 %v11337_v33 }
 0x804   : >> { %8076 = vmatprep.mubr.f32.mxu0 %v11384_v46  ;;  %7953 = vmatprep.mubr.f32.mxu1 %v11370_v25 }
 0x805   : >> { %8888 = vmatpush3.bf16.msra.mxu1 %v11273_v58 }
 0x806   : >> { %8997 = vmatprep.subr.bf16.mxu1 %v11264_v55 }
 0x807   : >> { %8077 = vmatmul.mubr.f32.gmra.mrb[30].mxu0 %v11391_v9  ;;  %7954 = vmatmul.mubr.f32.gmra.mrb[28].mxu1 %v11355_v7 }
 0x808   : >> { %8087 = vmatprep.mubr.f32.mxu0 %v11323_v62  ;;  %7956 = vmatprep.mubr.f32.mxu1 %v11384_v46 }
 0x80b   : >> { %8088 = vmatmul.mubr.f32.vlgmr.msra.gmra.mrb[24].mxu0 %v11320_v17  ;;  %7957 = vmatmul.mubr.f32.gmra.mrb[30].mxu1 %v11391_v9 }
 0x80c   : >> { %8090 = vmatprep.mubr.f32.mxu0 %v11340_v42  ;;  %7967 = vmatprep.mubr.f32.mxu1 %v11323_v62 }
 0x80f   : >> { %8091 = vmatmul.mubr.f32.gmra.mrb[26].mxu0 %v11337_v33  ;;  %7968 = vmatmul.mubr.f32.vlgmr.msra.gmra.mrb[24].mxu1 %v11320_v17 }
 0x810   : >> { %8999 = vmatpush3.bf16.msra.mxu1 %v11264_v55  ;;  %8093 = vmatprep.mubr.f32.mxu0 %v11370_v25 }
 0x811   : >> { %7970 = vmatprep.mubr.f32.mxu1 %v11340_v42  ;;  %8998 = vmatprep.subr.bf16.mxu1 %v11276_v34 }
 0x813   : >> { %8094 = vmatmul.mubr.f32.gmra.mrb[28].mxu0 %v11355_v7  ;;  %7971 = vmatmul.mubr.f32.gmra.mrb[26].mxu1 %v11337_v33 }
 0x814   : >> { %8096 = vmatprep.mubr.f32.mxu0 %v11384_v46  ;;  %7973 = vmatprep.mubr.f32.mxu1 %v11370_v25 }
 0x815   : >> { %9000 = vmatpush3.bf16.msra.mxu1 %v11276_v34 }
 0x817   : >> { %8097 = vmatmul.mubr.f32.gmra.mrb[30].mxu0 %v11391_v9  ;;  %7974 = vmatmul.mubr.f32.gmra.mrb[28].mxu1 %v11355_v7 }
 0x818   : >> { %7976 = vmatprep.mubr.f32.mxu1 %v11384_v46 }
 0x81b   : >> { %7977 = vmatmul.mubr.f32.gmra.mrb[30].mxu1 %v11391_v9 }
 0x81c   : >> { %7996 = vmatprep.mubr.f32.mxu1 %v11420_v27 }
 0x81f   : >> { %7997 = vmatmul.mubr.f32.vlgmr.msra.gmra.mrb[32].mxu1 %v11422_v26 }
 0x8de   : >> { %v8089_v32 = vpop.f32.mrb[24].mxu0 }
 0x8df   : >> { %v6099_v55 = vpop.f32.mrb[25].mxu0 }
 0x8e2   : >> { %v8092_v58 = vpop.f32.mrb[26].mxu0  ;;  %v7969_v43 = vpop.f32.mrb[24].mxu1 }
 0x8e3   : >> { %v6146_v34 = vmax.f32 %v7969_v43, %v8089_v32  ;;  %v6111_v29 = vpop.f32.mrb[27].mxu0  ;;  %v5313_v4 = vpop.f32.mrb[25].mxu1 }
 0x8e4   : >> { %v6145_v47 = vmax.f32 %v5313_v4, %v6099_v55 }
 0x8e5   : >> { %6157 = vst.msk [vmem:[%s11544_s27 + $0x8] sm:$0xff] %vm2264_vm5, %v6146_v34 }
 0x8e6   : >> { %6156 = vst.msk [vmem:[%s11544_s27] sm:$0xff] %vm2264_vm5, %v6145_v47  ;;  %v8095_v44 = vpop.f32.mrb[28].mxu0  ;;  %v7972_v61 = vpop.f32.mrb[26].mxu1 }
 0x8e7   : >> { %v6148_v49 = vmax.f32 %v7972_v61, %v8092_v58  ;;  %v6123_v56 = vpop.f32.mrb[29].mxu0  ;;  %v5325_v17 = vpop.f32.mrb[27].mxu1 }
 0x8e8   : >> { %v6147_v62 = vmax.f32 %v5325_v17, %v6111_v29 }
 0x8e9   : >> { %6159 = vst.msk [vmem:[%s11544_s27 + $0x18] sm:$0xff] %vm2264_vm5, %v6148_v49 }
 0x8ea   : >> { %6158 = vst.msk [vmem:[%s11544_s27 + $0x10] sm:$0xff] %vm2264_vm5, %v6147_v62  ;;  %v8098_v50 = vpop.f32.mrb[30].mxu0  ;;  %v7975_v54 = vpop.f32.mrb[28].mxu1 }
 0x8eb   : >> { %v6150_v11 = vmax.f32 %v7975_v54, %v8095_v44  ;;  %v6135_v33 = vpop.f32.mrb[31].mxu0  ;;  %v5337_v42 = vpop.f32.mrb[29].mxu1 }
 0x8ec   : >> { %v6149_v23 = vmax.f32 %v5337_v42, %v6123_v56 }
 0x8ed   : >> { %6161 = vst.msk [vmem:[%s11544_s27 + $0x28] sm:$0xff] %vm2264_vm5, %v6150_v11 }
 0x8ee   : >> { %6160 = vst.msk [vmem:[%s11544_s27 + $0x20] sm:$0xff] %vm2264_vm5, %v6149_v23  ;;  %v7978_v1 = vpop.f32.mrb[30].mxu1 }
 0x8ef   : >> { %v5349_v0 = vpop.f32.mrb[31].mxu1 }
 0x8f2   : >> { %v7998_v51 = vpop.f32.mrb[32].mxu1  ;;  %3858 = sbr.rel (!%p3856_p1) target bundleno = 1556 (0x614), region = 175 }
 0x8f3   : >> { %v9001_v40 = vadd.f32 %v8098_v50, %v7998_v51  ;;  %v5494_v60 = vpop.f32.mrb[33].mxu1 }
 0x8f4   : >> { %v9002_v21 = vadd.f32 %v6135_v33, %v5494_v60 }
 0x8f5   : >> { %v6152_v7 = vmax.f32 %v7978_v1, %v9001_v40 }
 0x8f6   : >> { %v6151_v19 = vmax.f32 %v5349_v0, %v9002_v21 }
 0x8f7   : >> { %6163 = vst.msk [vmem:[%s11544_s27 + $0x38] sm:$0xff] %vm2264_vm5, %v6152_v7 }
 0x8f8   : >> { %6162 = vst.msk [vmem:[%s11544_s27 + $0x30] sm:$0xff] %vm2264_vm5, %v6151_v19 }
 0x8f9 PF: > { %s11825_s19 = sld [smem:[#allocation11_spill]] }
 0x8ff   : > { %s25_s25 = sadd.s32 1, %s11825_s19  }
 0x900   : > { %p22_p4 = scmp.ge.s32.totalorder %s25_s25, 4  }
 0x902   :  { %24 = sbr.rel (!%p22_p4) target bundleno = 4 (0x4), region = 186 }
 0x909   :  { %6185 = vsyncpa [#allocation5], 1 }
 0x90a   :  { %6187 = vsyncpa [#allocation5 + $0x1], 1 }
 0x90b   :  { %6188 = vsyncpa [#allocation7], 1 }

// kernel: helmet_cnn_forward.3
= control target key start
LH: loop header
LB: loop body
LE: loop exit
PB: predicated region body
PF: predicated region fallthrough
CT: control target
= control target key end

     0   :  { %v11805_v47 = vmov 1983009808   ;;  %v2145_v49 = vlaneseq  ;;  %vm11807_vm0 = vmmov 0   ;;  %vm7393_vm1 = vcmask 1024   ;;  %s18584_s1 = inlined_call_operand.vmem [shape: f32[16384,128], index: 1, kind: input, shape index: {}]   ;;  %s18585_s0 = inlined_call_operand.vmem [shape: f32[2,16384], index: 0, kind: input, shape index: {}]   ;;  %s18586_s2 = inlined_call_operand.vmem [shape: f32[1,128], index: 2, kind: input, shape index: {}]   ;;  %s18587_s3 = inlined_call_operand.vmem [shape: f32[128,1], index: 3, kind: input, shape index: {}]   ;;  %s18588_s4 = inlined_call_operand.<no memory space> [shape: f32[1,1], index: 4, kind: input, shape index: {}]   ;;  %s18589_s5 = inlined_call_operand.vmem [shape: f32[2,1], index: 5, kind: output, shape index: {}]  }
   0x1   :  { %v70_v0 = vld [vmem:[%s18584_s1 + $0x80] sm:$0xff]  ;;  %v71_v1 = vld [vmem:[%s18584_s1 + $0x88] sm:$0xff]  ;;  %v72_v11 = vld [vmem:[%s18584_s1 + $0x90] sm:$0xff]  ;;  %v2143_v48 = vunpack.c.l.s4 %v11805_v47 }
   0x2   :  { %v54_v2 = vld [vmem:[%s18584_s1] sm:$0xff]  ;;  %v9693_v3 = vpack.c.bf16 %v71_v1, %v70_v0  ;;  %v55_v4 = vld [vmem:[%s18584_s1 + $0x8] sm:$0xff]  ;;  %v73_v13 = vld [vmem:[%s18584_s1 + $0x98] sm:$0xff]  ;;  %v2146_v0 = vshrl.u32 %v2145_v49, 7 }
   0x3   :  { %v102_v5 = vld [vmem:[%s18584_s1 + $0x180] sm:$0xff]  ;;  %v103_v6 = vld [vmem:[%s18584_s1 + $0x188] sm:$0xff]  ;;  %v9695_v7 = vpack.c.bf16 %v55_v4, %v54_v2  ;;  %v56_v14 = vld [vmem:[%s18584_s1 + $0x10] sm:$0xff]  ;;  %v9697_v16 = vpack.c.bf16 %v73_v13, %v72_v11  ;;  %v2144_v63 = vunpack.c.0.s8 %v2143_v48 }
   0x4   :  { %v9725_v8 = vpack.c.bf16 %v103_v6, %v102_v5  ;;  %v86_v9 = vld [vmem:[%s18584_s1 + $0x100] sm:$0xff]  ;;  %v87_v10 = vld [vmem:[%s18584_s1 + $0x108] sm:$0xff]  ;;  %9694 = vmatprep.subr.bf16.mxu0 %v9693_v3  ;;  %v57_v15 = vld [vmem:[%s18584_s1 + $0x18] sm:$0xff] }
   0x5   :  { %v9727_v12 = vpack.c.bf16 %v87_v10, %v86_v9  ;;  %9696 = vmatpush3.bf16.msra.mxu0 %v9695_v7  ;;  %v9699_v17 = vpack.c.bf16 %v57_v15, %v56_v14  ;;  %v104_v18 = vld [vmem:[%s18584_s1 + $0x190] sm:$0xff]  ;;  %v105_v19 = vld [vmem:[%s18584_s1 + $0x198] sm:$0xff]  ;;  %v74_v23 = vld [vmem:[%s18584_s1 + $0xa0] sm:$0xff]  ;;  %v11989_v13 = vsub.s32 %v2144_v63, %v2146_v0 }
   0x6   :  { %9726 = vmatprep.subr.bf16.mxu1 %v9725_v8  ;;  %v88_v20 = vld [vmem:[%s18584_s1 + $0x110] sm:$0xff]  ;;  %v9729_v21 = vpack.c.bf16 %v105_v19, %v104_v18  ;;  %v89_v22 = vld [vmem:[%s18584_s1 + $0x118] sm:$0xff]  ;;  %v75_v24 = vld [vmem:[%s18584_s1 + $0xa8] sm:$0xff]  ;;  %9698 = vmatprep.subr.bf16.mxu0 %v9697_v16 }
   0x7   :  { %9728 = vmatpush3.bf16.msra.mxu1 %v9727_v12  ;;  %v9731_v25 = vpack.c.bf16 %v89_v22, %v88_v20  ;;  %v9701_v26 = vpack.c.bf16 %v75_v24, %v74_v23  ;;  %v58_v27 = vld [vmem:[%s18584_s1 + $0x20] sm:$0xff]  ;;  %v59_v28 = vld [vmem:[%s18584_s1 + $0x28] sm:$0xff]  ;;  %v76_v35 = vld [vmem:[%s18584_s1 + $0xb0] sm:$0xff] }
   0x8   :  { %v106_v29 = vld [vmem:[%s18584_s1 + $0x1a0] sm:$0xff]  ;;  %9730 = vmatprep.subr.bf16.mxu1 %v9729_v21  ;;  %v107_v30 = vld [vmem:[%s18584_s1 + $0x1a8] sm:$0xff]  ;;  %v9703_v33 = vpack.c.bf16 %v59_v28, %v58_v27  ;;  %v77_v36 = vld [vmem:[%s18584_s1 + $0xb8] sm:$0xff] }
   0x9   :  { %v90_v31 = vld [vmem:[%s18584_s1 + $0x120] sm:$0xff]  ;;  %v91_v32 = vld [vmem:[%s18584_s1 + $0x128] sm:$0xff]  ;;  %9700 = vmatpush3.bf16.msra.mxu0 %v9699_v17  ;;  %v9733_v34 = vpack.c.bf16 %v107_v30, %v106_v29  ;;  %v60_v37 = vld [vmem:[%s18584_s1 + $0x30] sm:$0xff]  ;;  %v9705_v39 = vpack.c.bf16 %v77_v36, %v76_v35 }
   0xa   :  { %9702 = vmatprep.subr.bf16.mxu0 %v9701_v26  ;;  %v9735_v38 = vpack.c.bf16 %v91_v32, %v90_v31  ;;  %v61_v40 = vld [vmem:[%s18584_s1 + $0x38] sm:$0xff]  ;;  %v108_v41 = vld [vmem:[%s18584_s1 + $0x1b0] sm:$0xff]  ;;  %v78_v46 = vld [vmem:[%s18584_s1 + $0xc0] sm:$0xff] }
   0xb   :  { %9732 = vmatpush3.bf16.msra.mxu1 %v9731_v25  ;;  %v109_v42 = vld [vmem:[%s18584_s1 + $0x1b8] sm:$0xff]  ;;  %v92_v44 = vld [vmem:[%s18584_s1 + $0x130] sm:$0xff]  ;;  %v79_v50 = vld [vmem:[%s18584_s1 + $0xc8] sm:$0xff]  ;;  %v9707_v51 = vpack.c.bf16 %v61_v40, %v60_v37 }
   0xc   :  { %9734 = vmatprep.subr.bf16.mxu1 %v9733_v34  ;;  %v9737_v43 = vpack.c.bf16 %v109_v42, %v108_v41  ;;  %v93_v45 = vld [vmem:[%s18584_s1 + $0x138] sm:$0xff]  ;;  %v110_v52 = vld [vmem:[%s18584_s1 + $0x1c0] sm:$0xff]  ;;  %v111_v53 = vld [vmem:[%s18584_s1 + $0x1c8] sm:$0xff]  ;;  %v9709_v55 = vpack.c.bf16 %v79_v50, %v78_v46 }
   0xd   :  { %9704 = vmatpush3.bf16.msra.mxu0 %v9703_v33  ;;  %v9739_v54 = vpack.c.bf16 %v93_v45, %v92_v44  ;;  %v62_v56 = vld [vmem:[%s18584_s1 + $0x40] sm:$0xff]  ;;  %v63_v57 = vld [vmem:[%s18584_s1 + $0x48] sm:$0xff]  ;;  %v9741_v59 = vpack.c.bf16 %v111_v53, %v110_v52  ;;  %v80_v61 = vld [vmem:[%s18584_s1 + $0xd0] sm:$0xff] }
   0xe   :  { %9706 = vmatprep.subr.bf16.mxu0 %v9705_v39  ;;  %v94_v58 = vld [vmem:[%s18584_s1 + $0x140] sm:$0xff]  ;;  %v95_v60 = vld [vmem:[%s18584_s1 + $0x148] sm:$0xff]  ;;  %v81_v62 = vld [vmem:[%s18584_s1 + $0xd8] sm:$0xff]  ;;  %v9711_v3 = vpack.c.bf16 %v63_v57, %v62_v56 }
   0xf   :  { %9736 = vmatpush3.bf16.msra.mxu1 %v9735_v38  ;;  %v112_v1 = vld [vmem:[%s18584_s1 + $0x1d0] sm:$0xff]  ;;  %v113_v2 = vld [vmem:[%s18584_s1 + $0x1d8] sm:$0xff]  ;;  %v9743_v4 = vpack.c.bf16 %v95_v60, %v94_v58  ;;  %v9713_v5 = vpack.c.bf16 %v81_v62, %v80_v61  ;;  %v82_v11 = vld [vmem:[%s18584_s1 + $0xe0] sm:$0xff] }
  0x10   :  { %9738 = vmatprep.subr.bf16.mxu1 %v9737_v43  ;;  %v64_v6 = vld [vmem:[%s18584_s1 + $0x50] sm:$0xff]  ;;  %v65_v7 = vld [vmem:[%s18584_s1 + $0x58] sm:$0xff]  ;;  %v9745_v9 = vpack.c.bf16 %v113_v2, %v112_v1  ;;  %v83_v12 = vld [vmem:[%s18584_s1 + $0xe8] sm:$0xff] }
  0x11   :  { %9708 = vmatpush3.bf16.msra.mxu0 %v9707_v51  ;;  %v96_v8 = vld [vmem:[%s18584_s1 + $0x150] sm:$0xff]  ;;  %v97_v10 = vld [vmem:[%s18584_s1 + $0x158] sm:$0xff]  ;;  %v114_v14 = vld [vmem:[%s18584_s1 + $0x1e0] sm:$0xff]  ;;  %v9715_v16 = vpack.c.bf16 %v65_v7, %v64_v6  ;;  %v9717_v19 = vpack.c.bf16 %v83_v12, %v82_v11 }
  0x12   :  { %9710 = vmatprep.subr.bf16.mxu0 %v9709_v55  ;;  %v115_v15 = vld [vmem:[%s18584_s1 + $0x1e8] sm:$0xff]  ;;  %v66_v17 = vld [vmem:[%s18584_s1 + $0x60] sm:$0xff]  ;;  %v9747_v18 = vpack.c.bf16 %v97_v10, %v96_v8  ;;  %v84_v25 = vld [vmem:[%s18584_s1 + $0xf0] sm:$0xff] }
  0x13   :  { %9740 = vmatpush3.bf16.msra.mxu1 %v9739_v54  ;;  %v67_v20 = vld [vmem:[%s18584_s1 + $0x68] sm:$0xff]  ;;  %v98_v21 = vld [vmem:[%s18584_s1 + $0x160] sm:$0xff]  ;;  %v9749_v23 = vpack.c.bf16 %v115_v15, %v114_v14  ;;  %v85_v26 = vld [vmem:[%s18584_s1 + $0xf8] sm:$0xff] }
  0x14   :  { %9742 = vmatprep.subr.bf16.mxu1 %v9741_v59  ;;  %v22_v22 = vld [vmem:[%s18585_s0] sm:$0xff]  ;;  %v99_v24 = vld [vmem:[%s18584_s1 + $0x168] sm:$0xff]  ;;  %v116_v29 = vld [vmem:[%s18584_s1 + $0x1f0] sm:$0xff]  ;;  %v9719_v31 = vpack.c.bf16 %v67_v20, %v66_v17  ;;  %v9721_v35 = vpack.c.bf16 %v85_v26, %v84_v25 }
  0x15   :  { %9712 = vmatpush3.bf16.msra.mxu0 %v9711_v3  ;;  %v2148_v27 = vrot.slane %v22_v22, %v11989_v13  ;;  %v2141_v28 = vcombine.high %v22_v22, %v22_v22  ;;  %v117_v30 = vld [vmem:[%s18584_s1 + $0x1f8] sm:$0xff]  ;;  %v9751_v34 = vpack.c.bf16 %v99_v24, %v98_v21  ;;  %v68_v36 = vld [vmem:[%s18584_s1 + $0x70] sm:$0xff]  ;;  %v134_v41 = vld [vmem:[%s18584_s1 + $0x280] sm:$0xff] }
  0x16   :  { %9714 = vmatprep.subr.bf16.mxu0 %v9713_v5  ;;  %v69_v37 = vld [vmem:[%s18584_s1 + $0x78] sm:$0xff]  ;;  %v100_v38 = vld [vmem:[%s18584_s1 + $0x170] sm:$0xff]  ;;  %v9753_v39 = vpack.c.bf16 %v117_v30, %v116_v29  ;;  %v135_v42 = vld [vmem:[%s18584_s1 + $0x288] sm:$0xff] }
  0x17   :  { %9744 = vmatpush3.bf16.msra.mxu1 %v9743_v4  ;;  %v2156_v32 = vcombine.high %v2148_v27, %v2148_v27  ;;  %v2155_v33 = vrot.slane %v2141_v28, %v11989_v13  ;;  %v101_v40 = vld [vmem:[%s18584_s1 + $0x178] sm:$0xff]  ;;  %v166_v44 = vld [vmem:[%s18584_s1 + $0x380] sm:$0xff]  ;;  %v167_v45 = vld [vmem:[%s18584_s1 + $0x388] sm:$0xff]  ;;  %v9723_v46 = vpack.c.bf16 %v69_v37, %v68_v36  ;;  %v9757_v48 = vpack.c.bf16 %v135_v42, %v134_v41 }
  0x18   :  { %9746 = vmatprep.subr.bf16.mxu1 %v9745_v9  ;;  %v9755_v47 = vpack.c.bf16 %v101_v40, %v100_v38  ;;  %v118_v49 = vld [vmem:[%s18584_s1 + $0x200] sm:$0xff]  ;;  %v119_v50 = vld [vmem:[%s18584_s1 + $0x208] sm:$0xff]  ;;  %v9789_v52 = vpack.c.bf16 %v167_v45, %v166_v44  ;;  %v136_v54 = vld [vmem:[%s18584_s1 + $0x290] sm:$0xff] }
  0x19   :  { %9716 = vmatpush3.bf16.msra.mxu0 %v9715_v16  ;;  %2877 = vmatprep.mubr.f32.mxu0 %v2156_v32  ;;  %v2157_v43 = vcombine.high %v2155_v33, %v2155_v33  ;;  %v150_v51 = vld [vmem:[%s18584_s1 + $0x300] sm:$0xff]  ;;  %v151_v53 = vld [vmem:[%s18584_s1 + $0x308] sm:$0xff]  ;;  %v137_v55 = vld [vmem:[%s18584_s1 + $0x298] sm:$0xff]  ;;  %v9759_v58 = vpack.c.bf16 %v119_v50, %v118_v49 }
  0x1a   :  { %9718 = vmatprep.subr.bf16.mxu0 %v9717_v19  ;;  %v168_v56 = vld [vmem:[%s18584_s1 + $0x390] sm:$0xff]  ;;  %v169_v57 = vld [vmem:[%s18584_s1 + $0x398] sm:$0xff]  ;;  %v9791_v59 = vpack.c.bf16 %v151_v53, %v150_v51  ;;  %v9761_v60 = vpack.c.bf16 %v137_v55, %v136_v54  ;;  %v138_v2 = vld [vmem:[%s18584_s1 + $0x2a0] sm:$0xff] }
  0x1b   :  { %9748 = vmatpush3.bf16.msra.mxu1 %v9747_v18  ;;  %2947 = vmatprep.mubr.f32.mxu1 %v2157_v43  ;;  %v120_v61 = vld [vmem:[%s18584_s1 + $0x210] sm:$0xff]  ;;  %v121_v62 = vld [vmem:[%s18584_s1 + $0x218] sm:$0xff]  ;;  %v9793_v0 = vpack.c.bf16 %v169_v57, %v168_v56  ;;  %v139_v3 = vld [vmem:[%s18584_s1 + $0x2a8] sm:$0xff] }
  0x1c   :  { %9750 = vmatprep.subr.bf16.mxu1 %v9749_v23  ;;  %v152_v63 = vld [vmem:[%s18584_s1 + $0x310] sm:$0xff]  ;;  %v153_v1 = vld [vmem:[%s18584_s1 + $0x318] sm:$0xff]  ;;  %v170_v4 = vld [vmem:[%s18584_s1 + $0x3a0] sm:$0xff]  ;;  %v9763_v6 = vpack.c.bf16 %v121_v62, %v120_v61  ;;  %v9765_v8 = vpack.c.bf16 %v139_v3, %v138_v2 }
  0x1d   :  { %9720 = vmatpush3.bf16.msra.mxu0 %v9719_v31  ;;  %v171_v5 = vld [vmem:[%s18584_s1 + $0x3a8] sm:$0xff]  ;;  %v9795_v7 = vpack.c.bf16 %v153_v1, %v152_v63  ;;  %v122_v9 = vld [vmem:[%s18584_s1 + $0x220] sm:$0xff]  ;;  %v140_v15 = vld [vmem:[%s18584_s1 + $0x2b0] sm:$0xff] }
  0x1e   :  { %9722 = vmatprep.subr.bf16.mxu0 %v9721_v35  ;;  %v123_v10 = vld [vmem:[%s18584_s1 + $0x228] sm:$0xff]  ;;  %v154_v11 = vld [vmem:[%s18584_s1 + $0x320] sm:$0xff]  ;;  %v9797_v12 = vpack.c.bf16 %v171_v5, %v170_v4  ;;  %v141_v16 = vld [vmem:[%s18584_s1 + $0x2b8] sm:$0xff] }
  0x1f   :  { %9752 = vmatpush3.bf16.msra.mxu1 %v9751_v34  ;;  %v155_v14 = vld [vmem:[%s18584_s1 + $0x328] sm:$0xff]  ;;  %v172_v17 = vld [vmem:[%s18584_s1 + $0x3b0] sm:$0xff]  ;;  %v173_v18 = vld [vmem:[%s18584_s1 + $0x3b8] sm:$0xff]  ;;  %v9767_v19 = vpack.c.bf16 %v123_v10, %v122_v9  ;;  %v9769_v21 = vpack.c.bf16 %v141_v16, %v140_v15 }
  0x20   :  { %9754 = vmatprep.subr.bf16.mxu1 %v9753_v39  ;;  %v9799_v20 = vpack.c.bf16 %v155_v14, %v154_v11  ;;  %v124_v22 = vld [vmem:[%s18584_s1 + $0x230] sm:$0xff]  ;;  %v125_v23 = vld [vmem:[%s18584_s1 + $0x238] sm:$0xff]  ;;  %v9801_v25 = vpack.c.bf16 %v173_v18, %v172_v17  ;;  %v143_v28 = vld [vmem:[%s18584_s1 + $0x2c8] sm:$0xff] }
  0x21   :  { %9724 = vmatpush3.bf16.msra.mxu0 %v9723_v46  ;;  %v156_v24 = vld [vmem:[%s18584_s1 + $0x330] sm:$0xff]  ;;  %v157_v26 = vld [vmem:[%s18584_s1 + $0x338] sm:$0xff]  ;;  %v174_v29 = vld [vmem:[%s18584_s1 + $0x3c0] sm:$0xff]  ;;  %v9771_v32 = vpack.c.bf16 %v125_v23, %v124_v22 }
  0x22   :  { %9758 = vmatprep.subr.bf16.mxu0 %v9757_v48  ;;  %v175_v30 = vld [vmem:[%s18584_s1 + $0x3c8] sm:$0xff]  ;;  %v9803_v35 = vpack.c.bf16 %v157_v26, %v156_v24  ;;  %v126_v37 = vld [vmem:[%s18584_s1 + $0x240] sm:$0xff]  ;;  %v144_v42 = vld [vmem:[%s18584_s1 + $0x2d0] sm:$0xff] }
  0x23   :  { %9756 = vmatpush3.bf16.msra.mxu1 %v9755_v47  ;;  %v23_v31 = vld [vmem:[%s18585_s0 + $0x8] sm:$0xff]  ;;  %v158_v39 = vld [vmem:[%s18584_s1 + $0x340] sm:$0xff]  ;;  %v9805_v40 = vpack.c.bf16 %v175_v30, %v174_v29  ;;  %v145_v43 = vld [vmem:[%s18584_s1 + $0x2d8] sm:$0xff] }
  0x24   :  { %9790 = vmatprep.subr.bf16.mxu1 %v9789_v52  ;;  %2878 = vmatmul.mubr.f32.vlgmr.msra.gmra.mrb[0].mxu0 %v2148_v27  ;;  %v142_v27 = vld [vmem:[%s18584_s1 + $0x2c0] sm:$0xff]  ;;  %v2158_v34 = vcombine.high %v23_v31, %v23_v31  ;;  %v127_v38 = vld [vmem:[%s18584_s1 + $0x248] sm:$0xff]  ;;  %v176_v46 = vld [vmem:[%s18584_s1 + $0x3d0] sm:$0xff]  ;;  %v9777_v51 = vpack.c.bf16 %v145_v43, %v144_v42 }
  0x25   :  { %9760 = vmatpush3.bf16.msra.mxu0 %v9759_v58  ;;  %v9773_v36 = vpack.c.bf16 %v143_v28, %v142_v27  ;;  %v159_v41 = vld [vmem:[%s18584_s1 + $0x348] sm:$0xff]  ;;  %v177_v47 = vld [vmem:[%s18584_s1 + $0x3d8] sm:$0xff]  ;;  %v9775_v48 = vpack.c.bf16 %v127_v38, %v126_v37  ;;  %v128_v52 = vld [vmem:[%s18584_s1 + $0x250] sm:$0xff] }
  0x26   :  { %2948 = vmatmul.mubr.f32.vlgmr.msra.gmra.mrb[0].mxu1 %v2155_v33  ;;  %9762 = vmatprep.subr.bf16.mxu0 %v9761_v60  ;;  %v12150_v33 = vrot.slane %v23_v31, %v11989_v13  ;;  %v12173_v45 = vrot.slane %v2158_v34, %v11989_v13  ;;  %v9807_v50 = vpack.c.bf16 %v159_v41, %v158_v39  ;;  %v129_v53 = vld [vmem:[%s18584_s1 + $0x258] sm:$0xff]  ;;  %v160_v54 = vld [vmem:[%s18584_s1 + $0x350] sm:$0xff]  ;;  %v146_v57 = vld [vmem:[%s18584_s1 + $0x2e0] sm:$0xff] }
  0x27   :  { %9792 = vmatpush3.bf16.msra.mxu1 %v9791_v59  ;;  %v9809_v55 = vpack.c.bf16 %v177_v47, %v176_v46  ;;  %v161_v56 = vld [vmem:[%s18584_s1 + $0x358] sm:$0xff]  ;;  %v147_v58 = vld [vmem:[%s18584_s1 + $0x2e8] sm:$0xff]  ;;  %v178_v59 = vld [vmem:[%s18584_s1 + $0x3e0] sm:$0xff]  ;;  %v9779_v61 = vpack.c.bf16 %v129_v53, %v128_v52 }
  0x28   :  { %9794 = vmatprep.subr.bf16.mxu1 %v9793_v0  ;;  %v2173_v44 = vcombine.high %v12150_v33, %v12150_v33  ;;  %v2174_v49 = vcombine.high %v12173_v45, %v12173_v45  ;;  %v179_v60 = vld [vmem:[%s18584_s1 + $0x3e8] sm:$0xff]  ;;  %v9811_v62 = vpack.c.bf16 %v161_v56, %v160_v54  ;;  %v9781_v63 = vpack.c.bf16 %v147_v58, %v146_v57  ;;  %v130_v0 = vld [vmem:[%s18584_s1 + $0x260] sm:$0xff]  ;;  %v148_v5 = vld [vmem:[%s18584_s1 + $0x2f0] sm:$0xff] }
  0x29   :  { %9764 = vmatpush3.bf16.msra.mxu0 %v9763_v6  ;;  %v131_v1 = vld [vmem:[%s18584_s1 + $0x268] sm:$0xff]  ;;  %v162_v2 = vld [vmem:[%s18584_s1 + $0x360] sm:$0xff]  ;;  %v9813_v3 = vpack.c.bf16 %v179_v60, %v178_v59  ;;  %v149_v6 = vld [vmem:[%s18584_s1 + $0x2f8] sm:$0xff] }
  0x2a   :  { %9766 = vmatprep.subr.bf16.mxu0 %v9765_v8  ;;  %3017 = vmatprep.mubr.f32.mxu0 %v2173_v44  ;;  %v163_v4 = vld [vmem:[%s18584_s1 + $0x368] sm:$0xff]  ;;  %v181_v8 = vld [vmem:[%s18584_s1 + $0x3f8] sm:$0xff]  ;;  %v9783_v9 = vpack.c.bf16 %v131_v1, %v130_v0  ;;  %v9785_v11 = vpack.c.bf16 %v149_v6, %v148_v5  ;;  %v164_v15 = vld [vmem:[%s18584_s1 + $0x370] sm:$0xff] }
  0x2b   :  { %9796 = vmatpush3.bf16.msra.mxu1 %v9795_v7  ;;  %3087 = vmatprep.mubr.f32.mxu1 %v2174_v49  ;;  %v180_v7 = vld [vmem:[%s18584_s1 + $0x3f0] sm:$0xff]  ;;  %v9815_v10 = vpack.c.bf16 %v163_v4, %v162_v2  ;;  %v133_v14 = vld [vmem:[%s18584_s1 + $0x278] sm:$0xff]  ;;  %v198_v18 = vld [vmem:[%s18584_s1 + $0x480] sm:$0xff] }
  0x2c   :  { %9798 = vmatprep.subr.bf16.mxu1 %v9797_v12  ;;  %v132_v12 = vld [vmem:[%s18584_s1 + $0x270] sm:$0xff]  ;;  %v9817_v16 = vpack.c.bf16 %v181_v8, %v180_v7  ;;  %v165_v17 = vld [vmem:[%s18584_s1 + $0x378] sm:$0xff]  ;;  %v182_v23 = vld [vmem:[%s18584_s1 + $0x400] sm:$0xff] }
  0x2d   :  { %9768 = vmatpush3.bf16.msra.mxu0 %v9767_v19  ;;  %v199_v19 = vld [vmem:[%s18584_s1 + $0x488] sm:$0xff]  ;;  %v9787_v22 = vpack.c.bf16 %v133_v14, %v132_v12  ;;  %v9819_v24 = vpack.c.bf16 %v165_v17, %v164_v15  ;;  %v214_v27 = vld [vmem:[%s18584_s1 + $0x500] sm:$0xff]  ;;  %v200_v30 = vld [vmem:[%s18584_s1 + $0x490] sm:$0xff] }
  0x2e   :  { %9770 = vmatprep.subr.bf16.mxu0 %v9769_v21  ;;  %v231_v21 = vld [vmem:[%s18584_s1 + $0x588] sm:$0xff]  ;;  %v201_v31 = vld [vmem:[%s18584_s1 + $0x498] sm:$0xff]  ;;  %v24_v37 = vld [vmem:[%s18585_s0 + $0x10] sm:$0xff] }
  0x2f   :  { %9800 = vmatpush3.bf16.msra.mxu1 %v9799_v20  ;;  %v230_v20 = vld [vmem:[%s18584_s1 + $0x580] sm:$0xff]  ;;  %v183_v26 = vld [vmem:[%s18584_s1 + $0x408] sm:$0xff]  ;;  %v233_v34 = vld [vmem:[%s18584_s1 + $0x598] sm:$0xff]  ;;  %v9825_v38 = vpack.c.bf16 %v201_v31, %v200_v30  ;;  %v12292_v42 = vrot.slane %v24_v37, %v11989_v13  ;;  %v2175_v43 = vcombine.high %v24_v37, %v24_v37 }
  0x30   :  { %9802 = vmatprep.subr.bf16.mxu1 %v9801_v25  ;;  %v9821_v25 = vpack.c.bf16 %v199_v19, %v198_v18  ;;  %v215_v28 = vld [vmem:[%s18584_s1 + $0x508] sm:$0xff]  ;;  %v9853_v29 = vpack.c.bf16 %v231_v21, %v230_v20  ;;  %v184_v39 = vld [vmem:[%s18584_s1 + $0x410] sm:$0xff]  ;;  %v217_v46 = vld [vmem:[%s18584_s1 + $0x518] sm:$0xff] }
  0x31   :  { %9772 = vmatpush3.bf16.msra.mxu0 %v9771_v32  ;;  %v232_v32 = vld [vmem:[%s18584_s1 + $0x590] sm:$0xff]  ;;  %v202_v47 = vld [vmem:[%s18584_s1 + $0x4a0] sm:$0xff]  ;;  %v12313_v52 = vrot.slane %v2175_v43, %v11989_v13  ;;  %v187_v56 = vld [vmem:[%s18584_s1 + $0x428] sm:$0xff] }
  0x32   :  { %9774 = vmatprep.subr.bf16.mxu0 %v9773_v36  ;;  %v9855_v36 = vpack.c.bf16 %v215_v28, %v214_v27  ;;  %v216_v41 = vld [vmem:[%s18584_s1 + $0x510] sm:$0xff]  ;;  %v9857_v44 = vpack.c.bf16 %v233_v34, %v232_v32  ;;  %v234_v49 = vld [vmem:[%s18584_s1 + $0x5a0] sm:$0xff]  ;;  %v219_v59 = vld [vmem:[%s18584_s1 + $0x528] sm:$0xff] }
  0x33   :  { %9804 = vmatpush3.bf16.msra.mxu1 %v9803_v35  ;;  %v9823_v35 = vpack.c.bf16 %v183_v26, %v182_v23  ;;  %v218_v57 = vld [vmem:[%s18584_s1 + $0x520] sm:$0xff]  ;;  %v204_v60 = vld [vmem:[%s18584_s1 + $0x4b0] sm:$0xff]  ;;  %v189_v4 = vld [vmem:[%s18584_s1 + $0x438] sm:$0xff] }
  0x34   :  { %9806 = vmatprep.subr.bf16.mxu1 %v9805_v40  ;;  %v185_v40 = vld [vmem:[%s18584_s1 + $0x418] sm:$0xff]  ;;  %v9863_v1 = vpack.c.bf16 %v219_v59, %v218_v57  ;;  %v220_v5 = vld [vmem:[%s18584_s1 + $0x530] sm:$0xff]  ;;  %v206_v8 = vld [vmem:[%s18584_s1 + $0x4c0] sm:$0xff] }
  0x35   :  { %9776 = vmatpush3.bf16.msra.mxu0 %v9775_v48  ;;  %v203_v48 = vld [vmem:[%s18584_s1 + $0x4a8] sm:$0xff]  ;;  %v9827_v53 = vpack.c.bf16 %v185_v40, %v184_v39  ;;  %v221_v7 = vld [vmem:[%s18584_s1 + $0x538] sm:$0xff]  ;;  %v222_v18 = vld [vmem:[%s18584_s1 + $0x540] sm:$0xff] }
  0x36   :  { %9778 = vmatprep.subr.bf16.mxu0 %v9777_v51  ;;  %v2190_v51 = vcombine.high %v12292_v42, %v12292_v42  ;;  %v9829_v54 = vpack.c.bf16 %v203_v48, %v202_v47  ;;  %v9867_v14 = vpack.c.bf16 %v221_v7, %v220_v5  ;;  %v191_v17 = vld [vmem:[%s18584_s1 + $0x448] sm:$0xff]  ;;  %v208_v21 = vld [vmem:[%s18584_s1 + $0x4d0] sm:$0xff]  ;;  %v225_v32 = vld [vmem:[%s18584_s1 + $0x558] sm:$0xff] }
  0x37   :  { %9808 = vmatpush3.bf16.msra.mxu1 %v9807_v50  ;;  %v235_v50 = vld [vmem:[%s18584_s1 + $0x5a8] sm:$0xff]  ;;  %v240_v23 = vld [vmem:[%s18584_s1 + $0x5d0] sm:$0xff]  ;;  %v210_v34 = vld [vmem:[%s18584_s1 + $0x4e0] sm:$0xff] }
  0x38   :  { %9810 = vmatprep.subr.bf16.mxu1 %v9809_v55  ;;  %v186_v55 = vld [vmem:[%s18584_s1 + $0x420] sm:$0xff]  ;;  %v9861_v58 = vpack.c.bf16 %v235_v50, %v234_v49  ;;  %v223_v20 = vld [vmem:[%s18584_s1 + $0x548] sm:$0xff]  ;;  %v192_v28 = vld [vmem:[%s18584_s1 + $0x450] sm:$0xff] }
  0x39   :  { %9780 = vmatpush3.bf16.msra.mxu0 %v9779_v61  ;;  %v205_v61 = vld [vmem:[%s18584_s1 + $0x4b8] sm:$0xff]  ;;  %v9831_v0 = vpack.c.bf16 %v187_v56, %v186_v55  ;;  %v9871_v26 = vpack.c.bf16 %v223_v20, %v222_v18  ;;  %v224_v30 = vld [vmem:[%s18584_s1 + $0x550] sm:$0xff]  ;;  %v243_v37 = vld [vmem:[%s18584_s1 + $0x5e8] sm:$0xff] }
  0x3a   :  { %9782 = vmatprep.subr.bf16.mxu0 %v9781_v63  ;;  %v237_v63 = vld [vmem:[%s18584_s1 + $0x5b8] sm:$0xff]  ;;  %v9833_v2 = vpack.c.bf16 %v205_v61, %v204_v60  ;;  %v9875_v39 = vpack.c.bf16 %v225_v32, %v224_v30  ;;  %v195_v43 = vld [vmem:[%s18584_s1 + $0x468] sm:$0xff]  ;;  %v212_v48 = vld [vmem:[%s18584_s1 + $0x4f0] sm:$0xff] }
  0x3b   :  { %9812 = vmatpush3.bf16.msra.mxu1 %v9811_v62  ;;  %v236_v62 = vld [vmem:[%s18584_s1 + $0x5b0] sm:$0xff]  ;;  %v227_v47 = vld [vmem:[%s18584_s1 + $0x568] sm:$0xff]  ;;  %v213_v49 = vld [vmem:[%s18584_s1 + $0x4f8] sm:$0xff] }
  0x3c   :  { %9814 = vmatprep.subr.bf16.mxu1 %v9813_v3  ;;  %v188_v3 = vld [vmem:[%s18584_s1 + $0x430] sm:$0xff]  ;;  %v9865_v6 = vpack.c.bf16 %v237_v63, %v236_v62  ;;  %v9849_v55 = vpack.c.bf16 %v213_v49, %v212_v48  ;;  %v197_v57 = vld [vmem:[%s18584_s1 + $0x478] sm:$0xff]  ;;  %v262_v60 = vld [vmem:[%s18584_s1 + $0x680] sm:$0xff] }
  0x3d   :  { %9784 = vmatpush3.bf16.msra.mxu0 %v9783_v9  ;;  %v207_v9 = vld [vmem:[%s18584_s1 + $0x4c8] sm:$0xff]  ;;  %v9835_v12 = vpack.c.bf16 %v189_v4, %v188_v3  ;;  %v244_v50 = vld [vmem:[%s18584_s1 + $0x5f0] sm:$0xff]  ;;  %v229_v59 = vld [vmem:[%s18584_s1 + $0x578] sm:$0xff] }
  0x3e   :  { %9786 = vmatprep.subr.bf16.mxu0 %v9785_v11  ;;  %v239_v11 = vld [vmem:[%s18584_s1 + $0x5c8] sm:$0xff]  ;;  %v9837_v15 = vpack.c.bf16 %v207_v9, %v206_v8  ;;  %v196_v56 = vld [vmem:[%s18584_s1 + $0x470] sm:$0xff]  ;;  %v294_v62 = vld [vmem:[%s18584_s1 + $0x780] sm:$0xff] }
  0x3f   :  { %9816 = vmatpush3.bf16.msra.mxu1 %v9815_v10  ;;  %v238_v10 = vld [vmem:[%s18584_s1 + $0x5c0] sm:$0xff]  ;;  %v263_v61 = vld [vmem:[%s18584_s1 + $0x688] sm:$0xff]  ;;  %v264_v9 = vld [vmem:[%s18584_s1 + $0x690] sm:$0xff] }
  0x40   :  { %9818 = vmatprep.subr.bf16.mxu1 %v9817_v16  ;;  %v190_v16 = vld [vmem:[%s18584_s1 + $0x440] sm:$0xff]  ;;  %v9869_v19 = vpack.c.bf16 %v239_v11, %v238_v10  ;;  %v295_v63 = vld [vmem:[%s18584_s1 + $0x788] sm:$0xff]  ;;  %v9885_v3 = vpack.c.bf16 %v263_v61, %v262_v60  ;;  %v265_v10 = vld [vmem:[%s18584_s1 + $0x698] sm:$0xff] }
  0x41   :  { %9788 = vmatpush3.bf16.msra.mxu0 %v9787_v22  ;;  %v209_v22 = vld [vmem:[%s18584_s1 + $0x4d8] sm:$0xff]  ;;  %v246_v4 = vld [vmem:[%s18584_s1 + $0x600] sm:$0xff]  ;;  %v247_v5 = vld [vmem:[%s18584_s1 + $0x608] sm:$0xff]  ;;  %v9917_v7 = vpack.c.bf16 %v295_v63, %v294_v62  ;;  %v9889_v18 = vpack.c.bf16 %v265_v10, %v264_v9 }
  0x42   :  { %9822 = vmatprep.subr.bf16.mxu0 %v9821_v25  ;;  %v9839_v25 = vpack.c.bf16 %v191_v17, %v190_v16  ;;  %v9841_v27 = vpack.c.bf16 %v209_v22, %v208_v21  ;;  %v279_v8 = vld [vmem:[%s18584_s1 + $0x708] sm:$0xff]  ;;  %v9887_v16 = vpack.c.bf16 %v247_v5, %v246_v4  ;;  %v249_v20 = vld [vmem:[%s18584_s1 + $0x618] sm:$0xff]  ;;  %v280_v21 = vld [vmem:[%s18584_s1 + $0x710] sm:$0xff] }
  0x43   :  { %9820 = vmatpush3.bf16.msra.mxu1 %v9819_v24  ;;  %v241_v24 = vld [vmem:[%s18584_s1 + $0x5d8] sm:$0xff]  ;;  %v284_v48 = vld [vmem:[%s18584_s1 + $0x730] sm:$0xff]  ;;  %v287_v61 = vld [vmem:[%s18584_s1 + $0x748] sm:$0xff] }
  0x44   :  { %9854 = vmatprep.subr.bf16.mxu1 %v9853_v29  ;;  %3018 = vmatmul.mubr.f32.vlgmr.msra.gmra.mrb[2].mxu0 %v12150_v33  ;;  %v9859_v33 = vpack.c.bf16 %v217_v46, %v216_v41  ;;  %v193_v29 = vld [vmem:[%s18584_s1 + $0x458] sm:$0xff]  ;;  %v9873_v31 = vpack.c.bf16 %v241_v24, %v240_v23  ;;  %v194_v41 = vld [vmem:[%s18584_s1 + $0x460] sm:$0xff]  ;;  %v272_v62 = vld [vmem:[%s18584_s1 + $0x6d0] sm:$0xff] }
  0x45   :  { %9824 = vmatpush3.bf16.msra.mxu0 %v9823_v35  ;;  %3157 = vmatprep.mubr.f32.mxu0 %v2190_v51  ;;  %v211_v35 = vld [vmem:[%s18584_s1 + $0x4e8] sm:$0xff]  ;;  %v245_v51 = vld [vmem:[%s18584_s1 + $0x5f8] sm:$0xff]  ;;  %v266_v24 = vld [vmem:[%s18584_s1 + $0x6a0] sm:$0xff] }
  0x46   :  { %3088 = vmatmul.mubr.f32.vlgmr.msra.gmra.mrb[2].mxu1 %v12173_v45  ;;  %9826 = vmatprep.subr.bf16.mxu0 %v9825_v38  ;;  %v2191_v45 = vcombine.high %v12313_v52, %v12313_v52  ;;  %v9843_v38 = vpack.c.bf16 %v193_v29, %v192_v28  ;;  %v9845_v40 = vpack.c.bf16 %v211_v35, %v210_v34  ;;  %v281_v23 = vld [vmem:[%s18584_s1 + $0x718] sm:$0xff]  ;;  %v299_v28 = vld [vmem:[%s18584_s1 + $0x7a8] sm:$0xff]  ;;  %v282_v35 = vld [vmem:[%s18584_s1 + $0x720] sm:$0xff] }
  0x47   :  { %9856 = vmatpush3.bf16.msra.mxu1 %v9855_v36  ;;  %v242_v36 = vld [vmem:[%s18584_s1 + $0x5e0] sm:$0xff]  ;;  %v251_v34 = vld [vmem:[%s18584_s1 + $0x628] sm:$0xff]  ;;  %v273_v63 = vld [vmem:[%s18584_s1 + $0x6d8] sm:$0xff] }
  0x48   :  { %9858 = vmatprep.subr.bf16.mxu1 %v9857_v44  ;;  %3227 = vmatprep.mubr.f32.mxu1 %v2191_v45  ;;  %v226_v44 = vld [vmem:[%s18584_s1 + $0x560] sm:$0xff]  ;;  %v9877_v46 = vpack.c.bf16 %v243_v37, %v242_v36  ;;  %v228_v45 = vld [vmem:[%s18584_s1 + $0x570] sm:$0xff]  ;;  %v9905_v4 = vpack.c.bf16 %v273_v63, %v272_v62  ;;  %v289_v9 = vld [vmem:[%s18584_s1 + $0x758] sm:$0xff] }
  0x49   :  { %9828 = vmatpush3.bf16.msra.mxu0 %v9827_v53  ;;  %v9847_v53 = vpack.c.bf16 %v195_v43, %v194_v41  ;;  %v268_v37 = vld [vmem:[%s18584_s1 + $0x6b0] sm:$0xff]  ;;  %v274_v10 = vld [vmem:[%s18584_s1 + $0x6e0] sm:$0xff] }
  0x4a   :  { %9830 = vmatprep.subr.bf16.mxu0 %v9829_v54  ;;  %v9879_v54 = vpack.c.bf16 %v227_v47, %v226_v44  ;;  %v253_v47 = vld [vmem:[%s18584_s1 + $0x638] sm:$0xff]  ;;  %v256_v5 = vld [vmem:[%s18584_s1 + $0x650] sm:$0xff] }
  0x4b   :  { %9860 = vmatpush3.bf16.msra.mxu1 %v9859_v33  ;;  %v25_v33 = vld [vmem:[%s18585_s0 + $0x18] sm:$0xff]  ;;  %v344_v62 = vld [vmem:[%s18584_s1 + $0x910] sm:$0xff] }
  0x4c   :  { %9862 = vmatprep.subr.bf16.mxu1 %v9861_v58  ;;  %v9881_v58 = vpack.c.bf16 %v245_v51, %v244_v50  ;;  %v12484_v11 = vrot.slane %v25_v33, %v11989_v13  ;;  %v285_v50 = vld [vmem:[%s18584_s1 + $0x738] sm:$0xff]  ;;  %v270_v51 = vld [vmem:[%s18584_s1 + $0x6c0] sm:$0xff] }
  0x4d   :  { %9832 = vmatpush3.bf16.msra.mxu0 %v9831_v0  ;;  %v2192_v0 = vcombine.high %v25_v33, %v25_v33  ;;  %v302_v33 = vld [vmem:[%s18584_s1 + $0x7c0] sm:$0xff] }
  0x4e   :  { %9834 = vmatprep.subr.bf16.mxu0 %v9833_v2  ;;  %v9883_v2 = vpack.c.bf16 %v229_v59, %v228_v45  ;;  %v254_v45 = vld [vmem:[%s18584_s1 + $0x640] sm:$0xff] }
  0x4f   :  { %9864 = vmatpush3.bf16.msra.mxu1 %v9863_v1  ;;  %v9851_v1 = vpack.c.bf16 %v197_v57, %v196_v56  ;;  %v9931_v56 = vpack.c.bf16 %v285_v50, %v284_v48  ;;  %v286_v59 = vld [vmem:[%s18584_s1 + $0x740] sm:$0xff]  ;;  %v311_v48 = vld [vmem:[%s18584_s1 + $0x808] sm:$0xff] }
  0x50   :  { %9866 = vmatprep.subr.bf16.mxu1 %v9865_v6  ;;  %v278_v6 = vld [vmem:[%s18584_s1 + $0x700] sm:$0xff] }
  0x51   :  { %9836 = vmatpush3.bf16.msra.mxu0 %v9835_v12  ;;  %v296_v12 = vld [vmem:[%s18584_s1 + $0x790] sm:$0xff]  ;;  %v9919_v17 = vpack.c.bf16 %v279_v8, %v278_v6  ;;  %v257_v6 = vld [vmem:[%s18584_s1 + $0x658] sm:$0xff] }
  0x52   :  { %9838 = vmatprep.subr.bf16.mxu0 %v9837_v15  ;;  %v12493_v15 = vrot.slane %v2192_v0, %v11989_v13  ;;  %v304_v0 = vld [vmem:[%s18584_s1 + $0x7d0] sm:$0xff] }
  0x53   :  { %9868 = vmatpush3.bf16.msra.mxu1 %v9867_v14  ;;  %v297_v14 = vld [vmem:[%s18584_s1 + $0x798] sm:$0xff] }
  0x54   :  { %9870 = vmatprep.subr.bf16.mxu1 %v9869_v19  ;;  %v248_v19 = vld [vmem:[%s18584_s1 + $0x610] sm:$0xff]  ;;  %v9921_v22 = vpack.c.bf16 %v297_v14, %v296_v12  ;;  %v2208_v29 = vcombine.high %v12493_v15, %v12493_v15  ;;  %v275_v12 = vld [vmem:[%s18584_s1 + $0x6e8] sm:$0xff]  ;;  %v306_v14 = vld [vmem:[%s18584_s1 + $0x7e0] sm:$0xff] }
  0x55   :  { %9840 = vmatpush3.bf16.msra.mxu0 %v9839_v25  ;;  %v267_v25 = vld [vmem:[%s18584_s1 + $0x6a8] sm:$0xff]  ;;  %v9891_v30 = vpack.c.bf16 %v249_v20, %v248_v19  ;;  %v9909_v19 = vpack.c.bf16 %v275_v12, %v274_v10  ;;  %v258_v20 = vld [vmem:[%s18584_s1 + $0x660] sm:$0xff] }
  0x56   :  { %9842 = vmatprep.subr.bf16.mxu0 %v9841_v27  ;;  %v298_v27 = vld [vmem:[%s18584_s1 + $0x7a0] sm:$0xff]  ;;  %v9893_v32 = vpack.c.bf16 %v267_v25, %v266_v24  ;;  %v291_v24 = vld [vmem:[%s18584_s1 + $0x768] sm:$0xff]  ;;  %v276_v25 = vld [vmem:[%s18584_s1 + $0x6f0] sm:$0xff] }
  0x57   :  { %9872 = vmatpush3.bf16.msra.mxu1 %v9871_v26  ;;  %v2207_v26 = vcombine.high %v12484_v11, %v12484_v11  ;;  %v9925_v36 = vpack.c.bf16 %v299_v28, %v298_v27  ;;  %v308_v27 = vld [vmem:[%s18584_s1 + $0x7f0] sm:$0xff]  ;;  %v309_v28 = vld [vmem:[%s18584_s1 + $0x7f8] sm:$0xff]  ;;  %v315_v10 = vld [vmem:[%s18584_s1 + $0x828] sm:$0xff] }
  0x58   :  { %9874 = vmatprep.subr.bf16.mxu1 %v9873_v31  ;;  %v9923_v31 = vpack.c.bf16 %v281_v23, %v280_v21  ;;  %v259_v21 = vld [vmem:[%s18584_s1 + $0x668] sm:$0xff]  ;;  %v346_v12 = vld [vmem:[%s18584_s1 + $0x920] sm:$0xff] }
  0x59   :  { %9844 = vmatpush3.bf16.msra.mxu0 %v9843_v38  ;;  %v269_v38 = vld [vmem:[%s18584_s1 + $0x6b8] sm:$0xff] }
  0x5a   :  { %9846 = vmatprep.subr.bf16.mxu0 %v9845_v40  ;;  %v301_v40 = vld [vmem:[%s18584_s1 + $0x7b8] sm:$0xff]  ;;  %v9897_v44 = vpack.c.bf16 %v269_v38, %v268_v37  ;;  %v326_v37 = vld [vmem:[%s18584_s1 + $0x880] sm:$0xff]  ;;  %v327_v38 = vld [vmem:[%s18584_s1 + $0x888] sm:$0xff] }
  0x5b   :  { %9876 = vmatpush3.bf16.msra.mxu1 %v9875_v39  ;;  %v300_v39 = vld [vmem:[%s18584_s1 + $0x7b0] sm:$0xff] }
  0x5c   :  { %9878 = vmatprep.subr.bf16.mxu1 %v9877_v46  ;;  %v252_v46 = vld [vmem:[%s18584_s1 + $0x630] sm:$0xff]  ;;  %v9929_v49 = vpack.c.bf16 %v301_v40, %v300_v39  ;;  %v358_v39 = vld [vmem:[%s18584_s1 + $0x980] sm:$0xff]  ;;  %v359_v40 = vld [vmem:[%s18584_s1 + $0x988] sm:$0xff] }
  0x5d   :  { %9848 = vmatpush3.bf16.msra.mxu0 %v9847_v53  ;;  %v271_v53 = vld [vmem:[%s18584_s1 + $0x6c8] sm:$0xff]  ;;  %v9981_v50 = vpack.c.bf16 %v359_v40, %v358_v39  ;;  %v336_v39 = vld [vmem:[%s18584_s1 + $0x8d0] sm:$0xff]  ;;  %v337_v40 = vld [vmem:[%s18584_s1 + $0x8d8] sm:$0xff] }
  0x5e   :  { %9850 = vmatprep.subr.bf16.mxu0 %v9849_v55  ;;  %v9899_v55 = vpack.c.bf16 %v253_v47, %v252_v46  ;;  %v9901_v57 = vpack.c.bf16 %v271_v53, %v270_v51  ;;  %v9949_v46 = vpack.c.bf16 %v327_v38, %v326_v37  ;;  %v310_v47 = vld [vmem:[%s18584_s1 + $0x800] sm:$0xff]  ;;  %v343_v51 = vld [vmem:[%s18584_s1 + $0x908] sm:$0xff]  ;;  %v328_v53 = vld [vmem:[%s18584_s1 + $0x890] sm:$0xff] }
  0x5f   :  { %9880 = vmatpush3.bf16.msra.mxu1 %v9879_v54  ;;  %v303_v54 = vld [vmem:[%s18584_s1 + $0x7c8] sm:$0xff] }
  0x60   :  { %9882 = vmatprep.subr.bf16.mxu1 %v9881_v58  ;;  %v255_v58 = vld [vmem:[%s18584_s1 + $0x648] sm:$0xff]  ;;  %v9933_v60 = vpack.c.bf16 %v303_v54, %v302_v33  ;;  %v329_v33 = vld [vmem:[%s18584_s1 + $0x898] sm:$0xff] }
  0x61   :  { %9852 = vmatpush3.bf16.msra.mxu0 %v9851_v1  ;;  %v305_v1 = vld [vmem:[%s18584_s1 + $0x7d8] sm:$0xff]  ;;  %v351_v38 = vld [vmem:[%s18584_s1 + $0x948] sm:$0xff] }
  0x62   :  { %9886 = vmatprep.subr.bf16.mxu0 %v9885_v3  ;;  %v9935_v3 = vpack.c.bf16 %v287_v61, %v286_v59  ;;  %v9937_v8 = vpack.c.bf16 %v305_v1, %v304_v0  ;;  %v9953_v59 = vpack.c.bf16 %v329_v33, %v328_v53  ;;  %v313_v61 = vld [vmem:[%s18584_s1 + $0x818] sm:$0xff]  ;;  %v330_v1 = vld [vmem:[%s18584_s1 + $0x8a0] sm:$0xff] }
  0x63   :  { %9884 = vmatpush3.bf16.msra.mxu1 %v9883_v2  ;;  %v9903_v2 = vpack.c.bf16 %v255_v58, %v254_v45  ;;  %v9951_v45 = vpack.c.bf16 %v311_v48, %v310_v47  ;;  %v345_v0 = vld [vmem:[%s18584_s1 + $0x918] sm:$0xff]  ;;  %v9969_v47 = vpack.c.bf16 %v337_v40, %v336_v39  ;;  %v320_v48 = vld [vmem:[%s18584_s1 + $0x850] sm:$0xff]  ;;  %v338_v33 = vld [vmem:[%s18584_s1 + $0x8e0] sm:$0xff] }
  0x64   :  { %9918 = vmatprep.subr.bf16.mxu1 %v9917_v7  ;;  %3158 = vmatmul.mubr.f32.vlgmr.msra.gmra.mrb[4].mxu0 %v12292_v42  ;;  %v250_v42 = vld [vmem:[%s18584_s1 + $0x620] sm:$0xff]  ;;  %v288_v7 = vld [vmem:[%s18584_s1 + $0x750] sm:$0xff]  ;;  %v353_v53 = vld [vmem:[%s18584_s1 + $0x958] sm:$0xff] }
  0x65   :  { %9888 = vmatpush3.bf16.msra.mxu0 %v9887_v16  ;;  %3297 = vmatprep.mubr.f32.mxu0 %v2207_v26  ;;  %v9895_v41 = vpack.c.bf16 %v251_v34, %v250_v42  ;;  %v307_v16 = vld [vmem:[%s18584_s1 + $0x7e8] sm:$0xff]  ;;  %v277_v26 = vld [vmem:[%s18584_s1 + $0x6f8] sm:$0xff]  ;;  %v260_v42 = vld [vmem:[%s18584_s1 + $0x670] sm:$0xff] }
  0x66   :  { %3228 = vmatmul.mubr.f32.vlgmr.msra.gmra.mrb[4].mxu1 %v12313_v52  ;;  %9890 = vmatprep.subr.bf16.mxu0 %v9889_v18  ;;  %v283_v52 = vld [vmem:[%s18584_s1 + $0x728] sm:$0xff]  ;;  %v9939_v18 = vpack.c.bf16 %v289_v9, %v288_v7  ;;  %v9941_v23 = vpack.c.bf16 %v307_v16, %v306_v14  ;;  %v261_v34 = vld [vmem:[%s18584_s1 + $0x678] sm:$0xff]  ;;  %v332_v16 = vld [vmem:[%s18584_s1 + $0x8b0] sm:$0xff] }
  0x67   :  { %9920 = vmatpush3.bf16.msra.mxu1 %v9919_v17  ;;  %3367 = vmatprep.mubr.f32.mxu1 %v2208_v29  ;;  %v9927_v43 = vpack.c.bf16 %v283_v52, %v282_v35  ;;  %v9907_v17 = vpack.c.bf16 %v257_v6, %v256_v5  ;;  %v9911_v29 = vpack.c.bf16 %v259_v21, %v258_v20  ;;  %v292_v35 = vld [vmem:[%s18584_s1 + $0x770] sm:$0xff]  ;;  %v293_v52 = vld [vmem:[%s18584_s1 + $0x778] sm:$0xff]  ;;  %v363_v5 = vld [vmem:[%s18584_s1 + $0x9a8] sm:$0xff] }
  0x68   :  { %9922 = vmatprep.subr.bf16.mxu1 %v9921_v22  ;;  %v290_v22 = vld [vmem:[%s18584_s1 + $0x760] sm:$0xff]  ;;  %v408_v39 = vld [vmem:[%s18584_s1 + $0xb10] sm:$0xff] }
  0x69   :  { %9892 = vmatpush3.bf16.msra.mxu0 %v9891_v30  ;;  %v26_v30 = vld [vmem:[%s18585_s0 + $0x20] sm:$0xff] }
  0x6a   :  { %9894 = vmatprep.subr.bf16.mxu0 %v9893_v32  ;;  %v9913_v32 = vpack.c.bf16 %v277_v26, %v276_v25  ;;  %v12691_v54 = vrot.slane %v26_v30, %v11989_v13  ;;  %v348_v25 = vld [vmem:[%s18584_s1 + $0x930] sm:$0xff] }
  0x6b   :  { %9924 = vmatpush3.bf16.msra.mxu1 %v9923_v31  ;;  %v9943_v31 = vpack.c.bf16 %v291_v24, %v290_v22  ;;  %v317_v24 = vld [vmem:[%s18584_s1 + $0x838] sm:$0xff] }
  0x6c   :  { %9926 = vmatprep.subr.bf16.mxu1 %v9925_v36  ;;  %v9945_v36 = vpack.c.bf16 %v309_v28, %v308_v27  ;;  %v349_v27 = vld [vmem:[%s18584_s1 + $0x938] sm:$0xff]  ;;  %v334_v28 = vld [vmem:[%s18584_s1 + $0x8c0] sm:$0xff] }
  0x6d   :  { %9896 = vmatpush3.bf16.msra.mxu0 %v9895_v41  ;;  %v2209_v41 = vcombine.high %v26_v30, %v26_v30  ;;  %v366_v30 = vld [vmem:[%s18584_s1 + $0x9c0] sm:$0xff] }
  0x6e   :  { %9898 = vmatprep.subr.bf16.mxu0 %v9897_v44  ;;  %v9947_v44 = vpack.c.bf16 %v293_v52, %v292_v35  ;;  %v318_v35 = vld [vmem:[%s18584_s1 + $0x840] sm:$0xff] }
  0x6f   :  { %9928 = vmatpush3.bf16.msra.mxu1 %v9927_v43  ;;  %v9915_v43 = vpack.c.bf16 %v261_v34, %v260_v42  ;;  %v9995_v42 = vpack.c.bf16 %v349_v27, %v348_v25  ;;  %v350_v52 = vld [vmem:[%s18584_s1 + $0x940] sm:$0xff]  ;;  %v375_v25 = vld [vmem:[%s18584_s1 + $0xa08] sm:$0xff] }
  0x70   :  { %9930 = vmatprep.subr.bf16.mxu1 %v9929_v49  ;;  %v342_v49 = vld [vmem:[%s18584_s1 + $0x900] sm:$0xff] }
  0x71   :  { %9900 = vmatpush3.bf16.msra.mxu0 %v9899_v55  ;;  %v360_v55 = vld [vmem:[%s18584_s1 + $0x990] sm:$0xff]  ;;  %v9983_v58 = vpack.c.bf16 %v343_v51, %v342_v49  ;;  %v321_v49 = vld [vmem:[%s18584_s1 + $0x858] sm:$0xff] }
  0x72   :  { %9902 = vmatprep.subr.bf16.mxu0 %v9901_v57  ;;  %v12700_v57 = vrot.slane %v2209_v41, %v11989_v13  ;;  %v368_v41 = vld [vmem:[%s18584_s1 + $0x9d0] sm:$0xff] }
  0x73   :  { %9932 = vmatpush3.bf16.msra.mxu1 %v9931_v56  ;;  %v361_v56 = vld [vmem:[%s18584_s1 + $0x998] sm:$0xff] }
  0x74   :  { %9934 = vmatprep.subr.bf16.mxu1 %v9933_v60  ;;  %v312_v60 = vld [vmem:[%s18584_s1 + $0x810] sm:$0xff]  ;;  %v9985_v63 = vpack.c.bf16 %v361_v56, %v360_v55  ;;  %v2225_v6 = vcombine.high %v12700_v57, %v12700_v57  ;;  %v339_v55 = vld [vmem:[%s18584_s1 + $0x8e8] sm:$0xff]  ;;  %v370_v56 = vld [vmem:[%s18584_s1 + $0x9e0] sm:$0xff] }
  0x75   :  { %9904 = vmatpush3.bf16.msra.mxu0 %v9903_v2  ;;  %v331_v2 = vld [vmem:[%s18584_s1 + $0x8a8] sm:$0xff]  ;;  %v9955_v7 = vpack.c.bf16 %v313_v61, %v312_v60  ;;  %v9973_v60 = vpack.c.bf16 %v339_v55, %v338_v33  ;;  %v322_v61 = vld [vmem:[%s18584_s1 + $0x860] sm:$0xff] }
  0x76   :  { %9906 = vmatprep.subr.bf16.mxu0 %v9905_v4  ;;  %v362_v4 = vld [vmem:[%s18584_s1 + $0x9a0] sm:$0xff]  ;;  %v9957_v9 = vpack.c.bf16 %v331_v2, %v330_v1  ;;  %v355_v1 = vld [vmem:[%s18584_s1 + $0x968] sm:$0xff]  ;;  %v340_v2 = vld [vmem:[%s18584_s1 + $0x8f0] sm:$0xff] }
  0x77   :  { %9936 = vmatpush3.bf16.msra.mxu1 %v9935_v3  ;;  %v2224_v3 = vcombine.high %v12691_v54, %v12691_v54  ;;  %v9989_v14 = vpack.c.bf16 %v363_v5, %v362_v4  ;;  %v372_v4 = vld [vmem:[%s18584_s1 + $0x9f0] sm:$0xff]  ;;  %v373_v5 = vld [vmem:[%s18584_s1 + $0x9f8] sm:$0xff]  ;;  %v379_v33 = vld [vmem:[%s18584_s1 + $0xa28] sm:$0xff] }
  0x78   :  { %9938 = vmatprep.subr.bf16.mxu1 %v9937_v8  ;;  %v9987_v8 = vpack.c.bf16 %v345_v0, %v344_v62  ;;  %v323_v62 = vld [vmem:[%s18584_s1 + $0x868] sm:$0xff]  ;;  %v410_v55 = vld [vmem:[%s18584_s1 + $0xb20] sm:$0xff] }
  0x79   :  { %9908 = vmatpush3.bf16.msra.mxu0 %v9907_v17  ;;  %v333_v17 = vld [vmem:[%s18584_s1 + $0x8b8] sm:$0xff] }
  0x7a   :  { %9910 = vmatprep.subr.bf16.mxu0 %v9909_v19  ;;  %v365_v19 = vld [vmem:[%s18584_s1 + $0x9b8] sm:$0xff]  ;;  %v9961_v22 = vpack.c.bf16 %v333_v17, %v332_v16  ;;  %v390_v16 = vld [vmem:[%s18584_s1 + $0xa80] sm:$0xff]  ;;  %v391_v17 = vld [vmem:[%s18584_s1 + $0xa88] sm:$0xff] }
  0x7b   :  { %9940 = vmatpush3.bf16.msra.mxu1 %v9939_v18  ;;  %v364_v18 = vld [vmem:[%s18584_s1 + $0x9b0] sm:$0xff] }
  0x7c   :  { %9942 = vmatprep.subr.bf16.mxu1 %v9941_v23  ;;  %v316_v23 = vld [vmem:[%s18584_s1 + $0x830] sm:$0xff]  ;;  %v9993_v26 = vpack.c.bf16 %v365_v19, %v364_v18  ;;  %v422_v18 = vld [vmem:[%s18584_s1 + $0xb80] sm:$0xff]  ;;  %v423_v19 = vld [vmem:[%s18584_s1 + $0xb88] sm:$0xff] }
  0x7d   :  { %9912 = vmatpush3.bf16.msra.mxu0 %v9911_v29  ;;  %v335_v29 = vld [vmem:[%s18584_s1 + $0x8c8] sm:$0xff]  ;;  %v10045_v27 = vpack.c.bf16 %v423_v19, %v422_v18  ;;  %v400_v18 = vld [vmem:[%s18584_s1 + $0xad0] sm:$0xff]  ;;  %v401_v19 = vld [vmem:[%s18584_s1 + $0xad8] sm:$0xff] }
  0x7e   :  { %9914 = vmatprep.subr.bf16.mxu0 %v9913_v32  ;;  %v9963_v32 = vpack.c.bf16 %v317_v24, %v316_v23  ;;  %v9965_v34 = vpack.c.bf16 %v335_v29, %v334_v28  ;;  %v10013_v23 = vpack.c.bf16 %v391_v17, %v390_v16  ;;  %v374_v24 = vld [vmem:[%s18584_s1 + $0xa00] sm:$0xff]  ;;  %v407_v28 = vld [vmem:[%s18584_s1 + $0xb08] sm:$0xff]  ;;  %v392_v29 = vld [vmem:[%s18584_s1 + $0xa90] sm:$0xff] }
  0x7f   :  { %9944 = vmatpush3.bf16.msra.mxu1 %v9943_v31  ;;  %v367_v31 = vld [vmem:[%s18584_s1 + $0x9c8] sm:$0xff] }
  0x80   :  { %9946 = vmatprep.subr.bf16.mxu1 %v9945_v36  ;;  %v319_v36 = vld [vmem:[%s18584_s1 + $0x848] sm:$0xff]  ;;  %v9997_v37 = vpack.c.bf16 %v367_v31, %v366_v30  ;;  %v393_v30 = vld [vmem:[%s18584_s1 + $0xa98] sm:$0xff] }
  0x81   :  { %9916 = vmatpush3.bf16.msra.mxu0 %v9915_v43  ;;  %v369_v43 = vld [vmem:[%s18584_s1 + $0x9d8] sm:$0xff]  ;;  %v415_v17 = vld [vmem:[%s18584_s1 + $0xb48] sm:$0xff] }
  0x82   :  { %9950 = vmatprep.subr.bf16.mxu0 %v9949_v46  ;;  %v9999_v46 = vpack.c.bf16 %v351_v38, %v350_v52  ;;  %v10001_v51 = vpack.c.bf16 %v369_v43, %v368_v41  ;;  %v10017_v52 = vpack.c.bf16 %v393_v30, %v392_v29  ;;  %v377_v38 = vld [vmem:[%s18584_s1 + $0xa18] sm:$0xff]  ;;  %v394_v43 = vld [vmem:[%s18584_s1 + $0xaa0] sm:$0xff] }
  0x83   :  { %9948 = vmatpush3.bf16.msra.mxu1 %v9947_v44  ;;  %v9967_v44 = vpack.c.bf16 %v319_v36, %v318_v35  ;;  %v10015_v35 = vpack.c.bf16 %v375_v25, %v374_v24  ;;  %v409_v41 = vld [vmem:[%s18584_s1 + $0xb18] sm:$0xff]  ;;  %v10033_v24 = vpack.c.bf16 %v401_v19, %v400_v18  ;;  %v384_v25 = vld [vmem:[%s18584_s1 + $0xa50] sm:$0xff]  ;;  %v402_v30 = vld [vmem:[%s18584_s1 + $0xae0] sm:$0xff] }
  0x84   :  { %9982 = vmatprep.subr.bf16.mxu1 %v9981_v50  ;;  %3298 = vmatmul.mubr.f32.vlgmr.msra.gmra.mrb[6].mxu0 %v12484_v11  ;;  %v314_v11 = vld [vmem:[%s18584_s1 + $0x820] sm:$0xff]  ;;  %v352_v50 = vld [vmem:[%s18584_s1 + $0x950] sm:$0xff]  ;;  %v417_v29 = vld [vmem:[%s18584_s1 + $0xb58] sm:$0xff] }
  0x85   :  { %9952 = vmatpush3.bf16.msra.mxu0 %v9951_v45  ;;  %3437 = vmatprep.mubr.f32.mxu0 %v2224_v3  ;;  %v9959_v20 = vpack.c.bf16 %v315_v10, %v314_v11  ;;  %v371_v45 = vld [vmem:[%s18584_s1 + $0x9e8] sm:$0xff]  ;;  %v341_v3 = vld [vmem:[%s18584_s1 + $0x8f8] sm:$0xff]  ;;  %v324_v11 = vld [vmem:[%s18584_s1 + $0x870] sm:$0xff] }
  0x86   :  { %3368 = vmatmul.mubr.f32.vlgmr.msra.gmra.mrb[6].mxu1 %v12493_v15  ;;  %9954 = vmatprep.subr.bf16.mxu0 %v9953_v59  ;;  %v347_v15 = vld [vmem:[%s18584_s1 + $0x928] sm:$0xff]  ;;  %v10003_v59 = vpack.c.bf16 %v353_v53, %v352_v50  ;;  %v10005_v0 = vpack.c.bf16 %v371_v45, %v370_v56  ;;  %v325_v10 = vld [vmem:[%s18584_s1 + $0x878] sm:$0xff]  ;;  %v396_v45 = vld [vmem:[%s18584_s1 + $0xab0] sm:$0xff] }
  0x87   :  { %9984 = vmatpush3.bf16.msra.mxu1 %v9983_v58  ;;  %3507 = vmatprep.mubr.f32.mxu1 %v2225_v6  ;;  %v9991_v21 = vpack.c.bf16 %v347_v15, %v346_v12  ;;  %v9971_v58 = vpack.c.bf16 %v321_v49, %v320_v48  ;;  %v9975_v6 = vpack.c.bf16 %v323_v62, %v322_v61  ;;  %v356_v12 = vld [vmem:[%s18584_s1 + $0x970] sm:$0xff]  ;;  %v357_v15 = vld [vmem:[%s18584_s1 + $0x978] sm:$0xff]  ;;  %v427_v48 = vld [vmem:[%s18584_s1 + $0xba8] sm:$0xff] }
  0x88   :  { %9986 = vmatprep.subr.bf16.mxu1 %v9985_v63  ;;  %v354_v63 = vld [vmem:[%s18584_s1 + $0x960] sm:$0xff]  ;;  %v472_v18 = vld [vmem:[%s18584_s1 + $0xd10] sm:$0xff] }
  0x89   :  { %9956 = vmatpush3.bf16.msra.mxu0 %v9955_v7  ;;  %v27_v7 = vld [vmem:[%s18585_s0 + $0x28] sm:$0xff] }
  0x8a   :  { %9958 = vmatprep.subr.bf16.mxu0 %v9957_v9  ;;  %v9977_v9 = vpack.c.bf16 %v341_v3, %v340_v2  ;;  %v12898_v31 = vrot.slane %v27_v7, %v11989_v13  ;;  %v412_v2 = vld [vmem:[%s18584_s1 + $0xb30] sm:$0xff] }
  0x8b   :  { %9988 = vmatpush3.bf16.msra.mxu1 %v9987_v8  ;;  %v10007_v8 = vpack.c.bf16 %v355_v1, %v354_v63  ;;  %v381_v1 = vld [vmem:[%s18584_s1 + $0xa38] sm:$0xff] }
  0x8c   :  { %9990 = vmatprep.subr.bf16.mxu1 %v9989_v14  ;;  %v10009_v14 = vpack.c.bf16 %v373_v5, %v372_v4  ;;  %v413_v4 = vld [vmem:[%s18584_s1 + $0xb38] sm:$0xff]  ;;  %v398_v5 = vld [vmem:[%s18584_s1 + $0xac0] sm:$0xff] }
  0x8d   :  { %9960 = vmatpush3.bf16.msra.mxu0 %v9959_v20  ;;  %v2226_v20 = vcombine.high %v27_v7, %v27_v7  ;;  %v430_v7 = vld [vmem:[%s18584_s1 + $0xbc0] sm:$0xff] }
  0x8e   :  { %9962 = vmatprep.subr.bf16.mxu0 %v9961_v22  ;;  %v10011_v22 = vpack.c.bf16 %v357_v15, %v356_v12  ;;  %v382_v12 = vld [vmem:[%s18584_s1 + $0xa40] sm:$0xff] }
  0x8f   :  { %9992 = vmatpush3.bf16.msra.mxu1 %v9991_v21  ;;  %v9979_v21 = vpack.c.bf16 %v325_v10, %v324_v11  ;;  %v10059_v11 = vpack.c.bf16 %v413_v4, %v412_v2  ;;  %v414_v15 = vld [vmem:[%s18584_s1 + $0xb40] sm:$0xff]  ;;  %v439_v2 = vld [vmem:[%s18584_s1 + $0xc08] sm:$0xff] }
  0x90   :  { %9994 = vmatprep.subr.bf16.mxu1 %v9993_v26  ;;  %v406_v26 = vld [vmem:[%s18584_s1 + $0xb00] sm:$0xff] }
  0x91   :  { %9964 = vmatpush3.bf16.msra.mxu0 %v9963_v32  ;;  %v424_v32 = vld [vmem:[%s18584_s1 + $0xb90] sm:$0xff]  ;;  %v10047_v36 = vpack.c.bf16 %v407_v28, %v406_v26  ;;  %v385_v26 = vld [vmem:[%s18584_s1 + $0xa58] sm:$0xff] }
  0x92   :  { %9966 = vmatprep.subr.bf16.mxu0 %v9965_v34  ;;  %v12907_v34 = vrot.slane %v2226_v20, %v11989_v13  ;;  %v432_v20 = vld [vmem:[%s18584_s1 + $0xbd0] sm:$0xff] }
  0x93   :  { %9996 = vmatpush3.bf16.msra.mxu1 %v9995_v42  ;;  %v425_v42 = vld [vmem:[%s18584_s1 + $0xb98] sm:$0xff] }
  0x94   :  { %9998 = vmatprep.subr.bf16.mxu1 %v9997_v37  ;;  %v376_v37 = vld [vmem:[%s18584_s1 + $0xa10] sm:$0xff]  ;;  %v10049_v40 = vpack.c.bf16 %v425_v42, %v424_v32  ;;  %v2242_v49 = vcombine.high %v12907_v34, %v12907_v34  ;;  %v403_v32 = vld [vmem:[%s18584_s1 + $0xae8] sm:$0xff]  ;;  %v434_v42 = vld [vmem:[%s18584_s1 + $0xbe0] sm:$0xff] }
  0x95   :  { %9968 = vmatpush3.bf16.msra.mxu0 %v9967_v44  ;;  %v395_v44 = vld [vmem:[%s18584_s1 + $0xaa8] sm:$0xff]  ;;  %v10019_v50 = vpack.c.bf16 %v377_v38, %v376_v37  ;;  %v10037_v37 = vpack.c.bf16 %v403_v32, %v402_v30  ;;  %v386_v38 = vld [vmem:[%s18584_s1 + $0xa60] sm:$0xff] }
  0x96   :  { %9970 = vmatprep.subr.bf16.mxu0 %v9969_v47  ;;  %v426_v47 = vld [vmem:[%s18584_s1 + $0xba0] sm:$0xff]  ;;  %v10021_v53 = vpack.c.bf16 %v395_v44, %v394_v43  ;;  %v419_v43 = vld [vmem:[%s18584_s1 + $0xb68] sm:$0xff]  ;;  %v404_v44 = vld [vmem:[%s18584_s1 + $0xaf0] sm:$0xff] }
  0x97   :  { %10000 = vmatpush3.bf16.msra.mxu1 %v9999_v46  ;;  %v2241_v46 = vcombine.high %v12898_v31, %v12898_v31  ;;  %v10053_v56 = vpack.c.bf16 %v427_v48, %v426_v47  ;;  %v436_v47 = vld [vmem:[%s18584_s1 + $0xbf0] sm:$0xff]  ;;  %v437_v48 = vld [vmem:[%s18584_s1 + $0xbf8] sm:$0xff]  ;;  %v443_v30 = vld [vmem:[%s18584_s1 + $0xc28] sm:$0xff] }
  0x98   :  { %10002 = vmatprep.subr.bf16.mxu1 %v10001_v51  ;;  %v10051_v51 = vpack.c.bf16 %v409_v41, %v408_v39  ;;  %v387_v39 = vld [vmem:[%s18584_s1 + $0xa68] sm:$0xff]  ;;  %v474_v32 = vld [vmem:[%s18584_s1 + $0xd20] sm:$0xff] }
  0x99   :  { %9972 = vmatpush3.bf16.msra.mxu0 %v9971_v58  ;;  %v397_v58 = vld [vmem:[%s18584_s1 + $0xab8] sm:$0xff] }
  0x9a   :  { %9974 = vmatprep.subr.bf16.mxu0 %v9973_v60  ;;  %v429_v60 = vld [vmem:[%s18584_s1 + $0xbb8] sm:$0xff]  ;;  %v10025_v63 = vpack.c.bf16 %v397_v58, %v396_v45  ;;  %v454_v45 = vld [vmem:[%s18584_s1 + $0xc80] sm:$0xff]  ;;  %v455_v58 = vld [vmem:[%s18584_s1 + $0xc88] sm:$0xff] }
  0x9b   :  { %10004 = vmatpush3.bf16.msra.mxu1 %v10003_v59  ;;  %v428_v59 = vld [vmem:[%s18584_s1 + $0xbb0] sm:$0xff] }
  0x9c   :  { %10006 = vmatprep.subr.bf16.mxu1 %v10005_v0  ;;  %v380_v0 = vld [vmem:[%s18584_s1 + $0xa30] sm:$0xff]  ;;  %v10057_v3 = vpack.c.bf16 %v429_v60, %v428_v59  ;;  %v486_v59 = vld [vmem:[%s18584_s1 + $0xd80] sm:$0xff]  ;;  %v487_v60 = vld [vmem:[%s18584_s1 + $0xd88] sm:$0xff] }
  0x9d   :  { %9976 = vmatpush3.bf16.msra.mxu0 %v9975_v6  ;;  %v399_v6 = vld [vmem:[%s18584_s1 + $0xac8] sm:$0xff]  ;;  %v10109_v4 = vpack.c.bf16 %v487_v60, %v486_v59  ;;  %v464_v59 = vld [vmem:[%s18584_s1 + $0xcd0] sm:$0xff]  ;;  %v465_v60 = vld [vmem:[%s18584_s1 + $0xcd8] sm:$0xff] }
  0x9e   :  { %9978 = vmatprep.subr.bf16.mxu0 %v9977_v9  ;;  %v10027_v9 = vpack.c.bf16 %v381_v1, %v380_v0  ;;  %v10029_v10 = vpack.c.bf16 %v399_v6, %v398_v5  ;;  %v10077_v0 = vpack.c.bf16 %v455_v58, %v454_v45  ;;  %v438_v1 = vld [vmem:[%s18584_s1 + $0xc00] sm:$0xff]  ;;  %v471_v5 = vld [vmem:[%s18584_s1 + $0xd08] sm:$0xff]  ;;  %v456_v6 = vld [vmem:[%s18584_s1 + $0xc90] sm:$0xff] }
  0x9f   :  { %10008 = vmatpush3.bf16.msra.mxu1 %v10007_v8  ;;  %v431_v8 = vld [vmem:[%s18584_s1 + $0xbc8] sm:$0xff] }
  0xa0   :  { %10010 = vmatprep.subr.bf16.mxu1 %v10009_v14  ;;  %v383_v14 = vld [vmem:[%s18584_s1 + $0xa48] sm:$0xff]  ;;  %v10061_v16 = vpack.c.bf16 %v431_v8, %v430_v7  ;;  %v457_v7 = vld [vmem:[%s18584_s1 + $0xc98] sm:$0xff] }
  0xa1   :  { %9980 = vmatpush3.bf16.msra.mxu0 %v9979_v21  ;;  %v433_v21 = vld [vmem:[%s18584_s1 + $0xbd8] sm:$0xff]  ;;  %v479_v58 = vld [vmem:[%s18584_s1 + $0xd48] sm:$0xff] }
  0xa2   :  { %10014 = vmatprep.subr.bf16.mxu0 %v10013_v23  ;;  %v10063_v23 = vpack.c.bf16 %v415_v17, %v414_v15  ;;  %v10065_v28 = vpack.c.bf16 %v433_v21, %v432_v20  ;;  %v10081_v15 = vpack.c.bf16 %v457_v7, %v456_v6  ;;  %v441_v17 = vld [vmem:[%s18584_s1 + $0xc18] sm:$0xff]  ;;  %v458_v21 = vld [vmem:[%s18584_s1 + $0xca0] sm:$0xff] }
  0xa3   :  { %10012 = vmatpush3.bf16.msra.mxu1 %v10011_v22  ;;  %v10031_v22 = vpack.c.bf16 %v383_v14, %v382_v12  ;;  %v10079_v12 = vpack.c.bf16 %v439_v2, %v438_v1  ;;  %v473_v20 = vld [vmem:[%s18584_s1 + $0xd18] sm:$0xff]  ;;  %v10097_v1 = vpack.c.bf16 %v465_v60, %v464_v59  ;;  %v448_v2 = vld [vmem:[%s18584_s1 + $0xc50] sm:$0xff]  ;;  %v466_v7 = vld [vmem:[%s18584_s1 + $0xce0] sm:$0xff] }
  0xa4   :  { %10046 = vmatprep.subr.bf16.mxu1 %v10045_v27  ;;  %3438 = vmatmul.mubr.f32.vlgmr.msra.gmra.mrb[8].mxu0 %v12691_v54  ;;  %v378_v54 = vld [vmem:[%s18584_s1 + $0xa20] sm:$0xff]  ;;  %v416_v27 = vld [vmem:[%s18584_s1 + $0xb50] sm:$0xff]  ;;  %v481_v6 = vld [vmem:[%s18584_s1 + $0xd58] sm:$0xff] }
  0xa5   :  { %10016 = vmatpush3.bf16.msra.mxu0 %v10015_v35  ;;  %3577 = vmatprep.mubr.f32.mxu0 %v2241_v46  ;;  %v10023_v61 = vpack.c.bf16 %v379_v33, %v378_v54  ;;  %v435_v35 = vld [vmem:[%s18584_s1 + $0xbe8] sm:$0xff]  ;;  %v405_v46 = vld [vmem:[%s18584_s1 + $0xaf8] sm:$0xff]  ;;  %v388_v54 = vld [vmem:[%s18584_s1 + $0xa70] sm:$0xff] }
  0xa6   :  { %3508 = vmatmul.mubr.f32.vlgmr.msra.gmra.mrb[8].mxu1 %v12700_v57  ;;  %10018 = vmatprep.subr.bf16.mxu0 %v10017_v52  ;;  %v411_v57 = vld [vmem:[%s18584_s1 + $0xb28] sm:$0xff]  ;;  %v10067_v52 = vpack.c.bf16 %v417_v29, %v416_v27  ;;  %v10069_v41 = vpack.c.bf16 %v435_v35, %v434_v42  ;;  %v389_v33 = vld [vmem:[%s18584_s1 + $0xa78] sm:$0xff]  ;;  %v460_v35 = vld [vmem:[%s18584_s1 + $0xcb0] sm:$0xff] }
  0xa7   :  { %10048 = vmatpush3.bf16.msra.mxu1 %v10047_v36  ;;  %3647 = vmatprep.mubr.f32.mxu1 %v2242_v49  ;;  %v10055_v62 = vpack.c.bf16 %v411_v57, %v410_v55  ;;  %v10035_v36 = vpack.c.bf16 %v385_v26, %v384_v25  ;;  %v10039_v49 = vpack.c.bf16 %v387_v39, %v386_v38  ;;  %v420_v55 = vld [vmem:[%s18584_s1 + $0xb70] sm:$0xff]  ;;  %v421_v57 = vld [vmem:[%s18584_s1 + $0xb78] sm:$0xff]  ;;  %v491_v25 = vld [vmem:[%s18584_s1 + $0xda8] sm:$0xff] }
  0xa8   :  { %10050 = vmatprep.subr.bf16.mxu1 %v10049_v40  ;;  %v418_v40 = vld [vmem:[%s18584_s1 + $0xb60] sm:$0xff]  ;;  %v536_v59 = vld [vmem:[%s18584_s1 + $0xf10] sm:$0xff] }
  0xa9   :  { %10020 = vmatpush3.bf16.msra.mxu0 %v10019_v50  ;;  %v28_v50 = vld [vmem:[%s18585_s0 + $0x30] sm:$0xff] }
  0xaa   :  { %10022 = vmatprep.subr.bf16.mxu0 %v10021_v53  ;;  %v10041_v53 = vpack.c.bf16 %v405_v46, %v404_v44  ;;  %v13105_v8 = vrot.slane %v28_v50, %v11989_v13  ;;  %v476_v44 = vld [vmem:[%s18584_s1 + $0xd30] sm:$0xff] }
  0xab   :  { %10052 = vmatpush3.bf16.msra.mxu1 %v10051_v51  ;;  %v10071_v51 = vpack.c.bf16 %v419_v43, %v418_v40  ;;  %v445_v43 = vld [vmem:[%s18584_s1 + $0xc38] sm:$0xff] }
  0xac   :  { %10054 = vmatprep.subr.bf16.mxu1 %v10053_v56  ;;  %v10073_v56 = vpack.c.bf16 %v437_v48, %v436_v47  ;;  %v477_v47 = vld [vmem:[%s18584_s1 + $0xd38] sm:$0xff]  ;;  %v462_v48 = vld [vmem:[%s18584_s1 + $0xcc0] sm:$0xff] }
  0xad   :  { %10024 = vmatpush3.bf16.msra.mxu0 %v10023_v61  ;;  %v2243_v61 = vcombine.high %v28_v50, %v28_v50  ;;  %v494_v50 = vld [vmem:[%s18584_s1 + $0xdc0] sm:$0xff] }
  0xae   :  { %10026 = vmatprep.subr.bf16.mxu0 %v10025_v63  ;;  %v10075_v63 = vpack.c.bf16 %v421_v57, %v420_v55  ;;  %v446_v55 = vld [vmem:[%s18584_s1 + $0xc40] sm:$0xff] }
  0xaf   :  { %10056 = vmatpush3.bf16.msra.mxu1 %v10055_v62  ;;  %v10043_v62 = vpack.c.bf16 %v389_v33, %v388_v54  ;;  %v10123_v54 = vpack.c.bf16 %v477_v47, %v476_v44  ;;  %v478_v57 = vld [vmem:[%s18584_s1 + $0xd40] sm:$0xff]  ;;  %v503_v44 = vld [vmem:[%s18584_s1 + $0xe08] sm:$0xff] }
  0xb0   :  { %10058 = vmatprep.subr.bf16.mxu1 %v10057_v3  ;;  %v470_v3 = vld [vmem:[%s18584_s1 + $0xd00] sm:$0xff] }
  0xb1   :  { %10028 = vmatpush3.bf16.msra.mxu0 %v10027_v9  ;;  %v488_v9 = vld [vmem:[%s18584_s1 + $0xd90] sm:$0xff]  ;;  %v10111_v14 = vpack.c.bf16 %v471_v5, %v470_v3  ;;  %v449_v3 = vld [vmem:[%s18584_s1 + $0xc58] sm:$0xff] }
  0xb2   :  { %10030 = vmatprep.subr.bf16.mxu0 %v10029_v10  ;;  %v13114_v10 = vrot.slane %v2243_v61, %v11989_v13  ;;  %v496_v61 = vld [vmem:[%s18584_s1 + $0xdd0] sm:$0xff] }
  0xb3   :  { %10060 = vmatpush3.bf16.msra.mxu1 %v10059_v11  ;;  %v489_v11 = vld [vmem:[%s18584_s1 + $0xd98] sm:$0xff] }
  0xb4   :  { %10062 = vmatprep.subr.bf16.mxu1 %v10061_v16  ;;  %v440_v16 = vld [vmem:[%s18584_s1 + $0xc10] sm:$0xff]  ;;  %v10113_v19 = vpack.c.bf16 %v489_v11, %v488_v9  ;;  %v2259_v26 = vcombine.high %v13114_v10, %v13114_v10  ;;  %v467_v9 = vld [vmem:[%s18584_s1 + $0xce8] sm:$0xff]  ;;  %v498_v11 = vld [vmem:[%s18584_s1 + $0xde0] sm:$0xff] }
  0xb5   :  { %10032 = vmatpush3.bf16.msra.mxu0 %v10031_v22  ;;  %v459_v22 = vld [vmem:[%s18584_s1 + $0xca8] sm:$0xff]  ;;  %v10083_v27 = vpack.c.bf16 %v441_v17, %v440_v16  ;;  %v10101_v16 = vpack.c.bf16 %v467_v9, %v466_v7  ;;  %v450_v17 = vld [vmem:[%s18584_s1 + $0xc60] sm:$0xff] }
  0xb6   :  { %10034 = vmatprep.subr.bf16.mxu0 %v10033_v24  ;;  %v490_v24 = vld [vmem:[%s18584_s1 + $0xda0] sm:$0xff]  ;;  %v10085_v29 = vpack.c.bf16 %v459_v22, %v458_v21  ;;  %v483_v21 = vld [vmem:[%s18584_s1 + $0xd68] sm:$0xff]  ;;  %v468_v22 = vld [vmem:[%s18584_s1 + $0xcf0] sm:$0xff] }
  0xb7   :  { %10064 = vmatpush3.bf16.msra.mxu1 %v10063_v23  ;;  %v2258_v23 = vcombine.high %v13105_v8, %v13105_v8  ;;  %v10117_v42 = vpack.c.bf16 %v491_v25, %v490_v24  ;;  %v500_v24 = vld [vmem:[%s18584_s1 + $0xdf0] sm:$0xff]  ;;  %v501_v25 = vld [vmem:[%s18584_s1 + $0xdf8] sm:$0xff]  ;;  %v507_v7 = vld [vmem:[%s18584_s1 + $0xe28] sm:$0xff] }
  0xb8   :  { %10066 = vmatprep.subr.bf16.mxu1 %v10065_v28  ;;  %v10115_v28 = vpack.c.bf16 %v473_v20, %v472_v18  ;;  %v451_v18 = vld [vmem:[%s18584_s1 + $0xc68] sm:$0xff]  ;;  %v538_v9 = vld [vmem:[%s18584_s1 + $0xf20] sm:$0xff] }
  0xb9   :  { %10036 = vmatpush3.bf16.msra.mxu0 %v10035_v36  ;;  %v461_v36 = vld [vmem:[%s18584_s1 + $0xcb8] sm:$0xff] }
  0xba   :  { %10038 = vmatprep.subr.bf16.mxu0 %v10037_v37  ;;  %v493_v37 = vld [vmem:[%s18584_s1 + $0xdb8] sm:$0xff]  ;;  %v10089_v40 = vpack.c.bf16 %v461_v36, %v460_v35  ;;  %v518_v35 = vld [vmem:[%s18584_s1 + $0xe80] sm:$0xff]  ;;  %v519_v36 = vld [vmem:[%s18584_s1 + $0xe88] sm:$0xff] }
  0xbb   :  { %10068 = vmatpush3.bf16.msra.mxu1 %v10067_v52  ;;  %v492_v52 = vld [vmem:[%s18584_s1 + $0xdb0] sm:$0xff] }
  0xbc   :  { %10070 = vmatprep.subr.bf16.mxu1 %v10069_v41  ;;  %v444_v41 = vld [vmem:[%s18584_s1 + $0xc30] sm:$0xff]  ;;  %v10121_v46 = vpack.c.bf16 %v493_v37, %v492_v52  ;;  %v550_v52 = vld [vmem:[%s18584_s1 + $0xf80] sm:$0xff]  ;;  %v551_v37 = vld [vmem:[%s18584_s1 + $0xf88] sm:$0xff] }
  0xbd   :  { %10040 = vmatpush3.bf16.msra.mxu0 %v10039_v49  ;;  %v463_v49 = vld [vmem:[%s18584_s1 + $0xcc8] sm:$0xff]  ;;  %v10173_v47 = vpack.c.bf16 %v551_v37, %v550_v52  ;;  %v528_v52 = vld [vmem:[%s18584_s1 + $0xed0] sm:$0xff]  ;;  %v529_v37 = vld [vmem:[%s18584_s1 + $0xed8] sm:$0xff] }
  0xbe   :  { %10042 = vmatprep.subr.bf16.mxu0 %v10041_v53  ;;  %v10091_v53 = vpack.c.bf16 %v445_v43, %v444_v41  ;;  %v10093_v33 = vpack.c.bf16 %v463_v49, %v462_v48  ;;  %v10141_v41 = vpack.c.bf16 %v519_v36, %v518_v35  ;;  %v502_v43 = vld [vmem:[%s18584_s1 + $0xe00] sm:$0xff]  ;;  %v535_v48 = vld [vmem:[%s18584_s1 + $0xf08] sm:$0xff]  ;;  %v520_v49 = vld [vmem:[%s18584_s1 + $0xe90] sm:$0xff] }
  0xbf   :  { %10072 = vmatpush3.bf16.msra.mxu1 %v10071_v51  ;;  %v495_v51 = vld [vmem:[%s18584_s1 + $0xdc8] sm:$0xff] }
  0xc0   :  { %10074 = vmatprep.subr.bf16.mxu1 %v10073_v56  ;;  %v447_v56 = vld [vmem:[%s18584_s1 + $0xc48] sm:$0xff]  ;;  %v10125_v45 = vpack.c.bf16 %v495_v51, %v494_v50  ;;  %v521_v50 = vld [vmem:[%s18584_s1 + $0xe98] sm:$0xff] }
  0xc1   :  { %10044 = vmatpush3.bf16.msra.mxu0 %v10043_v62  ;;  %v497_v62 = vld [vmem:[%s18584_s1 + $0xdd8] sm:$0xff]  ;;  %v543_v36 = vld [vmem:[%s18584_s1 + $0xf48] sm:$0xff] }
  0xc2   :  { %10078 = vmatprep.subr.bf16.mxu0 %v10077_v0  ;;  %v10127_v0 = vpack.c.bf16 %v479_v58, %v478_v57  ;;  %v10129_v5 = vpack.c.bf16 %v497_v62, %v496_v61  ;;  %v10145_v57 = vpack.c.bf16 %v521_v50, %v520_v49  ;;  %v505_v58 = vld [vmem:[%s18584_s1 + $0xe18] sm:$0xff]  ;;  %v522_v62 = vld [vmem:[%s18584_s1 + $0xea0] sm:$0xff] }
  0xc3   :  { %10076 = vmatpush3.bf16.msra.mxu1 %v10075_v63  ;;  %v10095_v63 = vpack.c.bf16 %v447_v56, %v446_v55  ;;  %v10143_v55 = vpack.c.bf16 %v503_v44, %v502_v43  ;;  %v537_v61 = vld [vmem:[%s18584_s1 + $0xf18] sm:$0xff]  ;;  %v10161_v43 = vpack.c.bf16 %v529_v37, %v528_v52  ;;  %v512_v44 = vld [vmem:[%s18584_s1 + $0xe50] sm:$0xff]  ;;  %v530_v50 = vld [vmem:[%s18584_s1 + $0xee0] sm:$0xff] }
  0xc4   :  { %10110 = vmatprep.subr.bf16.mxu1 %v10109_v4  ;;  %3578 = vmatmul.mubr.f32.vlgmr.msra.gmra.mrb[10].mxu0 %v12898_v31  ;;  %v442_v31 = vld [vmem:[%s18584_s1 + $0xc20] sm:$0xff]  ;;  %v480_v4 = vld [vmem:[%s18584_s1 + $0xd50] sm:$0xff]  ;;  %v545_v49 = vld [vmem:[%s18584_s1 + $0xf58] sm:$0xff] }
  0xc5   :  { %10080 = vmatpush3.bf16.msra.mxu0 %v10079_v12  ;;  %3717 = vmatprep.mubr.f32.mxu0 %v2258_v23  ;;  %v10087_v38 = vpack.c.bf16 %v443_v30, %v442_v31  ;;  %v499_v12 = vld [vmem:[%s18584_s1 + $0xde8] sm:$0xff]  ;;  %v469_v23 = vld [vmem:[%s18584_s1 + $0xcf8] sm:$0xff]  ;;  %v452_v31 = vld [vmem:[%s18584_s1 + $0xc70] sm:$0xff] }
  0xc6   :  { %3648 = vmatmul.mubr.f32.vlgmr.msra.gmra.mrb[10].mxu1 %v12907_v34  ;;  %10082 = vmatprep.subr.bf16.mxu0 %v10081_v15  ;;  %v475_v34 = vld [vmem:[%s18584_s1 + $0xd28] sm:$0xff]  ;;  %v10131_v15 = vpack.c.bf16 %v481_v6, %v480_v4  ;;  %v10133_v20 = vpack.c.bf16 %v499_v12, %v498_v11  ;;  %v453_v30 = vld [vmem:[%s18584_s1 + $0xc78] sm:$0xff]  ;;  %v524_v12 = vld [vmem:[%s18584_s1 + $0xeb0] sm:$0xff] }
  0xc7   :  { %10112 = vmatpush3.bf16.msra.mxu1 %v10111_v14  ;;  %3787 = vmatprep.mubr.f32.mxu1 %v2259_v26  ;;  %v10119_v39 = vpack.c.bf16 %v475_v34, %v474_v32  ;;  %v10099_v14 = vpack.c.bf16 %v449_v3, %v448_v2  ;;  %v10103_v26 = vpack.c.bf16 %v451_v18, %v450_v17  ;;  %v484_v32 = vld [vmem:[%s18584_s1 + $0xd70] sm:$0xff]  ;;  %v485_v34 = vld [vmem:[%s18584_s1 + $0xd78] sm:$0xff]  ;;  %v555_v2 = vld [vmem:[%s18584_s1 + $0xfa8] sm:$0xff] }
  0xc8   :  { %10114 = vmatprep.subr.bf16.mxu1 %v10113_v19  ;;  %v482_v19 = vld [vmem:[%s18584_s1 + $0xd60] sm:$0xff]  ;;  %v616_v37 = vld [vmem:[%s18584_s1 + $0x1190] sm:$0xff] }
  0xc9   :  { %10084 = vmatpush3.bf16.msra.mxu0 %v10083_v27  ;;  %v29_v27 = vld [vmem:[%s18585_s0 + $0x38] sm:$0xff] }
  0xca   :  { %10086 = vmatprep.subr.bf16.mxu0 %v10085_v29  ;;  %v10105_v29 = vpack.c.bf16 %v469_v23, %v468_v22  ;;  %v13312_v51 = vrot.slane %v29_v27, %v11989_v13  ;;  %v540_v22 = vld [vmem:[%s18584_s1 + $0xf30] sm:$0xff] }
  0xcb   :  { %10116 = vmatpush3.bf16.msra.mxu1 %v10115_v28  ;;  %v10135_v28 = vpack.c.bf16 %v483_v21, %v482_v19  ;;  %v509_v21 = vld [vmem:[%s18584_s1 + $0xe38] sm:$0xff] }
  0xcc   :  { %10118 = vmatprep.subr.bf16.mxu1 %v10117_v42  ;;  %v10137_v42 = vpack.c.bf16 %v501_v25, %v500_v24  ;;  %v541_v24 = vld [vmem:[%s18584_s1 + $0xf38] sm:$0xff]  ;;  %v526_v25 = vld [vmem:[%s18584_s1 + $0xec0] sm:$0xff] }
  0xcd   :  { %10088 = vmatpush3.bf16.msra.mxu0 %v10087_v38  ;;  %v2260_v38 = vcombine.high %v29_v27, %v29_v27  ;;  %v558_v27 = vld [vmem:[%s18584_s1 + $0xfc0] sm:$0xff] }
  0xce   :  { %10090 = vmatprep.subr.bf16.mxu0 %v10089_v40  ;;  %v10139_v40 = vpack.c.bf16 %v485_v34, %v484_v32  ;;  %v510_v32 = vld [vmem:[%s18584_s1 + $0xe40] sm:$0xff] }
  0xcf   :  { %10120 = vmatpush3.bf16.msra.mxu1 %v10119_v39  ;;  %v10107_v39 = vpack.c.bf16 %v453_v30, %v452_v31  ;;  %v10187_v31 = vpack.c.bf16 %v541_v24, %v540_v22  ;;  %v542_v34 = vld [vmem:[%s18584_s1 + $0xf40] sm:$0xff]  ;;  %v583_v22 = vld [vmem:[%s18584_s1 + $0x1088] sm:$0xff] }
  0xd0   :  { %10122 = vmatprep.subr.bf16.mxu1 %v10121_v46  ;;  %v534_v46 = vld [vmem:[%s18584_s1 + $0xf00] sm:$0xff]  ;;  %v615_v24 = vld [vmem:[%s18584_s1 + $0x1188] sm:$0xff] }
  0xd1   :  { %10092 = vmatpush3.bf16.msra.mxu0 %v10091_v53  ;;  %v552_v53 = vld [vmem:[%s18584_s1 + $0xf90] sm:$0xff]  ;;  %v10175_v56 = vpack.c.bf16 %v535_v48, %v534_v46  ;;  %v513_v46 = vld [vmem:[%s18584_s1 + $0xe58] sm:$0xff] }
  0xd2   :  { %10094 = vmatprep.subr.bf16.mxu0 %v10093_v33  ;;  %v13321_v33 = vrot.slane %v2260_v38, %v11989_v13  ;;  %v560_v38 = vld [vmem:[%s18584_s1 + $0xfd0] sm:$0xff] }
  0xd3   :  { %10124 = vmatpush3.bf16.msra.mxu1 %v10123_v54  ;;  %v553_v54 = vld [vmem:[%s18584_s1 + $0xf98] sm:$0xff] }
  0xd4   :  { %10126 = vmatprep.subr.bf16.mxu1 %v10125_v45  ;;  %v504_v45 = vld [vmem:[%s18584_s1 + $0xe10] sm:$0xff]  ;;  %v10177_v60 = vpack.c.bf16 %v553_v54, %v552_v53  ;;  %v2276_v3 = vcombine.high %v13321_v33, %v13321_v33  ;;  %v531_v53 = vld [vmem:[%s18584_s1 + $0xee8] sm:$0xff]  ;;  %v562_v54 = vld [vmem:[%s18584_s1 + $0xfe0] sm:$0xff] }
  0xd5   :  { %10096 = vmatpush3.bf16.msra.mxu0 %v10095_v63  ;;  %v523_v63 = vld [vmem:[%s18584_s1 + $0xea8] sm:$0xff]  ;;  %v10147_v4 = vpack.c.bf16 %v505_v58, %v504_v45  ;;  %v10165_v45 = vpack.c.bf16 %v531_v53, %v530_v50  ;;  %v514_v58 = vld [vmem:[%s18584_s1 + $0xe60] sm:$0xff] }
  0xd6   :  { %10098 = vmatprep.subr.bf16.mxu0 %v10097_v1  ;;  %v554_v1 = vld [vmem:[%s18584_s1 + $0xfa0] sm:$0xff]  ;;  %v10149_v6 = vpack.c.bf16 %v523_v63, %v522_v62  ;;  %v547_v63 = vld [vmem:[%s18584_s1 + $0xf68] sm:$0xff] }
  0xd7   :  { %10128 = vmatpush3.bf16.msra.mxu1 %v10127_v0  ;;  %v2275_v0 = vcombine.high %v13312_v51, %v13312_v51  ;;  %v10181_v11 = vpack.c.bf16 %v555_v2, %v554_v1  ;;  %v533_v1 = vld [vmem:[%s18584_s1 + $0xef8] sm:$0xff]  ;;  %v7399_v2 = vld [vmem:[%s18586_s2] ss:$0 sm:$0xff]  ;;  %v587_v53 = vld [vmem:[%s18584_s1 + $0x10a8] sm:$0xff] }
  0xd8   :  { %10130 = vmatprep.subr.bf16.mxu1 %v10129_v5  ;;  %v10179_v5 = vpack.c.bf16 %v537_v61, %v536_v59  ;;  %v515_v59 = vld [vmem:[%s18584_s1 + $0xe68] sm:$0xff]  ;;  %v586_v50 = vld [vmem:[%s18584_s1 + $0x10a0] sm:$0xff] }
  0xd9   :  { %10100 = vmatpush3.bf16.msra.mxu0 %v10099_v14  ;;  %v525_v14 = vld [vmem:[%s18584_s1 + $0xeb8] sm:$0xff] }
  0xda   :  { %10102 = vmatprep.subr.bf16.mxu0 %v10101_v16  ;;  %v557_v16 = vld [vmem:[%s18584_s1 + $0xfb8] sm:$0xff]  ;;  %v10153_v19 = vpack.c.bf16 %v525_v14, %v524_v12 }
  0xdb   :  { %10132 = vmatpush3.bf16.msra.mxu1 %v10131_v15  ;;  %v556_v15 = vld [vmem:[%s18584_s1 + $0xfb0] sm:$0xff] }
  0xdc   :  { %10134 = vmatprep.subr.bf16.mxu1 %v10133_v20  ;;  %v508_v20 = vld [vmem:[%s18584_s1 + $0xe30] sm:$0xff]  ;;  %v10185_v23 = vpack.c.bf16 %v557_v16, %v556_v15  ;;  %v517_v16 = vld [vmem:[%s18584_s1 + $0xe78] sm:$0xff] }
  0xdd   :  { %10104 = vmatpush3.bf16.msra.mxu0 %v10103_v26  ;;  %v527_v26 = vld [vmem:[%s18584_s1 + $0xec8] sm:$0xff]  ;;  %v516_v15 = vld [vmem:[%s18584_s1 + $0xe70] sm:$0xff] }
  0xde   :  { %10106 = vmatprep.subr.bf16.mxu0 %v10105_v29  ;;  %v10155_v29 = vpack.c.bf16 %v509_v21, %v508_v20  ;;  %v10157_v30 = vpack.c.bf16 %v527_v26, %v526_v25  ;;  %v549_v20 = vld [vmem:[%s18584_s1 + $0xf78] sm:$0xff]  ;;  %v582_v21 = vld [vmem:[%s18584_s1 + $0x1080] sm:$0xff] }
  0xdf   :  { %10136 = vmatpush3.bf16.msra.mxu1 %v10135_v28  ;;  %v559_v28 = vld [vmem:[%s18584_s1 + $0xfc8] sm:$0xff] }
  0xe0   :  { %10138 = vmatprep.subr.bf16.mxu1 %v10137_v42  ;;  %v511_v42 = vld [vmem:[%s18584_s1 + $0xe48] sm:$0xff]  ;;  %v10189_v35 = vpack.c.bf16 %v559_v28, %v558_v27  ;;  %v10171_v27 = vpack.c.bf16 %v517_v16, %v516_v15 }
  0xe1   :  { %10108 = vmatpush3.bf16.msra.mxu0 %v10107_v39  ;;  %v561_v39 = vld [vmem:[%s18584_s1 + $0xfd8] sm:$0xff]  ;;  %v623_v15 = vld [vmem:[%s18584_s1 + $0x11c8] sm:$0xff] }
  0xe2   :  { %10142 = vmatprep.subr.bf16.mxu0 %v10141_v41  ;;  %v10191_v41 = vpack.c.bf16 %v543_v36, %v542_v34  ;;  %v10193_v48 = vpack.c.bf16 %v561_v39, %v560_v38  ;;  %v599_v34 = vld [vmem:[%s18584_s1 + $0x1108] sm:$0xff]  ;;  %v585_v36 = vld [vmem:[%s18584_s1 + $0x1098] sm:$0xff] }
  0xe3   :  { %10140 = vmatpush3.bf16.msra.mxu1 %v10139_v40  ;;  %v10159_v40 = vpack.c.bf16 %v511_v42, %v510_v32  ;;  %v598_v32 = vld [vmem:[%s18584_s1 + $0x1100] sm:$0xff]  ;;  %v617_v38 = vld [vmem:[%s18584_s1 + $0x1198] sm:$0xff] }
  0xe4   :  { %10174 = vmatprep.subr.bf16.mxu1 %v10173_v47  ;;  %3718 = vmatmul.mubr.f32.vlgmr.msra.gmra.mrb[12].mxu0 %v13105_v8  ;;  %v506_v8 = vld [vmem:[%s18584_s1 + $0xe20] sm:$0xff]  ;;  %v544_v47 = vld [vmem:[%s18584_s1 + $0xf50] sm:$0xff] }
  0xe5   :  { %10144 = vmatpush3.bf16.msra.mxu0 %v10143_v55  ;;  %3857 = vmatprep.mubr.f32.mxu0 %v2275_v0  ;;  %v10151_v17 = vpack.c.bf16 %v507_v7, %v506_v8  ;;  %v563_v55 = vld [vmem:[%s18584_s1 + $0xfe8] sm:$0xff]  ;;  %v532_v0 = vld [vmem:[%s18584_s1 + $0xef0] sm:$0xff] }
  0xe6   :  { %3788 = vmatmul.mubr.f32.vlgmr.msra.gmra.mrb[12].mxu1 %v13114_v10  ;;  %10146 = vmatprep.subr.bf16.mxu0 %v10145_v57  ;;  %v539_v10 = vld [vmem:[%s18584_s1 + $0xf28] sm:$0xff]  ;;  %v10195_v57 = vpack.c.bf16 %v545_v49, %v544_v47  ;;  %v10197_v62 = vpack.c.bf16 %v563_v55, %v562_v54  ;;  %v10169_v14 = vpack.c.bf16 %v533_v1, %v532_v0  ;;  %v600_v47 = vld [vmem:[%s18584_s1 + $0x1110] sm:$0xff]  ;;  %v601_v49 = vld [vmem:[%s18584_s1 + $0x1118] sm:$0xff] }
  0xe7   :  { %10176 = vmatpush3.bf16.msra.mxu1 %v10175_v56  ;;  %3927 = vmatprep.mubr.f32.mxu1 %v2276_v3  ;;  %v10183_v18 = vpack.c.bf16 %v539_v10, %v538_v9  ;;  %v10163_v56 = vpack.c.bf16 %v513_v46, %v512_v44  ;;  %v10167_v9 = vpack.c.bf16 %v515_v59, %v514_v58  ;;  %v568_v44 = vld [vmem:[%s18584_s1 + $0x1010] sm:$0xff]  ;;  %v569_v46 = vld [vmem:[%s18584_s1 + $0x1018] sm:$0xff]  ;;  %v618_v55 = vld [vmem:[%s18584_s1 + $0x11a0] sm:$0xff] }
  0xe8   :  { %10178 = vmatprep.subr.bf16.mxu1 %v10177_v60  ;;  %v546_v60 = vld [vmem:[%s18584_s1 + $0xf60] sm:$0xff]  ;;  %v10243_v58 = vpack.c.bf16 %v601_v49, %v600_v47  ;;  %v10213_v59 = vpack.c.bf16 %v587_v53, %v586_v50  ;;  %v589_v0 = vld [vmem:[%s18584_s1 + $0x10b8] sm:$0xff]  ;;  %v620_v1 = vld [vmem:[%s18584_s1 + $0x11b0] sm:$0xff] }
  0xe9   :  { %10148 = vmatpush3.bf16.msra.mxu0 %v10147_v4  ;;  %v10199_v12 = vpack.c.bf16 %v547_v63, %v546_v60  ;;  %v571_v60 = vld [vmem:[%s18584_s1 + $0x1028] sm:$0xff]  ;;  %v588_v63 = vld [vmem:[%s18584_s1 + $0x10b0] sm:$0xff]  ;;  %v578_v47 = vld [vmem:[%s18584_s1 + $0x1060] sm:$0xff] }
  0xea   :  { %10150 = vmatprep.subr.bf16.mxu0 %v10149_v6  ;;  %v565_v6 = vld [vmem:[%s18584_s1 + $0xff8] sm:$0xff]  ;;  %v610_v49 = vld [vmem:[%s18584_s1 + $0x1160] sm:$0xff] }
  0xeb   :  { %10180 = vmatpush3.bf16.msra.mxu1 %v10179_v5  ;;  %v564_v5 = vld [vmem:[%s18584_s1 + $0xff0] sm:$0xff] }
  0xec   :  { %10182 = vmatprep.subr.bf16.mxu1 %v10181_v11  ;;  %v30_v11 = vld [vmem:[%s18585_s0 + $0x40] sm:$0xff] }
  0xed   :  { %10152 = vmatpush3.bf16.msra.mxu0 %v10151_v17  ;;  %v548_v17 = vld [vmem:[%s18584_s1 + $0xf70] sm:$0xff]  ;;  %v2277_v25 = vcombine.high %v30_v11, %v30_v11  ;;  %v13524_v52 = vrot.slane %v30_v11, %v11989_v13  ;;  %v605_v11 = vld [vmem:[%s18584_s1 + $0x1138] sm:$0xff] }
  0xee   :  { %10154 = vmatprep.subr.bf16.mxu0 %v10153_v19  ;;  %v10201_v19 = vpack.c.bf16 %v565_v6, %v564_v5  ;;  %v10203_v28 = vpack.c.bf16 %v549_v20, %v548_v17  ;;  %v10217_v5 = vpack.c.bf16 %v589_v0, %v588_v63  ;;  %v572_v6 = vld [vmem:[%s18584_s1 + $0x1030] sm:$0xff]  ;;  %v575_v20 = vld [vmem:[%s18584_s1 + $0x1048] sm:$0xff] }
  0xef   :  { %10184 = vmatpush3.bf16.msra.mxu1 %v10183_v18  ;;  %v13533_v39 = vrot.slane %v2277_v25, %v11989_v13  ;;  %v2292_v54 = vcombine.high %v13524_v52, %v13524_v52  ;;  %v593_v25 = vld [vmem:[%s18584_s1 + $0x10d8] sm:$0xff] }
  0xf0   :  { %10186 = vmatprep.subr.bf16.mxu1 %v10185_v23  ;;  %v614_v23 = vld [vmem:[%s18584_s1 + $0x1180] sm:$0xff] }
  0xf1   :  { %10156 = vmatpush3.bf16.msra.mxu0 %v10155_v29  ;;  %v10205_v29 = vpack.c.bf16 %v583_v22, %v582_v21  ;;  %v10237_v42 = vpack.c.bf16 %v615_v24, %v614_v23  ;;  %v606_v21 = vld [vmem:[%s18584_s1 + $0x1140] sm:$0xff]  ;;  %v607_v23 = vld [vmem:[%s18584_s1 + $0x1148] sm:$0xff]  ;;  %v592_v24 = vld [vmem:[%s18584_s1 + $0x10d0] sm:$0xff] }
  0xf2   :  { %10158 = vmatprep.subr.bf16.mxu0 %v10157_v30  ;;  %v567_v30 = vld [vmem:[%s18584_s1 + $0x1008] sm:$0xff] }
  0xf3   :  { %10188 = vmatpush3.bf16.msra.mxu1 %v10187_v31  ;;  %v566_v31 = vld [vmem:[%s18584_s1 + $0x1000] sm:$0xff] }
  0xf4   :  { %10190 = vmatprep.subr.bf16.mxu1 %v10189_v35  ;;  %v584_v35 = vld [vmem:[%s18584_s1 + $0x1090] sm:$0xff] }
  0xf5   :  { %10160 = vmatpush3.bf16.msra.mxu0 %v10159_v40  ;;  %v10207_v40 = vpack.c.bf16 %v567_v30, %v566_v31  ;;  %v10255_v31 = vpack.c.bf16 %v607_v23, %v606_v21  ;;  %v10225_v30 = vpack.c.bf16 %v593_v25, %v592_v24  ;;  %v648_v21 = vld [vmem:[%s18584_s1 + $0x1290] sm:$0xff]  ;;  %v681_v25 = vld [vmem:[%s18584_s1 + $0x1398] sm:$0xff] }
  0xf6   :  { %10162 = vmatprep.subr.bf16.mxu0 %v10161_v43  ;;  %v10209_v43 = vpack.c.bf16 %v585_v36, %v584_v35  ;;  %v609_v36 = vld [vmem:[%s18584_s1 + $0x1158] sm:$0xff]  ;;  %v680_v24 = vld [vmem:[%s18584_s1 + $0x1390] sm:$0xff] }
  0xf7   :  { %10192 = vmatpush3.bf16.msra.mxu1 %v10191_v41  ;;  %v7433_v61 = vpop.f32.mrb[0].mxu0  ;;  %v10239_v41 = vpack.c.bf16 %v599_v34, %v598_v32  ;;  %v576_v32 = vld [vmem:[%s18584_s1 + $0x1050] sm:$0xff] }
  0xf8   :  { %10194 = vmatprep.subr.bf16.mxu1 %v10193_v48  ;;  %v7434_v3 = vpop.f32.mrb[1].mxu0  ;;  %v10241_v48 = vpack.c.bf16 %v617_v38, %v616_v37  ;;  %v608_v34 = vld [vmem:[%s18584_s1 + $0x1150] sm:$0xff]  ;;  %v594_v37 = vld [vmem:[%s18584_s1 + $0x10e0] sm:$0xff]  ;;  %v595_v38 = vld [vmem:[%s18584_s1 + $0x10e8] sm:$0xff] }
  0xf9   :  { %v7468_v4 = vpop.f32.mrb[0].mxu1  ;;  %v7435_v8 = vadd.f32 %v7434_v3, %v7433_v61  ;;  %10164 = vmatpush3.bf16.msra.mxu0 %v10163_v56  ;;  %v619_v56 = vld [vmem:[%s18584_s1 + $0x11a8] sm:$0xff]  ;;  %v602_v61 = vld [vmem:[%s18584_s1 + $0x1120] sm:$0xff] }
  0xfa   :  { %v7469_v7 = vpop.f32.mrb[1].mxu1  ;;  %10166 = vmatprep.subr.bf16.mxu0 %v10165_v45  ;;  %v10211_v45 = vpack.c.bf16 %v569_v46, %v568_v44  ;;  %v10259_v44 = vpack.c.bf16 %v609_v36, %v608_v34  ;;  %v10229_v46 = vpack.c.bf16 %v595_v38, %v594_v37  ;;  %v10305_v34 = vpack.c.bf16 %v681_v25, %v680_v24  ;;  %v650_v36 = vld [vmem:[%s18584_s1 + $0x12a0] sm:$0xff]  ;;  %v651_v37 = vld [vmem:[%s18584_s1 + $0x12a8] sm:$0xff] }
  0xfb   :  { %v7470_v10 = vadd.f32 %v7469_v7, %v7468_v4  ;;  %10196 = vmatpush3.bf16.msra.mxu1 %v10195_v57  ;;  %v2880_v18 = vadd.f32 %v7435_v8, %v7399_v2  ;;  %v2293_v57 = vcombine.high %v13533_v39, %v13533_v39  ;;  %v621_v2 = vld [vmem:[%s18584_s1 + $0x11b8] sm:$0xff]  ;;  %v604_v7 = vld [vmem:[%s18584_s1 + $0x1130] sm:$0xff]  ;;  %v658_v24 = vld [vmem:[%s18584_s1 + $0x12e0] sm:$0xff] }
  0xfc   :  { %10198 = vmatprep.subr.bf16.mxu1 %v10197_v62  ;;  %v10245_v62 = vpack.c.bf16 %v619_v56, %v618_v55  ;;  %v573_v8 = vld [vmem:[%s18584_s1 + $0x1038] sm:$0xff]  ;;  %v10251_v17 = vpack.c.bf16 %v605_v11, %v604_v7  ;;  %v596_v55 = vld [vmem:[%s18584_s1 + $0x10f0] sm:$0xff]  ;;  %v647_v7 = vld [vmem:[%s18584_s1 + $0x1288] sm:$0xff] }
  0xfd   :  { %v13503_v26 = vadd.f32 %v7470_v10, %v2880_v18  ;;  %10168 = vmatpush3.bf16.msra.mxu0 %v10167_v9  ;;  %v10249_v9 = vpack.c.bf16 %v621_v2, %v620_v1  ;;  %v590_v10 = vld [vmem:[%s18584_s1 + $0x10c0] sm:$0xff]  ;;  %v10219_v16 = vpack.c.bf16 %v573_v8, %v572_v6  ;;  %v597_v56 = vld [vmem:[%s18584_s1 + $0x10f8] sm:$0xff]  ;;  %v580_v1 = vld [vmem:[%s18584_s1 + $0x1070] sm:$0xff] }
  0xfe   :  { %10170 = vmatprep.subr.bf16.mxu0 %v10169_v14  ;;  %v622_v14 = vld [vmem:[%s18584_s1 + $0x11c0] sm:$0xff]  ;;  %v10233_v0 = vpack.c.bf16 %v597_v56, %v596_v55  ;;  %v581_v2 = vld [vmem:[%s18584_s1 + $0x1078] sm:$0xff]  ;;  %v684_v55 = vld [vmem:[%s18584_s1 + $0x13b0] sm:$0xff] }
  0xff   :  { %10200 = vmatpush3.bf16.msra.mxu1 %v10199_v12  ;;  %v591_v12 = vld [vmem:[%s18584_s1 + $0x10c8] sm:$0xff]  ;;  %v10253_v22 = vpack.c.bf16 %v623_v15, %v622_v14  ;;  %v613_v6 = vld [vmem:[%s18584_s1 + $0x1178] sm:$0xff]  ;;  %v646_v8 = vld [vmem:[%s18584_s1 + $0x1280] sm:$0xff] }
 0x100   :  { %10202 = vmatprep.subr.bf16.mxu1 %v10201_v19  ;;  %v10221_v18 = vpack.c.bf16 %v591_v12, %v590_v10  ;;  %v574_v19 = vld [vmem:[%s18584_s1 + $0x1040] sm:$0xff]  ;;  %v10235_v12 = vpack.c.bf16 %v581_v2, %v580_v1  ;;  %v10269_v15 = vpack.c.bf16 %v647_v7, %v646_v8  ;;  %v685_v56 = vld [vmem:[%s18584_s1 + $0x13b8] sm:$0xff]  ;;  %v687_v1 = vld [vmem:[%s18584_s1 + $0x13c8] sm:$0xff] }
 0x101   :  { %10172 = vmatpush3.bf16.msra.mxu0 %v10171_v27  ;;  %v624_v27 = vld [vmem:[%s18584_s1 + $0x11d0] sm:$0xff]  ;;  %v670_v8 = vld [vmem:[%s18584_s1 + $0x1340] sm:$0xff]  ;;  %v659_v25 = vld [vmem:[%s18584_s1 + $0x12e8] sm:$0xff] }
 0x102   :  { %10206 = vmatprep.subr.bf16.mxu0 %v10205_v29  ;;  %v10223_v29 = vpack.c.bf16 %v575_v20, %v574_v19  ;;  %v663_v20 = vld [vmem:[%s18584_s1 + $0x1308] sm:$0xff] }
 0x103   :  { %10204 = vmatpush3.bf16.msra.mxu1 %v10203_v28  ;;  %v625_v28 = vld [vmem:[%s18584_s1 + $0x11d8] sm:$0xff] }
 0x104   :  { %10238 = vmatprep.subr.bf16.mxu1 %v10237_v42  ;;  %3858 = vmatmul.mubr.f32.vlgmr.msra.gmra.mrb[14].mxu0 %v13312_v51  ;;  %v570_v51 = vld [vmem:[%s18584_s1 + $0x1020] sm:$0xff]  ;;  %v577_v42 = vld [vmem:[%s18584_s1 + $0x1058] sm:$0xff]  ;;  %v10257_v35 = vpack.c.bf16 %v625_v28, %v624_v27 }
 0x105   :  { %10208 = vmatpush3.bf16.msra.mxu0 %v10207_v40  ;;  %3997 = vmatprep.mubr.f32.mxu0 %v2292_v54  ;;  %v10215_v3 = vpack.c.bf16 %v571_v60, %v570_v51  ;;  %v626_v40 = vld [vmem:[%s18584_s1 + $0x11e0] sm:$0xff]  ;;  %v611_v54 = vld [vmem:[%s18584_s1 + $0x1168] sm:$0xff] }
 0x106   :  { %3928 = vmatmul.mubr.f32.vlgmr.msra.gmra.mrb[14].mxu1 %v13321_v33  ;;  %10210 = vmatprep.subr.bf16.mxu0 %v10209_v43  ;;  %v603_v33 = vld [vmem:[%s18584_s1 + $0x1128] sm:$0xff]  ;;  %v10227_v43 = vpack.c.bf16 %v577_v42, %v576_v32  ;;  %v10263_v63 = vpack.c.bf16 %v611_v54, %v610_v49  ;;  %v633_v32 = vld [vmem:[%s18584_s1 + $0x1218] sm:$0xff]  ;;  %v664_v42 = vld [vmem:[%s18584_s1 + $0x1310] sm:$0xff] }
 0x107   :  { %10240 = vmatpush3.bf16.msra.mxu1 %v10239_v41  ;;  %4067 = vmatprep.mubr.f32.mxu1 %v2293_v57  ;;  %v10247_v4 = vpack.c.bf16 %v603_v33, %v602_v61  ;;  %v627_v41 = vld [vmem:[%s18584_s1 + $0x11e8] sm:$0xff]  ;;  %v666_v49 = vld [vmem:[%s18584_s1 + $0x1320] sm:$0xff]  ;;  %v653_v54 = vld [vmem:[%s18584_s1 + $0x12b8] sm:$0xff] }
 0x108   :  { %10242 = vmatprep.subr.bf16.mxu1 %v10241_v48  ;;  %v579_v48 = vld [vmem:[%s18584_s1 + $0x1068] sm:$0xff]  ;;  %v10261_v53 = vpack.c.bf16 %v627_v41, %v626_v40  ;;  %v682_v40 = vld [vmem:[%s18584_s1 + $0x13a0] sm:$0xff] }
 0x109   :  { %10212 = vmatpush3.bf16.msra.mxu0 %v10211_v45  ;;  %v10231_v61 = vpack.c.bf16 %v579_v48, %v578_v47  ;;  %v683_v41 = vld [vmem:[%s18584_s1 + $0x13a8] sm:$0xff]  ;;  %v10277_v47 = vpack.c.bf16 %v651_v37, %v650_v36 }
 0x10a   :  { %10214 = vmatprep.subr.bf16.mxu0 %v10213_v59  ;;  %v629_v59 = vld [vmem:[%s18584_s1 + $0x11f8] sm:$0xff]  ;;  %v635_v48 = vld [vmem:[%s18584_s1 + $0x1228] sm:$0xff] }
 0x10b   :  { %10244 = vmatpush3.bf16.msra.mxu1 %v10243_v58  ;;  %v628_v58 = vld [vmem:[%s18584_s1 + $0x11f0] sm:$0xff] }
 0x10c   :  { %10246 = vmatprep.subr.bf16.mxu1 %v10245_v62  ;;  %v31_v62 = vld [vmem:[%s18585_s0 + $0x48] sm:$0xff] }
 0x10d   :  { %10216 = vmatpush3.bf16.msra.mxu0 %v10215_v3  ;;  %v612_v3 = vld [vmem:[%s18584_s1 + $0x1170] sm:$0xff]  ;;  %v2294_v11 = vcombine.high %v31_v62, %v31_v62  ;;  %v13734_v23 = vrot.slane %v31_v62, %v11989_v13  ;;  %v669_v62 = vld [vmem:[%s18584_s1 + $0x1338] sm:$0xff] }
 0x10e   :  { %10218 = vmatprep.subr.bf16.mxu0 %v10217_v5  ;;  %v10265_v5 = vpack.c.bf16 %v629_v59, %v628_v58  ;;  %v10267_v14 = vpack.c.bf16 %v613_v6, %v612_v3  ;;  %v636_v59 = vld [vmem:[%s18584_s1 + $0x1230] sm:$0xff]  ;;  %v639_v6 = vld [vmem:[%s18584_s1 + $0x1248] sm:$0xff] }
 0x10f   :  { %10248 = vmatpush3.bf16.msra.mxu1 %v10247_v4  ;;  %v13743_v27 = vrot.slane %v2294_v11, %v11989_v13  ;;  %v2309_v38 = vcombine.high %v13734_v23, %v13734_v23  ;;  %v657_v11 = vld [vmem:[%s18584_s1 + $0x12d8] sm:$0xff] }
 0x110   :  { %10250 = vmatprep.subr.bf16.mxu1 %v10249_v9  ;;  %v678_v9 = vld [vmem:[%s18584_s1 + $0x1380] sm:$0xff] }
 0x111   :  { %10220 = vmatpush3.bf16.msra.mxu0 %v10219_v16  ;;  %v630_v16 = vld [vmem:[%s18584_s1 + $0x1200] sm:$0xff] }
 0x112   :  { %10222 = vmatprep.subr.bf16.mxu0 %v10221_v18  ;;  %v662_v18 = vld [vmem:[%s18584_s1 + $0x1300] sm:$0xff] }
 0x113   :  { %10252 = vmatpush3.bf16.msra.mxu1 %v10251_v17  ;;  %v631_v17 = vld [vmem:[%s18584_s1 + $0x1208] sm:$0xff] }
 0x114   :  { %10254 = vmatprep.subr.bf16.mxu1 %v10253_v22  ;;  %v649_v22 = vld [vmem:[%s18584_s1 + $0x1298] sm:$0xff]  ;;  %v10271_v28 = vpack.c.bf16 %v631_v17, %v630_v16 }
 0x115   :  { %10224 = vmatpush3.bf16.msra.mxu0 %v10223_v29  ;;  %v10303_v29 = vpack.c.bf16 %v663_v20, %v662_v18  ;;  %v640_v18 = vld [vmem:[%s18584_s1 + $0x1250] sm:$0xff] }
 0x116   :  { %10226 = vmatprep.subr.bf16.mxu0 %v10225_v30  ;;  %v632_v30 = vld [vmem:[%s18584_s1 + $0x1210] sm:$0xff] }
 0x117   :  { %10256 = vmatpush3.bf16.msra.mxu1 %v10255_v31  ;;  %v7503_v50 = vpop.f32.mrb[2].mxu0  ;;  %v10273_v31 = vpack.c.bf16 %v649_v22, %v648_v21  ;;  %v672_v20 = vld [vmem:[%s18584_s1 + $0x1350] sm:$0xff]  ;;  %v673_v22 = vld [vmem:[%s18584_s1 + $0x1358] sm:$0xff] }
 0x118   :  { %10258 = vmatprep.subr.bf16.mxu1 %v10257_v35  ;;  %v7504_v57 = vpop.f32.mrb[3].mxu0  ;;  %v665_v35 = vld [vmem:[%s18584_s1 + $0x1318] sm:$0xff] }
 0x119   :  { %v7538_v45 = vpop.f32.mrb[2].mxu1  ;;  %v7505_v51 = vadd.f32 %v7504_v57, %v7503_v50  ;;  %10228 = vmatpush3.bf16.msra.mxu0 %v10227_v43  ;;  %v2310_v43 = vcombine.high %v13743_v27, %v13743_v27  ;;  %v10309_v50 = vpack.c.bf16 %v683_v41, %v682_v40  ;;  %v660_v40 = vld [vmem:[%s18584_s1 + $0x12f0] sm:$0xff]  ;;  %v661_v41 = vld [vmem:[%s18584_s1 + $0x12f8] sm:$0xff] }
 0x11a   :  { %v7539_v60 = vpop.f32.mrb[3].mxu1  ;;  %10230 = vmatprep.subr.bf16.mxu0 %v10229_v46  ;;  %v10307_v46 = vpack.c.bf16 %v665_v35, %v664_v42  ;;  %v642_v42 = vld [vmem:[%s18584_s1 + $0x1260] sm:$0xff] }
 0x11b   :  { %v7540_v33 = vadd.f32 %v7539_v60, %v7538_v45  ;;  %10260 = vmatpush3.bf16.msra.mxu1 %v10259_v44  ;;  %v3020_v4 = vadd.f32 %v7505_v51, %v13503_v26  ;;  %v679_v26 = vld [vmem:[%s18584_s1 + $0x1388] sm:$0xff]  ;;  %v10275_v44 = vpack.c.bf16 %v633_v32, %v632_v30  ;;  %v637_v51 = vld [vmem:[%s18584_s1 + $0x1238] sm:$0xff]  ;;  %v668_v60 = vld [vmem:[%s18584_s1 + $0x1330] sm:$0xff]  ;;  %v10323_v30 = vpack.c.bf16 %v673_v22, %v672_v20 }
 0x11c   :  { %10262 = vmatprep.subr.bf16.mxu1 %v10261_v53  ;;  %v10301_v19 = vpack.c.bf16 %v679_v26, %v678_v9  ;;  %v652_v53 = vld [vmem:[%s18584_s1 + $0x12b0] sm:$0xff]  ;;  %v10283_v2 = vpack.c.bf16 %v637_v51, %v636_v59  ;;  %v10315_v3 = vpack.c.bf16 %v669_v62, %v668_v60  ;;  %v671_v9 = vld [vmem:[%s18584_s1 + $0x1348] sm:$0xff]  ;;  %v10293_v32 = vpack.c.bf16 %v659_v25, %v658_v24  ;;  %v674_v35 = vld [vmem:[%s18584_s1 + $0x1360] sm:$0xff] }
 0x11d   :  { %v13713_v10 = vadd.f32 %v7540_v33, %v3020_v4  ;;  %10232 = vmatpush3.bf16.msra.mxu0 %v10231_v61  ;;  %v10281_v58 = vpack.c.bf16 %v653_v54, %v652_v53  ;;  %v10313_v61 = vpack.c.bf16 %v685_v56, %v684_v55  ;;  %v654_v33 = vld [vmem:[%s18584_s1 + $0x12c0] sm:$0xff]  ;;  %v656_v26 = vld [vmem:[%s18584_s1 + $0x12d0] sm:$0xff]  ;;  %v10319_v16 = vpack.c.bf16 %v671_v9, %v670_v8  ;;  %v645_v56 = vld [vmem:[%s18584_s1 + $0x1278] sm:$0xff] }
 0x11e   :  { %10234 = vmatprep.subr.bf16.mxu0 %v10233_v0  ;;  %v686_v0 = vld [vmem:[%s18584_s1 + $0x13c0] sm:$0xff]  ;;  %v10289_v17 = vpack.c.bf16 %v657_v11, %v656_v26  ;;  %v10297_v54 = vpack.c.bf16 %v661_v41, %v660_v40  ;;  %v644_v55 = vld [vmem:[%s18584_s1 + $0x1270] sm:$0xff]  ;;  %v677_v59 = vld [vmem:[%s18584_s1 + $0x1378] sm:$0xff] }
 0x11f   :  { %10264 = vmatpush3.bf16.msra.mxu1 %v10263_v63  ;;  %v655_v63 = vld [vmem:[%s18584_s1 + $0x12c8] sm:$0xff]  ;;  %v10317_v7 = vpack.c.bf16 %v687_v1, %v686_v0  ;;  %v710_v51 = vld [vmem:[%s18584_s1 + $0x1480] sm:$0xff]  ;;  %v712_v8 = vld [vmem:[%s18584_s1 + $0x1490] sm:$0xff] }
 0x120   :  { %10266 = vmatprep.subr.bf16.mxu1 %v10265_v5  ;;  %v10285_v4 = vpack.c.bf16 %v655_v63, %v654_v33  ;;  %v638_v5 = vld [vmem:[%s18584_s1 + $0x1240] sm:$0xff]  ;;  %v711_v60 = vld [vmem:[%s18584_s1 + $0x1488] sm:$0xff]  ;;  %v10299_v63 = vpack.c.bf16 %v645_v56, %v644_v55  ;;  %v744_v26 = vld [vmem:[%s18584_s1 + $0x1590] sm:$0xff] }
 0x121   :  { %10236 = vmatpush3.bf16.msra.mxu0 %v10235_v12  ;;  %v688_v12 = vld [vmem:[%s18584_s1 + $0x13d0] sm:$0xff]  ;;  %v10333_v1 = vpack.c.bf16 %v711_v60, %v710_v51  ;;  %v745_v11 = vld [vmem:[%s18584_s1 + $0x1598] sm:$0xff]  ;;  %v714_v22 = vld [vmem:[%s18584_s1 + $0x14a0] sm:$0xff] }
 0x122   :  { %10270 = vmatprep.subr.bf16.mxu0 %v10269_v15  ;;  %v10287_v15 = vpack.c.bf16 %v639_v6, %v638_v5  ;;  %v727_v6 = vld [vmem:[%s18584_s1 + $0x1508] sm:$0xff]  ;;  %v10369_v20 = vpack.c.bf16 %v745_v11, %v744_v26  ;;  %v748_v40 = vld [vmem:[%s18584_s1 + $0x15b0] sm:$0xff]  ;;  %v749_v41 = vld [vmem:[%s18584_s1 + $0x15b8] sm:$0xff] }
 0x123   :  { %10268 = vmatpush3.bf16.msra.mxu1 %v10267_v14  ;;  %v689_v14 = vld [vmem:[%s18584_s1 + $0x13d8] sm:$0xff]  ;;  %v715_v24 = vld [vmem:[%s18584_s1 + $0x14a8] sm:$0xff]  ;;  %v734_v51 = vld [vmem:[%s18584_s1 + $0x1540] sm:$0xff] }
 0x124   :  { %10302 = vmatprep.subr.bf16.mxu1 %v10301_v19  ;;  %3998 = vmatmul.mubr.f32.vlgmr.msra.gmra.mrb[16].mxu0 %v13524_v52  ;;  %v634_v52 = vld [vmem:[%s18584_s1 + $0x1220] sm:$0xff]  ;;  %v641_v19 = vld [vmem:[%s18584_s1 + $0x1258] sm:$0xff]  ;;  %v10321_v21 = vpack.c.bf16 %v689_v14, %v688_v12  ;;  %v751_v55 = vld [vmem:[%s18584_s1 + $0x15c8] sm:$0xff] }
 0x125   :  { %10272 = vmatpush3.bf16.msra.mxu0 %v10271_v28  ;;  %4137 = vmatprep.mubr.f32.mxu0 %v2309_v38  ;;  %v10279_v57 = vpack.c.bf16 %v635_v48, %v634_v52  ;;  %v690_v28 = vld [vmem:[%s18584_s1 + $0x13e0] sm:$0xff]  ;;  %v675_v38 = vld [vmem:[%s18584_s1 + $0x1368] sm:$0xff] }
 0x126   :  { %4068 = vmatmul.mubr.f32.vlgmr.msra.gmra.mrb[16].mxu1 %v13533_v39  ;;  %10274 = vmatprep.subr.bf16.mxu0 %v10273_v31  ;;  %v667_v39 = vld [vmem:[%s18584_s1 + $0x1328] sm:$0xff]  ;;  %v10291_v31 = vpack.c.bf16 %v641_v19, %v640_v18  ;;  %v10327_v53 = vpack.c.bf16 %v675_v38, %v674_v35  ;;  %v697_v18 = vld [vmem:[%s18584_s1 + $0x1418] sm:$0xff]  ;;  %v728_v19 = vld [vmem:[%s18584_s1 + $0x1510] sm:$0xff] }
 0x127   :  { %10304 = vmatpush3.bf16.msra.mxu1 %v10303_v29  ;;  %4207 = vmatprep.mubr.f32.mxu1 %v2310_v43  ;;  %v10311_v45 = vpack.c.bf16 %v667_v39, %v666_v49  ;;  %v691_v29 = vld [vmem:[%s18584_s1 + $0x13e8] sm:$0xff]  ;;  %v730_v35 = vld [vmem:[%s18584_s1 + $0x1520] sm:$0xff]  ;;  %v717_v38 = vld [vmem:[%s18584_s1 + $0x14b8] sm:$0xff] }
 0x128   :  { %10306 = vmatprep.subr.bf16.mxu1 %v10305_v34  ;;  %v643_v34 = vld [vmem:[%s18584_s1 + $0x1268] sm:$0xff]  ;;  %v10325_v37 = vpack.c.bf16 %v691_v29, %v690_v28  ;;  %v746_v28 = vld [vmem:[%s18584_s1 + $0x15a0] sm:$0xff] }
 0x129   :  { %10276 = vmatpush3.bf16.msra.mxu0 %v10275_v44  ;;  %v10295_v49 = vpack.c.bf16 %v643_v34, %v642_v42  ;;  %v747_v29 = vld [vmem:[%s18584_s1 + $0x15a8] sm:$0xff]  ;;  %v10341_v42 = vpack.c.bf16 %v715_v24, %v714_v22  ;;  %v722_v26 = vld [vmem:[%s18584_s1 + $0x14e0] sm:$0xff] }
 0x12a   :  { %10278 = vmatprep.subr.bf16.mxu0 %v10277_v47  ;;  %v693_v47 = vld [vmem:[%s18584_s1 + $0x13f8] sm:$0xff]  ;;  %v699_v34 = vld [vmem:[%s18584_s1 + $0x1428] sm:$0xff] }
 0x12b   :  { %10308 = vmatpush3.bf16.msra.mxu1 %v10307_v46  ;;  %v692_v46 = vld [vmem:[%s18584_s1 + $0x13f0] sm:$0xff]  ;;  %v723_v11 = vld [vmem:[%s18584_s1 + $0x14e8] sm:$0xff] }
 0x12c   :  { %10310 = vmatprep.subr.bf16.mxu1 %v10309_v50  ;;  %v32_v50 = vld [vmem:[%s18585_s0 + $0x50] sm:$0xff] }
 0x12d   :  { %10280 = vmatpush3.bf16.msra.mxu0 %v10279_v57  ;;  %v676_v57 = vld [vmem:[%s18584_s1 + $0x1370] sm:$0xff]  ;;  %v2311_v62 = vcombine.high %v32_v50, %v32_v50  ;;  %v13944_v9 = vrot.slane %v32_v50, %v11989_v13  ;;  %v733_v50 = vld [vmem:[%s18584_s1 + $0x1538] sm:$0xff] }
 0x12e   :  { %10282 = vmatprep.subr.bf16.mxu0 %v10281_v58  ;;  %v10329_v58 = vpack.c.bf16 %v693_v47, %v692_v46  ;;  %v10331_v0 = vpack.c.bf16 %v677_v59, %v676_v57  ;;  %v700_v47 = vld [vmem:[%s18584_s1 + $0x1430] sm:$0xff]  ;;  %v703_v59 = vld [vmem:[%s18584_s1 + $0x1448] sm:$0xff] }
 0x12f   :  { %10312 = vmatpush3.bf16.msra.mxu1 %v10311_v45  ;;  %v13953_v12 = vrot.slane %v2311_v62, %v11989_v13  ;;  %v2326_v25 = vcombine.high %v13944_v9, %v13944_v9  ;;  %v721_v62 = vld [vmem:[%s18584_s1 + $0x14d8] sm:$0xff] }
 0x130   :  { %10314 = vmatprep.subr.bf16.mxu1 %v10313_v61  ;;  %v742_v61 = vld [vmem:[%s18584_s1 + $0x1580] sm:$0xff] }
 0x131   :  { %10284 = vmatpush3.bf16.msra.mxu0 %v10283_v2  ;;  %v694_v2 = vld [vmem:[%s18584_s1 + $0x1400] sm:$0xff] }
 0x132   :  { %10286 = vmatprep.subr.bf16.mxu0 %v10285_v4  ;;  %v726_v4 = vld [vmem:[%s18584_s1 + $0x1500] sm:$0xff] }
 0x133   :  { %10316 = vmatpush3.bf16.msra.mxu1 %v10315_v3  ;;  %v695_v3 = vld [vmem:[%s18584_s1 + $0x1408] sm:$0xff] }
 0x134   :  { %10318 = vmatprep.subr.bf16.mxu1 %v10317_v7  ;;  %v713_v7 = vld [vmem:[%s18584_s1 + $0x1498] sm:$0xff]  ;;  %v10335_v14 = vpack.c.bf16 %v695_v3, %v694_v2 }
 0x135   :  { %10288 = vmatpush3.bf16.msra.mxu0 %v10287_v15  ;;  %v10367_v15 = vpack.c.bf16 %v727_v6, %v726_v4  ;;  %v704_v4 = vld [vmem:[%s18584_s1 + $0x1450] sm:$0xff] }
 0x136   :  { %10290 = vmatprep.subr.bf16.mxu0 %v10289_v17  ;;  %v696_v17 = vld [vmem:[%s18584_s1 + $0x1410] sm:$0xff] }
 0x137   :  { %10320 = vmatpush3.bf16.msra.mxu1 %v10319_v16  ;;  %v7573_v36 = vpop.f32.mrb[4].mxu0  ;;  %v10337_v16 = vpack.c.bf16 %v713_v7, %v712_v8  ;;  %v736_v6 = vld [vmem:[%s18584_s1 + $0x1550] sm:$0xff]  ;;  %v737_v7 = vld [vmem:[%s18584_s1 + $0x1558] sm:$0xff] }
 0x138   :  { %10322 = vmatprep.subr.bf16.mxu1 %v10321_v21  ;;  %v7574_v43 = vpop.f32.mrb[5].mxu0  ;;  %v729_v21 = vld [vmem:[%s18584_s1 + $0x1518] sm:$0xff] }
 0x139   :  { %v7608_v44 = vpop.f32.mrb[4].mxu1  ;;  %v7575_v52 = vadd.f32 %v7574_v43, %v7573_v36  ;;  %10292 = vmatpush3.bf16.msra.mxu0 %v10291_v31  ;;  %v2327_v31 = vcombine.high %v13953_v12, %v13953_v12  ;;  %v10373_v36 = vpack.c.bf16 %v747_v29, %v746_v28  ;;  %v724_v28 = vld [vmem:[%s18584_s1 + $0x14f0] sm:$0xff]  ;;  %v725_v29 = vld [vmem:[%s18584_s1 + $0x14f8] sm:$0xff] }
 0x13a   :  { %v7609_v48 = vpop.f32.mrb[5].mxu1  ;;  %10294 = vmatprep.subr.bf16.mxu0 %v10293_v32  ;;  %v10371_v32 = vpack.c.bf16 %v729_v21, %v728_v19  ;;  %v706_v19 = vld [vmem:[%s18584_s1 + $0x1460] sm:$0xff] }
 0x13b   :  { %v7610_v39 = vadd.f32 %v7609_v48, %v7608_v44  ;;  %10324 = vmatpush3.bf16.msra.mxu1 %v10323_v30  ;;  %v3160_v45 = vadd.f32 %v7575_v52, %v13713_v10  ;;  %v743_v10 = vld [vmem:[%s18584_s1 + $0x1588] sm:$0xff]  ;;  %v10339_v30 = vpack.c.bf16 %v697_v18, %v696_v17  ;;  %v701_v52 = vld [vmem:[%s18584_s1 + $0x1438] sm:$0xff]  ;;  %v732_v48 = vld [vmem:[%s18584_s1 + $0x1530] sm:$0xff]  ;;  %v10387_v17 = vpack.c.bf16 %v737_v7, %v736_v6 }
 0x13c   :  { %10326 = vmatprep.subr.bf16.mxu1 %v10325_v37  ;;  %v10365_v5 = vpack.c.bf16 %v743_v10, %v742_v61  ;;  %v716_v37 = vld [vmem:[%s18584_s1 + $0x14b0] sm:$0xff]  ;;  %v10347_v56 = vpack.c.bf16 %v701_v52, %v700_v47  ;;  %v10379_v57 = vpack.c.bf16 %v733_v50, %v732_v48  ;;  %v735_v61 = vld [vmem:[%s18584_s1 + $0x1548] sm:$0xff]  ;;  %v10357_v18 = vpack.c.bf16 %v723_v11, %v722_v26  ;;  %v738_v21 = vld [vmem:[%s18584_s1 + $0x1560] sm:$0xff] }
 0x13d   :  { %v13923_v33 = vadd.f32 %v7610_v39, %v3160_v45  ;;  %10296 = vmatpush3.bf16.msra.mxu0 %v10295_v49  ;;  %v10345_v46 = vpack.c.bf16 %v717_v38, %v716_v37  ;;  %v10377_v49 = vpack.c.bf16 %v749_v41, %v748_v40  ;;  %v718_v39 = vld [vmem:[%s18584_s1 + $0x14c0] sm:$0xff]  ;;  %v720_v10 = vld [vmem:[%s18584_s1 + $0x14d0] sm:$0xff]  ;;  %v10383_v2 = vpack.c.bf16 %v735_v61, %v734_v51  ;;  %v709_v41 = vld [vmem:[%s18584_s1 + $0x1478] sm:$0xff] }
 0x13e   :  { %10298 = vmatprep.subr.bf16.mxu0 %v10297_v54  ;;  %v750_v54 = vld [vmem:[%s18584_s1 + $0x15c0] sm:$0xff]  ;;  %v10353_v3 = vpack.c.bf16 %v721_v62, %v720_v10  ;;  %v10361_v38 = vpack.c.bf16 %v725_v29, %v724_v28  ;;  %v708_v40 = vld [vmem:[%s18584_s1 + $0x1470] sm:$0xff]  ;;  %v741_v47 = vld [vmem:[%s18584_s1 + $0x1578] sm:$0xff] }
 0x13f   :  { %10328 = vmatpush3.bf16.msra.mxu1 %v10327_v53  ;;  %v719_v53 = vld [vmem:[%s18584_s1 + $0x14c8] sm:$0xff]  ;;  %v10381_v60 = vpack.c.bf16 %v751_v55, %v750_v54  ;;  %v774_v52 = vld [vmem:[%s18584_s1 + $0x1680] sm:$0xff]  ;;  %v776_v51 = vld [vmem:[%s18584_s1 + $0x1690] sm:$0xff] }
 0x140   :  { %10330 = vmatprep.subr.bf16.mxu1 %v10329_v58  ;;  %v10349_v45 = vpack.c.bf16 %v719_v53, %v718_v39  ;;  %v702_v58 = vld [vmem:[%s18584_s1 + $0x1440] sm:$0xff]  ;;  %v775_v48 = vld [vmem:[%s18584_s1 + $0x1688] sm:$0xff]  ;;  %v10363_v53 = vpack.c.bf16 %v709_v41, %v708_v40  ;;  %v808_v10 = vld [vmem:[%s18584_s1 + $0x1790] sm:$0xff] }
 0x141   :  { %10300 = vmatpush3.bf16.msra.mxu0 %v10299_v63  ;;  %v752_v63 = vld [vmem:[%s18584_s1 + $0x15d0] sm:$0xff]  ;;  %v10397_v55 = vpack.c.bf16 %v775_v48, %v774_v52  ;;  %v809_v62 = vld [vmem:[%s18584_s1 + $0x1798] sm:$0xff]  ;;  %v778_v7 = vld [vmem:[%s18584_s1 + $0x16a0] sm:$0xff] }
 0x142   :  { %10334 = vmatprep.subr.bf16.mxu0 %v10333_v1  ;;  %v10351_v1 = vpack.c.bf16 %v703_v59, %v702_v58  ;;  %v791_v59 = vld [vmem:[%s18584_s1 + $0x1708] sm:$0xff]  ;;  %v10433_v6 = vpack.c.bf16 %v809_v62, %v808_v10  ;;  %v812_v28 = vld [vmem:[%s18584_s1 + $0x17b0] sm:$0xff]  ;;  %v813_v29 = vld [vmem:[%s18584_s1 + $0x17b8] sm:$0xff] }
 0x143   :  { %10332 = vmatpush3.bf16.msra.mxu1 %v10331_v0  ;;  %v753_v0 = vld [vmem:[%s18584_s1 + $0x15d8] sm:$0xff]  ;;  %v779_v26 = vld [vmem:[%s18584_s1 + $0x16a8] sm:$0xff]  ;;  %v798_v52 = vld [vmem:[%s18584_s1 + $0x1740] sm:$0xff] }
 0x144   :  { %10366 = vmatprep.subr.bf16.mxu1 %v10365_v5  ;;  %4138 = vmatmul.mubr.f32.vlgmr.msra.gmra.mrb[18].mxu0 %v13734_v23  ;;  %v698_v23 = vld [vmem:[%s18584_s1 + $0x1420] sm:$0xff]  ;;  %v705_v5 = vld [vmem:[%s18584_s1 + $0x1458] sm:$0xff]  ;;  %v10385_v8 = vpack.c.bf16 %v753_v0, %v752_v63  ;;  %v815_v40 = vld [vmem:[%s18584_s1 + $0x17c8] sm:$0xff] }
 0x145   :  { %10336 = vmatpush3.bf16.msra.mxu0 %v10335_v14  ;;  %4277 = vmatprep.mubr.f32.mxu0 %v2326_v25  ;;  %v10343_v43 = vpack.c.bf16 %v699_v34, %v698_v23  ;;  %v754_v14 = vld [vmem:[%s18584_s1 + $0x15e0] sm:$0xff]  ;;  %v739_v25 = vld [vmem:[%s18584_s1 + $0x1568] sm:$0xff] }
 0x146   :  { %4208 = vmatmul.mubr.f32.vlgmr.msra.gmra.mrb[18].mxu1 %v13743_v27  ;;  %10338 = vmatprep.subr.bf16.mxu0 %v10337_v16  ;;  %v731_v27 = vld [vmem:[%s18584_s1 + $0x1528] sm:$0xff]  ;;  %v10355_v16 = vpack.c.bf16 %v705_v5, %v704_v4  ;;  %v10391_v37 = vpack.c.bf16 %v739_v25, %v738_v21  ;;  %v761_v4 = vld [vmem:[%s18584_s1 + $0x1618] sm:$0xff]  ;;  %v792_v5 = vld [vmem:[%s18584_s1 + $0x1710] sm:$0xff] }
 0x147   :  { %10368 = vmatpush3.bf16.msra.mxu1 %v10367_v15  ;;  %4347 = vmatprep.mubr.f32.mxu1 %v2327_v31  ;;  %v10375_v44 = vpack.c.bf16 %v731_v27, %v730_v35  ;;  %v755_v15 = vld [vmem:[%s18584_s1 + $0x15e8] sm:$0xff]  ;;  %v794_v21 = vld [vmem:[%s18584_s1 + $0x1720] sm:$0xff]  ;;  %v781_v25 = vld [vmem:[%s18584_s1 + $0x16b8] sm:$0xff] }
 0x148   :  { %10370 = vmatprep.subr.bf16.mxu1 %v10369_v20  ;;  %v707_v20 = vld [vmem:[%s18584_s1 + $0x1468] sm:$0xff]  ;;  %v10389_v24 = vpack.c.bf16 %v755_v15, %v754_v14  ;;  %v810_v14 = vld [vmem:[%s18584_s1 + $0x17a0] sm:$0xff] }
 0x149   :  { %10340 = vmatpush3.bf16.msra.mxu0 %v10339_v30  ;;  %v10359_v35 = vpack.c.bf16 %v707_v20, %v706_v19  ;;  %v811_v15 = vld [vmem:[%s18584_s1 + $0x17a8] sm:$0xff]  ;;  %v10405_v19 = vpack.c.bf16 %v779_v26, %v778_v7  ;;  %v786_v10 = vld [vmem:[%s18584_s1 + $0x16e0] sm:$0xff] }
 0x14a   :  { %10342 = vmatprep.subr.bf16.mxu0 %v10341_v42  ;;  %v757_v42 = vld [vmem:[%s18584_s1 + $0x15f8] sm:$0xff]  ;;  %v763_v20 = vld [vmem:[%s18584_s1 + $0x1628] sm:$0xff] }
 0x14b   :  { %10372 = vmatpush3.bf16.msra.mxu1 %v10371_v32  ;;  %v756_v32 = vld [vmem:[%s18584_s1 + $0x15f0] sm:$0xff]  ;;  %v787_v62 = vld [vmem:[%s18584_s1 + $0x16e8] sm:$0xff] }
 0x14c   :  { %10374 = vmatprep.subr.bf16.mxu1 %v10373_v36  ;;  %v33_v36 = vld [vmem:[%s18585_s0 + $0x58] sm:$0xff] }
 0x14d   :  { %10344 = vmatpush3.bf16.msra.mxu0 %v10343_v43  ;;  %v740_v43 = vld [vmem:[%s18584_s1 + $0x1570] sm:$0xff]  ;;  %v2328_v50 = vcombine.high %v33_v36, %v33_v36  ;;  %v14154_v61 = vrot.slane %v33_v36, %v11989_v13  ;;  %v797_v36 = vld [vmem:[%s18584_s1 + $0x1738] sm:$0xff] }
 0x14e   :  { %10346 = vmatprep.subr.bf16.mxu0 %v10345_v46  ;;  %v10393_v46 = vpack.c.bf16 %v757_v42, %v756_v32  ;;  %v10395_v54 = vpack.c.bf16 %v741_v47, %v740_v43  ;;  %v764_v42 = vld [vmem:[%s18584_s1 + $0x1630] sm:$0xff]  ;;  %v767_v47 = vld [vmem:[%s18584_s1 + $0x1648] sm:$0xff] }
 0x14f   :  { %10376 = vmatpush3.bf16.msra.mxu1 %v10375_v44  ;;  %v14163_v63 = vrot.slane %v2328_v50, %v11989_v13  ;;  %v2343_v11 = vcombine.high %v14154_v61, %v14154_v61  ;;  %v785_v50 = vld [vmem:[%s18584_s1 + $0x16d8] sm:$0xff] }
 0x150   :  { %10378 = vmatprep.subr.bf16.mxu1 %v10377_v49  ;;  %v806_v49 = vld [vmem:[%s18584_s1 + $0x1780] sm:$0xff] }
 0x151   :  { %10348 = vmatpush3.bf16.msra.mxu0 %v10347_v56  ;;  %v758_v56 = vld [vmem:[%s18584_s1 + $0x1600] sm:$0xff] }
 0x152   :  { %10350 = vmatprep.subr.bf16.mxu0 %v10349_v45  ;;  %v790_v45 = vld [vmem:[%s18584_s1 + $0x1700] sm:$0xff] }
 0x153   :  { %10380 = vmatpush3.bf16.msra.mxu1 %v10379_v57  ;;  %v759_v57 = vld [vmem:[%s18584_s1 + $0x1608] sm:$0xff] }
 0x154   :  { %10382 = vmatprep.subr.bf16.mxu1 %v10381_v60  ;;  %v777_v60 = vld [vmem:[%s18584_s1 + $0x1698] sm:$0xff]  ;;  %v10399_v0 = vpack.c.bf16 %v759_v57, %v758_v56 }
 0x155   :  { %10352 = vmatpush3.bf16.msra.mxu0 %v10351_v1  ;;  %v10431_v1 = vpack.c.bf16 %v791_v59, %v790_v45  ;;  %v768_v45 = vld [vmem:[%s18584_s1 + $0x1650] sm:$0xff] }
 0x156   :  { %10354 = vmatprep.subr.bf16.mxu0 %v10353_v3  ;;  %v760_v3 = vld [vmem:[%s18584_s1 + $0x1610] sm:$0xff] }
 0x157   :  { %10384 = vmatpush3.bf16.msra.mxu1 %v10383_v2  ;;  %v7643_v22 = vpop.f32.mrb[6].mxu0  ;;  %v10401_v2 = vpack.c.bf16 %v777_v60, %v776_v51  ;;  %v800_v59 = vld [vmem:[%s18584_s1 + $0x1750] sm:$0xff]  ;;  %v801_v60 = vld [vmem:[%s18584_s1 + $0x1758] sm:$0xff] }
 0x158   :  { %10386 = vmatprep.subr.bf16.mxu1 %v10385_v8  ;;  %v7644_v31 = vpop.f32.mrb[7].mxu0  ;;  %v793_v8 = vld [vmem:[%s18584_s1 + $0x1718] sm:$0xff] }
 0x159   :  { %v7678_v30 = vpop.f32.mrb[6].mxu1  ;;  %v7645_v23 = vadd.f32 %v7644_v31, %v7643_v22  ;;  %10356 = vmatpush3.bf16.msra.mxu0 %v10355_v16  ;;  %v2344_v16 = vcombine.high %v14163_v63, %v14163_v63  ;;  %v10437_v22 = vpack.c.bf16 %v811_v15, %v810_v14  ;;  %v788_v14 = vld [vmem:[%s18584_s1 + $0x16f0] sm:$0xff]  ;;  %v789_v15 = vld [vmem:[%s18584_s1 + $0x16f8] sm:$0xff] }
 0x15a   :  { %v7679_v34 = vpop.f32.mrb[7].mxu1  ;;  %10358 = vmatprep.subr.bf16.mxu0 %v10357_v18  ;;  %v10435_v18 = vpack.c.bf16 %v793_v8, %v792_v5  ;;  %v770_v5 = vld [vmem:[%s18584_s1 + $0x1660] sm:$0xff] }
 0x15b   :  { %v7680_v27 = vadd.f32 %v7679_v34, %v7678_v30  ;;  %10388 = vmatpush3.bf16.msra.mxu1 %v10387_v17  ;;  %v3300_v44 = vadd.f32 %v7645_v23, %v13923_v33  ;;  %v807_v33 = vld [vmem:[%s18584_s1 + $0x1788] sm:$0xff]  ;;  %v10403_v17 = vpack.c.bf16 %v761_v4, %v760_v3  ;;  %v765_v23 = vld [vmem:[%s18584_s1 + $0x1638] sm:$0xff]  ;;  %v796_v34 = vld [vmem:[%s18584_s1 + $0x1730] sm:$0xff]  ;;  %v10451_v3 = vpack.c.bf16 %v801_v60, %v800_v59 }
 0x15c   :  { %10390 = vmatprep.subr.bf16.mxu1 %v10389_v24  ;;  %v10429_v58 = vpack.c.bf16 %v807_v33, %v806_v49  ;;  %v780_v24 = vld [vmem:[%s18584_s1 + $0x16b0] sm:$0xff]  ;;  %v10411_v41 = vpack.c.bf16 %v765_v23, %v764_v42  ;;  %v10443_v43 = vpack.c.bf16 %v797_v36, %v796_v34  ;;  %v799_v49 = vld [vmem:[%s18584_s1 + $0x1748] sm:$0xff]  ;;  %v10421_v4 = vpack.c.bf16 %v787_v62, %v786_v10  ;;  %v802_v8 = vld [vmem:[%s18584_s1 + $0x1760] sm:$0xff] }
 0x15d   :  { %v14133_v39 = vadd.f32 %v7680_v27, %v3300_v44  ;;  %10360 = vmatpush3.bf16.msra.mxu0 %v10359_v35  ;;  %v10409_v32 = vpack.c.bf16 %v781_v25, %v780_v24  ;;  %v10441_v35 = vpack.c.bf16 %v813_v29, %v812_v28  ;;  %v782_v27 = vld [vmem:[%s18584_s1 + $0x16c0] sm:$0xff]  ;;  %v784_v33 = vld [vmem:[%s18584_s1 + $0x16d0] sm:$0xff]  ;;  %v10447_v56 = vpack.c.bf16 %v799_v49, %v798_v52  ;;  %v773_v29 = vld [vmem:[%s18584_s1 + $0x1678] sm:$0xff] }
 0x15e   :  { %10362 = vmatprep.subr.bf16.mxu0 %v10361_v38  ;;  %v814_v38 = vld [vmem:[%s18584_s1 + $0x17c0] sm:$0xff]  ;;  %v10417_v57 = vpack.c.bf16 %v785_v50, %v784_v33  ;;  %v10425_v25 = vpack.c.bf16 %v789_v15, %v788_v14  ;;  %v772_v28 = vld [vmem:[%s18584_s1 + $0x1670] sm:$0xff]  ;;  %v805_v42 = vld [vmem:[%s18584_s1 + $0x1778] sm:$0xff] }
 0x15f   :  { %10392 = vmatpush3.bf16.msra.mxu1 %v10391_v37  ;;  %v783_v37 = vld [vmem:[%s18584_s1 + $0x16c8] sm:$0xff]  ;;  %v10445_v48 = vpack.c.bf16 %v815_v40, %v814_v38  ;;  %v838_v23 = vld [vmem:[%s18584_s1 + $0x1880] sm:$0xff]  ;;  %v840_v52 = vld [vmem:[%s18584_s1 + $0x1890] sm:$0xff] }
 0x160   :  { %10394 = vmatprep.subr.bf16.mxu1 %v10393_v46  ;;  %v10413_v44 = vpack.c.bf16 %v783_v37, %v782_v27  ;;  %v766_v46 = vld [vmem:[%s18584_s1 + $0x1640] sm:$0xff]  ;;  %v839_v34 = vld [vmem:[%s18584_s1 + $0x1888] sm:$0xff]  ;;  %v10427_v37 = vpack.c.bf16 %v773_v29, %v772_v28  ;;  %v872_v33 = vld [vmem:[%s18584_s1 + $0x1990] sm:$0xff] }
 0x161   :  { %10364 = vmatpush3.bf16.msra.mxu0 %v10363_v53  ;;  %v816_v53 = vld [vmem:[%s18584_s1 + $0x17d0] sm:$0xff]  ;;  %v10461_v40 = vpack.c.bf16 %v839_v34, %v838_v23  ;;  %v873_v50 = vld [vmem:[%s18584_s1 + $0x1998] sm:$0xff]  ;;  %v842_v60 = vld [vmem:[%s18584_s1 + $0x18a0] sm:$0xff] }
 0x162   :  { %10398 = vmatprep.subr.bf16.mxu0 %v10397_v55  ;;  %v10415_v55 = vpack.c.bf16 %v767_v47, %v766_v46  ;;  %v855_v47 = vld [vmem:[%s18584_s1 + $0x1908] sm:$0xff]  ;;  %v10497_v59 = vpack.c.bf16 %v873_v50, %v872_v33  ;;  %v876_v14 = vld [vmem:[%s18584_s1 + $0x19b0] sm:$0xff]  ;;  %v877_v15 = vld [vmem:[%s18584_s1 + $0x19b8] sm:$0xff] }
 0x163   :  { %10396 = vmatpush3.bf16.msra.mxu1 %v10395_v54  ;;  %v817_v54 = vld [vmem:[%s18584_s1 + $0x17d8] sm:$0xff]  ;;  %v843_v10 = vld [vmem:[%s18584_s1 + $0x18a8] sm:$0xff]  ;;  %v862_v23 = vld [vmem:[%s18584_s1 + $0x1940] sm:$0xff] }
 0x164   :  { %10430 = vmatprep.subr.bf16.mxu1 %v10429_v58  ;;  %4278 = vmatmul.mubr.f32.vlgmr.msra.gmra.mrb[20].mxu0 %v13944_v9  ;;  %v762_v9 = vld [vmem:[%s18584_s1 + $0x1620] sm:$0xff]  ;;  %v769_v58 = vld [vmem:[%s18584_s1 + $0x1658] sm:$0xff]  ;;  %v10449_v51 = vpack.c.bf16 %v817_v54, %v816_v53  ;;  %v879_v28 = vld [vmem:[%s18584_s1 + $0x19c8] sm:$0xff] }
 0x165   :  { %10400 = vmatpush3.bf16.msra.mxu0 %v10399_v0  ;;  %4417 = vmatprep.mubr.f32.mxu0 %v2343_v11  ;;  %v10407_v31 = vpack.c.bf16 %v763_v20, %v762_v9  ;;  %v818_v0 = vld [vmem:[%s18584_s1 + $0x17e0] sm:$0xff]  ;;  %v803_v11 = vld [vmem:[%s18584_s1 + $0x1768] sm:$0xff] }
 0x166   :  { %4348 = vmatmul.mubr.f32.vlgmr.msra.gmra.mrb[20].mxu1 %v13953_v12  ;;  %10402 = vmatprep.subr.bf16.mxu0 %v10401_v2  ;;  %v795_v12 = vld [vmem:[%s18584_s1 + $0x1728] sm:$0xff]  ;;  %v10419_v2 = vpack.c.bf16 %v769_v58, %v768_v45  ;;  %v10455_v24 = vpack.c.bf16 %v803_v11, %v802_v8  ;;  %v825_v45 = vld [vmem:[%s18584_s1 + $0x1818] sm:$0xff]  ;;  %v856_v58 = vld [vmem:[%s18584_s1 + $0x1910] sm:$0xff] }
 0x167   :  { %10432 = vmatpush3.bf16.msra.mxu1 %v10431_v1  ;;  %4487 = vmatprep.mubr.f32.mxu1 %v2344_v16  ;;  %v10439_v30 = vpack.c.bf16 %v795_v12, %v794_v21  ;;  %v819_v1 = vld [vmem:[%s18584_s1 + $0x17e8] sm:$0xff]  ;;  %v858_v8 = vld [vmem:[%s18584_s1 + $0x1920] sm:$0xff]  ;;  %v845_v11 = vld [vmem:[%s18584_s1 + $0x18b8] sm:$0xff] }
 0x168   :  { %10434 = vmatprep.subr.bf16.mxu1 %v10433_v6  ;;  %v771_v6 = vld [vmem:[%s18584_s1 + $0x1668] sm:$0xff]  ;;  %v10453_v26 = vpack.c.bf16 %v819_v1, %v818_v0  ;;  %v874_v0 = vld [vmem:[%s18584_s1 + $0x19a0] sm:$0xff] }
 0x169   :  { %10404 = vmatpush3.bf16.msra.mxu0 %v10403_v17  ;;  %v10423_v21 = vpack.c.bf16 %v771_v6, %v770_v5  ;;  %v875_v1 = vld [vmem:[%s18584_s1 + $0x19a8] sm:$0xff]  ;;  %v10469_v5 = vpack.c.bf16 %v843_v10, %v842_v60  ;;  %v850_v33 = vld [vmem:[%s18584_s1 + $0x18e0] sm:$0xff] }
 0x16a   :  { %10406 = vmatprep.subr.bf16.mxu0 %v10405_v19  ;;  %v821_v19 = vld [vmem:[%s18584_s1 + $0x17f8] sm:$0xff]  ;;  %v827_v6 = vld [vmem:[%s18584_s1 + $0x1828] sm:$0xff] }
 0x16b   :  { %10436 = vmatpush3.bf16.msra.mxu1 %v10435_v18  ;;  %v820_v18 = vld [vmem:[%s18584_s1 + $0x17f0] sm:$0xff]  ;;  %v851_v50 = vld [vmem:[%s18584_s1 + $0x18e8] sm:$0xff] }
 0x16c   :  { %10438 = vmatprep.subr.bf16.mxu1 %v10437_v22  ;;  %v34_v22 = vld [vmem:[%s18585_s0 + $0x60] sm:$0xff] }
 0x16d   :  { %10408 = vmatpush3.bf16.msra.mxu0 %v10407_v31  ;;  %v804_v31 = vld [vmem:[%s18584_s1 + $0x1770] sm:$0xff]  ;;  %v2345_v36 = vcombine.high %v34_v22, %v34_v22  ;;  %v14364_v49 = vrot.slane %v34_v22, %v11989_v13  ;;  %v861_v22 = vld [vmem:[%s18584_s1 + $0x1938] sm:$0xff] }
 0x16e   :  { %10410 = vmatprep.subr.bf16.mxu0 %v10409_v32  ;;  %v10457_v32 = vpack.c.bf16 %v821_v19, %v820_v18  ;;  %v10459_v38 = vpack.c.bf16 %v805_v42, %v804_v31  ;;  %v828_v19 = vld [vmem:[%s18584_s1 + $0x1830] sm:$0xff]  ;;  %v831_v42 = vld [vmem:[%s18584_s1 + $0x1848] sm:$0xff] }
 0x16f   :  { %10440 = vmatpush3.bf16.msra.mxu1 %v10439_v30  ;;  %v14373_v53 = vrot.slane %v2345_v36, %v11989_v13  ;;  %v2360_v62 = vcombine.high %v14364_v49, %v14364_v49  ;;  %v849_v36 = vld [vmem:[%s18584_s1 + $0x18d8] sm:$0xff] }
 0x170   :  { %10442 = vmatprep.subr.bf16.mxu1 %v10441_v35  ;;  %v870_v35 = vld [vmem:[%s18584_s1 + $0x1980] sm:$0xff] }
 0x171   :  { %10412 = vmatpush3.bf16.msra.mxu0 %v10411_v41  ;;  %v822_v41 = vld [vmem:[%s18584_s1 + $0x1800] sm:$0xff] }
 0x172   :  { %10414 = vmatprep.subr.bf16.mxu0 %v10413_v44  ;;  %v854_v44 = vld [vmem:[%s18584_s1 + $0x1900] sm:$0xff] }
 0x173   :  { %10444 = vmatpush3.bf16.msra.mxu1 %v10443_v43  ;;  %v823_v43 = vld [vmem:[%s18584_s1 + $0x1808] sm:$0xff] }
 0x174   :  { %10446 = vmatprep.subr.bf16.mxu1 %v10445_v48  ;;  %v841_v48 = vld [vmem:[%s18584_s1 + $0x1898] sm:$0xff]  ;;  %v10463_v54 = vpack.c.bf16 %v823_v43, %v822_v41 }
 0x175   :  { %10416 = vmatpush3.bf16.msra.mxu0 %v10415_v55  ;;  %v10495_v55 = vpack.c.bf16 %v855_v47, %v854_v44  ;;  %v832_v44 = vld [vmem:[%s18584_s1 + $0x1850] sm:$0xff] }
 0x176   :  { %10418 = vmatprep.subr.bf16.mxu0 %v10417_v57  ;;  %v824_v57 = vld [vmem:[%s18584_s1 + $0x1810] sm:$0xff] }
 0x177   :  { %10448 = vmatpush3.bf16.msra.mxu1 %v10447_v56  ;;  %v7713_v7 = vpop.f32.mrb[8].mxu0  ;;  %v10465_v56 = vpack.c.bf16 %v841_v48, %v840_v52  ;;  %v864_v47 = vld [vmem:[%s18584_s1 + $0x1950] sm:$0xff]  ;;  %v865_v48 = vld [vmem:[%s18584_s1 + $0x1958] sm:$0xff] }
 0x178   :  { %10450 = vmatprep.subr.bf16.mxu1 %v10449_v51  ;;  %v7714_v16 = vpop.f32.mrb[9].mxu0  ;;  %v857_v51 = vld [vmem:[%s18584_s1 + $0x1918] sm:$0xff] }
 0x179   :  { %v7748_v17 = vpop.f32.mrb[8].mxu1  ;;  %v7715_v9 = vadd.f32 %v7714_v16, %v7713_v7  ;;  %10420 = vmatpush3.bf16.msra.mxu0 %v10419_v2  ;;  %v2361_v2 = vcombine.high %v14373_v53, %v14373_v53  ;;  %v10501_v7 = vpack.c.bf16 %v875_v1, %v874_v0  ;;  %v852_v0 = vld [vmem:[%s18584_s1 + $0x18f0] sm:$0xff]  ;;  %v853_v1 = vld [vmem:[%s18584_s1 + $0x18f8] sm:$0xff] }
 0x17a   :  { %v7749_v20 = vpop.f32.mrb[9].mxu1  ;;  %10422 = vmatprep.subr.bf16.mxu0 %v10421_v4  ;;  %v10499_v4 = vpack.c.bf16 %v857_v51, %v856_v58  ;;  %v834_v58 = vld [vmem:[%s18584_s1 + $0x1860] sm:$0xff] }
 0x17b   :  { %v7750_v12 = vadd.f32 %v7749_v20, %v7748_v17  ;;  %10452 = vmatpush3.bf16.msra.mxu1 %v10451_v3  ;;  %v3440_v30 = vadd.f32 %v7715_v9, %v14133_v39  ;;  %v871_v39 = vld [vmem:[%s18584_s1 + $0x1988] sm:$0xff]  ;;  %v10467_v3 = vpack.c.bf16 %v825_v45, %v824_v57  ;;  %v829_v9 = vld [vmem:[%s18584_s1 + $0x1838] sm:$0xff]  ;;  %v860_v20 = vld [vmem:[%s18584_s1 + $0x1930] sm:$0xff]  ;;  %v10515_v57 = vpack.c.bf16 %v865_v48, %v864_v47 }
 0x17c   :  { %10454 = vmatprep.subr.bf16.mxu1 %v10453_v26  ;;  %v10493_v46 = vpack.c.bf16 %v871_v39, %v870_v35  ;;  %v844_v26 = vld [vmem:[%s18584_s1 + $0x18b0] sm:$0xff]  ;;  %v10475_v29 = vpack.c.bf16 %v829_v9, %v828_v19  ;;  %v10507_v31 = vpack.c.bf16 %v861_v22, %v860_v20  ;;  %v863_v35 = vld [vmem:[%s18584_s1 + $0x1948] sm:$0xff]  ;;  %v10485_v45 = vpack.c.bf16 %v851_v50, %v850_v33  ;;  %v866_v51 = vld [vmem:[%s18584_s1 + $0x1960] sm:$0xff] }
 0x17d   :  { %v14343_v27 = vadd.f32 %v7750_v12, %v3440_v30  ;;  %10424 = vmatpush3.bf16.msra.mxu0 %v10423_v21  ;;  %v10473_v18 = vpack.c.bf16 %v845_v11, %v844_v26  ;;  %v10505_v21 = vpack.c.bf16 %v877_v15, %v876_v14  ;;  %v846_v12 = vld [vmem:[%s18584_s1 + $0x18c0] sm:$0xff]  ;;  %v848_v39 = vld [vmem:[%s18584_s1 + $0x18d0] sm:$0xff]  ;;  %v10511_v41 = vpack.c.bf16 %v863_v35, %v862_v23  ;;  %v837_v15 = vld [vmem:[%s18584_s1 + $0x1878] sm:$0xff] }
 0x17e   :  { %10426 = vmatprep.subr.bf16.mxu0 %v10425_v25  ;;  %v878_v25 = vld [vmem:[%s18584_s1 + $0x19c0] sm:$0xff]  ;;  %v10481_v43 = vpack.c.bf16 %v849_v36, %v848_v39  ;;  %v10489_v11 = vpack.c.bf16 %v853_v1, %v852_v0  ;;  %v836_v14 = vld [vmem:[%s18584_s1 + $0x1870] sm:$0xff]  ;;  %v869_v19 = vld [vmem:[%s18584_s1 + $0x1978] sm:$0xff] }
 0x17f   :  { %10456 = vmatpush3.bf16.msra.mxu1 %v10455_v24  ;;  %v847_v24 = vld [vmem:[%s18584_s1 + $0x18c8] sm:$0xff]  ;;  %v10509_v34 = vpack.c.bf16 %v879_v28, %v878_v25  ;;  %v902_v9 = vld [vmem:[%s18584_s1 + $0x1a80] sm:$0xff]  ;;  %v904_v23 = vld [vmem:[%s18584_s1 + $0x1a90] sm:$0xff] }
 0x180   :  { %10458 = vmatprep.subr.bf16.mxu1 %v10457_v32  ;;  %v10477_v30 = vpack.c.bf16 %v847_v24, %v846_v12  ;;  %v830_v32 = vld [vmem:[%s18584_s1 + $0x1840] sm:$0xff]  ;;  %v903_v20 = vld [vmem:[%s18584_s1 + $0x1a88] sm:$0xff]  ;;  %v10491_v24 = vpack.c.bf16 %v837_v15, %v836_v14  ;;  %v936_v39 = vld [vmem:[%s18584_s1 + $0x1b90] sm:$0xff] }
 0x181   :  { %10428 = vmatpush3.bf16.msra.mxu0 %v10427_v37  ;;  %v880_v37 = vld [vmem:[%s18584_s1 + $0x19d0] sm:$0xff]  ;;  %v10525_v28 = vpack.c.bf16 %v903_v20, %v902_v9  ;;  %v937_v36 = vld [vmem:[%s18584_s1 + $0x1b98] sm:$0xff]  ;;  %v906_v48 = vld [vmem:[%s18584_s1 + $0x1aa0] sm:$0xff] }
 0x182   :  { %10462 = vmatprep.subr.bf16.mxu0 %v10461_v40  ;;  %v10479_v40 = vpack.c.bf16 %v831_v42, %v830_v32  ;;  %v919_v42 = vld [vmem:[%s18584_s1 + $0x1b08] sm:$0xff]  ;;  %v10561_v47 = vpack.c.bf16 %v937_v36, %v936_v39  ;;  %v940_v0 = vld [vmem:[%s18584_s1 + $0x1bb0] sm:$0xff]  ;;  %v941_v1 = vld [vmem:[%s18584_s1 + $0x1bb8] sm:$0xff] }
 0x183   :  { %10460 = vmatpush3.bf16.msra.mxu1 %v10459_v38  ;;  %v881_v38 = vld [vmem:[%s18584_s1 + $0x19d8] sm:$0xff]  ;;  %v907_v33 = vld [vmem:[%s18584_s1 + $0x1aa8] sm:$0xff]  ;;  %v926_v9 = vld [vmem:[%s18584_s1 + $0x1b40] sm:$0xff] }
 0x184   :  { %10494 = vmatprep.subr.bf16.mxu1 %v10493_v46  ;;  %4418 = vmatmul.mubr.f32.vlgmr.msra.gmra.mrb[22].mxu0 %v14154_v61  ;;  %v826_v61 = vld [vmem:[%s18584_s1 + $0x1820] sm:$0xff]  ;;  %v833_v46 = vld [vmem:[%s18584_s1 + $0x1858] sm:$0xff]  ;;  %v10513_v52 = vpack.c.bf16 %v881_v38, %v880_v37  ;;  %v943_v14 = vld [vmem:[%s18584_s1 + $0x1bc8] sm:$0xff] }
 0x185   :  { %10464 = vmatpush3.bf16.msra.mxu0 %v10463_v54  ;;  %4557 = vmatprep.mubr.f32.mxu0 %v2360_v62  ;;  %v10471_v16 = vpack.c.bf16 %v827_v6, %v826_v61  ;;  %v882_v54 = vld [vmem:[%s18584_s1 + $0x19e0] sm:$0xff]  ;;  %v867_v62 = vld [vmem:[%s18584_s1 + $0x1968] sm:$0xff] }
 0x186   :  { %4488 = vmatmul.mubr.f32.vlgmr.msra.gmra.mrb[22].mxu1 %v14163_v63  ;;  %10466 = vmatprep.subr.bf16.mxu0 %v10465_v56  ;;  %v859_v63 = vld [vmem:[%s18584_s1 + $0x1928] sm:$0xff]  ;;  %v10483_v56 = vpack.c.bf16 %v833_v46, %v832_v44  ;;  %v10519_v26 = vpack.c.bf16 %v867_v62, %v866_v51  ;;  %v889_v44 = vld [vmem:[%s18584_s1 + $0x1a18] sm:$0xff]  ;;  %v920_v46 = vld [vmem:[%s18584_s1 + $0x1b10] sm:$0xff] }
 0x187   :  { %10496 = vmatpush3.bf16.msra.mxu1 %v10495_v55  ;;  %4627 = vmatprep.mubr.f32.mxu1 %v2361_v2  ;;  %v10503_v17 = vpack.c.bf16 %v859_v63, %v858_v8  ;;  %v883_v55 = vld [vmem:[%s18584_s1 + $0x19e8] sm:$0xff]  ;;  %v922_v51 = vld [vmem:[%s18584_s1 + $0x1b20] sm:$0xff]  ;;  %v909_v62 = vld [vmem:[%s18584_s1 + $0x1ab8] sm:$0xff] }
 0x188   :  { %10498 = vmatprep.subr.bf16.mxu1 %v10497_v59  ;;  %v835_v59 = vld [vmem:[%s18584_s1 + $0x1868] sm:$0xff]  ;;  %v10517_v10 = vpack.c.bf16 %v883_v55, %v882_v54  ;;  %v938_v54 = vld [vmem:[%s18584_s1 + $0x1ba0] sm:$0xff] }
 0x189   :  { %10468 = vmatpush3.bf16.msra.mxu0 %v10467_v3  ;;  %v10487_v8 = vpack.c.bf16 %v835_v59, %v834_v58  ;;  %v939_v55 = vld [vmem:[%s18584_s1 + $0x1ba8] sm:$0xff]  ;;  %v10533_v58 = vpack.c.bf16 %v907_v33, %v906_v48  ;;  %v914_v39 = vld [vmem:[%s18584_s1 + $0x1ae0] sm:$0xff] }
 0x18a   :  { %10470 = vmatprep.subr.bf16.mxu0 %v10469_v5  ;;  %v885_v5 = vld [vmem:[%s18584_s1 + $0x19f8] sm:$0xff]  ;;  %v891_v59 = vld [vmem:[%s18584_s1 + $0x1a28] sm:$0xff] }
 0x18b   :  { %10500 = vmatpush3.bf16.msra.mxu1 %v10499_v4  ;;  %v884_v4 = vld [vmem:[%s18584_s1 + $0x19f0] sm:$0xff]  ;;  %v915_v36 = vld [vmem:[%s18584_s1 + $0x1ae8] sm:$0xff] }
 0x18c   :  { %10502 = vmatprep.subr.bf16.mxu1 %v10501_v7  ;;  %v35_v7 = vld [vmem:[%s18585_s0 + $0x68] sm:$0xff] }
 0x18d   :  { %10472 = vmatpush3.bf16.msra.mxu0 %v10471_v16  ;;  %v868_v16 = vld [vmem:[%s18584_s1 + $0x1970] sm:$0xff]  ;;  %v2362_v22 = vcombine.high %v35_v7, %v35_v7  ;;  %v14574_v35 = vrot.slane %v35_v7, %v11989_v13  ;;  %v925_v7 = vld [vmem:[%s18584_s1 + $0x1b38] sm:$0xff] }
 0x18e   :  { %10474 = vmatprep.subr.bf16.mxu0 %v10473_v18  ;;  %v10521_v18 = vpack.c.bf16 %v885_v5, %v884_v4  ;;  %v10523_v25 = vpack.c.bf16 %v869_v19, %v868_v16  ;;  %v892_v5 = vld [vmem:[%s18584_s1 + $0x1a30] sm:$0xff]  ;;  %v895_v19 = vld [vmem:[%s18584_s1 + $0x1a48] sm:$0xff] }
 0x18f   :  { %10504 = vmatpush3.bf16.msra.mxu1 %v10503_v17  ;;  %v14583_v37 = vrot.slane %v2362_v22, %v11989_v13  ;;  %v2377_v50 = vcombine.high %v14574_v35, %v14574_v35  ;;  %v913_v22 = vld [vmem:[%s18584_s1 + $0x1ad8] sm:$0xff] }
 0x190   :  { %10506 = vmatprep.subr.bf16.mxu1 %v10505_v21  ;;  %v934_v21 = vld [vmem:[%s18584_s1 + $0x1b80] sm:$0xff] }
 0x191   :  { %10476 = vmatpush3.bf16.msra.mxu0 %v10475_v29  ;;  %v886_v29 = vld [vmem:[%s18584_s1 + $0x1a00] sm:$0xff] }
 0x192   :  { %10478 = vmatprep.subr.bf16.mxu0 %v10477_v30  ;;  %v918_v30 = vld [vmem:[%s18584_s1 + $0x1b00] sm:$0xff] }
 0x193   :  { %10508 = vmatpush3.bf16.msra.mxu1 %v10507_v31  ;;  %v887_v31 = vld [vmem:[%s18584_s1 + $0x1a08] sm:$0xff] }
 0x194   :  { %10510 = vmatprep.subr.bf16.mxu1 %v10509_v34  ;;  %v905_v34 = vld [vmem:[%s18584_s1 + $0x1a98] sm:$0xff]  ;;  %v10527_v38 = vpack.c.bf16 %v887_v31, %v886_v29 }
 0x195   :  { %10480 = vmatpush3.bf16.msra.mxu0 %v10479_v40  ;;  %v10559_v40 = vpack.c.bf16 %v919_v42, %v918_v30  ;;  %v896_v30 = vld [vmem:[%s18584_s1 + $0x1a50] sm:$0xff] }
 0x196   :  { %10482 = vmatprep.subr.bf16.mxu0 %v10481_v43  ;;  %v888_v43 = vld [vmem:[%s18584_s1 + $0x1a10] sm:$0xff] }
 0x197   :  { %10512 = vmatpush3.bf16.msra.mxu1 %v10511_v41  ;;  %v7783_v60 = vpop.f32.mrb[10].mxu0  ;;  %v10529_v41 = vpack.c.bf16 %v905_v34, %v904_v23  ;;  %v928_v42 = vld [vmem:[%s18584_s1 + $0x1b50] sm:$0xff]  ;;  %v929_v34 = vld [vmem:[%s18584_s1 + $0x1b58] sm:$0xff] }
 0x198   :  { %10514 = vmatprep.subr.bf16.mxu1 %v10513_v52  ;;  %v7784_v2 = vpop.f32.mrb[11].mxu0  ;;  %v921_v52 = vld [vmem:[%s18584_s1 + $0x1b18] sm:$0xff] }
 0x199   :  { %v7818_v3 = vpop.f32.mrb[10].mxu1  ;;  %v7785_v61 = vadd.f32 %v7784_v2, %v7783_v60  ;;  %10484 = vmatpush3.bf16.msra.mxu0 %v10483_v56  ;;  %v2378_v56 = vcombine.high %v14583_v37, %v14583_v37  ;;  %v10565_v60 = vpack.c.bf16 %v939_v55, %v938_v54  ;;  %v916_v54 = vld [vmem:[%s18584_s1 + $0x1af0] sm:$0xff]  ;;  %v917_v55 = vld [vmem:[%s18584_s1 + $0x1af8] sm:$0xff] }
 0x19a   :  { %v7819_v6 = vpop.f32.mrb[11].mxu1  ;;  %10486 = vmatprep.subr.bf16.mxu0 %v10485_v45  ;;  %v10563_v45 = vpack.c.bf16 %v921_v52, %v920_v46  ;;  %v898_v46 = vld [vmem:[%s18584_s1 + $0x1a60] sm:$0xff] }
 0x19b   :  { %v7820_v63 = vadd.f32 %v7819_v6, %v7818_v3  ;;  %10516 = vmatpush3.bf16.msra.mxu1 %v10515_v57  ;;  %v3580_v17 = vadd.f32 %v7785_v61, %v14343_v27  ;;  %v935_v27 = vld [vmem:[%s18584_s1 + $0x1b88] sm:$0xff]  ;;  %v10531_v57 = vpack.c.bf16 %v889_v44, %v888_v43  ;;  %v893_v61 = vld [vmem:[%s18584_s1 + $0x1a38] sm:$0xff]  ;;  %v924_v6 = vld [vmem:[%s18584_s1 + $0x1b30] sm:$0xff]  ;;  %v10579_v43 = vpack.c.bf16 %v929_v34, %v928_v42 }
 0x19c   :  { %10518 = vmatprep.subr.bf16.mxu1 %v10517_v10  ;;  %v10557_v32 = vpack.c.bf16 %v935_v27, %v934_v21  ;;  %v908_v10 = vld [vmem:[%s18584_s1 + $0x1ab0] sm:$0xff]  ;;  %v10539_v15 = vpack.c.bf16 %v893_v61, %v892_v5  ;;  %v10571_v16 = vpack.c.bf16 %v925_v7, %v924_v6  ;;  %v927_v21 = vld [vmem:[%s18584_s1 + $0x1b48] sm:$0xff]  ;;  %v10549_v44 = vpack.c.bf16 %v915_v36, %v914_v39  ;;  %v930_v52 = vld [vmem:[%s18584_s1 + $0x1b60] sm:$0xff] }
 0x19d   :  { %v14553_v12 = vadd.f32 %v7820_v63, %v3580_v17  ;;  %10488 = vmatpush3.bf16.msra.mxu0 %v10487_v8  ;;  %v10537_v4 = vpack.c.bf16 %v909_v62, %v908_v10  ;;  %v10569_v8 = vpack.c.bf16 %v941_v1, %v940_v0  ;;  %v910_v63 = vld [vmem:[%s18584_s1 + $0x1ac0] sm:$0xff]  ;;  %v912_v27 = vld [vmem:[%s18584_s1 + $0x1ad0] sm:$0xff]  ;;  %v10575_v29 = vpack.c.bf16 %v927_v21, %v926_v9  ;;  %v901_v1 = vld [vmem:[%s18584_s1 + $0x1a78] sm:$0xff] }
 0x19e   :  { %10490 = vmatprep.subr.bf16.mxu0 %v10489_v11  ;;  %v942_v11 = vld [vmem:[%s18584_s1 + $0x1bc0] sm:$0xff]  ;;  %v10545_v31 = vpack.c.bf16 %v913_v22, %v912_v27  ;;  %v10553_v62 = vpack.c.bf16 %v917_v55, %v916_v54  ;;  %v900_v0 = vld [vmem:[%s18584_s1 + $0x1a70] sm:$0xff]  ;;  %v933_v5 = vld [vmem:[%s18584_s1 + $0x1b78] sm:$0xff] }
 0x19f   :  { %10520 = vmatpush3.bf16.msra.mxu1 %v10519_v26  ;;  %v911_v26 = vld [vmem:[%s18584_s1 + $0x1ac8] sm:$0xff]  ;;  %v10573_v20 = vpack.c.bf16 %v943_v14, %v942_v11  ;;  %v966_v61 = vld [vmem:[%s18584_s1 + $0x1c80] sm:$0xff]  ;;  %v968_v9 = vld [vmem:[%s18584_s1 + $0x1c90] sm:$0xff] }
 0x1a0   :  { %10522 = vmatprep.subr.bf16.mxu1 %v10521_v18  ;;  %v10541_v17 = vpack.c.bf16 %v911_v26, %v910_v63  ;;  %v894_v18 = vld [vmem:[%s18584_s1 + $0x1a40] sm:$0xff]  ;;  %v967_v6 = vld [vmem:[%s18584_s1 + $0x1c88] sm:$0xff]  ;;  %v10555_v26 = vpack.c.bf16 %v901_v1, %v900_v0  ;;  %v1000_v27 = vld [vmem:[%s18584_s1 + $0x1d90] sm:$0xff] }
 0x1a1   :  { %10492 = vmatpush3.bf16.msra.mxu0 %v10491_v24  ;;  %v944_v24 = vld [vmem:[%s18584_s1 + $0x1bd0] sm:$0xff]  ;;  %v10589_v14 = vpack.c.bf16 %v967_v6, %v966_v61  ;;  %v1001_v22 = vld [vmem:[%s18584_s1 + $0x1d98] sm:$0xff]  ;;  %v970_v34 = vld [vmem:[%s18584_s1 + $0x1ca0] sm:$0xff] }
 0x1a2   :  { %10526 = vmatprep.subr.bf16.mxu0 %v10525_v28  ;;  %v10543_v28 = vpack.c.bf16 %v895_v19, %v894_v18  ;;  %v983_v19 = vld [vmem:[%s18584_s1 + $0x1d08] sm:$0xff]  ;;  %v10625_v42 = vpack.c.bf16 %v1001_v22, %v1000_v27  ;;  %v1004_v54 = vld [vmem:[%s18584_s1 + $0x1db0] sm:$0xff]  ;;  %v1005_v55 = vld [vmem:[%s18584_s1 + $0x1db8] sm:$0xff] }
 0x1a3   :  { %10524 = vmatpush3.bf16.msra.mxu1 %v10523_v25  ;;  %v945_v25 = vld [vmem:[%s18584_s1 + $0x1bd8] sm:$0xff]  ;;  %v971_v39 = vld [vmem:[%s18584_s1 + $0x1ca8] sm:$0xff]  ;;  %v990_v61 = vld [vmem:[%s18584_s1 + $0x1d40] sm:$0xff] }
 0x1a4   :  { %10558 = vmatprep.subr.bf16.mxu1 %v10557_v32  ;;  %4558 = vmatmul.mubr.f32.vlgmr.msra.gmra.mrb[24].mxu0 %v14364_v49  ;;  %v890_v49 = vld [vmem:[%s18584_s1 + $0x1a20] sm:$0xff]  ;;  %v897_v32 = vld [vmem:[%s18584_s1 + $0x1a58] sm:$0xff]  ;;  %v10577_v23 = vpack.c.bf16 %v945_v25, %v944_v24  ;;  %v1007_v0 = vld [vmem:[%s18584_s1 + $0x1dc8] sm:$0xff] }
 0x1a5   :  { %10528 = vmatpush3.bf16.msra.mxu0 %v10527_v38  ;;  %4697 = vmatprep.mubr.f32.mxu0 %v2377_v50  ;;  %v10535_v2 = vpack.c.bf16 %v891_v59, %v890_v49  ;;  %v946_v38 = vld [vmem:[%s18584_s1 + $0x1be0] sm:$0xff]  ;;  %v931_v50 = vld [vmem:[%s18584_s1 + $0x1b68] sm:$0xff] }
 0x1a6   :  { %4628 = vmatmul.mubr.f32.vlgmr.msra.gmra.mrb[24].mxu1 %v14373_v53  ;;  %10530 = vmatprep.subr.bf16.mxu0 %v10529_v41  ;;  %v923_v53 = vld [vmem:[%s18584_s1 + $0x1b28] sm:$0xff]  ;;  %v10547_v41 = vpack.c.bf16 %v897_v32, %v896_v30  ;;  %v10583_v10 = vpack.c.bf16 %v931_v50, %v930_v52  ;;  %v953_v30 = vld [vmem:[%s18584_s1 + $0x1c18] sm:$0xff]  ;;  %v984_v32 = vld [vmem:[%s18584_s1 + $0x1d10] sm:$0xff] }
 0x1a7   :  { %10560 = vmatpush3.bf16.msra.mxu1 %v10559_v40  ;;  %4767 = vmatprep.mubr.f32.mxu1 %v2378_v56  ;;  %v10567_v3 = vpack.c.bf16 %v923_v53, %v922_v51  ;;  %v947_v40 = vld [vmem:[%s18584_s1 + $0x1be8] sm:$0xff]  ;;  %v986_v52 = vld [vmem:[%s18584_s1 + $0x1d20] sm:$0xff]  ;;  %v973_v50 = vld [vmem:[%s18584_s1 + $0x1cb8] sm:$0xff] }
 0x1a8   :  { %10562 = vmatprep.subr.bf16.mxu1 %v10561_v47  ;;  %v899_v47 = vld [vmem:[%s18584_s1 + $0x1a68] sm:$0xff]  ;;  %v10581_v33 = vpack.c.bf16 %v947_v40, %v946_v38  ;;  %v1002_v38 = vld [vmem:[%s18584_s1 + $0x1da0] sm:$0xff] }
 0x1a9   :  { %10532 = vmatpush3.bf16.msra.mxu0 %v10531_v57  ;;  %v10551_v51 = vpack.c.bf16 %v899_v47, %v898_v46  ;;  %v1003_v40 = vld [vmem:[%s18584_s1 + $0x1da8] sm:$0xff]  ;;  %v10597_v46 = vpack.c.bf16 %v971_v39, %v970_v34  ;;  %v978_v27 = vld [vmem:[%s18584_s1 + $0x1ce0] sm:$0xff] }
 0x1aa   :  { %10534 = vmatprep.subr.bf16.mxu0 %v10533_v58  ;;  %v949_v58 = vld [vmem:[%s18584_s1 + $0x1bf8] sm:$0xff]  ;;  %v955_v47 = vld [vmem:[%s18584_s1 + $0x1c28] sm:$0xff] }
 0x1ab   :  { %10564 = vmatpush3.bf16.msra.mxu1 %v10563_v45  ;;  %v948_v45 = vld [vmem:[%s18584_s1 + $0x1bf0] sm:$0xff]  ;;  %v979_v22 = vld [vmem:[%s18584_s1 + $0x1ce8] sm:$0xff] }
 0x1ac   :  { %10566 = vmatprep.subr.bf16.mxu1 %v10565_v60  ;;  %v36_v60 = vld [vmem:[%s18585_s0 + $0x70] sm:$0xff] }
 0x1ad   :  { %10536 = vmatpush3.bf16.msra.mxu0 %v10535_v2  ;;  %v932_v2 = vld [vmem:[%s18584_s1 + $0x1b70] sm:$0xff]  ;;  %v2379_v7 = vcombine.high %v36_v60, %v36_v60  ;;  %v14784_v21 = vrot.slane %v36_v60, %v11989_v13  ;;  %v989_v60 = vld [vmem:[%s18584_s1 + $0x1d38] sm:$0xff] }
 0x1ae   :  { %10538 = vmatprep.subr.bf16.mxu0 %v10537_v4  ;;  %v10585_v4 = vpack.c.bf16 %v949_v58, %v948_v45  ;;  %v10587_v11 = vpack.c.bf16 %v933_v5, %v932_v2  ;;  %v956_v58 = vld [vmem:[%s18584_s1 + $0x1c30] sm:$0xff]  ;;  %v959_v5 = vld [vmem:[%s18584_s1 + $0x1c48] sm:$0xff] }
 0x1af   :  { %10568 = vmatpush3.bf16.msra.mxu1 %v10567_v3  ;;  %v14793_v24 = vrot.slane %v2379_v7, %v11989_v13  ;;  %v2394_v36 = vcombine.high %v14784_v21, %v14784_v21  ;;  %v977_v7 = vld [vmem:[%s18584_s1 + $0x1cd8] sm:$0xff] }
 0x1b0   :  { %10570 = vmatprep.subr.bf16.mxu1 %v10569_v8  ;;  %v998_v8 = vld [vmem:[%s18584_s1 + $0x1d80] sm:$0xff] }
 0x1b1   :  { %10540 = vmatpush3.bf16.msra.mxu0 %v10539_v15  ;;  %v950_v15 = vld [vmem:[%s18584_s1 + $0x1c00] sm:$0xff] }
 0x1b2   :  { %10542 = vmatprep.subr.bf16.mxu0 %v10541_v17  ;;  %v982_v17 = vld [vmem:[%s18584_s1 + $0x1d00] sm:$0xff] }
 0x1b3   :  { %10572 = vmatpush3.bf16.msra.mxu1 %v10571_v16  ;;  %v951_v16 = vld [vmem:[%s18584_s1 + $0x1c08] sm:$0xff] }
 0x1b4   :  { %10574 = vmatprep.subr.bf16.mxu1 %v10573_v20  ;;  %v969_v20 = vld [vmem:[%s18584_s1 + $0x1c98] sm:$0xff]  ;;  %v10591_v25 = vpack.c.bf16 %v951_v16, %v950_v15 }
 0x1b5   :  { %10544 = vmatpush3.bf16.msra.mxu0 %v10543_v28  ;;  %v10623_v28 = vpack.c.bf16 %v983_v19, %v982_v17  ;;  %v960_v17 = vld [vmem:[%s18584_s1 + $0x1c50] sm:$0xff] }
 0x1b6   :  { %10546 = vmatprep.subr.bf16.mxu0 %v10545_v31  ;;  %v952_v31 = vld [vmem:[%s18584_s1 + $0x1c10] sm:$0xff] }
 0x1b7   :  { %10576 = vmatpush3.bf16.msra.mxu1 %v10575_v29  ;;  %v7853_v48 = vpop.f32.mrb[12].mxu0  ;;  %v10593_v29 = vpack.c.bf16 %v969_v20, %v968_v9  ;;  %v992_v19 = vld [vmem:[%s18584_s1 + $0x1d50] sm:$0xff]  ;;  %v993_v20 = vld [vmem:[%s18584_s1 + $0x1d58] sm:$0xff] }
 0x1b8   :  { %10578 = vmatprep.subr.bf16.mxu1 %v10577_v23  ;;  %v7854_v56 = vpop.f32.mrb[13].mxu0  ;;  %v985_v23 = vld [vmem:[%s18584_s1 + $0x1d18] sm:$0xff] }
 0x1b9   :  { %v7888_v57 = vpop.f32.mrb[12].mxu1  ;;  %v7855_v49 = vadd.f32 %v7854_v56, %v7853_v48  ;;  %10548 = vmatpush3.bf16.msra.mxu0 %v10547_v41  ;;  %v2395_v41 = vcombine.high %v14793_v24, %v14793_v24  ;;  %v10629_v48 = vpack.c.bf16 %v1003_v40, %v1002_v38  ;;  %v980_v38 = vld [vmem:[%s18584_s1 + $0x1cf0] sm:$0xff]  ;;  %v981_v40 = vld [vmem:[%s18584_s1 + $0x1cf8] sm:$0xff] }
 0x1ba   :  { %v7889_v59 = vpop.f32.mrb[13].mxu1  ;;  %10550 = vmatprep.subr.bf16.mxu0 %v10549_v44  ;;  %v10627_v44 = vpack.c.bf16 %v985_v23, %v984_v32  ;;  %v962_v32 = vld [vmem:[%s18584_s1 + $0x1c60] sm:$0xff] }
 0x1bb   :  { %v7890_v53 = vadd.f32 %v7889_v59, %v7888_v57  ;;  %10580 = vmatpush3.bf16.msra.mxu1 %v10579_v43  ;;  %v3720_v3 = vadd.f32 %v7855_v49, %v14553_v12  ;;  %v999_v12 = vld [vmem:[%s18584_s1 + $0x1d88] sm:$0xff]  ;;  %v10595_v43 = vpack.c.bf16 %v953_v30, %v952_v31  ;;  %v957_v49 = vld [vmem:[%s18584_s1 + $0x1c38] sm:$0xff]  ;;  %v988_v59 = vld [vmem:[%s18584_s1 + $0x1d30] sm:$0xff]  ;;  %v10643_v31 = vpack.c.bf16 %v993_v20, %v992_v19 }
 0x1bc   :  { %10582 = vmatprep.subr.bf16.mxu1 %v10581_v33  ;;  %v10621_v18 = vpack.c.bf16 %v999_v12, %v998_v8  ;;  %v972_v33 = vld [vmem:[%s18584_s1 + $0x1cb0] sm:$0xff]  ;;  %v10603_v1 = vpack.c.bf16 %v957_v49, %v956_v58  ;;  %v10635_v2 = vpack.c.bf16 %v989_v60, %v988_v59  ;;  %v991_v8 = vld [vmem:[%s18584_s1 + $0x1d48] sm:$0xff]  ;;  %v10613_v30 = vpack.c.bf16 %v979_v22, %v978_v27  ;;  %v994_v23 = vld [vmem:[%s18584_s1 + $0x1d60] sm:$0xff] }
 0x1bd   :  { %v14763_v63 = vadd.f32 %v7890_v53, %v3720_v3  ;;  %10552 = vmatpush3.bf16.msra.mxu0 %v10551_v51  ;;  %v10601_v45 = vpack.c.bf16 %v973_v50, %v972_v33  ;;  %v10633_v51 = vpack.c.bf16 %v1005_v55, %v1004_v54  ;;  %v974_v53 = vld [vmem:[%s18584_s1 + $0x1cc0] sm:$0xff]  ;;  %v976_v12 = vld [vmem:[%s18584_s1 + $0x1cd0] sm:$0xff]  ;;  %v10639_v15 = vpack.c.bf16 %v991_v8, %v990_v61  ;;  %v965_v55 = vld [vmem:[%s18584_s1 + $0x1c78] sm:$0xff] }
 0x1be   :  { %10554 = vmatprep.subr.bf16.mxu0 %v10553_v62  ;;  %v1006_v62 = vld [vmem:[%s18584_s1 + $0x1dc0] sm:$0xff]  ;;  %v10609_v16 = vpack.c.bf16 %v977_v7, %v976_v12  ;;  %v10617_v50 = vpack.c.bf16 %v981_v40, %v980_v38  ;;  %v964_v54 = vld [vmem:[%s18584_s1 + $0x1c70] sm:$0xff]  ;;  %v997_v58 = vld [vmem:[%s18584_s1 + $0x1d78] sm:$0xff] }
 0x1bf   :  { %10584 = vmatpush3.bf16.msra.mxu1 %v10583_v10  ;;  %v975_v10 = vld [vmem:[%s18584_s1 + $0x1cc8] sm:$0xff]  ;;  %v10637_v6 = vpack.c.bf16 %v1007_v0, %v1006_v62  ;;  %v1030_v49 = vld [vmem:[%s18584_s1 + $0x1e80] sm:$0xff]  ;;  %v1032_v61 = vld [vmem:[%s18584_s1 + $0x1e90] sm:$0xff] }
 0x1c0   :  { %10586 = vmatprep.subr.bf16.mxu1 %v10585_v4  ;;  %v10605_v3 = vpack.c.bf16 %v975_v10, %v974_v53  ;;  %v958_v4 = vld [vmem:[%s18584_s1 + $0x1c40] sm:$0xff]  ;;  %v1031_v59 = vld [vmem:[%s18584_s1 + $0x1e88] sm:$0xff]  ;;  %v10619_v10 = vpack.c.bf16 %v965_v55, %v964_v54  ;;  %v1064_v12 = vld [vmem:[%s18584_s1 + $0x1f90] sm:$0xff] }
 0x1c1   :  { %10556 = vmatpush3.bf16.msra.mxu0 %v10555_v26  ;;  %v1008_v26 = vld [vmem:[%s18584_s1 + $0x1dd0] sm:$0xff]  ;;  %v10653_v0 = vpack.c.bf16 %v1031_v59, %v1030_v49  ;;  %v1065_v7 = vld [vmem:[%s18584_s1 + $0x1f98] sm:$0xff]  ;;  %v1034_v20 = vld [vmem:[%s18584_s1 + $0x1ea0] sm:$0xff] }
 0x1c2   :  { %10590 = vmatprep.subr.bf16.mxu0 %v10589_v14  ;;  %v10607_v14 = vpack.c.bf16 %v959_v5, %v958_v4  ;;  %v1047_v5 = vld [vmem:[%s18584_s1 + $0x1f08] sm:$0xff]  ;;  %v10689_v19 = vpack.c.bf16 %v1065_v7, %v1064_v12  ;;  %v1068_v38 = vld [vmem:[%s18584_s1 + $0x1fb0] sm:$0xff]  ;;  %v1069_v40 = vld [vmem:[%s18584_s1 + $0x1fb8] sm:$0xff] }
 0x1c3   :  { %10588 = vmatpush3.bf16.msra.mxu1 %v10587_v11  ;;  %v1009_v11 = vld [vmem:[%s18584_s1 + $0x1dd8] sm:$0xff]  ;;  %v1035_v27 = vld [vmem:[%s18584_s1 + $0x1ea8] sm:$0xff]  ;;  %v1054_v49 = vld [vmem:[%s18584_s1 + $0x1f40] sm:$0xff] }
 0x1c4   :  { %10622 = vmatprep.subr.bf16.mxu1 %v10621_v18  ;;  %4698 = vmatmul.mubr.f32.vlgmr.msra.gmra.mrb[26].mxu0 %v14574_v35  ;;  %v954_v35 = vld [vmem:[%s18584_s1 + $0x1c20] sm:$0xff]  ;;  %v961_v18 = vld [vmem:[%s18584_s1 + $0x1c58] sm:$0xff]  ;;  %v10641_v9 = vpack.c.bf16 %v1009_v11, %v1008_v26  ;;  %v1071_v54 = vld [vmem:[%s18584_s1 + $0x1fc8] sm:$0xff] }
 0x1c5   :  { %10592 = vmatpush3.bf16.msra.mxu0 %v10591_v25  ;;  %4837 = vmatprep.mubr.f32.mxu0 %v2394_v36  ;;  %v10599_v56 = vpack.c.bf16 %v955_v47, %v954_v35  ;;  %v1010_v25 = vld [vmem:[%s18584_s1 + $0x1de0] sm:$0xff]  ;;  %v995_v36 = vld [vmem:[%s18584_s1 + $0x1d68] sm:$0xff] }
 0x1c6   :  { %4768 = vmatmul.mubr.f32.vlgmr.msra.gmra.mrb[26].mxu1 %v14583_v37  ;;  %10594 = vmatprep.subr.bf16.mxu0 %v10593_v29  ;;  %v987_v37 = vld [vmem:[%s18584_s1 + $0x1d28] sm:$0xff]  ;;  %v10611_v29 = vpack.c.bf16 %v961_v18, %v960_v17  ;;  %v10647_v33 = vpack.c.bf16 %v995_v36, %v994_v23  ;;  %v1017_v17 = vld [vmem:[%s18584_s1 + $0x1e18] sm:$0xff]  ;;  %v1048_v18 = vld [vmem:[%s18584_s1 + $0x1f10] sm:$0xff] }
 0x1c7   :  { %10624 = vmatpush3.bf16.msra.mxu1 %v10623_v28  ;;  %4907 = vmatprep.mubr.f32.mxu1 %v2395_v41  ;;  %v10631_v57 = vpack.c.bf16 %v987_v37, %v986_v52  ;;  %v1011_v28 = vld [vmem:[%s18584_s1 + $0x1de8] sm:$0xff]  ;;  %v1050_v23 = vld [vmem:[%s18584_s1 + $0x1f20] sm:$0xff]  ;;  %v1037_v36 = vld [vmem:[%s18584_s1 + $0x1eb8] sm:$0xff] }
 0x1c8   :  { %10626 = vmatprep.subr.bf16.mxu1 %v10625_v42  ;;  %v963_v42 = vld [vmem:[%s18584_s1 + $0x1c68] sm:$0xff]  ;;  %v10645_v39 = vpack.c.bf16 %v1011_v28, %v1010_v25  ;;  %v1066_v25 = vld [vmem:[%s18584_s1 + $0x1fa0] sm:$0xff] }
 0x1c9   :  { %10596 = vmatpush3.bf16.msra.mxu0 %v10595_v43  ;;  %v10615_v52 = vpack.c.bf16 %v963_v42, %v962_v32  ;;  %v1067_v28 = vld [vmem:[%s18584_s1 + $0x1fa8] sm:$0xff]  ;;  %v10661_v32 = vpack.c.bf16 %v1035_v27, %v1034_v20  ;;  %v1042_v12 = vld [vmem:[%s18584_s1 + $0x1ee0] sm:$0xff] }
 0x1ca   :  { %10598 = vmatprep.subr.bf16.mxu0 %v10597_v46  ;;  %v1013_v46 = vld [vmem:[%s18584_s1 + $0x1df8] sm:$0xff]  ;;  %v1019_v42 = vld [vmem:[%s18584_s1 + $0x1e28] sm:$0xff] }
 0x1cb   :  { %10628 = vmatpush3.bf16.msra.mxu1 %v10627_v44  ;;  %v1012_v44 = vld [vmem:[%s18584_s1 + $0x1df0] sm:$0xff]  ;;  %v1043_v7 = vld [vmem:[%s18584_s1 + $0x1ee8] sm:$0xff] }
 0x1cc   :  { %10630 = vmatprep.subr.bf16.mxu1 %v10629_v48  ;;  %v37_v48 = vld [vmem:[%s18585_s0 + $0x78] sm:$0xff] }
 0x1cd   :  { %10600 = vmatpush3.bf16.msra.mxu0 %v10599_v56  ;;  %v996_v56 = vld [vmem:[%s18584_s1 + $0x1d70] sm:$0xff]  ;;  %v2396_v60 = vcombine.high %v37_v48, %v37_v48  ;;  %v14994_v8 = vrot.slane %v37_v48, %v11989_v13  ;;  %v1053_v48 = vld [vmem:[%s18584_s1 + $0x1f38] sm:$0xff] }
 0x1ce   :  { %10602 = vmatprep.subr.bf16.mxu0 %v10601_v45  ;;  %v10649_v45 = vpack.c.bf16 %v1013_v46, %v1012_v44  ;;  %v10651_v62 = vpack.c.bf16 %v997_v58, %v996_v56  ;;  %v1020_v46 = vld [vmem:[%s18584_s1 + $0x1e30] sm:$0xff]  ;;  %v1023_v58 = vld [vmem:[%s18584_s1 + $0x1e48] sm:$0xff] }
 0x1cf   :  { %10632 = vmatpush3.bf16.msra.mxu1 %v10631_v57  ;;  %v15003_v26 = vrot.slane %v2396_v60, %v11989_v13  ;;  %v2411_v22 = vcombine.high %v14994_v8, %v14994_v8  ;;  %v1041_v60 = vld [vmem:[%s18584_s1 + $0x1ed8] sm:$0xff] }
 0x1d0   :  { %10634 = vmatprep.subr.bf16.mxu1 %v10633_v51  ;;  %v1062_v51 = vld [vmem:[%s18584_s1 + $0x1f80] sm:$0xff] }
 0x1d1   :  { %10604 = vmatpush3.bf16.msra.mxu0 %v10603_v1  ;;  %v1014_v1 = vld [vmem:[%s18584_s1 + $0x1e00] sm:$0xff] }
 0x1d2   :  { %10606 = vmatprep.subr.bf16.mxu0 %v10605_v3  ;;  %v1046_v3 = vld [vmem:[%s18584_s1 + $0x1f00] sm:$0xff] }
 0x1d3   :  { %10636 = vmatpush3.bf16.msra.mxu1 %v10635_v2  ;;  %v1015_v2 = vld [vmem:[%s18584_s1 + $0x1e08] sm:$0xff] }
 0x1d4   :  { %10638 = vmatprep.subr.bf16.mxu1 %v10637_v6  ;;  %v1033_v6 = vld [vmem:[%s18584_s1 + $0x1e98] sm:$0xff]  ;;  %v10655_v11 = vpack.c.bf16 %v1015_v2, %v1014_v1 }
 0x1d5   :  { %10608 = vmatpush3.bf16.msra.mxu0 %v10607_v14  ;;  %v10687_v14 = vpack.c.bf16 %v1047_v5, %v1046_v3  ;;  %v1024_v3 = vld [vmem:[%s18584_s1 + $0x1e50] sm:$0xff] }
 0x1d6   :  { %10610 = vmatprep.subr.bf16.mxu0 %v10609_v16  ;;  %v1016_v16 = vld [vmem:[%s18584_s1 + $0x1e10] sm:$0xff] }
 0x1d7   :  { %10640 = vmatpush3.bf16.msra.mxu1 %v10639_v15  ;;  %v7923_v34 = vpop.f32.mrb[14].mxu0  ;;  %v10657_v15 = vpack.c.bf16 %v1033_v6, %v1032_v61  ;;  %v1056_v5 = vld [vmem:[%s18584_s1 + $0x1f50] sm:$0xff]  ;;  %v1057_v6 = vld [vmem:[%s18584_s1 + $0x1f58] sm:$0xff] }
 0x1d8   :  { %10642 = vmatprep.subr.bf16.mxu1 %v10641_v9  ;;  %v7924_v41 = vpop.f32.mrb[15].mxu0  ;;  %v1049_v9 = vld [vmem:[%s18584_s1 + $0x1f18] sm:$0xff] }
 0x1d9   :  { %v7958_v43 = vpop.f32.mrb[14].mxu1  ;;  %v7925_v35 = vadd.f32 %v7924_v41, %v7923_v34  ;;  %10612 = vmatpush3.bf16.msra.mxu0 %v10611_v29  ;;  %v2412_v29 = vcombine.high %v15003_v26, %v15003_v26  ;;  %v10693_v34 = vpack.c.bf16 %v1067_v28, %v1066_v25  ;;  %v1044_v25 = vld [vmem:[%s18584_s1 + $0x1ef0] sm:$0xff]  ;;  %v1045_v28 = vld [vmem:[%s18584_s1 + $0x1ef8] sm:$0xff] }
 0x1da   :  { %v7959_v47 = vpop.f32.mrb[15].mxu1  ;;  %10614 = vmatprep.subr.bf16.mxu0 %v10613_v30  ;;  %v10691_v30 = vpack.c.bf16 %v1049_v9, %v1048_v18  ;;  %v1026_v18 = vld [vmem:[%s18584_s1 + $0x1e60] sm:$0xff] }
 0x1db   :  { %v7960_v37 = vadd.f32 %v7959_v47, %v7958_v43  ;;  %10644 = vmatpush3.bf16.msra.mxu1 %v10643_v31  ;;  %v3860_v57 = vadd.f32 %v7925_v35, %v14763_v63  ;;  %v1063_v63 = vld [vmem:[%s18584_s1 + $0x1f88] sm:$0xff]  ;;  %v10659_v31 = vpack.c.bf16 %v1017_v17, %v1016_v16  ;;  %v1021_v35 = vld [vmem:[%s18584_s1 + $0x1e38] sm:$0xff]  ;;  %v1052_v47 = vld [vmem:[%s18584_s1 + $0x1f30] sm:$0xff]  ;;  %v10707_v16 = vpack.c.bf16 %v1057_v6, %v1056_v5 }
 0x1dc   :  { %10646 = vmatprep.subr.bf16.mxu1 %v10645_v39  ;;  %v10685_v4 = vpack.c.bf16 %v1063_v63, %v1062_v51  ;;  %v1036_v39 = vld [vmem:[%s18584_s1 + $0x1eb0] sm:$0xff]  ;;  %v10667_v55 = vpack.c.bf16 %v1021_v35, %v1020_v46  ;;  %v10699_v56 = vpack.c.bf16 %v1053_v48, %v1052_v47  ;;  %v1055_v51 = vld [vmem:[%s18584_s1 + $0x1f48] sm:$0xff]  ;;  %v10677_v17 = vpack.c.bf16 %v1043_v7, %v1042_v12  ;;  %v1058_v9 = vld [vmem:[%s18584_s1 + $0x1f60] sm:$0xff] }
 0x1dd   :  { %v14973_v53 = vadd.f32 %v7960_v37, %v3860_v57  ;;  %10616 = vmatpush3.bf16.msra.mxu0 %v10615_v52  ;;  %v10665_v44 = vpack.c.bf16 %v1037_v36, %v1036_v39  ;;  %v10697_v52 = vpack.c.bf16 %v1069_v40, %v1068_v38  ;;  %v1038_v37 = vld [vmem:[%s18584_s1 + $0x1ec0] sm:$0xff]  ;;  %v1040_v63 = vld [vmem:[%s18584_s1 + $0x1ed0] sm:$0xff]  ;;  %v10703_v1 = vpack.c.bf16 %v1055_v51, %v1054_v49  ;;  %v1029_v40 = vld [vmem:[%s18584_s1 + $0x1e78] sm:$0xff] }
 0x1de   :  { %10618 = vmatprep.subr.bf16.mxu0 %v10617_v50  ;;  %v1070_v50 = vld [vmem:[%s18584_s1 + $0x1fc0] sm:$0xff]  ;;  %v10673_v2 = vpack.c.bf16 %v1041_v60, %v1040_v63  ;;  %v10681_v36 = vpack.c.bf16 %v1045_v28, %v1044_v25  ;;  %v1028_v38 = vld [vmem:[%s18584_s1 + $0x1e70] sm:$0xff]  ;;  %v1061_v46 = vld [vmem:[%s18584_s1 + $0x1f78] sm:$0xff] }
 0x1df   :  { %10648 = vmatpush3.bf16.msra.mxu1 %v10647_v33  ;;  %v1039_v33 = vld [vmem:[%s18584_s1 + $0x1ec8] sm:$0xff]  ;;  %v10701_v59 = vpack.c.bf16 %v1071_v54, %v1070_v50  ;;  %v1094_v35 = vld [vmem:[%s18584_s1 + $0x2080] sm:$0xff]  ;;  %v1096_v49 = vld [vmem:[%s18584_s1 + $0x2090] sm:$0xff] }
 0x1e0   :  { %10650 = vmatprep.subr.bf16.mxu1 %v10649_v45  ;;  %v10669_v57 = vpack.c.bf16 %v1039_v33, %v1038_v37  ;;  %v1022_v45 = vld [vmem:[%s18584_s1 + $0x1e40] sm:$0xff]  ;;  %v1095_v47 = vld [vmem:[%s18584_s1 + $0x2088] sm:$0xff]  ;;  %v10683_v33 = vpack.c.bf16 %v1029_v40, %v1028_v38  ;;  %v1128_v63 = vld [vmem:[%s18584_s1 + $0x2190] sm:$0xff] }
 0x1e1   :  { %10620 = vmatpush3.bf16.msra.mxu0 %v10619_v10  ;;  %v1072_v10 = vld [vmem:[%s18584_s1 + $0x1fd0] sm:$0xff]  ;;  %v10717_v54 = vpack.c.bf16 %v1095_v47, %v1094_v35  ;;  %v1129_v60 = vld [vmem:[%s18584_s1 + $0x2198] sm:$0xff]  ;;  %v1098_v6 = vld [vmem:[%s18584_s1 + $0x20a0] sm:$0xff] }
 0x1e2   :  { %10654 = vmatprep.subr.bf16.mxu0 %v10653_v0  ;;  %v10671_v0 = vpack.c.bf16 %v1023_v58, %v1022_v45  ;;  %v1111_v58 = vld [vmem:[%s18584_s1 + $0x2108] sm:$0xff]  ;;  %v10753_v5 = vpack.c.bf16 %v1129_v60, %v1128_v63  ;;  %v1132_v25 = vld [vmem:[%s18584_s1 + $0x21b0] sm:$0xff]  ;;  %v1133_v28 = vld [vmem:[%s18584_s1 + $0x21b8] sm:$0xff] }
 0x1e3   :  { %10652 = vmatpush3.bf16.msra.mxu1 %v10651_v62  ;;  %v1073_v62 = vld [vmem:[%s18584_s1 + $0x1fd8] sm:$0xff]  ;;  %v1099_v12 = vld [vmem:[%s18584_s1 + $0x20a8] sm:$0xff]  ;;  %v1118_v35 = vld [vmem:[%s18584_s1 + $0x2140] sm:$0xff] }
 0x1e4   :  { %10686 = vmatprep.subr.bf16.mxu1 %v10685_v4  ;;  %4838 = vmatmul.mubr.f32.vlgmr.msra.gmra.mrb[28].mxu0 %v14784_v21  ;;  %v1018_v21 = vld [vmem:[%s18584_s1 + $0x1e20] sm:$0xff]  ;;  %v1025_v4 = vld [vmem:[%s18584_s1 + $0x1e58] sm:$0xff]  ;;  %v10705_v61 = vpack.c.bf16 %v1073_v62, %v1072_v10  ;;  %v1135_v38 = vld [vmem:[%s18584_s1 + $0x21c8] sm:$0xff] }
 0x1e5   :  { %10656 = vmatpush3.bf16.msra.mxu0 %v10655_v11  ;;  %4977 = vmatprep.mubr.f32.mxu0 %v2411_v22  ;;  %v10663_v41 = vpack.c.bf16 %v1019_v42, %v1018_v21  ;;  %v1074_v11 = vld [vmem:[%s18584_s1 + $0x1fe0] sm:$0xff]  ;;  %v1059_v22 = vld [vmem:[%s18584_s1 + $0x1f68] sm:$0xff] }
 0x1e6   :  { %4908 = vmatmul.mubr.f32.vlgmr.msra.gmra.mrb[28].mxu1 %v14793_v24  ;;  %10658 = vmatprep.subr.bf16.mxu0 %v10657_v15  ;;  %v1051_v24 = vld [vmem:[%s18584_s1 + $0x1f28] sm:$0xff]  ;;  %v10675_v15 = vpack.c.bf16 %v1025_v4, %v1024_v3  ;;  %v10711_v39 = vpack.c.bf16 %v1059_v22, %v1058_v9  ;;  %v1081_v3 = vld [vmem:[%s18584_s1 + $0x2018] sm:$0xff]  ;;  %v1112_v4 = vld [vmem:[%s18584_s1 + $0x2110] sm:$0xff] }
 0x1e7   :  { %10688 = vmatpush3.bf16.msra.mxu1 %v10687_v14  ;;  %5047 = vmatprep.mubr.f32.mxu1 %v2412_v29  ;;  %v10695_v43 = vpack.c.bf16 %v1051_v24, %v1050_v23  ;;  %v1075_v14 = vld [vmem:[%s18584_s1 + $0x1fe8] sm:$0xff]  ;;  %v1114_v9 = vld [vmem:[%s18584_s1 + $0x2120] sm:$0xff]  ;;  %v1101_v22 = vld [vmem:[%s18584_s1 + $0x20b8] sm:$0xff] }
 0x1e8   :  { %10690 = vmatprep.subr.bf16.mxu1 %v10689_v19  ;;  %v1027_v19 = vld [vmem:[%s18584_s1 + $0x1e68] sm:$0xff]  ;;  %v10709_v27 = vpack.c.bf16 %v1075_v14, %v1074_v11  ;;  %v1130_v11 = vld [vmem:[%s18584_s1 + $0x21a0] sm:$0xff] }
 0x1e9   :  { %10660 = vmatpush3.bf16.msra.mxu0 %v10659_v31  ;;  %v10679_v23 = vpack.c.bf16 %v1027_v19, %v1026_v18  ;;  %v1131_v14 = vld [vmem:[%s18584_s1 + $0x21a8] sm:$0xff]  ;;  %v10725_v18 = vpack.c.bf16 %v1099_v12, %v1098_v6  ;;  %v1106_v63 = vld [vmem:[%s18584_s1 + $0x20e0] sm:$0xff] }
 0x1ea   :  { %10662 = vmatprep.subr.bf16.mxu0 %v10661_v32  ;;  %v1077_v32 = vld [vmem:[%s18584_s1 + $0x1ff8] sm:$0xff]  ;;  %v1083_v19 = vld [vmem:[%s18584_s1 + $0x2028] sm:$0xff] }
 0x1eb   :  { %10692 = vmatpush3.bf16.msra.mxu1 %v10691_v30  ;;  %v1076_v30 = vld [vmem:[%s18584_s1 + $0x1ff0] sm:$0xff]  ;;  %v1107_v60 = vld [vmem:[%s18584_s1 + $0x20e8] sm:$0xff] }
 0x1ec   :  { %10694 = vmatprep.subr.bf16.mxu1 %v10693_v34  ;;  %v38_v34 = vld [vmem:[%s18585_s0 + $0x80] sm:$0xff] }
 0x1ed   :  { %10664 = vmatpush3.bf16.msra.mxu0 %v10663_v41  ;;  %v1060_v41 = vld [vmem:[%s18584_s1 + $0x1f70] sm:$0xff]  ;;  %v2413_v48 = vcombine.high %v38_v34, %v38_v34  ;;  %v15204_v51 = vrot.slane %v38_v34, %v11989_v13  ;;  %v1117_v34 = vld [vmem:[%s18584_s1 + $0x2138] sm:$0xff] }
 0x1ee   :  { %10666 = vmatprep.subr.bf16.mxu0 %v10665_v44  ;;  %v10713_v44 = vpack.c.bf16 %v1077_v32, %v1076_v30  ;;  %v10715_v50 = vpack.c.bf16 %v1061_v46, %v1060_v41  ;;  %v1084_v32 = vld [vmem:[%s18584_s1 + $0x2030] sm:$0xff]  ;;  %v1087_v46 = vld [vmem:[%s18584_s1 + $0x2048] sm:$0xff] }
 0x1ef   :  { %10696 = vmatpush3.bf16.msra.mxu1 %v10695_v43  ;;  %v15213_v10 = vrot.slane %v2413_v48, %v11989_v13  ;;  %v2428_v7 = vcombine.high %v15204_v51, %v15204_v51  ;;  %v1105_v48 = vld [vmem:[%s18584_s1 + $0x20d8] sm:$0xff] }
 0x1f0   :  { %10698 = vmatprep.subr.bf16.mxu1 %v10697_v52  ;;  %v1126_v52 = vld [vmem:[%s18584_s1 + $0x2180] sm:$0xff] }
 0x1f1   :  { %10668 = vmatpush3.bf16.msra.mxu0 %v10667_v55  ;;  %v1078_v55 = vld [vmem:[%s18584_s1 + $0x2000] sm:$0xff] }
 0x1f2   :  { %10670 = vmatprep.subr.bf16.mxu0 %v10669_v57  ;;  %v1110_v57 = vld [vmem:[%s18584_s1 + $0x2100] sm:$0xff] }
 0x1f3   :  { %10700 = vmatpush3.bf16.msra.mxu1 %v10699_v56  ;;  %v1079_v56 = vld [vmem:[%s18584_s1 + $0x2008] sm:$0xff] }
 0x1f4   :  { %10702 = vmatprep.subr.bf16.mxu1 %v10701_v59  ;;  %v1097_v59 = vld [vmem:[%s18584_s1 + $0x2098] sm:$0xff]  ;;  %v10719_v62 = vpack.c.bf16 %v1079_v56, %v1078_v55 }
 0x1f5   :  { %10672 = vmatpush3.bf16.msra.mxu0 %v10671_v0  ;;  %v10751_v0 = vpack.c.bf16 %v1111_v58, %v1110_v57  ;;  %v1088_v57 = vld [vmem:[%s18584_s1 + $0x2050] sm:$0xff] }
 0x1f6   :  { %10674 = vmatprep.subr.bf16.mxu0 %v10673_v2  ;;  %v1080_v2 = vld [vmem:[%s18584_s1 + $0x2010] sm:$0xff] }
 0x1f7   :  { %10704 = vmatpush3.bf16.msra.mxu1 %v10703_v1  ;;  %v7993_v20 = vpop.f32.mrb[16].mxu0  ;;  %v10721_v1 = vpack.c.bf16 %v1097_v59, %v1096_v49  ;;  %v1120_v58 = vld [vmem:[%s18584_s1 + $0x2150] sm:$0xff]  ;;  %v1121_v59 = vld [vmem:[%s18584_s1 + $0x2158] sm:$0xff] }
 0x1f8   :  { %10706 = vmatprep.subr.bf16.mxu1 %v10705_v61  ;;  %v7994_v29 = vpop.f32.mrb[17].mxu0  ;;  %v1113_v61 = vld [vmem:[%s18584_s1 + $0x2118] sm:$0xff] }
 0x1f9   :  { %v8028_v31 = vpop.f32.mrb[16].mxu1  ;;  %v7995_v21 = vadd.f32 %v7994_v29, %v7993_v20  ;;  %10676 = vmatpush3.bf16.msra.mxu0 %v10675_v15  ;;  %v2429_v15 = vcombine.high %v15213_v10, %v15213_v10  ;;  %v10757_v20 = vpack.c.bf16 %v1131_v14, %v1130_v11  ;;  %v1108_v11 = vld [vmem:[%s18584_s1 + $0x20f0] sm:$0xff]  ;;  %v1109_v14 = vld [vmem:[%s18584_s1 + $0x20f8] sm:$0xff] }
 0x1fa   :  { %v8029_v42 = vpop.f32.mrb[17].mxu1  ;;  %10678 = vmatprep.subr.bf16.mxu0 %v10677_v17  ;;  %v10755_v17 = vpack.c.bf16 %v1113_v61, %v1112_v4  ;;  %v1090_v4 = vld [vmem:[%s18584_s1 + $0x2060] sm:$0xff] }
 0x1fb   :  { %v8030_v24 = vadd.f32 %v8029_v42, %v8028_v31  ;;  %10708 = vmatpush3.bf16.msra.mxu1 %v10707_v16  ;;  %v4000_v43 = vadd.f32 %v7995_v21, %v14973_v53  ;;  %v1127_v53 = vld [vmem:[%s18584_s1 + $0x2188] sm:$0xff]  ;;  %v10723_v16 = vpack.c.bf16 %v1081_v3, %v1080_v2  ;;  %v1085_v21 = vld [vmem:[%s18584_s1 + $0x2038] sm:$0xff]  ;;  %v1116_v42 = vld [vmem:[%s18584_s1 + $0x2130] sm:$0xff]  ;;  %v10771_v2 = vpack.c.bf16 %v1121_v59, %v1120_v58 }
 0x1fc   :  { %10710 = vmatprep.subr.bf16.mxu1 %v10709_v27  ;;  %v10749_v45 = vpack.c.bf16 %v1127_v53, %v1126_v52  ;;  %v1100_v27 = vld [vmem:[%s18584_s1 + $0x20b0] sm:$0xff]  ;;  %v10731_v40 = vpack.c.bf16 %v1085_v21, %v1084_v32  ;;  %v10763_v41 = vpack.c.bf16 %v1117_v34, %v1116_v42  ;;  %v1119_v52 = vld [vmem:[%s18584_s1 + $0x2148] sm:$0xff]  ;;  %v10741_v3 = vpack.c.bf16 %v1107_v60, %v1106_v63  ;;  %v1122_v61 = vld [vmem:[%s18584_s1 + $0x2160] sm:$0xff] }
 0x1fd   :  { %v15183_v37 = vadd.f32 %v8030_v24, %v4000_v43  ;;  %10680 = vmatpush3.bf16.msra.mxu0 %v10679_v23  ;;  %v10729_v30 = vpack.c.bf16 %v1101_v22, %v1100_v27  ;;  %v10761_v23 = vpack.c.bf16 %v1133_v28, %v1132_v25  ;;  %v1102_v24 = vld [vmem:[%s18584_s1 + $0x20c0] sm:$0xff]  ;;  %v1104_v53 = vld [vmem:[%s18584_s1 + $0x20d0] sm:$0xff]  ;;  %v10767_v55 = vpack.c.bf16 %v1119_v52, %v1118_v35  ;;  %v1093_v28 = vld [vmem:[%s18584_s1 + $0x2078] sm:$0xff] }
 0x1fe   :  { %10682 = vmatprep.subr.bf16.mxu0 %v10681_v36  ;;  %v1134_v36 = vld [vmem:[%s18584_s1 + $0x21c0] sm:$0xff]  ;;  %v10737_v56 = vpack.c.bf16 %v1105_v48, %v1104_v53  ;;  %v10745_v22 = vpack.c.bf16 %v1109_v14, %v1108_v11  ;;  %v1092_v25 = vld [vmem:[%s18584_s1 + $0x2070] sm:$0xff]  ;;  %v1125_v32 = vld [vmem:[%s18584_s1 + $0x2178] sm:$0xff] }
 0x1ff   :  { %10712 = vmatpush3.bf16.msra.mxu1 %v10711_v39  ;;  %v1103_v39 = vld [vmem:[%s18584_s1 + $0x20c8] sm:$0xff]  ;;  %v10765_v47 = vpack.c.bf16 %v1135_v38, %v1134_v36  ;;  %v1158_v21 = vld [vmem:[%s18584_s1 + $0x2280] sm:$0xff]  ;;  %v1160_v35 = vld [vmem:[%s18584_s1 + $0x2290] sm:$0xff] }
 0x200   :  { %10714 = vmatprep.subr.bf16.mxu1 %v10713_v44  ;;  %v10733_v43 = vpack.c.bf16 %v1103_v39, %v1102_v24  ;;  %v1086_v44 = vld [vmem:[%s18584_s1 + $0x2040] sm:$0xff]  ;;  %v1159_v42 = vld [vmem:[%s18584_s1 + $0x2288] sm:$0xff]  ;;  %v10747_v39 = vpack.c.bf16 %v1093_v28, %v1092_v25  ;;  %v1192_v53 = vld [vmem:[%s18584_s1 + $0x2390] sm:$0xff] }
 0x201   :  { %10684 = vmatpush3.bf16.msra.mxu0 %v10683_v33  ;;  %v1136_v33 = vld [vmem:[%s18584_s1 + $0x21d0] sm:$0xff]  ;;  %v10781_v38 = vpack.c.bf16 %v1159_v42, %v1158_v21  ;;  %v1193_v48 = vld [vmem:[%s18584_s1 + $0x2398] sm:$0xff]  ;;  %v1162_v59 = vld [vmem:[%s18584_s1 + $0x22a0] sm:$0xff] }
 0x202   :  { %10718 = vmatprep.subr.bf16.mxu0 %v10717_v54  ;;  %v10735_v54 = vpack.c.bf16 %v1087_v46, %v1086_v44  ;;  %v1175_v46 = vld [vmem:[%s18584_s1 + $0x2308] sm:$0xff]  ;;  %v10817_v58 = vpack.c.bf16 %v1193_v48, %v1192_v53  ;;  %v1196_v11 = vld [vmem:[%s18584_s1 + $0x23b0] sm:$0xff]  ;;  %v1197_v14 = vld [vmem:[%s18584_s1 + $0x23b8] sm:$0xff] }
 0x203   :  { %10716 = vmatpush3.bf16.msra.mxu1 %v10715_v50  ;;  %v1137_v50 = vld [vmem:[%s18584_s1 + $0x21d8] sm:$0xff]  ;;  %v1163_v63 = vld [vmem:[%s18584_s1 + $0x22a8] sm:$0xff]  ;;  %v1182_v21 = vld [vmem:[%s18584_s1 + $0x2340] sm:$0xff] }
 0x204   :  { %10750 = vmatprep.subr.bf16.mxu1 %v10749_v45  ;;  %4978 = vmatmul.mubr.f32.vlgmr.msra.gmra.mrb[30].mxu0 %v14994_v8  ;;  %v1082_v8 = vld [vmem:[%s18584_s1 + $0x2020] sm:$0xff]  ;;  %v1089_v45 = vld [vmem:[%s18584_s1 + $0x2058] sm:$0xff]  ;;  %v10769_v49 = vpack.c.bf16 %v1137_v50, %v1136_v33  ;;  %v1199_v25 = vld [vmem:[%s18584_s1 + $0x23c8] sm:$0xff] }
 0x205   :  { %10720 = vmatpush3.bf16.msra.mxu0 %v10719_v62  ;;  %5117 = vmatprep.mubr.f32.mxu0 %v2428_v7  ;;  %v10727_v29 = vpack.c.bf16 %v1083_v19, %v1082_v8  ;;  %v1138_v62 = vld [vmem:[%s18584_s1 + $0x21e0] sm:$0xff]  ;;  %v1123_v7 = vld [vmem:[%s18584_s1 + $0x2168] sm:$0xff] }
 0x206   :  { %5048 = vmatmul.mubr.f32.vlgmr.msra.gmra.mrb[30].mxu1 %v15003_v26  ;;  %10722 = vmatprep.subr.bf16.mxu0 %v10721_v1  ;;  %v1115_v26 = vld [vmem:[%s18584_s1 + $0x2128] sm:$0xff]  ;;  %v10739_v1 = vpack.c.bf16 %v1089_v45, %v1088_v57  ;;  %v10775_v27 = vpack.c.bf16 %v1123_v7, %v1122_v61  ;;  %v1145_v57 = vld [vmem:[%s18584_s1 + $0x2218] sm:$0xff]  ;;  %v1176_v45 = vld [vmem:[%s18584_s1 + $0x2310] sm:$0xff] }
 0x207   :  { %10752 = vmatpush3.bf16.msra.mxu1 %v10751_v0  ;;  %5187 = vmatprep.mubr.f32.mxu1 %v2429_v15  ;;  %v10759_v31 = vpack.c.bf16 %v1115_v26, %v1114_v9  ;;  %v1139_v0 = vld [vmem:[%s18584_s1 + $0x21e8] sm:$0xff]  ;;  %v1178_v61 = vld [vmem:[%s18584_s1 + $0x2320] sm:$0xff]  ;;  %v1165_v7 = vld [vmem:[%s18584_s1 + $0x22b8] sm:$0xff] }
 0x208   :  { %10754 = vmatprep.subr.bf16.mxu1 %v10753_v5  ;;  %v1091_v5 = vld [vmem:[%s18584_s1 + $0x2068] sm:$0xff]  ;;  %v10773_v12 = vpack.c.bf16 %v1139_v0, %v1138_v62  ;;  %v1194_v62 = vld [vmem:[%s18584_s1 + $0x23a0] sm:$0xff] }
 0x209   :  { %10724 = vmatpush3.bf16.msra.mxu0 %v10723_v16  ;;  %v10743_v9 = vpack.c.bf16 %v1091_v5, %v1090_v4  ;;  %v1195_v0 = vld [vmem:[%s18584_s1 + $0x23a8] sm:$0xff]  ;;  %v10789_v4 = vpack.c.bf16 %v1163_v63, %v1162_v59  ;;  %v1170_v53 = vld [vmem:[%s18584_s1 + $0x22e0] sm:$0xff] }
 0x20a   :  { %10726 = vmatprep.subr.bf16.mxu0 %v10725_v18  ;;  %v1141_v18 = vld [vmem:[%s18584_s1 + $0x21f8] sm:$0xff]  ;;  %v1147_v5 = vld [vmem:[%s18584_s1 + $0x2228] sm:$0xff] }
 0x20b   :  { %10756 = vmatpush3.bf16.msra.mxu1 %v10755_v17  ;;  %v1140_v17 = vld [vmem:[%s18584_s1 + $0x21f0] sm:$0xff]  ;;  %v1171_v48 = vld [vmem:[%s18584_s1 + $0x22e8] sm:$0xff] }
 0x20c   :  { %10758 = vmatprep.subr.bf16.mxu1 %v10757_v20  ;;  %v39_v20 = vld [vmem:[%s18585_s0 + $0x88] sm:$0xff] }
 0x20d   :  { %10728 = vmatpush3.bf16.msra.mxu0 %v10727_v29  ;;  %v1124_v29 = vld [vmem:[%s18584_s1 + $0x2170] sm:$0xff]  ;;  %v2430_v34 = vcombine.high %v39_v20, %v39_v20  ;;  %v15414_v52 = vrot.slane %v39_v20, %v11989_v13  ;;  %v1181_v20 = vld [vmem:[%s18584_s1 + $0x2338] sm:$0xff] }
 0x20e   :  { %10730 = vmatprep.subr.bf16.mxu0 %v10729_v30  ;;  %v10777_v30 = vpack.c.bf16 %v1141_v18, %v1140_v17  ;;  %v10779_v36 = vpack.c.bf16 %v1125_v32, %v1124_v29  ;;  %v1148_v18 = vld [vmem:[%s18584_s1 + $0x2230] sm:$0xff]  ;;  %v1151_v32 = vld [vmem:[%s18584_s1 + $0x2248] sm:$0xff] }
 0x20f   :  { %10760 = vmatpush3.bf16.msra.mxu1 %v10759_v31  ;;  %v15423_v33 = vrot.slane %v2430_v34, %v11989_v13  ;;  %v2445_v60 = vcombine.high %v15414_v52, %v15414_v52  ;;  %v1169_v34 = vld [vmem:[%s18584_s1 + $0x22d8] sm:$0xff] }
 0x210   :  { %10762 = vmatprep.subr.bf16.mxu1 %v10761_v23  ;;  %v1190_v23 = vld [vmem:[%s18584_s1 + $0x2380] sm:$0xff] }
 0x211   :  { %10732 = vmatpush3.bf16.msra.mxu0 %v10731_v40  ;;  %v1142_v40 = vld [vmem:[%s18584_s1 + $0x2200] sm:$0xff] }
 0x212   :  { %10734 = vmatprep.subr.bf16.mxu0 %v10733_v43  ;;  %v1174_v43 = vld [vmem:[%s18584_s1 + $0x2300] sm:$0xff] }
 0x213   :  { %10764 = vmatpush3.bf16.msra.mxu1 %v10763_v41  ;;  %v1143_v41 = vld [vmem:[%s18584_s1 + $0x2208] sm:$0xff] }
 0x214   :  { %10766 = vmatprep.subr.bf16.mxu1 %v10765_v47  ;;  %v1161_v47 = vld [vmem:[%s18584_s1 + $0x2298] sm:$0xff]  ;;  %v10783_v50 = vpack.c.bf16 %v1143_v41, %v1142_v40 }
 0x215   :  { %10736 = vmatpush3.bf16.msra.mxu0 %v10735_v54  ;;  %v10815_v54 = vpack.c.bf16 %v1175_v46, %v1174_v43  ;;  %v1152_v43 = vld [vmem:[%s18584_s1 + $0x2250] sm:$0xff] }
 0x216   :  { %10738 = vmatprep.subr.bf16.mxu0 %v10737_v56  ;;  %v1144_v56 = vld [vmem:[%s18584_s1 + $0x2210] sm:$0xff] }
 0x217   :  { %10768 = vmatpush3.bf16.msra.mxu1 %v10767_v55  ;;  %v8063_v6 = vpop.f32.mrb[18].mxu0  ;;  %v10785_v55 = vpack.c.bf16 %v1161_v47, %v1160_v35  ;;  %v1184_v46 = vld [vmem:[%s18584_s1 + $0x2350] sm:$0xff]  ;;  %v1185_v47 = vld [vmem:[%s18584_s1 + $0x2358] sm:$0xff] }
 0x218   :  { %10770 = vmatprep.subr.bf16.mxu1 %v10769_v49  ;;  %v8064_v15 = vpop.f32.mrb[19].mxu0  ;;  %v1177_v49 = vld [vmem:[%s18584_s1 + $0x2318] sm:$0xff] }
 0x219   :  { %v8098_v16 = vpop.f32.mrb[18].mxu1  ;;  %v8065_v8 = vadd.f32 %v8064_v15, %v8063_v6  ;;  %10740 = vmatpush3.bf16.msra.mxu0 %v10739_v1  ;;  %v2446_v1 = vcombine.high %v15423_v33, %v15423_v33  ;;  %v10821_v6 = vpack.c.bf16 %v1195_v0, %v1194_v62  ;;  %v1172_v62 = vld [vmem:[%s18584_s1 + $0x22f0] sm:$0xff]  ;;  %v1173_v0 = vld [vmem:[%s18584_s1 + $0x22f8] sm:$0xff] }
 0x21a   :  { %v8099_v19 = vpop.f32.mrb[19].mxu1  ;;  %10742 = vmatprep.subr.bf16.mxu0 %v10741_v3  ;;  %v10819_v3 = vpack.c.bf16 %v1177_v49, %v1176_v45  ;;  %v1154_v45 = vld [vmem:[%s18584_s1 + $0x2260] sm:$0xff] }
 0x21b   :  { %v8100_v26 = vadd.f32 %v8099_v19, %v8098_v16  ;;  %10772 = vmatpush3.bf16.msra.mxu1 %v10771_v2  ;;  %v4140_v31 = vadd.f32 %v8065_v8, %v15183_v37  ;;  %v1191_v37 = vld [vmem:[%s18584_s1 + $0x2388] sm:$0xff]  ;;  %v10787_v2 = vpack.c.bf16 %v1145_v57, %v1144_v56  ;;  %v1149_v8 = vld [vmem:[%s18584_s1 + $0x2238] sm:$0xff]  ;;  %v1180_v19 = vld [vmem:[%s18584_s1 + $0x2330] sm:$0xff]  ;;  %v10835_v56 = vpack.c.bf16 %v1185_v47, %v1184_v46 }
 0x21c   :  { %10774 = vmatprep.subr.bf16.mxu1 %v10773_v12  ;;  %v10813_v44 = vpack.c.bf16 %v1191_v37, %v1190_v23  ;;  %v1164_v12 = vld [vmem:[%s18584_s1 + $0x22b0] sm:$0xff]  ;;  %v10795_v28 = vpack.c.bf16 %v1149_v8, %v1148_v18  ;;  %v10827_v29 = vpack.c.bf16 %v1181_v20, %v1180_v19  ;;  %v1183_v23 = vld [vmem:[%s18584_s1 + $0x2348] sm:$0xff]  ;;  %v10805_v57 = vpack.c.bf16 %v1171_v48, %v1170_v53  ;;  %v1186_v49 = vld [vmem:[%s18584_s1 + $0x2360] sm:$0xff] }
 0x21d   :  { %v15393_v24 = vadd.f32 %v8100_v26, %v4140_v31  ;;  %10744 = vmatpush3.bf16.msra.mxu0 %v10743_v9  ;;  %v10793_v17 = vpack.c.bf16 %v1165_v7, %v1164_v12  ;;  %v10825_v9 = vpack.c.bf16 %v1197_v14, %v1196_v11  ;;  %v1166_v26 = vld [vmem:[%s18584_s1 + $0x22c0] sm:$0xff]  ;;  %v1168_v37 = vld [vmem:[%s18584_s1 + $0x22d0] sm:$0xff]  ;;  %v10831_v40 = vpack.c.bf16 %v1183_v23, %v1182_v21  ;;  %v1157_v14 = vld [vmem:[%s18584_s1 + $0x2278] sm:$0xff] }
 0x21e   :  { %10746 = vmatprep.subr.bf16.mxu0 %v10745_v22  ;;  %v1198_v22 = vld [vmem:[%s18584_s1 + $0x23c0] sm:$0xff]  ;;  %v10801_v41 = vpack.c.bf16 %v1169_v34, %v1168_v37  ;;  %v10809_v7 = vpack.c.bf16 %v1173_v0, %v1172_v62  ;;  %v1156_v11 = vld [vmem:[%s18584_s1 + $0x2270] sm:$0xff]  ;;  %v1189_v18 = vld [vmem:[%s18584_s1 + $0x2378] sm:$0xff] }
 0x21f   :  { %10776 = vmatpush3.bf16.msra.mxu1 %v10775_v27  ;;  %v1167_v27 = vld [vmem:[%s18584_s1 + $0x22c8] sm:$0xff]  ;;  %v10829_v42 = vpack.c.bf16 %v1199_v25, %v1198_v22  ;;  %v1222_v8 = vld [vmem:[%s18584_s1 + $0x2480] sm:$0xff]  ;;  %v1224_v21 = vld [vmem:[%s18584_s1 + $0x2490] sm:$0xff] }
 0x220   :  { %10778 = vmatprep.subr.bf16.mxu1 %v10777_v30  ;;  %v10797_v31 = vpack.c.bf16 %v1167_v27, %v1166_v26  ;;  %v1150_v30 = vld [vmem:[%s18584_s1 + $0x2240] sm:$0xff]  ;;  %v1223_v19 = vld [vmem:[%s18584_s1 + $0x2488] sm:$0xff]  ;;  %v10811_v27 = vpack.c.bf16 %v1157_v14, %v1156_v11  ;;  %v1256_v37 = vld [vmem:[%s18584_s1 + $0x2590] sm:$0xff] }
 0x221   :  { %10748 = vmatpush3.bf16.msra.mxu0 %v10747_v39  ;;  %v1200_v39 = vld [vmem:[%s18584_s1 + $0x23d0] sm:$0xff]  ;;  %v10845_v25 = vpack.c.bf16 %v1223_v19, %v1222_v8  ;;  %v1257_v34 = vld [vmem:[%s18584_s1 + $0x2598] sm:$0xff]  ;;  %v1226_v47 = vld [vmem:[%s18584_s1 + $0x24a0] sm:$0xff] }
 0x222   :  { %10782 = vmatprep.subr.bf16.mxu0 %v10781_v38  ;;  %v10799_v38 = vpack.c.bf16 %v1151_v32, %v1150_v30  ;;  %v1239_v32 = vld [vmem:[%s18584_s1 + $0x2508] sm:$0xff]  ;;  %v10881_v46 = vpack.c.bf16 %v1257_v34, %v1256_v37  ;;  %v1260_v62 = vld [vmem:[%s18584_s1 + $0x25b0] sm:$0xff]  ;;  %v1261_v0 = vld [vmem:[%s18584_s1 + $0x25b8] sm:$0xff] }
 0x223   :  { %10780 = vmatpush3.bf16.msra.mxu1 %v10779_v36  ;;  %v1201_v36 = vld [vmem:[%s18584_s1 + $0x23d8] sm:$0xff]  ;;  %v1227_v53 = vld [vmem:[%s18584_s1 + $0x24a8] sm:$0xff]  ;;  %v1246_v8 = vld [vmem:[%s18584_s1 + $0x2540] sm:$0xff] }
 0x224   :  { %10814 = vmatprep.subr.bf16.mxu1 %v10813_v44  ;;  %5118 = vmatmul.mubr.f32.vlgmr.msra.gmra.mrb[32].mxu0 %v15204_v51  ;;  %v1146_v51 = vld [vmem:[%s18584_s1 + $0x2220] sm:$0xff]  ;;  %v1153_v44 = vld [vmem:[%s18584_s1 + $0x2258] sm:$0xff]  ;;  %v10833_v35 = vpack.c.bf16 %v1201_v36, %v1200_v39  ;;  %v1263_v11 = vld [vmem:[%s18584_s1 + $0x25c8] sm:$0xff] }
 0x225   :  { %10784 = vmatpush3.bf16.msra.mxu0 %v10783_v50  ;;  %5257 = vmatprep.mubr.f32.mxu0 %v2445_v60  ;;  %v10791_v15 = vpack.c.bf16 %v1147_v5, %v1146_v51  ;;  %v1202_v50 = vld [vmem:[%s18584_s1 + $0x23e0] sm:$0xff]  ;;  %v1187_v60 = vld [vmem:[%s18584_s1 + $0x2368] sm:$0xff] }
 0x226   :  { %5188 = vmatmul.mubr.f32.vlgmr.msra.gmra.mrb[32].mxu1 %v15213_v10  ;;  %10786 = vmatprep.subr.bf16.mxu0 %v10785_v55  ;;  %v1179_v10 = vld [vmem:[%s18584_s1 + $0x2328] sm:$0xff]  ;;  %v10803_v55 = vpack.c.bf16 %v1153_v44, %v1152_v43  ;;  %v10839_v12 = vpack.c.bf16 %v1187_v60, %v1186_v49  ;;  %v1209_v43 = vld [vmem:[%s18584_s1 + $0x2418] sm:$0xff]  ;;  %v1240_v44 = vld [vmem:[%s18584_s1 + $0x2510] sm:$0xff] }
 0x227   :  { %10816 = vmatpush3.bf16.msra.mxu1 %v10815_v54  ;;  %5327 = vmatprep.mubr.f32.mxu1 %v2446_v1  ;;  %v10823_v16 = vpack.c.bf16 %v1179_v10, %v1178_v61  ;;  %v1203_v54 = vld [vmem:[%s18584_s1 + $0x23e8] sm:$0xff]  ;;  %v1242_v49 = vld [vmem:[%s18584_s1 + $0x2520] sm:$0xff]  ;;  %v1229_v60 = vld [vmem:[%s18584_s1 + $0x24b8] sm:$0xff] }
 0x228   :  { %10818 = vmatprep.subr.bf16.mxu1 %v10817_v58  ;;  %v1155_v58 = vld [vmem:[%s18584_s1 + $0x2268] sm:$0xff]  ;;  %v10837_v63 = vpack.c.bf16 %v1203_v54, %v1202_v50  ;;  %v1258_v50 = vld [vmem:[%s18584_s1 + $0x25a0] sm:$0xff] }
 0x229   :  { %10788 = vmatpush3.bf16.msra.mxu0 %v10787_v2  ;;  %v10807_v61 = vpack.c.bf16 %v1155_v58, %v1154_v45  ;;  %v1259_v54 = vld [vmem:[%s18584_s1 + $0x25a8] sm:$0xff]  ;;  %v10853_v45 = vpack.c.bf16 %v1227_v53, %v1226_v47  ;;  %v1234_v37 = vld [vmem:[%s18584_s1 + $0x24e0] sm:$0xff] }
 0x22a   :  { %10790 = vmatprep.subr.bf16.mxu0 %v10789_v4  ;;  %v1205_v4 = vld [vmem:[%s18584_s1 + $0x23f8] sm:$0xff]  ;;  %v1211_v58 = vld [vmem:[%s18584_s1 + $0x2428] sm:$0xff] }
 0x22b   :  { %10820 = vmatpush3.bf16.msra.mxu1 %v10819_v3  ;;  %v1204_v3 = vld [vmem:[%s18584_s1 + $0x23f0] sm:$0xff]  ;;  %v1235_v34 = vld [vmem:[%s18584_s1 + $0x24e8] sm:$0xff] }
 0x22c   :  { %10822 = vmatprep.subr.bf16.mxu1 %v10821_v6  ;;  %v40_v6 = vld [vmem:[%s18585_s0 + $0x90] sm:$0xff] }
 0x22d   :  { %10792 = vmatpush3.bf16.msra.mxu0 %v10791_v15  ;;  %v1188_v15 = vld [vmem:[%s18584_s1 + $0x2370] sm:$0xff]  ;;  %v2447_v20 = vcombine.high %v40_v6, %v40_v6  ;;  %v15624_v23 = vrot.slane %v40_v6, %v11989_v13  ;;  %v1245_v6 = vld [vmem:[%s18584_s1 + $0x2538] sm:$0xff] }
 0x22e   :  { %10794 = vmatprep.subr.bf16.mxu0 %v10793_v17  ;;  %v10841_v17 = vpack.c.bf16 %v1205_v4, %v1204_v3  ;;  %v10843_v22 = vpack.c.bf16 %v1189_v18, %v1188_v15  ;;  %v1212_v4 = vld [vmem:[%s18584_s1 + $0x2430] sm:$0xff]  ;;  %v1215_v18 = vld [vmem:[%s18584_s1 + $0x2448] sm:$0xff] }
 0x22f   :  { %10824 = vmatpush3.bf16.msra.mxu1 %v10823_v16  ;;  %v15633_v39 = vrot.slane %v2447_v20, %v11989_v13  ;;  %v2462_v48 = vcombine.high %v15624_v23, %v15624_v23  ;;  %v1233_v20 = vld [vmem:[%s18584_s1 + $0x24d8] sm:$0xff] }
 0x230   :  { %10826 = vmatprep.subr.bf16.mxu1 %v10825_v9  ;;  %v1254_v9 = vld [vmem:[%s18584_s1 + $0x2580] sm:$0xff] }
 0x231   :  { %10796 = vmatpush3.bf16.msra.mxu0 %v10795_v28  ;;  %v1206_v28 = vld [vmem:[%s18584_s1 + $0x2400] sm:$0xff] }
 0x232   :  { %10798 = vmatprep.subr.bf16.mxu0 %v10797_v31  ;;  %v1238_v31 = vld [vmem:[%s18584_s1 + $0x2500] sm:$0xff] }
 0x233   :  { %10828 = vmatpush3.bf16.msra.mxu1 %v10827_v29  ;;  %v1207_v29 = vld [vmem:[%s18584_s1 + $0x2408] sm:$0xff] }
 0x234   :  { %10830 = vmatprep.subr.bf16.mxu1 %v10829_v42  ;;  %v1225_v42 = vld [vmem:[%s18584_s1 + $0x2498] sm:$0xff]  ;;  %v10847_v36 = vpack.c.bf16 %v1207_v29, %v1206_v28 }
 0x235   :  { %10800 = vmatpush3.bf16.msra.mxu0 %v10799_v38  ;;  %v10879_v38 = vpack.c.bf16 %v1239_v32, %v1238_v31  ;;  %v1216_v31 = vld [vmem:[%s18584_s1 + $0x2450] sm:$0xff] }
 0x236   :  { %10802 = vmatprep.subr.bf16.mxu0 %v10801_v41  ;;  %v1208_v41 = vld [vmem:[%s18584_s1 + $0x2410] sm:$0xff] }
 0x237   :  { %10832 = vmatpush3.bf16.msra.mxu1 %v10831_v40  ;;  %v8133_v59 = vpop.f32.mrb[20].mxu0  ;;  %v10849_v40 = vpack.c.bf16 %v1225_v42, %v1224_v21  ;;  %v1248_v32 = vld [vmem:[%s18584_s1 + $0x2550] sm:$0xff]  ;;  %v1249_v42 = vld [vmem:[%s18584_s1 + $0x2558] sm:$0xff] }
 0x238   :  { %10834 = vmatprep.subr.bf16.mxu1 %v10833_v35  ;;  %v8134_v1 = vpop.f32.mrb[21].mxu0  ;;  %v1241_v35 = vld [vmem:[%s18584_s1 + $0x2518] sm:$0xff] }
 0x239   :  { %v8168_v2 = vpop.f32.mrb[20].mxu1  ;;  %v8135_v51 = vadd.f32 %v8134_v1, %v8133_v59  ;;  %10804 = vmatpush3.bf16.msra.mxu0 %v10803_v55  ;;  %v2463_v55 = vcombine.high %v15633_v39, %v15633_v39  ;;  %v10885_v59 = vpack.c.bf16 %v1259_v54, %v1258_v50  ;;  %v1236_v50 = vld [vmem:[%s18584_s1 + $0x24f0] sm:$0xff]  ;;  %v1237_v54 = vld [vmem:[%s18584_s1 + $0x24f8] sm:$0xff] }
 0x23a   :  { %v8169_v5 = vpop.f32.mrb[21].mxu1  ;;  %10806 = vmatprep.subr.bf16.mxu0 %v10805_v57  ;;  %v10883_v57 = vpack.c.bf16 %v1241_v35, %v1240_v44  ;;  %v1218_v44 = vld [vmem:[%s18584_s1 + $0x2460] sm:$0xff] }
 0x23b   :  { %v8170_v10 = vadd.f32 %v8169_v5, %v8168_v2  ;;  %10836 = vmatpush3.bf16.msra.mxu1 %v10835_v56  ;;  %v4280_v16 = vadd.f32 %v8135_v51, %v15393_v24  ;;  %v1255_v24 = vld [vmem:[%s18584_s1 + $0x2588] sm:$0xff]  ;;  %v10851_v56 = vpack.c.bf16 %v1209_v43, %v1208_v41  ;;  %v1213_v51 = vld [vmem:[%s18584_s1 + $0x2438] sm:$0xff]  ;;  %v1244_v5 = vld [vmem:[%s18584_s1 + $0x2530] sm:$0xff]  ;;  %v10899_v41 = vpack.c.bf16 %v1249_v42, %v1248_v32 }
 0x23c   :  { %10838 = vmatprep.subr.bf16.mxu1 %v10837_v63  ;;  %v10877_v30 = vpack.c.bf16 %v1255_v24, %v1254_v9  ;;  %v1228_v63 = vld [vmem:[%s18584_s1 + $0x24b0] sm:$0xff]  ;;  %v10859_v14 = vpack.c.bf16 %v1213_v51, %v1212_v4  ;;  %v10891_v15 = vpack.c.bf16 %v1245_v6, %v1244_v5  ;;  %v1247_v9 = vld [vmem:[%s18584_s1 + $0x2548] sm:$0xff]  ;;  %v10869_v43 = vpack.c.bf16 %v1235_v34, %v1234_v37  ;;  %v1250_v35 = vld [vmem:[%s18584_s1 + $0x2560] sm:$0xff] }
 0x23d   :  { %v15603_v26 = vadd.f32 %v8170_v10, %v4280_v16  ;;  %10808 = vmatpush3.bf16.msra.mxu0 %v10807_v61  ;;  %v10857_v3 = vpack.c.bf16 %v1229_v60, %v1228_v63  ;;  %v10889_v61 = vpack.c.bf16 %v1261_v0, %v1260_v62  ;;  %v1230_v10 = vld [vmem:[%s18584_s1 + $0x24c0] sm:$0xff]  ;;  %v1232_v24 = vld [vmem:[%s18584_s1 + $0x24d0] sm:$0xff]  ;;  %v10895_v28 = vpack.c.bf16 %v1247_v9, %v1246_v8  ;;  %v1221_v0 = vld [vmem:[%s18584_s1 + $0x2478] sm:$0xff] }
 0x23e   :  { %10810 = vmatprep.subr.bf16.mxu0 %v10809_v7  ;;  %v1262_v7 = vld [vmem:[%s18584_s1 + $0x25c0] sm:$0xff]  ;;  %v10865_v29 = vpack.c.bf16 %v1233_v20, %v1232_v24  ;;  %v10873_v60 = vpack.c.bf16 %v1237_v54, %v1236_v50  ;;  %v1220_v62 = vld [vmem:[%s18584_s1 + $0x2470] sm:$0xff]  ;;  %v1253_v4 = vld [vmem:[%s18584_s1 + $0x2578] sm:$0xff] }
 0x23f   :  { %10840 = vmatpush3.bf16.msra.mxu1 %v10839_v12  ;;  %v1231_v12 = vld [vmem:[%s18584_s1 + $0x24c8] sm:$0xff]  ;;  %v10893_v19 = vpack.c.bf16 %v1263_v11, %v1262_v7  ;;  %v1286_v51 = vld [vmem:[%s18584_s1 + $0x2680] sm:$0xff]  ;;  %v1288_v8 = vld [vmem:[%s18584_s1 + $0x2690] sm:$0xff] }
 0x240   :  { %10842 = vmatprep.subr.bf16.mxu1 %v10841_v17  ;;  %v10861_v16 = vpack.c.bf16 %v1231_v12, %v1230_v10  ;;  %v1214_v17 = vld [vmem:[%s18584_s1 + $0x2440] sm:$0xff]  ;;  %v1287_v5 = vld [vmem:[%s18584_s1 + $0x2688] sm:$0xff]  ;;  %v10875_v12 = vpack.c.bf16 %v1221_v0, %v1220_v62  ;;  %v1320_v24 = vld [vmem:[%s18584_s1 + $0x2790] sm:$0xff] }
 0x241   :  { %10812 = vmatpush3.bf16.msra.mxu0 %v10811_v27  ;;  %v1264_v27 = vld [vmem:[%s18584_s1 + $0x25d0] sm:$0xff]  ;;  %v10909_v11 = vpack.c.bf16 %v1287_v5, %v1286_v51  ;;  %v1321_v20 = vld [vmem:[%s18584_s1 + $0x2798] sm:$0xff]  ;;  %v1290_v42 = vld [vmem:[%s18584_s1 + $0x26a0] sm:$0xff] }
 0x242   :  { %10846 = vmatprep.subr.bf16.mxu0 %v10845_v25  ;;  %v10863_v25 = vpack.c.bf16 %v1215_v18, %v1214_v17  ;;  %v1303_v18 = vld [vmem:[%s18584_s1 + $0x2708] sm:$0xff]  ;;  %v10945_v32 = vpack.c.bf16 %v1321_v20, %v1320_v24  ;;  %v1324_v50 = vld [vmem:[%s18584_s1 + $0x27b0] sm:$0xff]  ;;  %v1325_v54 = vld [vmem:[%s18584_s1 + $0x27b8] sm:$0xff] }
 0x243   :  { %10844 = vmatpush3.bf16.msra.mxu1 %v10843_v22  ;;  %v1265_v22 = vld [vmem:[%s18584_s1 + $0x25d8] sm:$0xff]  ;;  %v1291_v37 = vld [vmem:[%s18584_s1 + $0x26a8] sm:$0xff]  ;;  %v1310_v51 = vld [vmem:[%s18584_s1 + $0x2740] sm:$0xff] }
 0x244   :  { %10878 = vmatprep.subr.bf16.mxu1 %v10877_v30  ;;  %5258 = vmatmul.mubr.f32.vlgmr.msra.gmra.mrb[34].mxu0 %v15414_v52  ;;  %v1210_v52 = vld [vmem:[%s18584_s1 + $0x2420] sm:$0xff]  ;;  %v1217_v30 = vld [vmem:[%s18584_s1 + $0x2458] sm:$0xff]  ;;  %v10897_v21 = vpack.c.bf16 %v1265_v22, %v1264_v27  ;;  %v1327_v62 = vld [vmem:[%s18584_s1 + $0x27c8] sm:$0xff] }
 0x245   :  { %10848 = vmatpush3.bf16.msra.mxu0 %v10847_v36  ;;  %5397 = vmatprep.mubr.f32.mxu0 %v2462_v48  ;;  %v10855_v1 = vpack.c.bf16 %v1211_v58, %v1210_v52  ;;  %v1266_v36 = vld [vmem:[%s18584_s1 + $0x25e0] sm:$0xff]  ;;  %v1251_v48 = vld [vmem:[%s18584_s1 + $0x2568] sm:$0xff] }
 0x246   :  { %5328 = vmatmul.mubr.f32.vlgmr.msra.gmra.mrb[34].mxu1 %v15423_v33  ;;  %10850 = vmatprep.subr.bf16.mxu0 %v10849_v40  ;;  %v1243_v33 = vld [vmem:[%s18584_s1 + $0x2528] sm:$0xff]  ;;  %v10867_v40 = vpack.c.bf16 %v1217_v30, %v1216_v31  ;;  %v10903_v63 = vpack.c.bf16 %v1251_v48, %v1250_v35  ;;  %v1273_v31 = vld [vmem:[%s18584_s1 + $0x2618] sm:$0xff]  ;;  %v1304_v30 = vld [vmem:[%s18584_s1 + $0x2710] sm:$0xff] }
 0x247   :  { %10880 = vmatpush3.bf16.msra.mxu1 %v10879_v38  ;;  %5467 = vmatprep.mubr.f32.mxu1 %v2463_v55  ;;  %v10887_v2 = vpack.c.bf16 %v1243_v33, %v1242_v49  ;;  %v1267_v38 = vld [vmem:[%s18584_s1 + $0x25e8] sm:$0xff]  ;;  %v1306_v35 = vld [vmem:[%s18584_s1 + $0x2720] sm:$0xff]  ;;  %v1293_v48 = vld [vmem:[%s18584_s1 + $0x26b8] sm:$0xff] }
 0x248   :  { %10882 = vmatprep.subr.bf16.mxu1 %v10881_v46  ;;  %v1219_v46 = vld [vmem:[%s18584_s1 + $0x2468] sm:$0xff]  ;;  %v10901_v53 = vpack.c.bf16 %v1267_v38, %v1266_v36  ;;  %v1322_v36 = vld [vmem:[%s18584_s1 + $0x27a0] sm:$0xff] }
 0x249   :  { %10852 = vmatpush3.bf16.msra.mxu0 %v10851_v56  ;;  %v10871_v49 = vpack.c.bf16 %v1219_v46, %v1218_v44  ;;  %v1323_v38 = vld [vmem:[%s18584_s1 + $0x27a8] sm:$0xff]  ;;  %v10917_v44 = vpack.c.bf16 %v1291_v37, %v1290_v42  ;;  %v1298_v24 = vld [vmem:[%s18584_s1 + $0x26e0] sm:$0xff] }
 0x24a   :  { %10854 = vmatprep.subr.bf16.mxu0 %v10853_v45  ;;  %v1269_v45 = vld [vmem:[%s18584_s1 + $0x25f8] sm:$0xff]  ;;  %v1275_v46 = vld [vmem:[%s18584_s1 + $0x2628] sm:$0xff] }
 0x24b   :  { %10884 = vmatpush3.bf16.msra.mxu1 %v10883_v57  ;;  %v1268_v57 = vld [vmem:[%s18584_s1 + $0x25f0] sm:$0xff]  ;;  %v1299_v20 = vld [vmem:[%s18584_s1 + $0x26e8] sm:$0xff] }
 0x24c   :  { %10886 = vmatprep.subr.bf16.mxu1 %v10885_v59  ;;  %v41_v59 = vld [vmem:[%s18585_s0 + $0x98] sm:$0xff] }
 0x24d   :  { %10856 = vmatpush3.bf16.msra.mxu0 %v10855_v1  ;;  %v1252_v1 = vld [vmem:[%s18584_s1 + $0x2570] sm:$0xff]  ;;  %v2464_v6 = vcombine.high %v41_v59, %v41_v59  ;;  %v15834_v9 = vrot.slane %v41_v59, %v11989_v13  ;;  %v1309_v59 = vld [vmem:[%s18584_s1 + $0x2738] sm:$0xff] }
 0x24e   :  { %10858 = vmatprep.subr.bf16.mxu0 %v10857_v3  ;;  %v10905_v3 = vpack.c.bf16 %v1269_v45, %v1268_v57  ;;  %v10907_v7 = vpack.c.bf16 %v1253_v4, %v1252_v1  ;;  %v1276_v45 = vld [vmem:[%s18584_s1 + $0x2630] sm:$0xff]  ;;  %v1279_v4 = vld [vmem:[%s18584_s1 + $0x2648] sm:$0xff] }
 0x24f   :  { %10888 = vmatpush3.bf16.msra.mxu1 %v10887_v2  ;;  %v15843_v27 = vrot.slane %v2464_v6, %v11989_v13  ;;  %v2479_v34 = vcombine.high %v15834_v9, %v15834_v9  ;;  %v1297_v6 = vld [vmem:[%s18584_s1 + $0x26d8] sm:$0xff] }
 0x250   :  { %10890 = vmatprep.subr.bf16.mxu1 %v10889_v61  ;;  %v1318_v61 = vld [vmem:[%s18584_s1 + $0x2780] sm:$0xff] }
 0x251   :  { %10860 = vmatpush3.bf16.msra.mxu0 %v10859_v14  ;;  %v1270_v14 = vld [vmem:[%s18584_s1 + $0x2600] sm:$0xff] }
 0x252   :  { %10862 = vmatprep.subr.bf16.mxu0 %v10861_v16  ;;  %v1302_v16 = vld [vmem:[%s18584_s1 + $0x2700] sm:$0xff] }
 0x253   :  { %10892 = vmatpush3.bf16.msra.mxu1 %v10891_v15  ;;  %v1271_v15 = vld [vmem:[%s18584_s1 + $0x2608] sm:$0xff] }
 0x254   :  { %10894 = vmatprep.subr.bf16.mxu1 %v10893_v19  ;;  %v1289_v19 = vld [vmem:[%s18584_s1 + $0x2698] sm:$0xff]  ;;  %v10911_v22 = vpack.c.bf16 %v1271_v15, %v1270_v14 }
 0x255   :  { %10864 = vmatpush3.bf16.msra.mxu0 %v10863_v25  ;;  %v10943_v25 = vpack.c.bf16 %v1303_v18, %v1302_v16  ;;  %v1280_v16 = vld [vmem:[%s18584_s1 + $0x2650] sm:$0xff] }
 0x256   :  { %10866 = vmatprep.subr.bf16.mxu0 %v10865_v29  ;;  %v1272_v29 = vld [vmem:[%s18584_s1 + $0x2610] sm:$0xff] }
 0x257   :  { %10896 = vmatpush3.bf16.msra.mxu1 %v10895_v28  ;;  %v8203_v47 = vpop.f32.mrb[22].mxu0  ;;  %v10913_v28 = vpack.c.bf16 %v1289_v19, %v1288_v8  ;;  %v1312_v18 = vld [vmem:[%s18584_s1 + $0x2750] sm:$0xff]  ;;  %v1313_v19 = vld [vmem:[%s18584_s1 + $0x2758] sm:$0xff] }
 0x258   :  { %10898 = vmatprep.subr.bf16.mxu1 %v10897_v21  ;;  %v8204_v55 = vpop.f32.mrb[23].mxu0  ;;  %v1305_v21 = vld [vmem:[%s18584_s1 + $0x2718] sm:$0xff] }
 0x259   :  { %v8238_v56 = vpop.f32.mrb[22].mxu1  ;;  %v8205_v52 = vadd.f32 %v8204_v55, %v8203_v47  ;;  %10868 = vmatpush3.bf16.msra.mxu0 %v10867_v40  ;;  %v2480_v40 = vcombine.high %v15843_v27, %v15843_v27  ;;  %v10949_v47 = vpack.c.bf16 %v1323_v38, %v1322_v36  ;;  %v1300_v36 = vld [vmem:[%s18584_s1 + $0x26f0] sm:$0xff]  ;;  %v1301_v38 = vld [vmem:[%s18584_s1 + $0x26f8] sm:$0xff] }
 0x25a   :  { %v8239_v58 = vpop.f32.mrb[23].mxu1  ;;  %10870 = vmatprep.subr.bf16.mxu0 %v10869_v43  ;;  %v10947_v43 = vpack.c.bf16 %v1305_v21, %v1304_v30  ;;  %v1282_v30 = vld [vmem:[%s18584_s1 + $0x2660] sm:$0xff] }
 0x25b   :  { %v8240_v33 = vadd.f32 %v8239_v58, %v8238_v56  ;;  %10900 = vmatpush3.bf16.msra.mxu1 %v10899_v41  ;;  %v4420_v2 = vadd.f32 %v8205_v52, %v15603_v26  ;;  %v1319_v26 = vld [vmem:[%s18584_s1 + $0x2788] sm:$0xff]  ;;  %v10915_v41 = vpack.c.bf16 %v1273_v31, %v1272_v29  ;;  %v1277_v52 = vld [vmem:[%s18584_s1 + $0x2638] sm:$0xff]  ;;  %v1308_v58 = vld [vmem:[%s18584_s1 + $0x2730] sm:$0xff]  ;;  %v10963_v29 = vpack.c.bf16 %v1313_v19, %v1312_v18 }
 0x25c   :  { %10902 = vmatprep.subr.bf16.mxu1 %v10901_v53  ;;  %v10941_v17 = vpack.c.bf16 %v1319_v26, %v1318_v61  ;;  %v1292_v53 = vld [vmem:[%s18584_s1 + $0x26b0] sm:$0xff]  ;;  %v10923_v0 = vpack.c.bf16 %v1277_v52, %v1276_v45  ;;  %v10955_v1 = vpack.c.bf16 %v1309_v59, %v1308_v58  ;;  %v1311_v61 = vld [vmem:[%s18584_s1 + $0x2748] sm:$0xff]  ;;  %v10933_v31 = vpack.c.bf16 %v1299_v20, %v1298_v24  ;;  %v1314_v21 = vld [vmem:[%s18584_s1 + $0x2760] sm:$0xff] }
 0x25d   :  { %v15813_v10 = vadd.f32 %v8240_v33, %v4420_v2  ;;  %10872 = vmatpush3.bf16.msra.mxu0 %v10871_v49  ;;  %v10921_v57 = vpack.c.bf16 %v1293_v48, %v1292_v53  ;;  %v10953_v49 = vpack.c.bf16 %v1325_v54, %v1324_v50  ;;  %v1294_v33 = vld [vmem:[%s18584_s1 + $0x26c0] sm:$0xff]  ;;  %v1296_v26 = vld [vmem:[%s18584_s1 + $0x26d0] sm:$0xff]  ;;  %v10959_v14 = vpack.c.bf16 %v1311_v61, %v1310_v51  ;;  %v1285_v54 = vld [vmem:[%s18584_s1 + $0x2678] sm:$0xff] }
 0x25e   :  { %10874 = vmatprep.subr.bf16.mxu0 %v10873_v60  ;;  %v1326_v60 = vld [vmem:[%s18584_s1 + $0x27c0] sm:$0xff]  ;;  %v10929_v15 = vpack.c.bf16 %v1297_v6, %v1296_v26  ;;  %v10937_v48 = vpack.c.bf16 %v1301_v38, %v1300_v36  ;;  %v1284_v50 = vld [vmem:[%s18584_s1 + $0x2670] sm:$0xff]  ;;  %v1317_v45 = vld [vmem:[%s18584_s1 + $0x2778] sm:$0xff] }
 0x25f   :  { %10904 = vmatpush3.bf16.msra.mxu1 %v10903_v63  ;;  %v1295_v63 = vld [vmem:[%s18584_s1 + $0x26c8] sm:$0xff]  ;;  %v10957_v5 = vpack.c.bf16 %v1327_v62, %v1326_v60  ;;  %v1350_v52 = vld [vmem:[%s18584_s1 + $0x2880] sm:$0xff]  ;;  %v1352_v51 = vld [vmem:[%s18584_s1 + $0x2890] sm:$0xff] }
 0x260   :  { %10906 = vmatprep.subr.bf16.mxu1 %v10905_v3  ;;  %v10925_v2 = vpack.c.bf16 %v1295_v63, %v1294_v33  ;;  %v1278_v3 = vld [vmem:[%s18584_s1 + $0x2640] sm:$0xff]  ;;  %v1351_v58 = vld [vmem:[%s18584_s1 + $0x2888] sm:$0xff]  ;;  %v10939_v63 = vpack.c.bf16 %v1285_v54, %v1284_v50  ;;  %v1384_v26 = vld [vmem:[%s18584_s1 + $0x2990] sm:$0xff] }
 0x261   :  { %10876 = vmatpush3.bf16.msra.mxu0 %v10875_v12  ;;  %v1328_v12 = vld [vmem:[%s18584_s1 + $0x27d0] sm:$0xff]  ;;  %v10973_v62 = vpack.c.bf16 %v1351_v58, %v1350_v52  ;;  %v1385_v6 = vld [vmem:[%s18584_s1 + $0x2998] sm:$0xff]  ;;  %v1354_v19 = vld [vmem:[%s18584_s1 + $0x28a0] sm:$0xff] }
 0x262   :  { %10910 = vmatprep.subr.bf16.mxu0 %v10909_v11  ;;  %v10927_v11 = vpack.c.bf16 %v1279_v4, %v1278_v3  ;;  %v1367_v4 = vld [vmem:[%s18584_s1 + $0x2908] sm:$0xff]  ;;  %v11009_v18 = vpack.c.bf16 %v1385_v6, %v1384_v26  ;;  %v1388_v36 = vld [vmem:[%s18584_s1 + $0x29b0] sm:$0xff]  ;;  %v1389_v38 = vld [vmem:[%s18584_s1 + $0x29b8] sm:$0xff] }
 0x263   :  { %10908 = vmatpush3.bf16.msra.mxu1 %v10907_v7  ;;  %v1329_v7 = vld [vmem:[%s18584_s1 + $0x27d8] sm:$0xff]  ;;  %v1355_v24 = vld [vmem:[%s18584_s1 + $0x28a8] sm:$0xff]  ;;  %v1374_v52 = vld [vmem:[%s18584_s1 + $0x2940] sm:$0xff] }
 0x264   :  { %10942 = vmatprep.subr.bf16.mxu1 %v10941_v17  ;;  %5398 = vmatmul.mubr.f32.vlgmr.msra.gmra.mrb[36].mxu0 %v15624_v23  ;;  %v1274_v23 = vld [vmem:[%s18584_s1 + $0x2620] sm:$0xff]  ;;  %v1281_v17 = vld [vmem:[%s18584_s1 + $0x2658] sm:$0xff]  ;;  %v10961_v8 = vpack.c.bf16 %v1329_v7, %v1328_v12  ;;  %v1391_v50 = vld [vmem:[%s18584_s1 + $0x29c8] sm:$0xff] }
 0x265   :  { %10912 = vmatpush3.bf16.msra.mxu0 %v10911_v22  ;;  %5537 = vmatprep.mubr.f32.mxu0 %v2479_v34  ;;  %v10919_v55 = vpack.c.bf16 %v1275_v46, %v1274_v23  ;;  %v1330_v22 = vld [vmem:[%s18584_s1 + $0x27e0] sm:$0xff]  ;;  %v1315_v34 = vld [vmem:[%s18584_s1 + $0x2768] sm:$0xff] }
 0x266   :  { %5468 = vmatmul.mubr.f32.vlgmr.msra.gmra.mrb[36].mxu1 %v15633_v39  ;;  %10914 = vmatprep.subr.bf16.mxu0 %v10913_v28  ;;  %v1307_v39 = vld [vmem:[%s18584_s1 + $0x2728] sm:$0xff]  ;;  %v10931_v28 = vpack.c.bf16 %v1281_v17, %v1280_v16  ;;  %v10967_v53 = vpack.c.bf16 %v1315_v34, %v1314_v21  ;;  %v1337_v16 = vld [vmem:[%s18584_s1 + $0x2818] sm:$0xff]  ;;  %v1368_v17 = vld [vmem:[%s18584_s1 + $0x2910] sm:$0xff] }
 0x267   :  { %10944 = vmatpush3.bf16.msra.mxu1 %v10943_v25  ;;  %5607 = vmatprep.mubr.f32.mxu1 %v2480_v40  ;;  %v10951_v56 = vpack.c.bf16 %v1307_v39, %v1306_v35  ;;  %v1331_v25 = vld [vmem:[%s18584_s1 + $0x27e8] sm:$0xff]  ;;  %v1370_v21 = vld [vmem:[%s18584_s1 + $0x2920] sm:$0xff]  ;;  %v1357_v34 = vld [vmem:[%s18584_s1 + $0x28b8] sm:$0xff] }
 0x268   :  { %10946 = vmatprep.subr.bf16.mxu1 %v10945_v32  ;;  %v1283_v32 = vld [vmem:[%s18584_s1 + $0x2668] sm:$0xff]  ;;  %v10965_v37 = vpack.c.bf16 %v1331_v25, %v1330_v22  ;;  %v1386_v22 = vld [vmem:[%s18584_s1 + $0x29a0] sm:$0xff] }
 0x269   :  { %10916 = vmatpush3.bf16.msra.mxu0 %v10915_v41  ;;  %v10935_v35 = vpack.c.bf16 %v1283_v32, %v1282_v30  ;;  %v1387_v25 = vld [vmem:[%s18584_s1 + $0x29a8] sm:$0xff]  ;;  %v10981_v30 = vpack.c.bf16 %v1355_v24, %v1354_v19  ;;  %v1362_v26 = vld [vmem:[%s18584_s1 + $0x28e0] sm:$0xff] }
 0x26a   :  { %10918 = vmatprep.subr.bf16.mxu0 %v10917_v44  ;;  %v1333_v44 = vld [vmem:[%s18584_s1 + $0x27f8] sm:$0xff]  ;;  %v1339_v32 = vld [vmem:[%s18584_s1 + $0x2828] sm:$0xff] }
 0x26b   :  { %10948 = vmatpush3.bf16.msra.mxu1 %v10947_v43  ;;  %v1332_v43 = vld [vmem:[%s18584_s1 + $0x27f0] sm:$0xff]  ;;  %v1363_v6 = vld [vmem:[%s18584_s1 + $0x28e8] sm:$0xff] }
 0x26c   :  { %10950 = vmatprep.subr.bf16.mxu1 %v10949_v47  ;;  %v42_v47 = vld [vmem:[%s18585_s0 + $0xa0] sm:$0xff] }
 0x26d   :  { %10920 = vmatpush3.bf16.msra.mxu0 %v10919_v55  ;;  %v1316_v55 = vld [vmem:[%s18584_s1 + $0x2770] sm:$0xff]  ;;  %v2481_v59 = vcombine.high %v42_v47, %v42_v47  ;;  %v16044_v61 = vrot.slane %v42_v47, %v11989_v13  ;;  %v1373_v47 = vld [vmem:[%s18584_s1 + $0x2938] sm:$0xff] }
 0x26e   :  { %10922 = vmatprep.subr.bf16.mxu0 %v10921_v57  ;;  %v10969_v57 = vpack.c.bf16 %v1333_v44, %v1332_v43  ;;  %v10971_v60 = vpack.c.bf16 %v1317_v45, %v1316_v55  ;;  %v1340_v44 = vld [vmem:[%s18584_s1 + $0x2830] sm:$0xff]  ;;  %v1343_v45 = vld [vmem:[%s18584_s1 + $0x2848] sm:$0xff] }
 0x26f   :  { %10952 = vmatpush3.bf16.msra.mxu1 %v10951_v56  ;;  %v16053_v12 = vrot.slane %v2481_v59, %v11989_v13  ;;  %v2496_v20 = vcombine.high %v16044_v61, %v16044_v61  ;;  %v1361_v59 = vld [vmem:[%s18584_s1 + $0x28d8] sm:$0xff] }
 0x270   :  { %10954 = vmatprep.subr.bf16.mxu1 %v10953_v49  ;;  %v1382_v49 = vld [vmem:[%s18584_s1 + $0x2980] sm:$0xff] }
 0x271   :  { %10924 = vmatpush3.bf16.msra.mxu0 %v10923_v0  ;;  %v1334_v0 = vld [vmem:[%s18584_s1 + $0x2800] sm:$0xff] }
 0x272   :  { %10926 = vmatprep.subr.bf16.mxu0 %v10925_v2  ;;  %v1366_v2 = vld [vmem:[%s18584_s1 + $0x2900] sm:$0xff] }
 0x273   :  { %10956 = vmatpush3.bf16.msra.mxu1 %v10955_v1  ;;  %v1335_v1 = vld [vmem:[%s18584_s1 + $0x2808] sm:$0xff] }
 0x274   :  { %10958 = vmatprep.subr.bf16.mxu1 %v10957_v5  ;;  %v1353_v5 = vld [vmem:[%s18584_s1 + $0x2898] sm:$0xff]  ;;  %v10975_v7 = vpack.c.bf16 %v1335_v1, %v1334_v0 }
 0x275   :  { %10928 = vmatpush3.bf16.msra.mxu0 %v10927_v11  ;;  %v11007_v11 = vpack.c.bf16 %v1367_v4, %v1366_v2  ;;  %v1344_v2 = vld [vmem:[%s18584_s1 + $0x2850] sm:$0xff] }
 0x276   :  { %10930 = vmatprep.subr.bf16.mxu0 %v10929_v15  ;;  %v1336_v15 = vld [vmem:[%s18584_s1 + $0x2810] sm:$0xff] }
 0x277   :  { %10960 = vmatpush3.bf16.msra.mxu1 %v10959_v14  ;;  %v8273_v42 = vpop.f32.mrb[24].mxu0  ;;  %v10977_v14 = vpack.c.bf16 %v1353_v5, %v1352_v51  ;;  %v1376_v4 = vld [vmem:[%s18584_s1 + $0x2950] sm:$0xff]  ;;  %v1377_v5 = vld [vmem:[%s18584_s1 + $0x2958] sm:$0xff] }
 0x278   :  { %10962 = vmatprep.subr.bf16.mxu1 %v10961_v8  ;;  %v8274_v40 = vpop.f32.mrb[25].mxu0  ;;  %v1369_v8 = vld [vmem:[%s18584_s1 + $0x2918] sm:$0xff] }
 0x279   :  { %v8308_v41 = vpop.f32.mrb[24].mxu1  ;;  %v8275_v23 = vadd.f32 %v8274_v40, %v8273_v42  ;;  %10932 = vmatpush3.bf16.msra.mxu0 %v10931_v28  ;;  %v2497_v28 = vcombine.high %v16053_v12, %v16053_v12  ;;  %v11013_v42 = vpack.c.bf16 %v1387_v25, %v1386_v22  ;;  %v1364_v22 = vld [vmem:[%s18584_s1 + $0x28f0] sm:$0xff]  ;;  %v1365_v25 = vld [vmem:[%s18584_s1 + $0x28f8] sm:$0xff] }
 0x27a   :  { %v8309_v46 = vpop.f32.mrb[25].mxu1  ;;  %10934 = vmatprep.subr.bf16.mxu0 %v10933_v31  ;;  %v11011_v31 = vpack.c.bf16 %v1369_v8, %v1368_v17  ;;  %v1346_v17 = vld [vmem:[%s18584_s1 + $0x2860] sm:$0xff] }
 0x27b   :  { %v8310_v39 = vadd.f32 %v8309_v46, %v8308_v41  ;;  %10964 = vmatpush3.bf16.msra.mxu1 %v10963_v29  ;;  %v4560_v56 = vadd.f32 %v8275_v23, %v15813_v10  ;;  %v1383_v10 = vld [vmem:[%s18584_s1 + $0x2988] sm:$0xff]  ;;  %v10979_v29 = vpack.c.bf16 %v1337_v16, %v1336_v15  ;;  %v1341_v23 = vld [vmem:[%s18584_s1 + $0x2838] sm:$0xff]  ;;  %v1372_v46 = vld [vmem:[%s18584_s1 + $0x2930] sm:$0xff]  ;;  %v11027_v15 = vpack.c.bf16 %v1377_v5, %v1376_v4 }
 0x27c   :  { %10966 = vmatprep.subr.bf16.mxu1 %v10965_v37  ;;  %v11005_v3 = vpack.c.bf16 %v1383_v10, %v1382_v49  ;;  %v1356_v37 = vld [vmem:[%s18584_s1 + $0x28b0] sm:$0xff]  ;;  %v10987_v54 = vpack.c.bf16 %v1341_v23, %v1340_v44  ;;  %v11019_v55 = vpack.c.bf16 %v1373_v47, %v1372_v46  ;;  %v1375_v49 = vld [vmem:[%s18584_s1 + $0x2948] sm:$0xff]  ;;  %v10997_v16 = vpack.c.bf16 %v1363_v6, %v1362_v26  ;;  %v1378_v8 = vld [vmem:[%s18584_s1 + $0x2960] sm:$0xff] }
 0x27d   :  { %v16023_v33 = vadd.f32 %v8310_v39, %v4560_v56  ;;  %10936 = vmatpush3.bf16.msra.mxu0 %v10935_v35  ;;  %v10985_v43 = vpack.c.bf16 %v1357_v34, %v1356_v37  ;;  %v11017_v35 = vpack.c.bf16 %v1389_v38, %v1388_v36  ;;  %v1358_v39 = vld [vmem:[%s18584_s1 + $0x28c0] sm:$0xff]  ;;  %v1360_v10 = vld [vmem:[%s18584_s1 + $0x28d0] sm:$0xff]  ;;  %v11023_v0 = vpack.c.bf16 %v1375_v49, %v1374_v52  ;;  %v1349_v38 = vld [vmem:[%s18584_s1 + $0x2878] sm:$0xff] }
 0x27e   :  { %10938 = vmatprep.subr.bf16.mxu0 %v10937_v48  ;;  %v1390_v48 = vld [vmem:[%s18584_s1 + $0x29c0] sm:$0xff]  ;;  %v10993_v1 = vpack.c.bf16 %v1361_v59, %v1360_v10  ;;  %v11001_v34 = vpack.c.bf16 %v1365_v25, %v1364_v22  ;;  %v1348_v36 = vld [vmem:[%s18584_s1 + $0x2870] sm:$0xff]  ;;  %v1381_v44 = vld [vmem:[%s18584_s1 + $0x2978] sm:$0xff] }
 0x27f   :  { %10968 = vmatpush3.bf16.msra.mxu1 %v10967_v53  ;;  %v1359_v53 = vld [vmem:[%s18584_s1 + $0x28c8] sm:$0xff]  ;;  %v11021_v58 = vpack.c.bf16 %v1391_v50, %v1390_v48  ;;  %v1414_v23 = vld [vmem:[%s18584_s1 + $0x2a80] sm:$0xff]  ;;  %v1416_v52 = vld [vmem:[%s18584_s1 + $0x2a90] sm:$0xff] }
 0x280   :  { %10970 = vmatprep.subr.bf16.mxu1 %v10969_v57  ;;  %v10989_v56 = vpack.c.bf16 %v1359_v53, %v1358_v39  ;;  %v1342_v57 = vld [vmem:[%s18584_s1 + $0x2840] sm:$0xff]  ;;  %v1415_v46 = vld [vmem:[%s18584_s1 + $0x2a88] sm:$0xff]  ;;  %v11003_v53 = vpack.c.bf16 %v1349_v38, %v1348_v36  ;;  %v1448_v10 = vld [vmem:[%s18584_s1 + $0x2b90] sm:$0xff] }
 0x281   :  { %10940 = vmatpush3.bf16.msra.mxu0 %v10939_v63  ;;  %v1392_v63 = vld [vmem:[%s18584_s1 + $0x29d0] sm:$0xff]  ;;  %v11037_v50 = vpack.c.bf16 %v1415_v46, %v1414_v23  ;;  %v1449_v59 = vld [vmem:[%s18584_s1 + $0x2b98] sm:$0xff]  ;;  %v1418_v5 = vld [vmem:[%s18584_s1 + $0x2aa0] sm:$0xff] }
 0x282   :  { %10974 = vmatprep.subr.bf16.mxu0 %v10973_v62  ;;  %v10991_v62 = vpack.c.bf16 %v1343_v45, %v1342_v57  ;;  %v1431_v45 = vld [vmem:[%s18584_s1 + $0x2b08] sm:$0xff]  ;;  %v11073_v4 = vpack.c.bf16 %v1449_v59, %v1448_v10  ;;  %v1452_v22 = vld [vmem:[%s18584_s1 + $0x2bb0] sm:$0xff]  ;;  %v1453_v25 = vld [vmem:[%s18584_s1 + $0x2bb8] sm:$0xff] }
 0x283   :  { %10972 = vmatpush3.bf16.msra.mxu1 %v10971_v60  ;;  %v1393_v60 = vld [vmem:[%s18584_s1 + $0x29d8] sm:$0xff]  ;;  %v1419_v26 = vld [vmem:[%s18584_s1 + $0x2aa8] sm:$0xff]  ;;  %v1438_v23 = vld [vmem:[%s18584_s1 + $0x2b40] sm:$0xff] }
 0x284   :  { %11006 = vmatprep.subr.bf16.mxu1 %v11005_v3  ;;  %5538 = vmatmul.mubr.f32.vlgmr.msra.gmra.mrb[38].mxu0 %v15834_v9  ;;  %v1338_v9 = vld [vmem:[%s18584_s1 + $0x2820] sm:$0xff]  ;;  %v1345_v3 = vld [vmem:[%s18584_s1 + $0x2858] sm:$0xff]  ;;  %v11025_v51 = vpack.c.bf16 %v1393_v60, %v1392_v63  ;;  %v1455_v36 = vld [vmem:[%s18584_s1 + $0x2bc8] sm:$0xff] }
 0x285   :  { %10976 = vmatpush3.bf16.msra.mxu0 %v10975_v7  ;;  %5677 = vmatprep.mubr.f32.mxu0 %v2496_v20  ;;  %v10983_v40 = vpack.c.bf16 %v1339_v32, %v1338_v9  ;;  %v1394_v7 = vld [vmem:[%s18584_s1 + $0x29e0] sm:$0xff]  ;;  %v1379_v20 = vld [vmem:[%s18584_s1 + $0x2968] sm:$0xff] }
 0x286   :  { %5608 = vmatmul.mubr.f32.vlgmr.msra.gmra.mrb[38].mxu1 %v15843_v27  ;;  %10978 = vmatprep.subr.bf16.mxu0 %v10977_v14  ;;  %v1371_v27 = vld [vmem:[%s18584_s1 + $0x2928] sm:$0xff]  ;;  %v10995_v14 = vpack.c.bf16 %v1345_v3, %v1344_v2  ;;  %v11031_v37 = vpack.c.bf16 %v1379_v20, %v1378_v8  ;;  %v1401_v2 = vld [vmem:[%s18584_s1 + $0x2a18] sm:$0xff]  ;;  %v1432_v3 = vld [vmem:[%s18584_s1 + $0x2b10] sm:$0xff] }
 0x287   :  { %11008 = vmatpush3.bf16.msra.mxu1 %v11007_v11  ;;  %5747 = vmatprep.mubr.f32.mxu1 %v2497_v28  ;;  %v11015_v41 = vpack.c.bf16 %v1371_v27, %v1370_v21  ;;  %v1395_v11 = vld [vmem:[%s18584_s1 + $0x29e8] sm:$0xff]  ;;  %v1434_v8 = vld [vmem:[%s18584_s1 + $0x2b20] sm:$0xff]  ;;  %v1421_v20 = vld [vmem:[%s18584_s1 + $0x2ab8] sm:$0xff] }
 0x288   :  { %11010 = vmatprep.subr.bf16.mxu1 %v11009_v18  ;;  %v1347_v18 = vld [vmem:[%s18584_s1 + $0x2868] sm:$0xff]  ;;  %v11029_v24 = vpack.c.bf16 %v1395_v11, %v1394_v7  ;;  %v1450_v7 = vld [vmem:[%s18584_s1 + $0x2ba0] sm:$0xff] }
 0x289   :  { %10980 = vmatpush3.bf16.msra.mxu0 %v10979_v29  ;;  %v10999_v21 = vpack.c.bf16 %v1347_v18, %v1346_v17  ;;  %v1451_v11 = vld [vmem:[%s18584_s1 + $0x2ba8] sm:$0xff]  ;;  %v11045_v17 = vpack.c.bf16 %v1419_v26, %v1418_v5  ;;  %v1426_v10 = vld [vmem:[%s18584_s1 + $0x2ae0] sm:$0xff] }
 0x28a   :  { %10982 = vmatprep.subr.bf16.mxu0 %v10981_v30  ;;  %v1397_v30 = vld [vmem:[%s18584_s1 + $0x29f8] sm:$0xff]  ;;  %v1403_v18 = vld [vmem:[%s18584_s1 + $0x2a28] sm:$0xff] }
 0x28b   :  { %11012 = vmatpush3.bf16.msra.mxu1 %v11011_v31  ;;  %v1396_v31 = vld [vmem:[%s18584_s1 + $0x29f0] sm:$0xff]  ;;  %v1427_v59 = vld [vmem:[%s18584_s1 + $0x2ae8] sm:$0xff] }
 0x28c   :  { %11014 = vmatprep.subr.bf16.mxu1 %v11013_v42  ;;  %v43_v42 = vld [vmem:[%s18585_s0 + $0xa8] sm:$0xff] }
 0x28d   :  { %10984 = vmatpush3.bf16.msra.mxu0 %v10983_v40  ;;  %v1380_v40 = vld [vmem:[%s18584_s1 + $0x2970] sm:$0xff]  ;;  %v2498_v47 = vcombine.high %v43_v42, %v43_v42  ;;  %v16254_v49 = vrot.slane %v43_v42, %v11989_v13  ;;  %v1437_v42 = vld [vmem:[%s18584_s1 + $0x2b38] sm:$0xff] }
 0x28e   :  { %10986 = vmatprep.subr.bf16.mxu0 %v10985_v43  ;;  %v11033_v43 = vpack.c.bf16 %v1397_v30, %v1396_v31  ;;  %v11035_v48 = vpack.c.bf16 %v1381_v44, %v1380_v40  ;;  %v1404_v30 = vld [vmem:[%s18584_s1 + $0x2a30] sm:$0xff]  ;;  %v1407_v44 = vld [vmem:[%s18584_s1 + $0x2a48] sm:$0xff] }
 0x28f   :  { %11016 = vmatpush3.bf16.msra.mxu1 %v11015_v41  ;;  %v16263_v63 = vrot.slane %v2498_v47, %v11989_v13  ;;  %v2513_v6 = vcombine.high %v16254_v49, %v16254_v49  ;;  %v1425_v47 = vld [vmem:[%s18584_s1 + $0x2ad8] sm:$0xff] }
 0x290   :  { %11018 = vmatprep.subr.bf16.mxu1 %v11017_v35  ;;  %v1446_v35 = vld [vmem:[%s18584_s1 + $0x2b80] sm:$0xff] }
 0x291   :  { %10988 = vmatpush3.bf16.msra.mxu0 %v10987_v54  ;;  %v1398_v54 = vld [vmem:[%s18584_s1 + $0x2a00] sm:$0xff] }
 0x292   :  { %10990 = vmatprep.subr.bf16.mxu0 %v10989_v56  ;;  %v1430_v56 = vld [vmem:[%s18584_s1 + $0x2b00] sm:$0xff] }
 0x293   :  { %11020 = vmatpush3.bf16.msra.mxu1 %v11019_v55  ;;  %v1399_v55 = vld [vmem:[%s18584_s1 + $0x2a08] sm:$0xff] }
 0x294   :  { %11022 = vmatprep.subr.bf16.mxu1 %v11021_v58  ;;  %v1417_v58 = vld [vmem:[%s18584_s1 + $0x2a98] sm:$0xff]  ;;  %v11039_v60 = vpack.c.bf16 %v1399_v55, %v1398_v54 }
 0x295   :  { %10992 = vmatpush3.bf16.msra.mxu0 %v10991_v62  ;;  %v11071_v62 = vpack.c.bf16 %v1431_v45, %v1430_v56  ;;  %v1408_v56 = vld [vmem:[%s18584_s1 + $0x2a50] sm:$0xff] }
 0x296   :  { %10994 = vmatprep.subr.bf16.mxu0 %v10993_v1  ;;  %v1400_v1 = vld [vmem:[%s18584_s1 + $0x2a10] sm:$0xff] }
 0x297   :  { %11024 = vmatpush3.bf16.msra.mxu1 %v11023_v0  ;;  %v8343_v19 = vpop.f32.mrb[26].mxu0  ;;  %v11041_v0 = vpack.c.bf16 %v1417_v58, %v1416_v52  ;;  %v1440_v45 = vld [vmem:[%s18584_s1 + $0x2b50] sm:$0xff]  ;;  %v1441_v58 = vld [vmem:[%s18584_s1 + $0x2b58] sm:$0xff] }
 0x298   :  { %11026 = vmatprep.subr.bf16.mxu1 %v11025_v51  ;;  %v8344_v28 = vpop.f32.mrb[27].mxu0  ;;  %v1433_v51 = vld [vmem:[%s18584_s1 + $0x2b18] sm:$0xff] }
 0x299   :  { %v8378_v29 = vpop.f32.mrb[26].mxu1  ;;  %v8345_v9 = vadd.f32 %v8344_v28, %v8343_v19  ;;  %10996 = vmatpush3.bf16.msra.mxu0 %v10995_v14  ;;  %v2514_v14 = vcombine.high %v16263_v63, %v16263_v63  ;;  %v11077_v19 = vpack.c.bf16 %v1451_v11, %v1450_v7  ;;  %v1428_v7 = vld [vmem:[%s18584_s1 + $0x2af0] sm:$0xff]  ;;  %v1429_v11 = vld [vmem:[%s18584_s1 + $0x2af8] sm:$0xff] }
 0x29a   :  { %v8379_v32 = vpop.f32.mrb[27].mxu1  ;;  %10998 = vmatprep.subr.bf16.mxu0 %v10997_v16  ;;  %v11075_v16 = vpack.c.bf16 %v1433_v51, %v1432_v3  ;;  %v1410_v3 = vld [vmem:[%s18584_s1 + $0x2a60] sm:$0xff] }
 0x29b   :  { %v8380_v27 = vadd.f32 %v8379_v32, %v8378_v29  ;;  %11028 = vmatpush3.bf16.msra.mxu1 %v11027_v15  ;;  %v4700_v41 = vadd.f32 %v8345_v9, %v16023_v33  ;;  %v1447_v33 = vld [vmem:[%s18584_s1 + $0x2b88] sm:$0xff]  ;;  %v11043_v15 = vpack.c.bf16 %v1401_v2, %v1400_v1  ;;  %v1405_v9 = vld [vmem:[%s18584_s1 + $0x2a38] sm:$0xff]  ;;  %v1436_v32 = vld [vmem:[%s18584_s1 + $0x2b30] sm:$0xff]  ;;  %v11091_v1 = vpack.c.bf16 %v1441_v58, %v1440_v45 }
 0x29c   :  { %11030 = vmatprep.subr.bf16.mxu1 %v11029_v24  ;;  %v11069_v57 = vpack.c.bf16 %v1447_v33, %v1446_v35  ;;  %v1420_v24 = vld [vmem:[%s18584_s1 + $0x2ab0] sm:$0xff]  ;;  %v11051_v38 = vpack.c.bf16 %v1405_v9, %v1404_v30  ;;  %v11083_v40 = vpack.c.bf16 %v1437_v42, %v1436_v32  ;;  %v1439_v35 = vld [vmem:[%s18584_s1 + $0x2b48] sm:$0xff]  ;;  %v11061_v2 = vpack.c.bf16 %v1427_v59, %v1426_v10  ;;  %v1442_v51 = vld [vmem:[%s18584_s1 + $0x2b60] sm:$0xff] }
 0x29d   :  { %v16233_v39 = vadd.f32 %v8380_v27, %v4700_v41  ;;  %11000 = vmatpush3.bf16.msra.mxu0 %v10999_v21  ;;  %v11049_v31 = vpack.c.bf16 %v1421_v20, %v1420_v24  ;;  %v11081_v21 = vpack.c.bf16 %v1453_v25, %v1452_v22  ;;  %v1422_v27 = vld [vmem:[%s18584_s1 + $0x2ac0] sm:$0xff]  ;;  %v1424_v33 = vld [vmem:[%s18584_s1 + $0x2ad0] sm:$0xff]  ;;  %v11087_v54 = vpack.c.bf16 %v1439_v35, %v1438_v23  ;;  %v1413_v25 = vld [vmem:[%s18584_s1 + $0x2a78] sm:$0xff] }
 0x29e   :  { %11002 = vmatprep.subr.bf16.mxu0 %v11001_v34  ;;  %v1454_v34 = vld [vmem:[%s18584_s1 + $0x2bc0] sm:$0xff]  ;;  %v11057_v55 = vpack.c.bf16 %v1425_v47, %v1424_v33  ;;  %v11065_v20 = vpack.c.bf16 %v1429_v11, %v1428_v7  ;;  %v1412_v22 = vld [vmem:[%s18584_s1 + $0x2a70] sm:$0xff]  ;;  %v1445_v30 = vld [vmem:[%s18584_s1 + $0x2b78] sm:$0xff] }
 0x29f   :  { %11032 = vmatpush3.bf16.msra.mxu1 %v11031_v37  ;;  %v1423_v37 = vld [vmem:[%s18584_s1 + $0x2ac8] sm:$0xff]  ;;  %v11085_v46 = vpack.c.bf16 %v1455_v36, %v1454_v34  ;;  %v1478_v9 = vld [vmem:[%s18584_s1 + $0x2c80] sm:$0xff]  ;;  %v1480_v23 = vld [vmem:[%s18584_s1 + $0x2c90] sm:$0xff] }
 0x2a0   :  { %11034 = vmatprep.subr.bf16.mxu1 %v11033_v43  ;;  %v11053_v41 = vpack.c.bf16 %v1423_v37, %v1422_v27  ;;  %v1406_v43 = vld [vmem:[%s18584_s1 + $0x2a40] sm:$0xff]  ;;  %v1479_v32 = vld [vmem:[%s18584_s1 + $0x2c88] sm:$0xff]  ;;  %v11067_v37 = vpack.c.bf16 %v1413_v25, %v1412_v22  ;;  %v1512_v33 = vld [vmem:[%s18584_s1 + $0x2d90] sm:$0xff] }
 0x2a1   :  { %11004 = vmatpush3.bf16.msra.mxu0 %v11003_v53  ;;  %v1456_v53 = vld [vmem:[%s18584_s1 + $0x2bd0] sm:$0xff]  ;;  %v11101_v36 = vpack.c.bf16 %v1479_v32, %v1478_v9  ;;  %v1513_v47 = vld [vmem:[%s18584_s1 + $0x2d98] sm:$0xff]  ;;  %v1482_v58 = vld [vmem:[%s18584_s1 + $0x2ca0] sm:$0xff] }
 0x2a2   :  { %11038 = vmatprep.subr.bf16.mxu0 %v11037_v50  ;;  %v11055_v50 = vpack.c.bf16 %v1407_v44, %v1406_v43  ;;  %v1495_v44 = vld [vmem:[%s18584_s1 + $0x2d08] sm:$0xff]  ;;  %v11137_v45 = vpack.c.bf16 %v1513_v47, %v1512_v33  ;;  %v1516_v7 = vld [vmem:[%s18584_s1 + $0x2db0] sm:$0xff]  ;;  %v1517_v11 = vld [vmem:[%s18584_s1 + $0x2db8] sm:$0xff] }
 0x2a3   :  { %11036 = vmatpush3.bf16.msra.mxu1 %v11035_v48  ;;  %v1457_v48 = vld [vmem:[%s18584_s1 + $0x2bd8] sm:$0xff]  ;;  %v1483_v10 = vld [vmem:[%s18584_s1 + $0x2ca8] sm:$0xff]  ;;  %v1502_v9 = vld [vmem:[%s18584_s1 + $0x2d40] sm:$0xff] }
 0x2a4   :  { %11070 = vmatprep.subr.bf16.mxu1 %v11069_v57  ;;  %5678 = vmatmul.mubr.f32.vlgmr.msra.gmra.mrb[40].mxu0 %v16044_v61  ;;  %v1402_v61 = vld [vmem:[%s18584_s1 + $0x2a20] sm:$0xff]  ;;  %v1409_v57 = vld [vmem:[%s18584_s1 + $0x2a58] sm:$0xff]  ;;  %v11089_v52 = vpack.c.bf16 %v1457_v48, %v1456_v53  ;;  %v1519_v22 = vld [vmem:[%s18584_s1 + $0x2dc8] sm:$0xff] }
 0x2a5   :  { %11040 = vmatpush3.bf16.msra.mxu0 %v11039_v60  ;;  %5817 = vmatprep.mubr.f32.mxu0 %v2513_v6  ;;  %v11047_v28 = vpack.c.bf16 %v1403_v18, %v1402_v61  ;;  %v1458_v60 = vld [vmem:[%s18584_s1 + $0x2be0] sm:$0xff]  ;;  %v1443_v6 = vld [vmem:[%s18584_s1 + $0x2b68] sm:$0xff] }
 0x2a6   :  { %5748 = vmatmul.mubr.f32.vlgmr.msra.gmra.mrb[40].mxu1 %v16053_v12  ;;  %11042 = vmatprep.subr.bf16.mxu0 %v11041_v0  ;;  %v1435_v12 = vld [vmem:[%s18584_s1 + $0x2b28] sm:$0xff]  ;;  %v11059_v0 = vpack.c.bf16 %v1409_v57, %v1408_v56  ;;  %v11095_v24 = vpack.c.bf16 %v1443_v6, %v1442_v51  ;;  %v1465_v56 = vld [vmem:[%s18584_s1 + $0x2c18] sm:$0xff]  ;;  %v1496_v57 = vld [vmem:[%s18584_s1 + $0x2d10] sm:$0xff] }
 0x2a7   :  { %11072 = vmatpush3.bf16.msra.mxu1 %v11071_v62  ;;  %5887 = vmatprep.mubr.f32.mxu1 %v2514_v14  ;;  %v11079_v29 = vpack.c.bf16 %v1435_v12, %v1434_v8  ;;  %v1459_v62 = vld [vmem:[%s18584_s1 + $0x2be8] sm:$0xff]  ;;  %v1498_v51 = vld [vmem:[%s18584_s1 + $0x2d20] sm:$0xff]  ;;  %v1485_v6 = vld [vmem:[%s18584_s1 + $0x2cb8] sm:$0xff] }
 0x2a8   :  { %11074 = vmatprep.subr.bf16.mxu1 %v11073_v4  ;;  %v1411_v4 = vld [vmem:[%s18584_s1 + $0x2a68] sm:$0xff]  ;;  %v11093_v26 = vpack.c.bf16 %v1459_v62, %v1458_v60  ;;  %v1514_v60 = vld [vmem:[%s18584_s1 + $0x2da0] sm:$0xff] }
 0x2a9   :  { %11044 = vmatpush3.bf16.msra.mxu0 %v11043_v15  ;;  %v11063_v8 = vpack.c.bf16 %v1411_v4, %v1410_v3  ;;  %v1515_v62 = vld [vmem:[%s18584_s1 + $0x2da8] sm:$0xff]  ;;  %v11109_v3 = vpack.c.bf16 %v1483_v10, %v1482_v58  ;;  %v1490_v33 = vld [vmem:[%s18584_s1 + $0x2ce0] sm:$0xff] }
 0x2aa   :  { %11046 = vmatprep.subr.bf16.mxu0 %v11045_v17  ;;  %v1461_v17 = vld [vmem:[%s18584_s1 + $0x2bf8] sm:$0xff]  ;;  %v1467_v4 = vld [vmem:[%s18584_s1 + $0x2c28] sm:$0xff] }
 0x2ab   :  { %11076 = vmatpush3.bf16.msra.mxu1 %v11075_v16  ;;  %v1460_v16 = vld [vmem:[%s18584_s1 + $0x2bf0] sm:$0xff]  ;;  %v1491_v47 = vld [vmem:[%s18584_s1 + $0x2ce8] sm:$0xff] }
 0x2ac   :  { %11078 = vmatprep.subr.bf16.mxu1 %v11077_v19  ;;  %v44_v19 = vld [vmem:[%s18585_s0 + $0xb0] sm:$0xff] }
 0x2ad   :  { %11048 = vmatpush3.bf16.msra.mxu0 %v11047_v28  ;;  %v1444_v28 = vld [vmem:[%s18584_s1 + $0x2b70] sm:$0xff]  ;;  %v2515_v42 = vcombine.high %v44_v19, %v44_v19  ;;  %v16464_v35 = vrot.slane %v44_v19, %v11989_v13  ;;  %v1501_v19 = vld [vmem:[%s18584_s1 + $0x2d38] sm:$0xff] }
 0x2ae   :  { %11050 = vmatprep.subr.bf16.mxu0 %v11049_v31  ;;  %v11097_v31 = vpack.c.bf16 %v1461_v17, %v1460_v16  ;;  %v11099_v34 = vpack.c.bf16 %v1445_v30, %v1444_v28  ;;  %v1468_v17 = vld [vmem:[%s18584_s1 + $0x2c30] sm:$0xff]  ;;  %v1471_v30 = vld [vmem:[%s18584_s1 + $0x2c48] sm:$0xff] }
 0x2af   :  { %11080 = vmatpush3.bf16.msra.mxu1 %v11079_v29  ;;  %v16473_v53 = vrot.slane %v2515_v42, %v11989_v13  ;;  %v2530_v59 = vcombine.high %v16464_v35, %v16464_v35  ;;  %v1489_v42 = vld [vmem:[%s18584_s1 + $0x2cd8] sm:$0xff] }
 0x2b0   :  { %11082 = vmatprep.subr.bf16.mxu1 %v11081_v21  ;;  %v1510_v21 = vld [vmem:[%s18584_s1 + $0x2d80] sm:$0xff] }
 0x2b1   :  { %11052 = vmatpush3.bf16.msra.mxu0 %v11051_v38  ;;  %v1462_v38 = vld [vmem:[%s18584_s1 + $0x2c00] sm:$0xff] }
 0x2b2   :  { %11054 = vmatprep.subr.bf16.mxu0 %v11053_v41  ;;  %v1494_v41 = vld [vmem:[%s18584_s1 + $0x2d00] sm:$0xff] }
 0x2b3   :  { %11084 = vmatpush3.bf16.msra.mxu1 %v11083_v40  ;;  %v1463_v40 = vld [vmem:[%s18584_s1 + $0x2c08] sm:$0xff] }
 0x2b4   :  { %11086 = vmatprep.subr.bf16.mxu1 %v11085_v46  ;;  %v1481_v46 = vld [vmem:[%s18584_s1 + $0x2c98] sm:$0xff]  ;;  %v11103_v48 = vpack.c.bf16 %v1463_v40, %v1462_v38 }
 0x2b5   :  { %11056 = vmatpush3.bf16.msra.mxu0 %v11055_v50  ;;  %v11135_v50 = vpack.c.bf16 %v1495_v44, %v1494_v41  ;;  %v1472_v41 = vld [vmem:[%s18584_s1 + $0x2c50] sm:$0xff] }
 0x2b6   :  { %11058 = vmatprep.subr.bf16.mxu0 %v11057_v55  ;;  %v1464_v55 = vld [vmem:[%s18584_s1 + $0x2c10] sm:$0xff] }
 0x2b7   :  { %11088 = vmatpush3.bf16.msra.mxu1 %v11087_v54  ;;  %v8413_v5 = vpop.f32.mrb[28].mxu0  ;;  %v11105_v54 = vpack.c.bf16 %v1481_v46, %v1480_v23  ;;  %v1504_v44 = vld [vmem:[%s18584_s1 + $0x2d50] sm:$0xff]  ;;  %v1505_v46 = vld [vmem:[%s18584_s1 + $0x2d58] sm:$0xff] }
 0x2b8   :  { %11090 = vmatprep.subr.bf16.mxu1 %v11089_v52  ;;  %v8414_v14 = vpop.f32.mrb[29].mxu0  ;;  %v1497_v52 = vld [vmem:[%s18584_s1 + $0x2d18] sm:$0xff] }
 0x2b9   :  { %v8448_v15 = vpop.f32.mrb[28].mxu1  ;;  %v8415_v61 = vadd.f32 %v8414_v14, %v8413_v5  ;;  %11060 = vmatpush3.bf16.msra.mxu0 %v11059_v0  ;;  %v2531_v0 = vcombine.high %v16473_v53, %v16473_v53  ;;  %v11141_v5 = vpack.c.bf16 %v1515_v62, %v1514_v60  ;;  %v1492_v60 = vld [vmem:[%s18584_s1 + $0x2cf0] sm:$0xff]  ;;  %v1493_v62 = vld [vmem:[%s18584_s1 + $0x2cf8] sm:$0xff] }
 0x2ba   :  { %v8449_v18 = vpop.f32.mrb[29].mxu1  ;;  %11062 = vmatprep.subr.bf16.mxu0 %v11061_v2  ;;  %v11139_v2 = vpack.c.bf16 %v1497_v52, %v1496_v57  ;;  %v1474_v57 = vld [vmem:[%s18584_s1 + $0x2c60] sm:$0xff] }
 0x2bb   :  { %v8450_v12 = vadd.f32 %v8449_v18, %v8448_v15  ;;  %11092 = vmatpush3.bf16.msra.mxu1 %v11091_v1  ;;  %v4840_v29 = vadd.f32 %v8415_v61, %v16233_v39  ;;  %v1511_v39 = vld [vmem:[%s18584_s1 + $0x2d88] sm:$0xff]  ;;  %v11107_v1 = vpack.c.bf16 %v1465_v56, %v1464_v55  ;;  %v1469_v61 = vld [vmem:[%s18584_s1 + $0x2c38] sm:$0xff]  ;;  %v1500_v18 = vld [vmem:[%s18584_s1 + $0x2d30] sm:$0xff]  ;;  %v11155_v55 = vpack.c.bf16 %v1505_v46, %v1504_v44 }
 0x2bc   :  { %11094 = vmatprep.subr.bf16.mxu1 %v11093_v26  ;;  %v11133_v43 = vpack.c.bf16 %v1511_v39, %v1510_v21  ;;  %v1484_v26 = vld [vmem:[%s18584_s1 + $0x2cb0] sm:$0xff]  ;;  %v11115_v25 = vpack.c.bf16 %v1469_v61, %v1468_v17  ;;  %v11147_v28 = vpack.c.bf16 %v1501_v19, %v1500_v18  ;;  %v1503_v21 = vld [vmem:[%s18584_s1 + $0x2d48] sm:$0xff]  ;;  %v11125_v56 = vpack.c.bf16 %v1491_v47, %v1490_v33  ;;  %v1506_v52 = vld [vmem:[%s18584_s1 + $0x2d60] sm:$0xff] }
 0x2bd   :  { %v16443_v27 = vadd.f32 %v8450_v12, %v4840_v29  ;;  %11064 = vmatpush3.bf16.msra.mxu0 %v11063_v8  ;;  %v11113_v16 = vpack.c.bf16 %v1485_v6, %v1484_v26  ;;  %v11145_v8 = vpack.c.bf16 %v1517_v11, %v1516_v7  ;;  %v1486_v12 = vld [vmem:[%s18584_s1 + $0x2cc0] sm:$0xff]  ;;  %v1488_v39 = vld [vmem:[%s18584_s1 + $0x2cd0] sm:$0xff]  ;;  %v11151_v38 = vpack.c.bf16 %v1503_v21, %v1502_v9  ;;  %v1477_v11 = vld [vmem:[%s18584_s1 + $0x2c78] sm:$0xff] }
 0x2be   :  { %11066 = vmatprep.subr.bf16.mxu0 %v11065_v20  ;;  %v1518_v20 = vld [vmem:[%s18584_s1 + $0x2dc0] sm:$0xff]  ;;  %v11121_v40 = vpack.c.bf16 %v1489_v42, %v1488_v39  ;;  %v11129_v6 = vpack.c.bf16 %v1493_v62, %v1492_v60  ;;  %v1476_v7 = vld [vmem:[%s18584_s1 + $0x2c70] sm:$0xff]  ;;  %v1509_v17 = vld [vmem:[%s18584_s1 + $0x2d78] sm:$0xff] }
 0x2bf   :  { %11096 = vmatpush3.bf16.msra.mxu1 %v11095_v24  ;;  %v1487_v24 = vld [vmem:[%s18584_s1 + $0x2cc8] sm:$0xff]  ;;  %v11149_v32 = vpack.c.bf16 %v1519_v22, %v1518_v20  ;;  %v1542_v61 = vld [vmem:[%s18584_s1 + $0x2e80] sm:$0xff]  ;;  %v1544_v9 = vld [vmem:[%s18584_s1 + $0x2e90] sm:$0xff] }
 0x2c0   :  { %11098 = vmatprep.subr.bf16.mxu1 %v11097_v31  ;;  %v11117_v29 = vpack.c.bf16 %v1487_v24, %v1486_v12  ;;  %v1470_v31 = vld [vmem:[%s18584_s1 + $0x2c40] sm:$0xff]  ;;  %v1543_v18 = vld [vmem:[%s18584_s1 + $0x2e88] sm:$0xff]  ;;  %v11131_v24 = vpack.c.bf16 %v1477_v11, %v1476_v7  ;;  %v1576_v39 = vld [vmem:[%s18584_s1 + $0x2f90] sm:$0xff] }
 0x2c1   :  { %11068 = vmatpush3.bf16.msra.mxu0 %v11067_v37  ;;  %v1520_v37 = vld [vmem:[%s18584_s1 + $0x2dd0] sm:$0xff]  ;;  %v11165_v22 = vpack.c.bf16 %v1543_v18, %v1542_v61  ;;  %v1577_v42 = vld [vmem:[%s18584_s1 + $0x2f98] sm:$0xff]  ;;  %v1546_v46 = vld [vmem:[%s18584_s1 + $0x2ea0] sm:$0xff] }
 0x2c2   :  { %11102 = vmatprep.subr.bf16.mxu0 %v11101_v36  ;;  %v11119_v36 = vpack.c.bf16 %v1471_v30, %v1470_v31  ;;  %v1559_v30 = vld [vmem:[%s18584_s1 + $0x2f08] sm:$0xff]  ;;  %v11201_v44 = vpack.c.bf16 %v1577_v42, %v1576_v39  ;;  %v1580_v60 = vld [vmem:[%s18584_s1 + $0x2fb0] sm:$0xff]  ;;  %v1581_v62 = vld [vmem:[%s18584_s1 + $0x2fb8] sm:$0xff] }
 0x2c3   :  { %11100 = vmatpush3.bf16.msra.mxu1 %v11099_v34  ;;  %v1521_v34 = vld [vmem:[%s18584_s1 + $0x2dd8] sm:$0xff]  ;;  %v1547_v33 = vld [vmem:[%s18584_s1 + $0x2ea8] sm:$0xff]  ;;  %v1566_v61 = vld [vmem:[%s18584_s1 + $0x2f40] sm:$0xff] }
 0x2c4   :  { %11134 = vmatprep.subr.bf16.mxu1 %v11133_v43  ;;  %5818 = vmatmul.mubr.f32.vlgmr.msra.gmra.mrb[42].mxu0 %v16254_v49  ;;  %v1466_v49 = vld [vmem:[%s18584_s1 + $0x2c20] sm:$0xff]  ;;  %v1473_v43 = vld [vmem:[%s18584_s1 + $0x2c58] sm:$0xff]  ;;  %v11153_v23 = vpack.c.bf16 %v1521_v34, %v1520_v37  ;;  %v1583_v7 = vld [vmem:[%s18584_s1 + $0x2fc8] sm:$0xff] }
 0x2c5   :  { %11104 = vmatpush3.bf16.msra.mxu0 %v11103_v48  ;;  %5957 = vmatprep.mubr.f32.mxu0 %v2530_v59  ;;  %v11111_v14 = vpack.c.bf16 %v1467_v4, %v1466_v49  ;;  %v1522_v48 = vld [vmem:[%s18584_s1 + $0x2de0] sm:$0xff]  ;;  %v1507_v59 = vld [vmem:[%s18584_s1 + $0x2d68] sm:$0xff] }
 0x2c6   :  { %5888 = vmatmul.mubr.f32.vlgmr.msra.gmra.mrb[42].mxu1 %v16263_v63  ;;  %11106 = vmatprep.subr.bf16.mxu0 %v11105_v54  ;;  %v1499_v63 = vld [vmem:[%s18584_s1 + $0x2d28] sm:$0xff]  ;;  %v11123_v54 = vpack.c.bf16 %v1473_v43, %v1472_v41  ;;  %v11159_v26 = vpack.c.bf16 %v1507_v59, %v1506_v52  ;;  %v1529_v41 = vld [vmem:[%s18584_s1 + $0x2e18] sm:$0xff]  ;;  %v1560_v43 = vld [vmem:[%s18584_s1 + $0x2f10] sm:$0xff] }
 0x2c7   :  { %11136 = vmatpush3.bf16.msra.mxu1 %v11135_v50  ;;  %6027 = vmatprep.mubr.f32.mxu1 %v2531_v0  ;;  %v11143_v15 = vpack.c.bf16 %v1499_v63, %v1498_v51  ;;  %v1523_v50 = vld [vmem:[%s18584_s1 + $0x2de8] sm:$0xff]  ;;  %v1562_v52 = vld [vmem:[%s18584_s1 + $0x2f20] sm:$0xff]  ;;  %v1549_v59 = vld [vmem:[%s18584_s1 + $0x2eb8] sm:$0xff] }
 0x2c8   :  { %11138 = vmatprep.subr.bf16.mxu1 %v11137_v45  ;;  %v1475_v45 = vld [vmem:[%s18584_s1 + $0x2c68] sm:$0xff]  ;;  %v11157_v10 = vpack.c.bf16 %v1523_v50, %v1522_v48  ;;  %v1578_v48 = vld [vmem:[%s18584_s1 + $0x2fa0] sm:$0xff] }
 0x2c9   :  { %11108 = vmatpush3.bf16.msra.mxu0 %v11107_v1  ;;  %v11127_v51 = vpack.c.bf16 %v1475_v45, %v1474_v57  ;;  %v1579_v50 = vld [vmem:[%s18584_s1 + $0x2fa8] sm:$0xff]  ;;  %v11173_v57 = vpack.c.bf16 %v1547_v33, %v1546_v46  ;;  %v1554_v39 = vld [vmem:[%s18584_s1 + $0x2ee0] sm:$0xff] }
 0x2ca   :  { %11110 = vmatprep.subr.bf16.mxu0 %v11109_v3  ;;  %v1525_v3 = vld [vmem:[%s18584_s1 + $0x2df8] sm:$0xff]  ;;  %v1531_v45 = vld [vmem:[%s18584_s1 + $0x2e28] sm:$0xff] }
 0x2cb   :  { %11140 = vmatpush3.bf16.msra.mxu1 %v11139_v2  ;;  %v1524_v2 = vld [vmem:[%s18584_s1 + $0x2df0] sm:$0xff]  ;;  %v1555_v42 = vld [vmem:[%s18584_s1 + $0x2ee8] sm:$0xff] }
 0x2cc   :  { %11142 = vmatprep.subr.bf16.mxu1 %v11141_v5  ;;  %v45_v5 = vld [vmem:[%s18585_s0 + $0xb8] sm:$0xff] }
 0x2cd   :  { %11112 = vmatpush3.bf16.msra.mxu0 %v11111_v14  ;;  %v1508_v14 = vld [vmem:[%s18584_s1 + $0x2d70] sm:$0xff]  ;;  %v2532_v19 = vcombine.high %v45_v5, %v45_v5  ;;  %v16674_v21 = vrot.slane %v45_v5, %v11989_v13  ;;  %v1565_v5 = vld [vmem:[%s18584_s1 + $0x2f38] sm:$0xff] }
 0x2ce   :  { %11114 = vmatprep.subr.bf16.mxu0 %v11113_v16  ;;  %v11161_v16 = vpack.c.bf16 %v1525_v3, %v1524_v2  ;;  %v11163_v20 = vpack.c.bf16 %v1509_v17, %v1508_v14  ;;  %v1532_v3 = vld [vmem:[%s18584_s1 + $0x2e30] sm:$0xff]  ;;  %v1535_v17 = vld [vmem:[%s18584_s1 + $0x2e48] sm:$0xff] }
 0x2cf   :  { %11144 = vmatpush3.bf16.msra.mxu1 %v11143_v15  ;;  %v16683_v37 = vrot.slane %v2532_v19, %v11989_v13  ;;  %v2547_v47 = vcombine.high %v16674_v21, %v16674_v21  ;;  %v1553_v19 = vld [vmem:[%s18584_s1 + $0x2ed8] sm:$0xff] }
 0x2d0   :  { %11146 = vmatprep.subr.bf16.mxu1 %v11145_v8  ;;  %v1574_v8 = vld [vmem:[%s18584_s1 + $0x2f80] sm:$0xff] }
 0x2d1   :  { %11116 = vmatpush3.bf16.msra.mxu0 %v11115_v25  ;;  %v1526_v25 = vld [vmem:[%s18584_s1 + $0x2e00] sm:$0xff] }
 0x2d2   :  { %11118 = vmatprep.subr.bf16.mxu0 %v11117_v29  ;;  %v1558_v29 = vld [vmem:[%s18584_s1 + $0x2f00] sm:$0xff] }
 0x2d3   :  { %11148 = vmatpush3.bf16.msra.mxu1 %v11147_v28  ;;  %v1527_v28 = vld [vmem:[%s18584_s1 + $0x2e08] sm:$0xff] }
 0x2d4   :  { %11150 = vmatprep.subr.bf16.mxu1 %v11149_v32  ;;  %v1545_v32 = vld [vmem:[%s18584_s1 + $0x2e98] sm:$0xff]  ;;  %v11167_v34 = vpack.c.bf16 %v1527_v28, %v1526_v25 }
 0x2d5   :  { %11120 = vmatpush3.bf16.msra.mxu0 %v11119_v36  ;;  %v11199_v36 = vpack.c.bf16 %v1559_v30, %v1558_v29  ;;  %v1536_v29 = vld [vmem:[%s18584_s1 + $0x2e50] sm:$0xff] }
 0x2d6   :  { %11122 = vmatprep.subr.bf16.mxu0 %v11121_v40  ;;  %v1528_v40 = vld [vmem:[%s18584_s1 + $0x2e10] sm:$0xff] }
 0x2d7   :  { %11152 = vmatpush3.bf16.msra.mxu1 %v11151_v38  ;;  %v8483_v58 = vpop.f32.mrb[30].mxu0  ;;  %v11169_v38 = vpack.c.bf16 %v1545_v32, %v1544_v9  ;;  %v1568_v30 = vld [vmem:[%s18584_s1 + $0x2f50] sm:$0xff]  ;;  %v1569_v32 = vld [vmem:[%s18584_s1 + $0x2f58] sm:$0xff] }
 0x2d8   :  { %11154 = vmatprep.subr.bf16.mxu1 %v11153_v23  ;;  %v8484_v0 = vpop.f32.mrb[31].mxu0  ;;  %v1561_v23 = vld [vmem:[%s18584_s1 + $0x2f18] sm:$0xff] }
 0x2d9   :  { %v8518_v1 = vpop.f32.mrb[30].mxu1  ;;  %v8485_v49 = vadd.f32 %v8484_v0, %v8483_v58  ;;  %11124 = vmatpush3.bf16.msra.mxu0 %v11123_v54  ;;  %v2548_v54 = vcombine.high %v16683_v37, %v16683_v37  ;;  %v11205_v58 = vpack.c.bf16 %v1579_v50, %v1578_v48  ;;  %v1556_v48 = vld [vmem:[%s18584_s1 + $0x2ef0] sm:$0xff]  ;;  %v1557_v50 = vld [vmem:[%s18584_s1 + $0x2ef8] sm:$0xff] }
 0x2da   :  { %v8519_v4 = vpop.f32.mrb[31].mxu1  ;;  %11126 = vmatprep.subr.bf16.mxu0 %v11125_v56  ;;  %v11203_v56 = vpack.c.bf16 %v1561_v23, %v1560_v43  ;;  %v1538_v43 = vld [vmem:[%s18584_s1 + $0x2e60] sm:$0xff] }
 0x2db   :  { %v8520_v63 = vadd.f32 %v8519_v4, %v8518_v1  ;;  %11156 = vmatpush3.bf16.msra.mxu1 %v11155_v55  ;;  %v4980_v15 = vadd.f32 %v8485_v49, %v16443_v27  ;;  %v1575_v27 = vld [vmem:[%s18584_s1 + $0x2f88] sm:$0xff]  ;;  %v11171_v55 = vpack.c.bf16 %v1529_v41, %v1528_v40  ;;  %v1533_v49 = vld [vmem:[%s18584_s1 + $0x2e38] sm:$0xff]  ;;  %v1564_v4 = vld [vmem:[%s18584_s1 + $0x2f30] sm:$0xff]  ;;  %v11219_v40 = vpack.c.bf16 %v1569_v32, %v1568_v30 }
 0x2dc   :  { %11158 = vmatprep.subr.bf16.mxu1 %v11157_v10  ;;  %v11197_v31 = vpack.c.bf16 %v1575_v27, %v1574_v8  ;;  %v1548_v10 = vld [vmem:[%s18584_s1 + $0x2eb0] sm:$0xff]  ;;  %v11179_v11 = vpack.c.bf16 %v1533_v49, %v1532_v3  ;;  %v11211_v14 = vpack.c.bf16 %v1565_v5, %v1564_v4  ;;  %v1567_v8 = vld [vmem:[%s18584_s1 + $0x2f48] sm:$0xff]  ;;  %v11189_v41 = vpack.c.bf16 %v1555_v42, %v1554_v39  ;;  %v1570_v23 = vld [vmem:[%s18584_s1 + $0x2f60] sm:$0xff] }
 0x2dd   :  { %v16653_v12 = vadd.f32 %v8520_v63, %v4980_v15  ;;  %11128 = vmatpush3.bf16.msra.mxu0 %v11127_v51  ;;  %v11177_v2 = vpack.c.bf16 %v1549_v59, %v1548_v10  ;;  %v11209_v51 = vpack.c.bf16 %v1581_v62, %v1580_v60  ;;  %v1550_v63 = vld [vmem:[%s18584_s1 + $0x2ec0] sm:$0xff]  ;;  %v1552_v27 = vld [vmem:[%s18584_s1 + $0x2ed0] sm:$0xff]  ;;  %v11215_v25 = vpack.c.bf16 %v1567_v8, %v1566_v61  ;;  %v1541_v62 = vld [vmem:[%s18584_s1 + $0x2e78] sm:$0xff] }
 0x2de   :  { %11130 = vmatprep.subr.bf16.mxu0 %v11129_v6  ;;  %v1582_v6 = vld [vmem:[%s18584_s1 + $0x2fc0] sm:$0xff]  ;;  %v11185_v28 = vpack.c.bf16 %v1553_v19, %v1552_v27  ;;  %v11193_v59 = vpack.c.bf16 %v1557_v50, %v1556_v48  ;;  %v1540_v60 = vld [vmem:[%s18584_s1 + $0x2e70] sm:$0xff]  ;;  %v1573_v3 = vld [vmem:[%s18584_s1 + $0x2f78] sm:$0xff] }
 0x2df   :  { %11160 = vmatpush3.bf16.msra.mxu1 %v11159_v26  ;;  %v1551_v26 = vld [vmem:[%s18584_s1 + $0x2ec8] sm:$0xff]  ;;  %v11213_v18 = vpack.c.bf16 %v1583_v7, %v1582_v6  ;;  %v1606_v49 = vld [vmem:[%s18584_s1 + $0x3080] sm:$0xff]  ;;  %v1608_v61 = vld [vmem:[%s18584_s1 + $0x3090] sm:$0xff] }
 0x2e0   :  { %11162 = vmatprep.subr.bf16.mxu1 %v11161_v16  ;;  %v11181_v15 = vpack.c.bf16 %v1551_v26, %v1550_v63  ;;  %v1534_v16 = vld [vmem:[%s18584_s1 + $0x2e40] sm:$0xff]  ;;  %v1607_v4 = vld [vmem:[%s18584_s1 + $0x3088] sm:$0xff]  ;;  %v11195_v26 = vpack.c.bf16 %v1541_v62, %v1540_v60  ;;  %v1640_v27 = vld [vmem:[%s18584_s1 + $0x3190] sm:$0xff] }
 0x2e1   :  { %11132 = vmatpush3.bf16.msra.mxu0 %v11131_v24  ;;  %v1584_v24 = vld [vmem:[%s18584_s1 + $0x2fd0] sm:$0xff]  ;;  %v11229_v7 = vpack.c.bf16 %v1607_v4, %v1606_v49  ;;  %v1641_v19 = vld [vmem:[%s18584_s1 + $0x3198] sm:$0xff]  ;;  %v1610_v32 = vld [vmem:[%s18584_s1 + $0x30a0] sm:$0xff] }
 0x2e2   :  { %11166 = vmatprep.subr.bf16.mxu0 %v11165_v22  ;;  %v11183_v22 = vpack.c.bf16 %v1535_v17, %v1534_v16  ;;  %v1623_v17 = vld [vmem:[%s18584_s1 + $0x3108] sm:$0xff]  ;;  %v11265_v30 = vpack.c.bf16 %v1641_v19, %v1640_v27  ;;  %v1644_v48 = vld [vmem:[%s18584_s1 + $0x31b0] sm:$0xff]  ;;  %v1645_v50 = vld [vmem:[%s18584_s1 + $0x31b8] sm:$0xff] }
 0x2e3   :  { %11164 = vmatpush3.bf16.msra.mxu1 %v11163_v20  ;;  %v1585_v20 = vld [vmem:[%s18584_s1 + $0x2fd8] sm:$0xff]  ;;  %v1611_v39 = vld [vmem:[%s18584_s1 + $0x30a8] sm:$0xff]  ;;  %v1630_v49 = vld [vmem:[%s18584_s1 + $0x3140] sm:$0xff] }
 0x2e4   :  { %11198 = vmatprep.subr.bf16.mxu1 %v11197_v31  ;;  %5958 = vmatmul.mubr.f32.vlgmr.msra.gmra.mrb[44].mxu0 %v16464_v35  ;;  %v1530_v35 = vld [vmem:[%s18584_s1 + $0x2e20] sm:$0xff]  ;;  %v1537_v31 = vld [vmem:[%s18584_s1 + $0x2e58] sm:$0xff]  ;;  %v11217_v9 = vpack.c.bf16 %v1585_v20, %v1584_v24  ;;  %v1647_v60 = vld [vmem:[%s18584_s1 + $0x31c8] sm:$0xff] }
 0x2e5   :  { %11168 = vmatpush3.bf16.msra.mxu0 %v11167_v34  ;;  %6097 = vmatprep.mubr.f32.mxu0 %v2547_v47  ;;  %v11175_v0 = vpack.c.bf16 %v1531_v45, %v1530_v35  ;;  %v1586_v34 = vld [vmem:[%s18584_s1 + $0x2fe0] sm:$0xff]  ;;  %v1571_v47 = vld [vmem:[%s18584_s1 + $0x2f68] sm:$0xff] }
 0x2e6   :  { %6028 = vmatmul.mubr.f32.vlgmr.msra.gmra.mrb[44].mxu1 %v16473_v53  ;;  %11170 = vmatprep.subr.bf16.mxu0 %v11169_v38  ;;  %v1563_v53 = vld [vmem:[%s18584_s1 + $0x2f28] sm:$0xff]  ;;  %v11187_v38 = vpack.c.bf16 %v1537_v31, %v1536_v29  ;;  %v11223_v10 = vpack.c.bf16 %v1571_v47, %v1570_v23  ;;  %v1593_v29 = vld [vmem:[%s18584_s1 + $0x3018] sm:$0xff]  ;;  %v1624_v31 = vld [vmem:[%s18584_s1 + $0x3110] sm:$0xff] }
 0x2e7   :  { %11200 = vmatpush3.bf16.msra.mxu1 %v11199_v36  ;;  %6167 = vmatprep.mubr.f32.mxu1 %v2548_v54  ;;  %v11207_v1 = vpack.c.bf16 %v1563_v53, %v1562_v52  ;;  %v1587_v36 = vld [vmem:[%s18584_s1 + $0x2fe8] sm:$0xff]  ;;  %v1626_v23 = vld [vmem:[%s18584_s1 + $0x3120] sm:$0xff]  ;;  %v1613_v47 = vld [vmem:[%s18584_s1 + $0x30b8] sm:$0xff] }
 0x2e8   :  { %11202 = vmatprep.subr.bf16.mxu1 %v11201_v44  ;;  %v1539_v44 = vld [vmem:[%s18584_s1 + $0x2e68] sm:$0xff]  ;;  %v11221_v33 = vpack.c.bf16 %v1587_v36, %v1586_v34  ;;  %v1642_v34 = vld [vmem:[%s18584_s1 + $0x31a0] sm:$0xff] }
 0x2e9   :  { %11172 = vmatpush3.bf16.msra.mxu0 %v11171_v55  ;;  %v11191_v52 = vpack.c.bf16 %v1539_v44, %v1538_v43  ;;  %v1643_v36 = vld [vmem:[%s18584_s1 + $0x31a8] sm:$0xff]  ;;  %v11237_v43 = vpack.c.bf16 %v1611_v39, %v1610_v32  ;;  %v1618_v27 = vld [vmem:[%s18584_s1 + $0x30e0] sm:$0xff] }
 0x2ea   :  { %11174 = vmatprep.subr.bf16.mxu0 %v11173_v57  ;;  %v1589_v57 = vld [vmem:[%s18584_s1 + $0x2ff8] sm:$0xff]  ;;  %v1595_v44 = vld [vmem:[%s18584_s1 + $0x3028] sm:$0xff] }
 0x2eb   :  { %11204 = vmatpush3.bf16.msra.mxu1 %v11203_v56  ;;  %v1588_v56 = vld [vmem:[%s18584_s1 + $0x2ff0] sm:$0xff]  ;;  %v1619_v19 = vld [vmem:[%s18584_s1 + $0x30e8] sm:$0xff] }
 0x2ec   :  { %11206 = vmatprep.subr.bf16.mxu1 %v11205_v58  ;;  %v46_v58 = vld [vmem:[%s18585_s0 + $0xc0] sm:$0xff] }
 0x2ed   :  { %11176 = vmatpush3.bf16.msra.mxu0 %v11175_v0  ;;  %v1572_v0 = vld [vmem:[%s18584_s1 + $0x2f70] sm:$0xff]  ;;  %v2549_v5 = vcombine.high %v46_v58, %v46_v58  ;;  %v16884_v8 = vrot.slane %v46_v58, %v11989_v13  ;;  %v1629_v58 = vld [vmem:[%s18584_s1 + $0x3138] sm:$0xff] }
 0x2ee   :  { %11178 = vmatprep.subr.bf16.mxu0 %v11177_v2  ;;  %v11225_v2 = vpack.c.bf16 %v1589_v57, %v1588_v56  ;;  %v11227_v6 = vpack.c.bf16 %v1573_v3, %v1572_v0  ;;  %v1596_v57 = vld [vmem:[%s18584_s1 + $0x3030] sm:$0xff]  ;;  %v1599_v3 = vld [vmem:[%s18584_s1 + $0x3048] sm:$0xff] }
 0x2ef   :  { %11208 = vmatpush3.bf16.msra.mxu1 %v11207_v1  ;;  %v16893_v24 = vrot.slane %v2549_v5, %v11989_v13  ;;  %v2564_v42 = vcombine.high %v16884_v8, %v16884_v8  ;;  %v1617_v5 = vld [vmem:[%s18584_s1 + $0x30d8] sm:$0xff] }
 0x2f0   :  { %11210 = vmatprep.subr.bf16.mxu1 %v11209_v51  ;;  %v1638_v51 = vld [vmem:[%s18584_s1 + $0x3180] sm:$0xff] }
 0x2f1   :  { %11180 = vmatpush3.bf16.msra.mxu0 %v11179_v11  ;;  %v1590_v11 = vld [vmem:[%s18584_s1 + $0x3000] sm:$0xff] }
 0x2f2   :  { %11182 = vmatprep.subr.bf16.mxu0 %v11181_v15  ;;  %v1622_v15 = vld [vmem:[%s18584_s1 + $0x3100] sm:$0xff] }
 0x2f3   :  { %11212 = vmatpush3.bf16.msra.mxu1 %v11211_v14  ;;  %v1591_v14 = vld [vmem:[%s18584_s1 + $0x3008] sm:$0xff] }
 0x2f4   :  { %11214 = vmatprep.subr.bf16.mxu1 %v11213_v18  ;;  %v1609_v18 = vld [vmem:[%s18584_s1 + $0x3098] sm:$0xff]  ;;  %v11231_v20 = vpack.c.bf16 %v1591_v14, %v1590_v11 }
 0x2f5   :  { %11184 = vmatpush3.bf16.msra.mxu0 %v11183_v22  ;;  %v11263_v22 = vpack.c.bf16 %v1623_v17, %v1622_v15  ;;  %v1600_v15 = vld [vmem:[%s18584_s1 + $0x3050] sm:$0xff] }
 0x2f6   :  { %11186 = vmatprep.subr.bf16.mxu0 %v11185_v28  ;;  %v1592_v28 = vld [vmem:[%s18584_s1 + $0x3010] sm:$0xff] }
 0x2f7   :  { %11216 = vmatpush3.bf16.msra.mxu1 %v11215_v25  ;;  %v8553_v46 = vpop.f32.mrb[32].mxu0  ;;  %v11233_v25 = vpack.c.bf16 %v1609_v18, %v1608_v61  ;;  %v1632_v17 = vld [vmem:[%s18584_s1 + $0x3150] sm:$0xff]  ;;  %v1633_v18 = vld [vmem:[%s18584_s1 + $0x3158] sm:$0xff] }
 0x2f8   :  { %11218 = vmatprep.subr.bf16.mxu1 %v11217_v9  ;;  %v8554_v54 = vpop.f32.mrb[33].mxu0  ;;  %v1625_v9 = vld [vmem:[%s18584_s1 + $0x3118] sm:$0xff] }
 0x2f9   :  { %v8588_v55 = vpop.f32.mrb[32].mxu1  ;;  %v8555_v35 = vadd.f32 %v8554_v54, %v8553_v46  ;;  %11188 = vmatpush3.bf16.msra.mxu0 %v11187_v38  ;;  %v2565_v38 = vcombine.high %v16893_v24, %v16893_v24  ;;  %v11269_v46 = vpack.c.bf16 %v1643_v36, %v1642_v34  ;;  %v1620_v34 = vld [vmem:[%s18584_s1 + $0x30f0] sm:$0xff]  ;;  %v1621_v36 = vld [vmem:[%s18584_s1 + $0x30f8] sm:$0xff] }
 0x2fa   :  { %v8589_v45 = vpop.f32.mrb[33].mxu1  ;;  %11190 = vmatprep.subr.bf16.mxu0 %v11189_v41  ;;  %v11267_v41 = vpack.c.bf16 %v1625_v9, %v1624_v31  ;;  %v1602_v31 = vld [vmem:[%s18584_s1 + $0x3060] sm:$0xff] }
 0x2fb   :  { %v8590_v53 = vadd.f32 %v8589_v45, %v8588_v55  ;;  %11220 = vmatpush3.bf16.msra.mxu1 %v11219_v40  ;;  %v5120_v1 = vadd.f32 %v8555_v35, %v16653_v12  ;;  %v1639_v12 = vld [vmem:[%s18584_s1 + $0x3188] sm:$0xff]  ;;  %v11235_v40 = vpack.c.bf16 %v1593_v29, %v1592_v28  ;;  %v1597_v35 = vld [vmem:[%s18584_s1 + $0x3038] sm:$0xff]  ;;  %v1628_v45 = vld [vmem:[%s18584_s1 + $0x3130] sm:$0xff]  ;;  %v11283_v28 = vpack.c.bf16 %v1633_v18, %v1632_v17 }
 0x2fc   :  { %11222 = vmatprep.subr.bf16.mxu1 %v11221_v33  ;;  %v11261_v16 = vpack.c.bf16 %v1639_v12, %v1638_v51  ;;  %v1612_v33 = vld [vmem:[%s18584_s1 + $0x30b0] sm:$0xff]  ;;  %v11243_v62 = vpack.c.bf16 %v1597_v35, %v1596_v57  ;;  %v11275_v0 = vpack.c.bf16 %v1629_v58, %v1628_v45  ;;  %v1631_v51 = vld [vmem:[%s18584_s1 + $0x3148] sm:$0xff]  ;;  %v11253_v29 = vpack.c.bf16 %v1619_v19, %v1618_v27  ;;  %v1634_v9 = vld [vmem:[%s18584_s1 + $0x3160] sm:$0xff] }
 0x2fd   :  { %v16863_v63 = vadd.f32 %v8590_v53, %v5120_v1  ;;  %11192 = vmatpush3.bf16.msra.mxu0 %v11191_v52  ;;  %v11241_v56 = vpack.c.bf16 %v1613_v47, %v1612_v33  ;;  %v11273_v52 = vpack.c.bf16 %v1645_v50, %v1644_v48  ;;  %v1614_v53 = vld [vmem:[%s18584_s1 + $0x30c0] sm:$0xff]  ;;  %v1616_v12 = vld [vmem:[%s18584_s1 + $0x30d0] sm:$0xff]  ;;  %v11279_v11 = vpack.c.bf16 %v1631_v51, %v1630_v49  ;;  %v1605_v50 = vld [vmem:[%s18584_s1 + $0x3078] sm:$0xff] }
 0x2fe   :  { %11194 = vmatprep.subr.bf16.mxu0 %v11193_v59  ;;  %v1646_v59 = vld [vmem:[%s18584_s1 + $0x31c0] sm:$0xff]  ;;  %v11249_v14 = vpack.c.bf16 %v1617_v5, %v1616_v12  ;;  %v11257_v47 = vpack.c.bf16 %v1621_v36, %v1620_v34  ;;  %v1604_v48 = vld [vmem:[%s18584_s1 + $0x3070] sm:$0xff]  ;;  %v1637_v57 = vld [vmem:[%s18584_s1 + $0x3178] sm:$0xff] }
 0x2ff   :  { %11224 = vmatpush3.bf16.msra.mxu1 %v11223_v10  ;;  %v1615_v10 = vld [vmem:[%s18584_s1 + $0x30c8] sm:$0xff]  ;;  %v11277_v4 = vpack.c.bf16 %v1647_v60, %v1646_v59  ;;  %v1670_v35 = vld [vmem:[%s18584_s1 + $0x3280] sm:$0xff]  ;;  %v1672_v49 = vld [vmem:[%s18584_s1 + $0x3290] sm:$0xff] }
 0x300   :  { %11226 = vmatprep.subr.bf16.mxu1 %v11225_v2  ;;  %v11245_v1 = vpack.c.bf16 %v1615_v10, %v1614_v53  ;;  %v1598_v2 = vld [vmem:[%s18584_s1 + $0x3040] sm:$0xff]  ;;  %v1671_v45 = vld [vmem:[%s18584_s1 + $0x3288] sm:$0xff]  ;;  %v11259_v10 = vpack.c.bf16 %v1605_v50, %v1604_v48  ;;  %v1704_v12 = vld [vmem:[%s18584_s1 + $0x3390] sm:$0xff] }
 0x301   :  { %11196 = vmatpush3.bf16.msra.mxu0 %v11195_v26  ;;  %v1648_v26 = vld [vmem:[%s18584_s1 + $0x31d0] sm:$0xff]  ;;  %v11293_v60 = vpack.c.bf16 %v1671_v45, %v1670_v35  ;;  %v1705_v5 = vld [vmem:[%s18584_s1 + $0x3398] sm:$0xff]  ;;  %v1674_v18 = vld [vmem:[%s18584_s1 + $0x32a0] sm:$0xff] }
 0x302   :  { %11230 = vmatprep.subr.bf16.mxu0 %v11229_v7  ;;  %v11247_v7 = vpack.c.bf16 %v1599_v3, %v1598_v2  ;;  %v1687_v3 = vld [vmem:[%s18584_s1 + $0x3308] sm:$0xff]  ;;  %v11329_v17 = vpack.c.bf16 %v1705_v5, %v1704_v12  ;;  %v1708_v34 = vld [vmem:[%s18584_s1 + $0x33b0] sm:$0xff]  ;;  %v1709_v36 = vld [vmem:[%s18584_s1 + $0x33b8] sm:$0xff] }
 0x303   :  { %11228 = vmatpush3.bf16.msra.mxu1 %v11227_v6  ;;  %v1649_v6 = vld [vmem:[%s18584_s1 + $0x31d8] sm:$0xff]  ;;  %v1675_v27 = vld [vmem:[%s18584_s1 + $0x32a8] sm:$0xff]  ;;  %v1694_v35 = vld [vmem:[%s18584_s1 + $0x3340] sm:$0xff] }
 0x304   :  { %11262 = vmatprep.subr.bf16.mxu1 %v11261_v16  ;;  %6098 = vmatmul.mubr.f32.vlgmr.msra.gmra.mrb[46].mxu0 %v16674_v21  ;;  %v1594_v21 = vld [vmem:[%s18584_s1 + $0x3020] sm:$0xff]  ;;  %v1601_v16 = vld [vmem:[%s18584_s1 + $0x3058] sm:$0xff]  ;;  %v11281_v61 = vpack.c.bf16 %v1649_v6, %v1648_v26  ;;  %v1711_v48 = vld [vmem:[%s18584_s1 + $0x33c8] sm:$0xff] }
 0x305   :  { %11232 = vmatpush3.bf16.msra.mxu0 %v11231_v20  ;;  %6237 = vmatprep.mubr.f32.mxu0 %v2564_v42  ;;  %v11239_v54 = vpack.c.bf16 %v1595_v44, %v1594_v21  ;;  %v1650_v20 = vld [vmem:[%s18584_s1 + $0x31e0] sm:$0xff]  ;;  %v1635_v42 = vld [vmem:[%s18584_s1 + $0x3168] sm:$0xff] }
 0x306   :  { %6168 = vmatmul.mubr.f32.vlgmr.msra.gmra.mrb[46].mxu1 %v16683_v37  ;;  %11234 = vmatprep.subr.bf16.mxu0 %v11233_v25  ;;  %v1627_v37 = vld [vmem:[%s18584_s1 + $0x3128] sm:$0xff]  ;;  %v11251_v25 = vpack.c.bf16 %v1601_v16, %v1600_v15  ;;  %v11287_v33 = vpack.c.bf16 %v1635_v42, %v1634_v9  ;;  %v1657_v15 = vld [vmem:[%s18584_s1 + $0x3218] sm:$0xff]  ;;  %v1688_v16 = vld [vmem:[%s18584_s1 + $0x3310] sm:$0xff] }
 0x307   :  { %11264 = vmatpush3.bf16.msra.mxu1 %v11263_v22  ;;  %6307 = vmatprep.mubr.f32.mxu1 %v2565_v38  ;;  %v11271_v55 = vpack.c.bf16 %v1627_v37, %v1626_v23  ;;  %v1651_v22 = vld [vmem:[%s18584_s1 + $0x31e8] sm:$0xff]  ;;  %v1690_v9 = vld [vmem:[%s18584_s1 + $0x3320] sm:$0xff]  ;;  %v1677_v42 = vld [vmem:[%s18584_s1 + $0x32b8] sm:$0xff] }
 0x308   :  { %11266 = vmatprep.subr.bf16.mxu1 %v11265_v30  ;;  %v1603_v30 = vld [vmem:[%s18584_s1 + $0x3068] sm:$0xff]  ;;  %v11285_v39 = vpack.c.bf16 %v1651_v22, %v1650_v20  ;;  %v1706_v20 = vld [vmem:[%s18584_s1 + $0x33a0] sm:$0xff] }
 0x309   :  { %11236 = vmatpush3.bf16.msra.mxu0 %v11235_v40  ;;  %v11255_v23 = vpack.c.bf16 %v1603_v30, %v1602_v31  ;;  %v1707_v22 = vld [vmem:[%s18584_s1 + $0x33a8] sm:$0xff]  ;;  %v11301_v31 = vpack.c.bf16 %v1675_v27, %v1674_v18  ;;  %v1682_v12 = vld [vmem:[%s18584_s1 + $0x32e0] sm:$0xff] }
 0x30a   :  { %11238 = vmatprep.subr.bf16.mxu0 %v11237_v43  ;;  %v1653_v43 = vld [vmem:[%s18584_s1 + $0x31f8] sm:$0xff]  ;;  %v1659_v30 = vld [vmem:[%s18584_s1 + $0x3228] sm:$0xff] }
 0x30b   :  { %11268 = vmatpush3.bf16.msra.mxu1 %v11267_v41  ;;  %v1652_v41 = vld [vmem:[%s18584_s1 + $0x31f0] sm:$0xff]  ;;  %v1683_v5 = vld [vmem:[%s18584_s1 + $0x32e8] sm:$0xff] }
 0x30c   :  { %11270 = vmatprep.subr.bf16.mxu1 %v11269_v46  ;;  %v47_v46 = vld [vmem:[%s18585_s0 + $0xc8] sm:$0xff] }
 0x30d   :  { %11240 = vmatpush3.bf16.msra.mxu0 %v11239_v54  ;;  %v1636_v54 = vld [vmem:[%s18584_s1 + $0x3170] sm:$0xff]  ;;  %v2566_v58 = vcombine.high %v47_v46, %v47_v46  ;;  %v17094_v51 = vrot.slane %v47_v46, %v11989_v13  ;;  %v1693_v46 = vld [vmem:[%s18584_s1 + $0x3338] sm:$0xff] }
 0x30e   :  { %11242 = vmatprep.subr.bf16.mxu0 %v11241_v56  ;;  %v11289_v56 = vpack.c.bf16 %v1653_v43, %v1652_v41  ;;  %v11291_v59 = vpack.c.bf16 %v1637_v57, %v1636_v54  ;;  %v1660_v43 = vld [vmem:[%s18584_s1 + $0x3230] sm:$0xff]  ;;  %v1663_v57 = vld [vmem:[%s18584_s1 + $0x3248] sm:$0xff] }
 0x30f   :  { %11272 = vmatpush3.bf16.msra.mxu1 %v11271_v55  ;;  %v17103_v26 = vrot.slane %v2566_v58, %v11989_v13  ;;  %v2581_v19 = vcombine.high %v17094_v51, %v17094_v51  ;;  %v1681_v58 = vld [vmem:[%s18584_s1 + $0x32d8] sm:$0xff] }
 0x310   :  { %11274 = vmatprep.subr.bf16.mxu1 %v11273_v52  ;;  %v1702_v52 = vld [vmem:[%s18584_s1 + $0x3380] sm:$0xff] }
 0x311   :  { %11244 = vmatpush3.bf16.msra.mxu0 %v11243_v62  ;;  %v1654_v62 = vld [vmem:[%s18584_s1 + $0x3200] sm:$0xff] }
 0x312   :  { %11246 = vmatprep.subr.bf16.mxu0 %v11245_v1  ;;  %v1686_v1 = vld [vmem:[%s18584_s1 + $0x3300] sm:$0xff] }
 0x313   :  { %11276 = vmatpush3.bf16.msra.mxu1 %v11275_v0  ;;  %v1655_v0 = vld [vmem:[%s18584_s1 + $0x3208] sm:$0xff] }
 0x314   :  { %11278 = vmatprep.subr.bf16.mxu1 %v11277_v4  ;;  %v1673_v4 = vld [vmem:[%s18584_s1 + $0x3298] sm:$0xff]  ;;  %v11295_v6 = vpack.c.bf16 %v1655_v0, %v1654_v62 }
 0x315   :  { %11248 = vmatpush3.bf16.msra.mxu0 %v11247_v7  ;;  %v11327_v7 = vpack.c.bf16 %v1687_v3, %v1686_v1  ;;  %v1664_v1 = vld [vmem:[%s18584_s1 + $0x3250] sm:$0xff] }
 0x316   :  { %11250 = vmatprep.subr.bf16.mxu0 %v11249_v14  ;;  %v1656_v14 = vld [vmem:[%s18584_s1 + $0x3210] sm:$0xff] }
 0x317   :  { %11280 = vmatpush3.bf16.msra.mxu1 %v11279_v11  ;;  %v8623_v32 = vpop.f32.mrb[34].mxu0  ;;  %v11297_v11 = vpack.c.bf16 %v1673_v4, %v1672_v49  ;;  %v1696_v3 = vld [vmem:[%s18584_s1 + $0x3350] sm:$0xff]  ;;  %v1697_v4 = vld [vmem:[%s18584_s1 + $0x3358] sm:$0xff] }
 0x318   :  { %11282 = vmatprep.subr.bf16.mxu1 %v11281_v61  ;;  %v8624_v38 = vpop.f32.mrb[35].mxu0  ;;  %v1689_v61 = vld [vmem:[%s18584_s1 + $0x3318] sm:$0xff] }
 0x319   :  { %v8658_v40 = vpop.f32.mrb[34].mxu1  ;;  %v8625_v21 = vadd.f32 %v8624_v38, %v8623_v32  ;;  %11252 = vmatpush3.bf16.msra.mxu0 %v11251_v25  ;;  %v2582_v25 = vcombine.high %v17103_v26, %v17103_v26  ;;  %v11333_v32 = vpack.c.bf16 %v1707_v22, %v1706_v20  ;;  %v1684_v20 = vld [vmem:[%s18584_s1 + $0x32f0] sm:$0xff]  ;;  %v1685_v22 = vld [vmem:[%s18584_s1 + $0x32f8] sm:$0xff] }
 0x31a   :  { %v8659_v44 = vpop.f32.mrb[35].mxu1  ;;  %11254 = vmatprep.subr.bf16.mxu0 %v11253_v29  ;;  %v11331_v29 = vpack.c.bf16 %v1689_v61, %v1688_v16  ;;  %v1666_v16 = vld [vmem:[%s18584_s1 + $0x3260] sm:$0xff] }
 0x31b   :  { %v8660_v37 = vadd.f32 %v8659_v44, %v8658_v40  ;;  %11284 = vmatpush3.bf16.msra.mxu1 %v11283_v28  ;;  %v5260_v55 = vadd.f32 %v8625_v21, %v16863_v63  ;;  %v1703_v63 = vld [vmem:[%s18584_s1 + $0x3388] sm:$0xff]  ;;  %v11299_v28 = vpack.c.bf16 %v1657_v15, %v1656_v14  ;;  %v1661_v21 = vld [vmem:[%s18584_s1 + $0x3238] sm:$0xff]  ;;  %v1692_v44 = vld [vmem:[%s18584_s1 + $0x3330] sm:$0xff]  ;;  %v11347_v14 = vpack.c.bf16 %v1697_v4, %v1696_v3 }
 0x31c   :  { %11286 = vmatprep.subr.bf16.mxu1 %v11285_v39  ;;  %v11325_v2 = vpack.c.bf16 %v1703_v63, %v1702_v52  ;;  %v1676_v39 = vld [vmem:[%s18584_s1 + $0x32b0] sm:$0xff]  ;;  %v11307_v50 = vpack.c.bf16 %v1661_v21, %v1660_v43  ;;  %v11339_v54 = vpack.c.bf16 %v1693_v46, %v1692_v44  ;;  %v1695_v52 = vld [vmem:[%s18584_s1 + $0x3348] sm:$0xff]  ;;  %v11317_v15 = vpack.c.bf16 %v1683_v5, %v1682_v12  ;;  %v1698_v61 = vld [vmem:[%s18584_s1 + $0x3360] sm:$0xff] }
 0x31d   :  { %v17073_v53 = vadd.f32 %v8660_v37, %v5260_v55  ;;  %11256 = vmatpush3.bf16.msra.mxu0 %v11255_v23  ;;  %v11305_v41 = vpack.c.bf16 %v1677_v42, %v1676_v39  ;;  %v11337_v23 = vpack.c.bf16 %v1709_v36, %v1708_v34  ;;  %v1678_v37 = vld [vmem:[%s18584_s1 + $0x32c0] sm:$0xff]  ;;  %v1680_v63 = vld [vmem:[%s18584_s1 + $0x32d0] sm:$0xff]  ;;  %v11343_v62 = vpack.c.bf16 %v1695_v52, %v1694_v35  ;;  %v1669_v36 = vld [vmem:[%s18584_s1 + $0x3278] sm:$0xff] }
 0x31e   :  { %11258 = vmatprep.subr.bf16.mxu0 %v11257_v47  ;;  %v1710_v47 = vld [vmem:[%s18584_s1 + $0x33c0] sm:$0xff]  ;;  %v11313_v0 = vpack.c.bf16 %v1681_v58, %v1680_v63  ;;  %v11321_v42 = vpack.c.bf16 %v1685_v22, %v1684_v20  ;;  %v1668_v34 = vld [vmem:[%s18584_s1 + $0x3270] sm:$0xff]  ;;  %v1701_v43 = vld [vmem:[%s18584_s1 + $0x3378] sm:$0xff] }
 0x31f   :  { %11288 = vmatpush3.bf16.msra.mxu1 %v11287_v33  ;;  %v1679_v33 = vld [vmem:[%s18584_s1 + $0x32c8] sm:$0xff]  ;;  %v11341_v45 = vpack.c.bf16 %v1711_v48, %v1710_v47  ;;  %v1734_v21 = vld [vmem:[%s18584_s1 + $0x3480] sm:$0xff]  ;;  %v1736_v35 = vld [vmem:[%s18584_s1 + $0x3490] sm:$0xff] }
 0x320   :  { %11290 = vmatprep.subr.bf16.mxu1 %v11289_v56  ;;  %v11309_v55 = vpack.c.bf16 %v1679_v33, %v1678_v37  ;;  %v1662_v56 = vld [vmem:[%s18584_s1 + $0x3240] sm:$0xff]  ;;  %v1735_v44 = vld [vmem:[%s18584_s1 + $0x3488] sm:$0xff]  ;;  %v11323_v33 = vpack.c.bf16 %v1669_v36, %v1668_v34  ;;  %v1768_v63 = vld [vmem:[%s18584_s1 + $0x3590] sm:$0xff] }
 0x321   :  { %11260 = vmatpush3.bf16.msra.mxu0 %v11259_v10  ;;  %v1712_v10 = vld [vmem:[%s18584_s1 + $0x33d0] sm:$0xff]  ;;  %v11357_v48 = vpack.c.bf16 %v1735_v44, %v1734_v21  ;;  %v1769_v58 = vld [vmem:[%s18584_s1 + $0x3598] sm:$0xff]  ;;  %v1738_v4 = vld [vmem:[%s18584_s1 + $0x34a0] sm:$0xff] }
 0x322   :  { %11294 = vmatprep.subr.bf16.mxu0 %v11293_v60  ;;  %v11311_v60 = vpack.c.bf16 %v1663_v57, %v1662_v56  ;;  %v1751_v57 = vld [vmem:[%s18584_s1 + $0x3508] sm:$0xff]  ;;  %v11393_v3 = vpack.c.bf16 %v1769_v58, %v1768_v63  ;;  %v1772_v20 = vld [vmem:[%s18584_s1 + $0x35b0] sm:$0xff]  ;;  %v1773_v22 = vld [vmem:[%s18584_s1 + $0x35b8] sm:$0xff] }
 0x323   :  { %11292 = vmatpush3.bf16.msra.mxu1 %v11291_v59  ;;  %v1713_v59 = vld [vmem:[%s18584_s1 + $0x33d8] sm:$0xff]  ;;  %v1739_v12 = vld [vmem:[%s18584_s1 + $0x34a8] sm:$0xff]  ;;  %v1758_v21 = vld [vmem:[%s18584_s1 + $0x3540] sm:$0xff] }
 0x324   :  { %11326 = vmatprep.subr.bf16.mxu1 %v11325_v2  ;;  %6238 = vmatmul.mubr.f32.vlgmr.msra.gmra.mrb[48].mxu0 %v16884_v8  ;;  %v1658_v8 = vld [vmem:[%s18584_s1 + $0x3220] sm:$0xff]  ;;  %v1665_v2 = vld [vmem:[%s18584_s1 + $0x3258] sm:$0xff]  ;;  %v11345_v49 = vpack.c.bf16 %v1713_v59, %v1712_v10  ;;  %v1775_v34 = vld [vmem:[%s18584_s1 + $0x35c8] sm:$0xff] }
 0x325   :  { %11296 = vmatpush3.bf16.msra.mxu0 %v11295_v6  ;;  %6377 = vmatprep.mubr.f32.mxu0 %v2581_v19  ;;  %v11303_v38 = vpack.c.bf16 %v1659_v30, %v1658_v8  ;;  %v1714_v6 = vld [vmem:[%s18584_s1 + $0x33e0] sm:$0xff]  ;;  %v1699_v19 = vld [vmem:[%s18584_s1 + $0x3368] sm:$0xff] }
 0x326   :  { %6308 = vmatmul.mubr.f32.vlgmr.msra.gmra.mrb[48].mxu1 %v16893_v24  ;;  %11298 = vmatprep.subr.bf16.mxu0 %v11297_v11  ;;  %v1691_v24 = vld [vmem:[%s18584_s1 + $0x3328] sm:$0xff]  ;;  %v11315_v11 = vpack.c.bf16 %v1665_v2, %v1664_v1  ;;  %v11351_v39 = vpack.c.bf16 %v1699_v19, %v1698_v61  ;;  %v1721_v1 = vld [vmem:[%s18584_s1 + $0x3418] sm:$0xff]  ;;  %v1752_v2 = vld [vmem:[%s18584_s1 + $0x3510] sm:$0xff] }
 0x327   :  { %11328 = vmatpush3.bf16.msra.mxu1 %v11327_v7  ;;  %6447 = vmatprep.mubr.f32.mxu1 %v2582_v25  ;;  %v11335_v40 = vpack.c.bf16 %v1691_v24, %v1690_v9  ;;  %v1715_v7 = vld [vmem:[%s18584_s1 + $0x33e8] sm:$0xff]  ;;  %v1754_v61 = vld [vmem:[%s18584_s1 + $0x3520] sm:$0xff]  ;;  %v1741_v19 = vld [vmem:[%s18584_s1 + $0x34b8] sm:$0xff] }
 0x328   :  { %11330 = vmatprep.subr.bf16.mxu1 %v11329_v17  ;;  %v1667_v17 = vld [vmem:[%s18584_s1 + $0x3268] sm:$0xff]  ;;  %v11349_v27 = vpack.c.bf16 %v1715_v7, %v1714_v6  ;;  %v1770_v6 = vld [vmem:[%s18584_s1 + $0x35a0] sm:$0xff] }
 0x329   :  { %11300 = vmatpush3.bf16.msra.mxu0 %v11299_v28  ;;  %v11319_v9 = vpack.c.bf16 %v1667_v17, %v1666_v16  ;;  %v1771_v7 = vld [vmem:[%s18584_s1 + $0x35a8] sm:$0xff]  ;;  %v11365_v16 = vpack.c.bf16 %v1739_v12, %v1738_v4  ;;  %v1746_v63 = vld [vmem:[%s18584_s1 + $0x34e0] sm:$0xff] }
 0x32a   :  { %11302 = vmatprep.subr.bf16.mxu0 %v11301_v31  ;;  %v1717_v31 = vld [vmem:[%s18584_s1 + $0x33f8] sm:$0xff]  ;;  %v1723_v17 = vld [vmem:[%s18584_s1 + $0x3428] sm:$0xff] }
 0x32b   :  { %11332 = vmatpush3.bf16.msra.mxu1 %v11331_v29  ;;  %v1716_v29 = vld [vmem:[%s18584_s1 + $0x33f0] sm:$0xff]  ;;  %v1747_v58 = vld [vmem:[%s18584_s1 + $0x34e8] sm:$0xff] }
 0x32c   :  { %11334 = vmatprep.subr.bf16.mxu1 %v11333_v32  ;;  %v48_v32 = vld [vmem:[%s18585_s0 + $0xd0] sm:$0xff] }
 0x32d   :  { %11304 = vmatpush3.bf16.msra.mxu0 %v11303_v38  ;;  %v1700_v38 = vld [vmem:[%s18584_s1 + $0x3370] sm:$0xff]  ;;  %v2583_v46 = vcombine.high %v48_v32, %v48_v32  ;;  %v17304_v52 = vrot.slane %v48_v32, %v11989_v13  ;;  %v1757_v32 = vld [vmem:[%s18584_s1 + $0x3538] sm:$0xff] }
 0x32e   :  { %11306 = vmatprep.subr.bf16.mxu0 %v11305_v41  ;;  %v11353_v41 = vpack.c.bf16 %v1717_v31, %v1716_v29  ;;  %v11355_v47 = vpack.c.bf16 %v1701_v43, %v1700_v38  ;;  %v1724_v31 = vld [vmem:[%s18584_s1 + $0x3430] sm:$0xff]  ;;  %v1727_v43 = vld [vmem:[%s18584_s1 + $0x3448] sm:$0xff] }
 0x32f   :  { %11336 = vmatpush3.bf16.msra.mxu1 %v11335_v40  ;;  %v17313_v10 = vrot.slane %v2583_v46, %v11989_v13  ;;  %v2598_v5 = vcombine.high %v17304_v52, %v17304_v52  ;;  %v1745_v46 = vld [vmem:[%s18584_s1 + $0x34d8] sm:$0xff] }
 0x330   :  { %11338 = vmatprep.subr.bf16.mxu1 %v11337_v23  ;;  %v1766_v23 = vld [vmem:[%s18584_s1 + $0x3580] sm:$0xff] }
 0x331   :  { %11308 = vmatpush3.bf16.msra.mxu0 %v11307_v50  ;;  %v1718_v50 = vld [vmem:[%s18584_s1 + $0x3400] sm:$0xff] }
 0x332   :  { %11310 = vmatprep.subr.bf16.mxu0 %v11309_v55  ;;  %v1750_v55 = vld [vmem:[%s18584_s1 + $0x3500] sm:$0xff] }
 0x333   :  { %11340 = vmatpush3.bf16.msra.mxu1 %v11339_v54  ;;  %v1719_v54 = vld [vmem:[%s18584_s1 + $0x3408] sm:$0xff] }
 0x334   :  { %11342 = vmatprep.subr.bf16.mxu1 %v11341_v45  ;;  %v1737_v45 = vld [vmem:[%s18584_s1 + $0x3498] sm:$0xff]  ;;  %v11359_v59 = vpack.c.bf16 %v1719_v54, %v1718_v50 }
 0x335   :  { %11312 = vmatpush3.bf16.msra.mxu0 %v11311_v60  ;;  %v11391_v60 = vpack.c.bf16 %v1751_v57, %v1750_v55  ;;  %v1728_v55 = vld [vmem:[%s18584_s1 + $0x3450] sm:$0xff] }
 0x336   :  { %11314 = vmatprep.subr.bf16.mxu0 %v11313_v0  ;;  %v1720_v0 = vld [vmem:[%s18584_s1 + $0x3410] sm:$0xff] }
 0x337   :  { %11344 = vmatpush3.bf16.msra.mxu1 %v11343_v62  ;;  %v8693_v18 = vpop.f32.mrb[36].mxu0  ;;  %v11361_v62 = vpack.c.bf16 %v1737_v45, %v1736_v35  ;;  %v1760_v57 = vld [vmem:[%s18584_s1 + $0x3550] sm:$0xff]  ;;  %v1761_v45 = vld [vmem:[%s18584_s1 + $0x3558] sm:$0xff] }
 0x338   :  { %11346 = vmatprep.subr.bf16.mxu1 %v11345_v49  ;;  %v8694_v25 = vpop.f32.mrb[37].mxu0  ;;  %v1753_v49 = vld [vmem:[%s18584_s1 + $0x3518] sm:$0xff] }
 0x339   :  { %v8728_v28 = vpop.f32.mrb[36].mxu1  ;;  %v8695_v8 = vadd.f32 %v8694_v25, %v8693_v18  ;;  %11316 = vmatpush3.bf16.msra.mxu0 %v11315_v11  ;;  %v2599_v11 = vcombine.high %v17313_v10, %v17313_v10  ;;  %v11397_v18 = vpack.c.bf16 %v1771_v7, %v1770_v6  ;;  %v1748_v6 = vld [vmem:[%s18584_s1 + $0x34f0] sm:$0xff]  ;;  %v1749_v7 = vld [vmem:[%s18584_s1 + $0x34f8] sm:$0xff] }
 0x33a   :  { %v8729_v30 = vpop.f32.mrb[37].mxu1  ;;  %11318 = vmatprep.subr.bf16.mxu0 %v11317_v15  ;;  %v11395_v15 = vpack.c.bf16 %v1753_v49, %v1752_v2  ;;  %v1730_v2 = vld [vmem:[%s18584_s1 + $0x3460] sm:$0xff] }
 0x33b   :  { %v8730_v24 = vadd.f32 %v8729_v30, %v8728_v28  ;;  %11348 = vmatpush3.bf16.msra.mxu1 %v11347_v14  ;;  %v5400_v40 = vadd.f32 %v8695_v8, %v17073_v53  ;;  %v1767_v53 = vld [vmem:[%s18584_s1 + $0x3588] sm:$0xff]  ;;  %v11363_v14 = vpack.c.bf16 %v1721_v1, %v1720_v0  ;;  %v1725_v8 = vld [vmem:[%s18584_s1 + $0x3438] sm:$0xff]  ;;  %v1756_v30 = vld [vmem:[%s18584_s1 + $0x3530] sm:$0xff]  ;;  %v11411_v0 = vpack.c.bf16 %v1761_v45, %v1760_v57 }
 0x33c   :  { %11350 = vmatprep.subr.bf16.mxu1 %v11349_v27  ;;  %v11389_v56 = vpack.c.bf16 %v1767_v53, %v1766_v23  ;;  %v1740_v27 = vld [vmem:[%s18584_s1 + $0x34b0] sm:$0xff]  ;;  %v11371_v36 = vpack.c.bf16 %v1725_v8, %v1724_v31  ;;  %v11403_v38 = vpack.c.bf16 %v1757_v32, %v1756_v30  ;;  %v1759_v23 = vld [vmem:[%s18584_s1 + $0x3548] sm:$0xff]  ;;  %v11381_v1 = vpack.c.bf16 %v1747_v58, %v1746_v63  ;;  %v1762_v49 = vld [vmem:[%s18584_s1 + $0x3560] sm:$0xff] }
 0x33d   :  { %v17283_v37 = vadd.f32 %v8730_v24, %v5400_v40  ;;  %11320 = vmatpush3.bf16.msra.mxu0 %v11319_v9  ;;  %v11369_v29 = vpack.c.bf16 %v1741_v19, %v1740_v27  ;;  %v11401_v9 = vpack.c.bf16 %v1773_v22, %v1772_v20  ;;  %v1742_v24 = vld [vmem:[%s18584_s1 + $0x34c0] sm:$0xff]  ;;  %v1744_v53 = vld [vmem:[%s18584_s1 + $0x34d0] sm:$0xff]  ;;  %v11407_v50 = vpack.c.bf16 %v1759_v23, %v1758_v21  ;;  %v1733_v22 = vld [vmem:[%s18584_s1 + $0x3478] sm:$0xff] }
 0x33e   :  { %11322 = vmatprep.subr.bf16.mxu0 %v11321_v42  ;;  %v1774_v42 = vld [vmem:[%s18584_s1 + $0x35c0] sm:$0xff]  ;;  %v11377_v54 = vpack.c.bf16 %v1745_v46, %v1744_v53  ;;  %v11385_v19 = vpack.c.bf16 %v1749_v7, %v1748_v6  ;;  %v1732_v20 = vld [vmem:[%s18584_s1 + $0x3470] sm:$0xff]  ;;  %v1765_v31 = vld [vmem:[%s18584_s1 + $0x3578] sm:$0xff] }
 0x33f   :  { %11352 = vmatpush3.bf16.msra.mxu1 %v11351_v39  ;;  %v1743_v39 = vld [vmem:[%s18584_s1 + $0x34c8] sm:$0xff]  ;;  %v11405_v44 = vpack.c.bf16 %v1775_v34, %v1774_v42  ;;  %v1798_v8 = vld [vmem:[%s18584_s1 + $0x3680] sm:$0xff]  ;;  %v1800_v21 = vld [vmem:[%s18584_s1 + $0x3690] sm:$0xff] }
 0x340   :  { %11354 = vmatprep.subr.bf16.mxu1 %v11353_v41  ;;  %v11373_v40 = vpack.c.bf16 %v1743_v39, %v1742_v24  ;;  %v1726_v41 = vld [vmem:[%s18584_s1 + $0x3440] sm:$0xff]  ;;  %v1799_v30 = vld [vmem:[%s18584_s1 + $0x3688] sm:$0xff]  ;;  %v11387_v39 = vpack.c.bf16 %v1733_v22, %v1732_v20  ;;  %v1832_v53 = vld [vmem:[%s18584_s1 + $0x3790] sm:$0xff] }
 0x341   :  { %11324 = vmatpush3.bf16.msra.mxu0 %v11323_v33  ;;  %v1776_v33 = vld [vmem:[%s18584_s1 + $0x35d0] sm:$0xff]  ;;  %v11421_v34 = vpack.c.bf16 %v1799_v30, %v1798_v8  ;;  %v1833_v46 = vld [vmem:[%s18584_s1 + $0x3798] sm:$0xff]  ;;  %v1802_v45 = vld [vmem:[%s18584_s1 + $0x36a0] sm:$0xff] }
 0x342   :  { %11358 = vmatprep.subr.bf16.mxu0 %v11357_v48  ;;  %v11375_v48 = vpack.c.bf16 %v1727_v43, %v1726_v41  ;;  %v1815_v43 = vld [vmem:[%s18584_s1 + $0x3708] sm:$0xff]  ;;  %v11457_v57 = vpack.c.bf16 %v1833_v46, %v1832_v53  ;;  %v1836_v6 = vld [vmem:[%s18584_s1 + $0x37b0] sm:$0xff]  ;;  %v1837_v7 = vld [vmem:[%s18584_s1 + $0x37b8] sm:$0xff] }
 0x343   :  { %11356 = vmatpush3.bf16.msra.mxu1 %v11355_v47  ;;  %v1777_v47 = vld [vmem:[%s18584_s1 + $0x35d8] sm:$0xff]  ;;  %v1803_v63 = vld [vmem:[%s18584_s1 + $0x36a8] sm:$0xff]  ;;  %v1822_v8 = vld [vmem:[%s18584_s1 + $0x3740] sm:$0xff] }
 0x344   :  { %11390 = vmatprep.subr.bf16.mxu1 %v11389_v56  ;;  %6378 = vmatmul.mubr.f32.vlgmr.msra.gmra.mrb[50].mxu0 %v17094_v51  ;;  %v1722_v51 = vld [vmem:[%s18584_s1 + $0x3420] sm:$0xff]  ;;  %v1729_v56 = vld [vmem:[%s18584_s1 + $0x3458] sm:$0xff]  ;;  %v11409_v35 = vpack.c.bf16 %v1777_v47, %v1776_v33  ;;  %v1839_v20 = vld [vmem:[%s18584_s1 + $0x37c8] sm:$0xff] }
 0x345   :  { %11360 = vmatpush3.bf16.msra.mxu0 %v11359_v59  ;;  %6517 = vmatprep.mubr.f32.mxu0 %v2598_v5  ;;  %v11367_v25 = vpack.c.bf16 %v1723_v17, %v1722_v51  ;;  %v1778_v59 = vld [vmem:[%s18584_s1 + $0x35e0] sm:$0xff]  ;;  %v1763_v5 = vld [vmem:[%s18584_s1 + $0x3568] sm:$0xff] }
 0x346   :  { %6448 = vmatmul.mubr.f32.vlgmr.msra.gmra.mrb[50].mxu1 %v17103_v26  ;;  %11362 = vmatprep.subr.bf16.mxu0 %v11361_v62  ;;  %v1755_v26 = vld [vmem:[%s18584_s1 + $0x3528] sm:$0xff]  ;;  %v11379_v62 = vpack.c.bf16 %v1729_v56, %v1728_v55  ;;  %v11415_v27 = vpack.c.bf16 %v1763_v5, %v1762_v49  ;;  %v1785_v55 = vld [vmem:[%s18584_s1 + $0x3618] sm:$0xff]  ;;  %v1816_v56 = vld [vmem:[%s18584_s1 + $0x3710] sm:$0xff] }
 0x347   :  { %11392 = vmatpush3.bf16.msra.mxu1 %v11391_v60  ;;  %6587 = vmatprep.mubr.f32.mxu1 %v2599_v11  ;;  %v11399_v28 = vpack.c.bf16 %v1755_v26, %v1754_v61  ;;  %v1779_v60 = vld [vmem:[%s18584_s1 + $0x35e8] sm:$0xff]  ;;  %v1818_v49 = vld [vmem:[%s18584_s1 + $0x3720] sm:$0xff]  ;;  %v1805_v5 = vld [vmem:[%s18584_s1 + $0x36b8] sm:$0xff] }
 0x348   :  { %11394 = vmatprep.subr.bf16.mxu1 %v11393_v3  ;;  %v1731_v3 = vld [vmem:[%s18584_s1 + $0x3468] sm:$0xff]  ;;  %v11413_v12 = vpack.c.bf16 %v1779_v60, %v1778_v59  ;;  %v1834_v59 = vld [vmem:[%s18584_s1 + $0x37a0] sm:$0xff] }
 0x349   :  { %11364 = vmatpush3.bf16.msra.mxu0 %v11363_v14  ;;  %v11383_v61 = vpack.c.bf16 %v1731_v3, %v1730_v2  ;;  %v1835_v60 = vld [vmem:[%s18584_s1 + $0x37a8] sm:$0xff]  ;;  %v11429_v2 = vpack.c.bf16 %v1803_v63, %v1802_v45  ;;  %v1810_v53 = vld [vmem:[%s18584_s1 + $0x36e0] sm:$0xff] }
 0x34a   :  { %11366 = vmatprep.subr.bf16.mxu0 %v11365_v16  ;;  %v1781_v16 = vld [vmem:[%s18584_s1 + $0x35f8] sm:$0xff]  ;;  %v1787_v3 = vld [vmem:[%s18584_s1 + $0x3628] sm:$0xff] }
 0x34b   :  { %11396 = vmatpush3.bf16.msra.mxu1 %v11395_v15  ;;  %v1780_v15 = vld [vmem:[%s18584_s1 + $0x35f0] sm:$0xff]  ;;  %v1811_v46 = vld [vmem:[%s18584_s1 + $0x36e8] sm:$0xff] }
 0x34c   :  { %11398 = vmatprep.subr.bf16.mxu1 %v11397_v18  ;;  %v49_v18 = vld [vmem:[%s18585_s0 + $0xd8] sm:$0xff] }
 0x34d   :  { %11368 = vmatpush3.bf16.msra.mxu0 %v11367_v25  ;;  %v1764_v25 = vld [vmem:[%s18584_s1 + $0x3570] sm:$0xff]  ;;  %v2600_v32 = vcombine.high %v49_v18, %v49_v18  ;;  %v17514_v23 = vrot.slane %v49_v18, %v11989_v13  ;;  %v1821_v18 = vld [vmem:[%s18584_s1 + $0x3738] sm:$0xff] }
 0x34e   :  { %11370 = vmatprep.subr.bf16.mxu0 %v11369_v29  ;;  %v11417_v29 = vpack.c.bf16 %v1781_v16, %v1780_v15  ;;  %v11419_v42 = vpack.c.bf16 %v1765_v31, %v1764_v25  ;;  %v1788_v16 = vld [vmem:[%s18584_s1 + $0x3630] sm:$0xff]  ;;  %v1791_v31 = vld [vmem:[%s18584_s1 + $0x3648] sm:$0xff] }
 0x34f   :  { %11400 = vmatpush3.bf16.msra.mxu1 %v11399_v28  ;;  %v17523_v33 = vrot.slane %v2600_v32, %v11989_v13  ;;  %v2615_v58 = vcombine.high %v17514_v23, %v17514_v23  ;;  %v1809_v32 = vld [vmem:[%s18584_s1 + $0x36d8] sm:$0xff] }
 0x350   :  { %11402 = vmatprep.subr.bf16.mxu1 %v11401_v9  ;;  %v1830_v9 = vld [vmem:[%s18584_s1 + $0x3780] sm:$0xff] }
 0x351   :  { %11372 = vmatpush3.bf16.msra.mxu0 %v11371_v36  ;;  %v1782_v36 = vld [vmem:[%s18584_s1 + $0x3600] sm:$0xff] }
 0x352   :  { %11374 = vmatprep.subr.bf16.mxu0 %v11373_v40  ;;  %v1814_v40 = vld [vmem:[%s18584_s1 + $0x3700] sm:$0xff] }
 0x353   :  { %11404 = vmatpush3.bf16.msra.mxu1 %v11403_v38  ;;  %v1783_v38 = vld [vmem:[%s18584_s1 + $0x3608] sm:$0xff] }
 0x354   :  { %11406 = vmatprep.subr.bf16.mxu1 %v11405_v44  ;;  %v1801_v44 = vld [vmem:[%s18584_s1 + $0x3698] sm:$0xff]  ;;  %v11423_v47 = vpack.c.bf16 %v1783_v38, %v1782_v36 }
 0x355   :  { %11376 = vmatpush3.bf16.msra.mxu0 %v11375_v48  ;;  %v11455_v48 = vpack.c.bf16 %v1815_v43, %v1814_v40  ;;  %v1792_v40 = vld [vmem:[%s18584_s1 + $0x3650] sm:$0xff] }
 0x356   :  { %11378 = vmatprep.subr.bf16.mxu0 %v11377_v54  ;;  %v1784_v54 = vld [vmem:[%s18584_s1 + $0x3610] sm:$0xff] }
 0x357   :  { %11408 = vmatpush3.bf16.msra.mxu1 %v11407_v50  ;;  %v8763_v4 = vpop.f32.mrb[38].mxu0  ;;  %v11425_v50 = vpack.c.bf16 %v1801_v44, %v1800_v21  ;;  %v1824_v43 = vld [vmem:[%s18584_s1 + $0x3750] sm:$0xff]  ;;  %v1825_v44 = vld [vmem:[%s18584_s1 + $0x3758] sm:$0xff] }
 0x358   :  { %11410 = vmatprep.subr.bf16.mxu1 %v11409_v35  ;;  %v8764_v11 = vpop.f32.mrb[39].mxu0  ;;  %v1817_v35 = vld [vmem:[%s18584_s1 + $0x3718] sm:$0xff] }
 0x359   :  { %v8798_v14 = vpop.f32.mrb[38].mxu1  ;;  %v8765_v51 = vadd.f32 %v8764_v11, %v8763_v4  ;;  %11380 = vmatpush3.bf16.msra.mxu0 %v11379_v62  ;;  %v2616_v62 = vcombine.high %v17523_v33, %v17523_v33  ;;  %v11461_v4 = vpack.c.bf16 %v1835_v60, %v1834_v59  ;;  %v1812_v59 = vld [vmem:[%s18584_s1 + $0x36f0] sm:$0xff]  ;;  %v1813_v60 = vld [vmem:[%s18584_s1 + $0x36f8] sm:$0xff] }
 0x35a   :  { %v8799_v17 = vpop.f32.mrb[39].mxu1  ;;  %11382 = vmatprep.subr.bf16.mxu0 %v11381_v1  ;;  %v11459_v1 = vpack.c.bf16 %v1817_v35, %v1816_v56  ;;  %v1794_v56 = vld [vmem:[%s18584_s1 + $0x3660] sm:$0xff] }
 0x35b   :  { %v8800_v26 = vadd.f32 %v8799_v17, %v8798_v14  ;;  %11412 = vmatpush3.bf16.msra.mxu1 %v11411_v0  ;;  %v5540_v28 = vadd.f32 %v8765_v51, %v17283_v37  ;;  %v1831_v37 = vld [vmem:[%s18584_s1 + $0x3788] sm:$0xff]  ;;  %v11427_v0 = vpack.c.bf16 %v1785_v55, %v1784_v54  ;;  %v1789_v51 = vld [vmem:[%s18584_s1 + $0x3638] sm:$0xff]  ;;  %v1820_v17 = vld [vmem:[%s18584_s1 + $0x3730] sm:$0xff]  ;;  %v11475_v54 = vpack.c.bf16 %v1825_v44, %v1824_v43 }
 0x35c   :  { %11414 = vmatprep.subr.bf16.mxu1 %v11413_v12  ;;  %v11453_v41 = vpack.c.bf16 %v1831_v37, %v1830_v9  ;;  %v1804_v12 = vld [vmem:[%s18584_s1 + $0x36b0] sm:$0xff]  ;;  %v11435_v22 = vpack.c.bf16 %v1789_v51, %v1788_v16  ;;  %v11467_v25 = vpack.c.bf16 %v1821_v18, %v1820_v17  ;;  %v1823_v9 = vld [vmem:[%s18584_s1 + $0x3748] sm:$0xff]  ;;  %v11445_v55 = vpack.c.bf16 %v1811_v46, %v1810_v53  ;;  %v1826_v35 = vld [vmem:[%s18584_s1 + $0x3760] sm:$0xff] }
 0x35d   :  { %v17493_v24 = vadd.f32 %v8800_v26, %v5540_v28  ;;  %11384 = vmatpush3.bf16.msra.mxu0 %v11383_v61  ;;  %v11433_v15 = vpack.c.bf16 %v1805_v5, %v1804_v12  ;;  %v11465_v61 = vpack.c.bf16 %v1837_v7, %v1836_v6  ;;  %v1806_v26 = vld [vmem:[%s18584_s1 + $0x36c0] sm:$0xff]  ;;  %v1808_v37 = vld [vmem:[%s18584_s1 + $0x36d0] sm:$0xff]  ;;  %v11471_v36 = vpack.c.bf16 %v1823_v9, %v1822_v8  ;;  %v1797_v7 = vld [vmem:[%s18584_s1 + $0x3678] sm:$0xff] }
 0x35e   :  { %11386 = vmatprep.subr.bf16.mxu0 %v11385_v19  ;;  %v1838_v19 = vld [vmem:[%s18584_s1 + $0x37c0] sm:$0xff]  ;;  %v11441_v38 = vpack.c.bf16 %v1809_v32, %v1808_v37  ;;  %v11449_v5 = vpack.c.bf16 %v1813_v60, %v1812_v59  ;;  %v1796_v6 = vld [vmem:[%s18584_s1 + $0x3670] sm:$0xff]  ;;  %v1829_v16 = vld [vmem:[%s18584_s1 + $0x3778] sm:$0xff] }
 0x35f   :  { %11416 = vmatpush3.bf16.msra.mxu1 %v11415_v27  ;;  %v1807_v27 = vld [vmem:[%s18584_s1 + $0x36c8] sm:$0xff]  ;;  %v11469_v30 = vpack.c.bf16 %v1839_v20, %v1838_v19  ;;  %v1862_v51 = vld [vmem:[%s18584_s1 + $0x3880] sm:$0xff]  ;;  %v1864_v8 = vld [vmem:[%s18584_s1 + $0x3890] sm:$0xff] }
 0x360   :  { %11418 = vmatprep.subr.bf16.mxu1 %v11417_v29  ;;  %v11437_v28 = vpack.c.bf16 %v1807_v27, %v1806_v26  ;;  %v1790_v29 = vld [vmem:[%s18584_s1 + $0x3640] sm:$0xff]  ;;  %v1863_v17 = vld [vmem:[%s18584_s1 + $0x3888] sm:$0xff]  ;;  %v11451_v27 = vpack.c.bf16 %v1797_v7, %v1796_v6  ;;  %v1896_v37 = vld [vmem:[%s18584_s1 + $0x3990] sm:$0xff] }
 0x361   :  { %11388 = vmatpush3.bf16.msra.mxu0 %v11387_v39  ;;  %v1840_v39 = vld [vmem:[%s18584_s1 + $0x37d0] sm:$0xff]  ;;  %v11485_v20 = vpack.c.bf16 %v1863_v17, %v1862_v51  ;;  %v1897_v32 = vld [vmem:[%s18584_s1 + $0x3998] sm:$0xff]  ;;  %v1866_v44 = vld [vmem:[%s18584_s1 + $0x38a0] sm:$0xff] }
 0x362   :  { %11422 = vmatprep.subr.bf16.mxu0 %v11421_v34  ;;  %v11439_v34 = vpack.c.bf16 %v1791_v31, %v1790_v29  ;;  %v1879_v31 = vld [vmem:[%s18584_s1 + $0x3908] sm:$0xff]  ;;  %v11521_v43 = vpack.c.bf16 %v1897_v32, %v1896_v37  ;;  %v1900_v59 = vld [vmem:[%s18584_s1 + $0x39b0] sm:$0xff]  ;;  %v1901_v60 = vld [vmem:[%s18584_s1 + $0x39b8] sm:$0xff] }
 0x363   :  { %11420 = vmatpush3.bf16.msra.mxu1 %v11419_v42  ;;  %v1841_v42 = vld [vmem:[%s18584_s1 + $0x37d8] sm:$0xff]  ;;  %v1867_v53 = vld [vmem:[%s18584_s1 + $0x38a8] sm:$0xff]  ;;  %v1886_v51 = vld [vmem:[%s18584_s1 + $0x3940] sm:$0xff] }
 0x364   :  { %11454 = vmatprep.subr.bf16.mxu1 %v11453_v41  ;;  %6518 = vmatmul.mubr.f32.vlgmr.msra.gmra.mrb[52].mxu0 %v17304_v52  ;;  %v1786_v52 = vld [vmem:[%s18584_s1 + $0x3620] sm:$0xff]  ;;  %v1793_v41 = vld [vmem:[%s18584_s1 + $0x3658] sm:$0xff]  ;;  %v11473_v21 = vpack.c.bf16 %v1841_v42, %v1840_v39  ;;  %v1903_v6 = vld [vmem:[%s18584_s1 + $0x39c8] sm:$0xff] }
 0x365   :  { %11424 = vmatpush3.bf16.msra.mxu0 %v11423_v47  ;;  %6657 = vmatprep.mubr.f32.mxu0 %v2615_v58  ;;  %v11431_v11 = vpack.c.bf16 %v1787_v3, %v1786_v52  ;;  %v1842_v47 = vld [vmem:[%s18584_s1 + $0x37e0] sm:$0xff]  ;;  %v1827_v58 = vld [vmem:[%s18584_s1 + $0x3768] sm:$0xff] }
 0x366   :  { %6588 = vmatmul.mubr.f32.vlgmr.msra.gmra.mrb[52].mxu1 %v17313_v10  ;;  %11426 = vmatprep.subr.bf16.mxu0 %v11425_v50  ;;  %v1819_v10 = vld [vmem:[%s18584_s1 + $0x3728] sm:$0xff]  ;;  %v11443_v50 = vpack.c.bf16 %v1793_v41, %v1792_v40  ;;  %v11479_v12 = vpack.c.bf16 %v1827_v58, %v1826_v35  ;;  %v1849_v40 = vld [vmem:[%s18584_s1 + $0x3818] sm:$0xff]  ;;  %v1880_v41 = vld [vmem:[%s18584_s1 + $0x3910] sm:$0xff] }
 0x367   :  { %11456 = vmatpush3.bf16.msra.mxu1 %v11455_v48  ;;  %6727 = vmatprep.mubr.f32.mxu1 %v2616_v62  ;;  %v11463_v14 = vpack.c.bf16 %v1819_v10, %v1818_v49  ;;  %v1843_v48 = vld [vmem:[%s18584_s1 + $0x37e8] sm:$0xff]  ;;  %v1882_v35 = vld [vmem:[%s18584_s1 + $0x3920] sm:$0xff]  ;;  %v1869_v58 = vld [vmem:[%s18584_s1 + $0x38b8] sm:$0xff] }
 0x368   :  { %11458 = vmatprep.subr.bf16.mxu1 %v11457_v57  ;;  %v1795_v57 = vld [vmem:[%s18584_s1 + $0x3668] sm:$0xff]  ;;  %v11477_v63 = vpack.c.bf16 %v1843_v48, %v1842_v47  ;;  %v1898_v47 = vld [vmem:[%s18584_s1 + $0x39a0] sm:$0xff] }
 0x369   :  { %11428 = vmatpush3.bf16.msra.mxu0 %v11427_v0  ;;  %v11447_v49 = vpack.c.bf16 %v1795_v57, %v1794_v56  ;;  %v1899_v48 = vld [vmem:[%s18584_s1 + $0x39a8] sm:$0xff]  ;;  %v11493_v56 = vpack.c.bf16 %v1867_v53, %v1866_v44  ;;  %v1874_v37 = vld [vmem:[%s18584_s1 + $0x38e0] sm:$0xff] }
 0x36a   :  { %11430 = vmatprep.subr.bf16.mxu0 %v11429_v2  ;;  %v1845_v2 = vld [vmem:[%s18584_s1 + $0x37f8] sm:$0xff]  ;;  %v1851_v57 = vld [vmem:[%s18584_s1 + $0x3828] sm:$0xff] }
 0x36b   :  { %11460 = vmatpush3.bf16.msra.mxu1 %v11459_v1  ;;  %v1844_v1 = vld [vmem:[%s18584_s1 + $0x37f0] sm:$0xff]  ;;  %v1875_v32 = vld [vmem:[%s18584_s1 + $0x38e8] sm:$0xff] }
 0x36c   :  { %11462 = vmatprep.subr.bf16.mxu1 %v11461_v4  ;;  %v50_v4 = vld [vmem:[%s18585_s0 + $0xe0] sm:$0xff] }
 0x36d   :  { %11432 = vmatpush3.bf16.msra.mxu0 %v11431_v11  ;;  %v1828_v11 = vld [vmem:[%s18584_s1 + $0x3770] sm:$0xff]  ;;  %v2617_v18 = vcombine.high %v50_v4, %v50_v4  ;;  %v17724_v9 = vrot.slane %v50_v4, %v11989_v13  ;;  %v1885_v4 = vld [vmem:[%s18584_s1 + $0x3938] sm:$0xff] }
 0x36e   :  { %11434 = vmatprep.subr.bf16.mxu0 %v11433_v15  ;;  %v11481_v15 = vpack.c.bf16 %v1845_v2, %v1844_v1  ;;  %v11483_v19 = vpack.c.bf16 %v1829_v16, %v1828_v11  ;;  %v1852_v2 = vld [vmem:[%s18584_s1 + $0x3830] sm:$0xff]  ;;  %v1855_v16 = vld [vmem:[%s18584_s1 + $0x3848] sm:$0xff] }
 0x36f   :  { %11464 = vmatpush3.bf16.msra.mxu1 %v11463_v14  ;;  %v17733_v39 = vrot.slane %v2617_v18, %v11989_v13  ;;  %v2632_v46 = vcombine.high %v17724_v9, %v17724_v9  ;;  %v1873_v18 = vld [vmem:[%s18584_s1 + $0x38d8] sm:$0xff] }
 0x370   :  { %11466 = vmatprep.subr.bf16.mxu1 %v11465_v61  ;;  %v1894_v61 = vld [vmem:[%s18584_s1 + $0x3980] sm:$0xff] }
 0x371   :  { %11436 = vmatpush3.bf16.msra.mxu0 %v11435_v22  ;;  %v1846_v22 = vld [vmem:[%s18584_s1 + $0x3800] sm:$0xff] }
 0x372   :  { %11438 = vmatprep.subr.bf16.mxu0 %v11437_v28  ;;  %v1878_v28 = vld [vmem:[%s18584_s1 + $0x3900] sm:$0xff] }
 0x373   :  { %11468 = vmatpush3.bf16.msra.mxu1 %v11467_v25  ;;  %v1847_v25 = vld [vmem:[%s18584_s1 + $0x3808] sm:$0xff] }
 0x374   :  { %11470 = vmatprep.subr.bf16.mxu1 %v11469_v30  ;;  %v1865_v30 = vld [vmem:[%s18584_s1 + $0x3898] sm:$0xff]  ;;  %v11487_v42 = vpack.c.bf16 %v1847_v25, %v1846_v22 }
 0x375   :  { %11440 = vmatpush3.bf16.msra.mxu0 %v11439_v34  ;;  %v11519_v34 = vpack.c.bf16 %v1879_v31, %v1878_v28  ;;  %v1856_v28 = vld [vmem:[%s18584_s1 + $0x3850] sm:$0xff] }
 0x376   :  { %11442 = vmatprep.subr.bf16.mxu0 %v11441_v38  ;;  %v1848_v38 = vld [vmem:[%s18584_s1 + $0x3810] sm:$0xff] }
 0x377   :  { %11472 = vmatpush3.bf16.msra.mxu1 %v11471_v36  ;;  %v8833_v45 = vpop.f32.mrb[40].mxu0  ;;  %v11489_v36 = vpack.c.bf16 %v1865_v30, %v1864_v8  ;;  %v1888_v31 = vld [vmem:[%s18584_s1 + $0x3950] sm:$0xff]  ;;  %v1889_v30 = vld [vmem:[%s18584_s1 + $0x3958] sm:$0xff] }
 0x378   :  { %11474 = vmatprep.subr.bf16.mxu1 %v11473_v21  ;;  %v8834_v62 = vpop.f32.mrb[41].mxu0  ;;  %v1881_v21 = vld [vmem:[%s18584_s1 + $0x3918] sm:$0xff] }
 0x379   :  { %v8868_v0 = vpop.f32.mrb[40].mxu1  ;;  %v8835_v52 = vadd.f32 %v8834_v62, %v8833_v45  ;;  %11444 = vmatpush3.bf16.msra.mxu0 %v11443_v50  ;;  %v2633_v50 = vcombine.high %v17733_v39, %v17733_v39  ;;  %v11525_v45 = vpack.c.bf16 %v1899_v48, %v1898_v47  ;;  %v1876_v47 = vld [vmem:[%s18584_s1 + $0x38f0] sm:$0xff]  ;;  %v1877_v48 = vld [vmem:[%s18584_s1 + $0x38f8] sm:$0xff] }
 0x37a   :  { %v8869_v3 = vpop.f32.mrb[41].mxu1  ;;  %11446 = vmatprep.subr.bf16.mxu0 %v11445_v55  ;;  %v11523_v55 = vpack.c.bf16 %v1881_v21, %v1880_v41  ;;  %v1858_v41 = vld [vmem:[%s18584_s1 + $0x3860] sm:$0xff] }
 0x37b   :  { %v8870_v10 = vadd.f32 %v8869_v3, %v8868_v0  ;;  %11476 = vmatpush3.bf16.msra.mxu1 %v11475_v54  ;;  %v5680_v14 = vadd.f32 %v8835_v52, %v17493_v24  ;;  %v1895_v24 = vld [vmem:[%s18584_s1 + $0x3988] sm:$0xff]  ;;  %v11491_v54 = vpack.c.bf16 %v1849_v40, %v1848_v38  ;;  %v1853_v52 = vld [vmem:[%s18584_s1 + $0x3838] sm:$0xff]  ;;  %v1884_v3 = vld [vmem:[%s18584_s1 + $0x3930] sm:$0xff]  ;;  %v11539_v38 = vpack.c.bf16 %v1889_v30, %v1888_v31 }
 0x37c   :  { %11478 = vmatprep.subr.bf16.mxu1 %v11477_v63  ;;  %v11517_v29 = vpack.c.bf16 %v1895_v24, %v1894_v61  ;;  %v1868_v63 = vld [vmem:[%s18584_s1 + $0x38b0] sm:$0xff]  ;;  %v11499_v7 = vpack.c.bf16 %v1853_v52, %v1852_v2  ;;  %v11531_v11 = vpack.c.bf16 %v1885_v4, %v1884_v3  ;;  %v1887_v61 = vld [vmem:[%s18584_s1 + $0x3948] sm:$0xff]  ;;  %v11509_v40 = vpack.c.bf16 %v1875_v32, %v1874_v37  ;;  %v1890_v21 = vld [vmem:[%s18584_s1 + $0x3960] sm:$0xff] }
 0x37d   :  { %v17703_v26 = vadd.f32 %v8870_v10, %v5680_v14  ;;  %11448 = vmatpush3.bf16.msra.mxu0 %v11447_v49  ;;  %v11497_v1 = vpack.c.bf16 %v1869_v58, %v1868_v63  ;;  %v11529_v49 = vpack.c.bf16 %v1901_v60, %v1900_v59  ;;  %v1870_v10 = vld [vmem:[%s18584_s1 + $0x38c0] sm:$0xff]  ;;  %v1872_v24 = vld [vmem:[%s18584_s1 + $0x38d0] sm:$0xff]  ;;  %v11535_v22 = vpack.c.bf16 %v1887_v61, %v1886_v51  ;;  %v1861_v60 = vld [vmem:[%s18584_s1 + $0x3878] sm:$0xff] }
 0x37e   :  { %11450 = vmatprep.subr.bf16.mxu0 %v11449_v5  ;;  %v1902_v5 = vld [vmem:[%s18584_s1 + $0x39c0] sm:$0xff]  ;;  %v11505_v25 = vpack.c.bf16 %v1873_v18, %v1872_v24  ;;  %v11513_v58 = vpack.c.bf16 %v1877_v48, %v1876_v47  ;;  %v1860_v59 = vld [vmem:[%s18584_s1 + $0x3870] sm:$0xff]  ;;  %v1893_v2 = vld [vmem:[%s18584_s1 + $0x3978] sm:$0xff] }
 0x37f   :  { %11480 = vmatpush3.bf16.msra.mxu1 %v11479_v12  ;;  %v1871_v12 = vld [vmem:[%s18584_s1 + $0x38c8] sm:$0xff]  ;;  %v11533_v17 = vpack.c.bf16 %v1903_v6, %v1902_v5  ;;  %v1926_v52 = vld [vmem:[%s18584_s1 + $0x3a80] sm:$0xff]  ;;  %v1928_v51 = vld [vmem:[%s18584_s1 + $0x3a90] sm:$0xff] }
 0x380   :  { %11482 = vmatprep.subr.bf16.mxu1 %v11481_v15  ;;  %v11501_v14 = vpack.c.bf16 %v1871_v12, %v1870_v10  ;;  %v1854_v15 = vld [vmem:[%s18584_s1 + $0x3840] sm:$0xff]  ;;  %v1927_v3 = vld [vmem:[%s18584_s1 + $0x3a88] sm:$0xff]  ;;  %v11515_v12 = vpack.c.bf16 %v1861_v60, %v1860_v59  ;;  %v1960_v24 = vld [vmem:[%s18584_s1 + $0x3b90] sm:$0xff] }
 0x381   :  { %11452 = vmatpush3.bf16.msra.mxu0 %v11451_v27  ;;  %v1904_v27 = vld [vmem:[%s18584_s1 + $0x39d0] sm:$0xff]  ;;  %v11549_v6 = vpack.c.bf16 %v1927_v3, %v1926_v52  ;;  %v1961_v18 = vld [vmem:[%s18584_s1 + $0x3b98] sm:$0xff]  ;;  %v1930_v30 = vld [vmem:[%s18584_s1 + $0x3aa0] sm:$0xff] }
 0x382   :  { %11486 = vmatprep.subr.bf16.mxu0 %v11485_v20  ;;  %v11503_v20 = vpack.c.bf16 %v1855_v16, %v1854_v15  ;;  %v1943_v16 = vld [vmem:[%s18584_s1 + $0x3b08] sm:$0xff]  ;;  %v11585_v31 = vpack.c.bf16 %v1961_v18, %v1960_v24  ;;  %v1964_v47 = vld [vmem:[%s18584_s1 + $0x3bb0] sm:$0xff]  ;;  %v1965_v48 = vld [vmem:[%s18584_s1 + $0x3bb8] sm:$0xff] }
 0x383   :  { %11484 = vmatpush3.bf16.msra.mxu1 %v11483_v19  ;;  %v1905_v19 = vld [vmem:[%s18584_s1 + $0x39d8] sm:$0xff]  ;;  %v1931_v37 = vld [vmem:[%s18584_s1 + $0x3aa8] sm:$0xff]  ;;  %v1950_v52 = vld [vmem:[%s18584_s1 + $0x3b40] sm:$0xff] }
 0x384   :  { %11518 = vmatprep.subr.bf16.mxu1 %v11517_v29  ;;  %6658 = vmatmul.mubr.f32.vlgmr.msra.gmra.mrb[54].mxu0 %v17514_v23  ;;  %v1850_v23 = vld [vmem:[%s18584_s1 + $0x3820] sm:$0xff]  ;;  %v1857_v29 = vld [vmem:[%s18584_s1 + $0x3858] sm:$0xff]  ;;  %v11537_v8 = vpack.c.bf16 %v1905_v19, %v1904_v27  ;;  %v1967_v59 = vld [vmem:[%s18584_s1 + $0x3bc8] sm:$0xff] }
 0x385   :  { %11488 = vmatpush3.bf16.msra.mxu0 %v11487_v42  ;;  %6797 = vmatprep.mubr.f32.mxu0 %v2632_v46  ;;  %v11495_v62 = vpack.c.bf16 %v1851_v57, %v1850_v23  ;;  %v1906_v42 = vld [vmem:[%s18584_s1 + $0x39e0] sm:$0xff]  ;;  %v1891_v46 = vld [vmem:[%s18584_s1 + $0x3968] sm:$0xff] }
 0x386   :  { %6728 = vmatmul.mubr.f32.vlgmr.msra.gmra.mrb[54].mxu1 %v17523_v33  ;;  %11490 = vmatprep.subr.bf16.mxu0 %v11489_v36  ;;  %v1883_v33 = vld [vmem:[%s18584_s1 + $0x3928] sm:$0xff]  ;;  %v11507_v36 = vpack.c.bf16 %v1857_v29, %v1856_v28  ;;  %v11543_v63 = vpack.c.bf16 %v1891_v46, %v1890_v21  ;;  %v1913_v28 = vld [vmem:[%s18584_s1 + $0x3a18] sm:$0xff]  ;;  %v1944_v29 = vld [vmem:[%s18584_s1 + $0x3b10] sm:$0xff] }
 0x387   :  { %11520 = vmatpush3.bf16.msra.mxu1 %v11519_v34  ;;  %6867 = vmatprep.mubr.f32.mxu1 %v2633_v50  ;;  %v11527_v0 = vpack.c.bf16 %v1883_v33, %v1882_v35  ;;  %v1907_v34 = vld [vmem:[%s18584_s1 + $0x39e8] sm:$0xff]  ;;  %v1946_v21 = vld [vmem:[%s18584_s1 + $0x3b20] sm:$0xff]  ;;  %v1933_v46 = vld [vmem:[%s18584_s1 + $0x3ab8] sm:$0xff] }
 0x388   :  { %11522 = vmatprep.subr.bf16.mxu1 %v11521_v43  ;;  %v1859_v43 = vld [vmem:[%s18584_s1 + $0x3868] sm:$0xff]  ;;  %v11541_v53 = vpack.c.bf16 %v1907_v34, %v1906_v42  ;;  %v1962_v42 = vld [vmem:[%s18584_s1 + $0x3ba0] sm:$0xff] }
 0x389   :  { %11492 = vmatpush3.bf16.msra.mxu0 %v11491_v54  ;;  %v11511_v35 = vpack.c.bf16 %v1859_v43, %v1858_v41  ;;  %v1963_v34 = vld [vmem:[%s18584_s1 + $0x3ba8] sm:$0xff]  ;;  %v11557_v41 = vpack.c.bf16 %v1931_v37, %v1930_v30  ;;  %v1938_v24 = vld [vmem:[%s18584_s1 + $0x3ae0] sm:$0xff] }
 0x38a   :  { %11494 = vmatprep.subr.bf16.mxu0 %v11493_v56  ;;  %v1909_v56 = vld [vmem:[%s18584_s1 + $0x39f8] sm:$0xff]  ;;  %v1915_v43 = vld [vmem:[%s18584_s1 + $0x3a28] sm:$0xff] }
 0x38b   :  { %11524 = vmatpush3.bf16.msra.mxu1 %v11523_v55  ;;  %v1908_v55 = vld [vmem:[%s18584_s1 + $0x39f0] sm:$0xff]  ;;  %v1939_v18 = vld [vmem:[%s18584_s1 + $0x3ae8] sm:$0xff] }
 0x38c   :  { %11526 = vmatprep.subr.bf16.mxu1 %v11525_v45  ;;  %v51_v45 = vld [vmem:[%s18585_s0 + $0xe8] sm:$0xff] }
 0x38d   :  { %11496 = vmatpush3.bf16.msra.mxu0 %v11495_v62  ;;  %v1892_v62 = vld [vmem:[%s18584_s1 + $0x3970] sm:$0xff]  ;;  %v2634_v4 = vcombine.high %v51_v45, %v51_v45  ;;  %v17934_v61 = vrot.slane %v51_v45, %v11989_v13  ;;  %v1949_v45 = vld [vmem:[%s18584_s1 + $0x3b38] sm:$0xff] }
 0x38e   :  { %11498 = vmatprep.subr.bf16.mxu0 %v11497_v1  ;;  %v11545_v1 = vpack.c.bf16 %v1909_v56, %v1908_v55  ;;  %v11547_v5 = vpack.c.bf16 %v1893_v2, %v1892_v62  ;;  %v1916_v56 = vld [vmem:[%s18584_s1 + $0x3a30] sm:$0xff]  ;;  %v1919_v2 = vld [vmem:[%s18584_s1 + $0x3a48] sm:$0xff] }
 0x38f   :  { %11528 = vmatpush3.bf16.msra.mxu1 %v11527_v0  ;;  %v17943_v27 = vrot.slane %v2634_v4, %v11989_v13  ;;  %v2649_v32 = vcombine.high %v17934_v61, %v17934_v61  ;;  %v1937_v4 = vld [vmem:[%s18584_s1 + $0x3ad8] sm:$0xff] }
 0x390   :  { %11530 = vmatprep.subr.bf16.mxu1 %v11529_v49  ;;  %v1958_v49 = vld [vmem:[%s18584_s1 + $0x3b80] sm:$0xff] }
 0x391   :  { %11500 = vmatpush3.bf16.msra.mxu0 %v11499_v7  ;;  %v1910_v7 = vld [vmem:[%s18584_s1 + $0x3a00] sm:$0xff] }
 0x392   :  { %11502 = vmatprep.subr.bf16.mxu0 %v11501_v14  ;;  %v1942_v14 = vld [vmem:[%s18584_s1 + $0x3b00] sm:$0xff] }
 0x393   :  { %11532 = vmatpush3.bf16.msra.mxu1 %v11531_v11  ;;  %v1911_v11 = vld [vmem:[%s18584_s1 + $0x3a08] sm:$0xff] }
 0x394   :  { %11534 = vmatprep.subr.bf16.mxu1 %v11533_v17  ;;  %v1929_v17 = vld [vmem:[%s18584_s1 + $0x3a98] sm:$0xff]  ;;  %v11551_v19 = vpack.c.bf16 %v1911_v11, %v1910_v7 }
 0x395   :  { %11504 = vmatpush3.bf16.msra.mxu0 %v11503_v20  ;;  %v11583_v20 = vpack.c.bf16 %v1943_v16, %v1942_v14  ;;  %v1920_v14 = vld [vmem:[%s18584_s1 + $0x3a50] sm:$0xff] }
 0x396   :  { %11506 = vmatprep.subr.bf16.mxu0 %v11505_v25  ;;  %v1912_v25 = vld [vmem:[%s18584_s1 + $0x3a10] sm:$0xff] }
 0x397   :  { %11536 = vmatpush3.bf16.msra.mxu1 %v11535_v22  ;;  %v8903_v44 = vpop.f32.mrb[42].mxu0  ;;  %v11553_v22 = vpack.c.bf16 %v1929_v17, %v1928_v51  ;;  %v1952_v16 = vld [vmem:[%s18584_s1 + $0x3b50] sm:$0xff]  ;;  %v1953_v17 = vld [vmem:[%s18584_s1 + $0x3b58] sm:$0xff] }
 0x398   :  { %11538 = vmatprep.subr.bf16.mxu1 %v11537_v8  ;;  %v8904_v50 = vpop.f32.mrb[43].mxu0  ;;  %v1945_v8 = vld [vmem:[%s18584_s1 + $0x3b18] sm:$0xff] }
 0x399   :  { %v8938_v54 = vpop.f32.mrb[42].mxu1  ;;  %v8905_v23 = vadd.f32 %v8904_v50, %v8903_v44  ;;  %11508 = vmatpush3.bf16.msra.mxu0 %v11507_v36  ;;  %v2650_v36 = vcombine.high %v17943_v27, %v17943_v27  ;;  %v11589_v44 = vpack.c.bf16 %v1963_v34, %v1962_v42  ;;  %v1940_v42 = vld [vmem:[%s18584_s1 + $0x3af0] sm:$0xff]  ;;  %v1941_v34 = vld [vmem:[%s18584_s1 + $0x3af8] sm:$0xff] }
 0x39a   :  { %v8939_v57 = vpop.f32.mrb[43].mxu1  ;;  %11510 = vmatprep.subr.bf16.mxu0 %v11509_v40  ;;  %v11587_v40 = vpack.c.bf16 %v1945_v8, %v1944_v29  ;;  %v1922_v29 = vld [vmem:[%s18584_s1 + $0x3a60] sm:$0xff] }
 0x39b   :  { %v8940_v33 = vadd.f32 %v8939_v57, %v8938_v54  ;;  %11540 = vmatpush3.bf16.msra.mxu1 %v11539_v38  ;;  %v5820_v0 = vadd.f32 %v8905_v23, %v17703_v26  ;;  %v1959_v26 = vld [vmem:[%s18584_s1 + $0x3b88] sm:$0xff]  ;;  %v11555_v38 = vpack.c.bf16 %v1913_v28, %v1912_v25  ;;  %v1917_v23 = vld [vmem:[%s18584_s1 + $0x3a38] sm:$0xff]  ;;  %v1948_v57 = vld [vmem:[%s18584_s1 + $0x3b30] sm:$0xff]  ;;  %v11603_v25 = vpack.c.bf16 %v1953_v17, %v1952_v16 }
 0x39c   :  { %11542 = vmatprep.subr.bf16.mxu1 %v11541_v53  ;;  %v11581_v15 = vpack.c.bf16 %v1959_v26, %v1958_v49  ;;  %v1932_v53 = vld [vmem:[%s18584_s1 + $0x3ab0] sm:$0xff]  ;;  %v11563_v60 = vpack.c.bf16 %v1917_v23, %v1916_v56  ;;  %v11595_v62 = vpack.c.bf16 %v1949_v45, %v1948_v57  ;;  %v1951_v49 = vld [vmem:[%s18584_s1 + $0x3b48] sm:$0xff]  ;;  %v11573_v28 = vpack.c.bf16 %v1939_v18, %v1938_v24  ;;  %v1954_v8 = vld [vmem:[%s18584_s1 + $0x3b60] sm:$0xff] }
 0x39d   :  { %v17913_v10 = vadd.f32 %v8940_v33, %v5820_v0  ;;  %11512 = vmatpush3.bf16.msra.mxu0 %v11511_v35  ;;  %v11561_v55 = vpack.c.bf16 %v1933_v46, %v1932_v53  ;;  %v11593_v35 = vpack.c.bf16 %v1965_v48, %v1964_v47  ;;  %v1934_v33 = vld [vmem:[%s18584_s1 + $0x3ac0] sm:$0xff]  ;;  %v1936_v26 = vld [vmem:[%s18584_s1 + $0x3ad0] sm:$0xff]  ;;  %v11599_v7 = vpack.c.bf16 %v1951_v49, %v1950_v52  ;;  %v1925_v48 = vld [vmem:[%s18584_s1 + $0x3a78] sm:$0xff] }
 0x39e   :  { %11514 = vmatprep.subr.bf16.mxu0 %v11513_v58  ;;  %v1966_v58 = vld [vmem:[%s18584_s1 + $0x3bc0] sm:$0xff]  ;;  %v11569_v11 = vpack.c.bf16 %v1937_v4, %v1936_v26  ;;  %v11577_v46 = vpack.c.bf16 %v1941_v34, %v1940_v42  ;;  %v1924_v47 = vld [vmem:[%s18584_s1 + $0x3a70] sm:$0xff]  ;;  %v1957_v56 = vld [vmem:[%s18584_s1 + $0x3b78] sm:$0xff] }
 0x39f   :  { %11544 = vmatpush3.bf16.msra.mxu1 %v11543_v63  ;;  %v1935_v63 = vld [vmem:[%s18584_s1 + $0x3ac8] sm:$0xff]  ;;  %v11597_v3 = vpack.c.bf16 %v1967_v59, %v1966_v58  ;;  %v1990_v23 = vld [vmem:[%s18584_s1 + $0x3c80] sm:$0xff]  ;;  %v1992_v52 = vld [vmem:[%s18584_s1 + $0x3c90] sm:$0xff] }
 0x3a0   :  { %11546 = vmatprep.subr.bf16.mxu1 %v11545_v1  ;;  %v11565_v0 = vpack.c.bf16 %v1935_v63, %v1934_v33  ;;  %v1918_v1 = vld [vmem:[%s18584_s1 + $0x3a40] sm:$0xff]  ;;  %v1991_v57 = vld [vmem:[%s18584_s1 + $0x3c88] sm:$0xff]  ;;  %v11579_v63 = vpack.c.bf16 %v1925_v48, %v1924_v47  ;;  %v2024_v26 = vld [vmem:[%s18584_s1 + $0x3d90] sm:$0xff] }
 0x3a1   :  { %11516 = vmatpush3.bf16.msra.mxu0 %v11515_v12  ;;  %v1968_v12 = vld [vmem:[%s18584_s1 + $0x3bd0] sm:$0xff]  ;;  %v11613_v59 = vpack.c.bf16 %v1991_v57, %v1990_v23  ;;  %v2025_v4 = vld [vmem:[%s18584_s1 + $0x3d98] sm:$0xff]  ;;  %v1994_v17 = vld [vmem:[%s18584_s1 + $0x3ca0] sm:$0xff] }
 0x3a2   :  { %11550 = vmatprep.subr.bf16.mxu0 %v11549_v6  ;;  %v11567_v6 = vpack.c.bf16 %v1919_v2, %v1918_v1  ;;  %v2007_v2 = vld [vmem:[%s18584_s1 + $0x3d08] sm:$0xff]  ;;  %v11649_v16 = vpack.c.bf16 %v2025_v4, %v2024_v26  ;;  %v2028_v42 = vld [vmem:[%s18584_s1 + $0x3db0] sm:$0xff]  ;;  %v2029_v34 = vld [vmem:[%s18584_s1 + $0x3db8] sm:$0xff] }
 0x3a3   :  { %11548 = vmatpush3.bf16.msra.mxu1 %v11547_v5  ;;  %v1969_v5 = vld [vmem:[%s18584_s1 + $0x3bd8] sm:$0xff]  ;;  %v1995_v24 = vld [vmem:[%s18584_s1 + $0x3ca8] sm:$0xff]  ;;  %v2014_v23 = vld [vmem:[%s18584_s1 + $0x3d40] sm:$0xff] }
 0x3a4   :  { %11582 = vmatprep.subr.bf16.mxu1 %v11581_v15  ;;  %6798 = vmatmul.mubr.f32.vlgmr.msra.gmra.mrb[56].mxu0 %v17724_v9  ;;  %v1914_v9 = vld [vmem:[%s18584_s1 + $0x3a20] sm:$0xff]  ;;  %v1921_v15 = vld [vmem:[%s18584_s1 + $0x3a58] sm:$0xff]  ;;  %v11601_v51 = vpack.c.bf16 %v1969_v5, %v1968_v12  ;;  %v2031_v47 = vld [vmem:[%s18584_s1 + $0x3dc8] sm:$0xff] }
 0x3a5   :  { %11552 = vmatpush3.bf16.msra.mxu0 %v11551_v19  ;;  %6937 = vmatprep.mubr.f32.mxu0 %v2649_v32  ;;  %v11559_v50 = vpack.c.bf16 %v1915_v43, %v1914_v9  ;;  %v1970_v19 = vld [vmem:[%s18584_s1 + $0x3be0] sm:$0xff]  ;;  %v1955_v32 = vld [vmem:[%s18584_s1 + $0x3b68] sm:$0xff] }
 0x3a6   :  { %6868 = vmatmul.mubr.f32.vlgmr.msra.gmra.mrb[56].mxu1 %v17733_v39  ;;  %11554 = vmatprep.subr.bf16.mxu0 %v11553_v22  ;;  %v1947_v39 = vld [vmem:[%s18584_s1 + $0x3b28] sm:$0xff]  ;;  %v11571_v22 = vpack.c.bf16 %v1921_v15, %v1920_v14  ;;  %v11607_v53 = vpack.c.bf16 %v1955_v32, %v1954_v8  ;;  %v1977_v14 = vld [vmem:[%s18584_s1 + $0x3c18] sm:$0xff]  ;;  %v2008_v15 = vld [vmem:[%s18584_s1 + $0x3d10] sm:$0xff] }
 0x3a7   :  { %11584 = vmatpush3.bf16.msra.mxu1 %v11583_v20  ;;  %7007 = vmatprep.mubr.f32.mxu1 %v2650_v36  ;;  %v11591_v54 = vpack.c.bf16 %v1947_v39, %v1946_v21  ;;  %v1971_v20 = vld [vmem:[%s18584_s1 + $0x3be8] sm:$0xff]  ;;  %v2010_v8 = vld [vmem:[%s18584_s1 + $0x3d20] sm:$0xff]  ;;  %v1997_v32 = vld [vmem:[%s18584_s1 + $0x3cb8] sm:$0xff] }
 0x3a8   :  { %11586 = vmatprep.subr.bf16.mxu1 %v11585_v31  ;;  %v1923_v31 = vld [vmem:[%s18584_s1 + $0x3a68] sm:$0xff]  ;;  %v11605_v37 = vpack.c.bf16 %v1971_v20, %v1970_v19  ;;  %v2026_v19 = vld [vmem:[%s18584_s1 + $0x3da0] sm:$0xff] }
 0x3a9   :  { %11556 = vmatpush3.bf16.msra.mxu0 %v11555_v38  ;;  %v11575_v21 = vpack.c.bf16 %v1923_v31, %v1922_v29  ;;  %v2027_v20 = vld [vmem:[%s18584_s1 + $0x3da8] sm:$0xff]  ;;  %v11621_v29 = vpack.c.bf16 %v1995_v24, %v1994_v17  ;;  %v2002_v26 = vld [vmem:[%s18584_s1 + $0x3ce0] sm:$0xff] }
 0x3aa   :  { %11558 = vmatprep.subr.bf16.mxu0 %v11557_v41  ;;  %v1973_v41 = vld [vmem:[%s18584_s1 + $0x3bf8] sm:$0xff]  ;;  %v1979_v31 = vld [vmem:[%s18584_s1 + $0x3c28] sm:$0xff] }
 0x3ab   :  { %11588 = vmatpush3.bf16.msra.mxu1 %v11587_v40  ;;  %v1972_v40 = vld [vmem:[%s18584_s1 + $0x3bf0] sm:$0xff]  ;;  %v2003_v4 = vld [vmem:[%s18584_s1 + $0x3ce8] sm:$0xff] }
 0x3ac   :  { %11590 = vmatprep.subr.bf16.mxu1 %v11589_v44  ;;  %v52_v44 = vld [vmem:[%s18585_s0 + $0xf0] sm:$0xff] }
 0x3ad   :  { %11560 = vmatpush3.bf16.msra.mxu0 %v11559_v50  ;;  %v1956_v50 = vld [vmem:[%s18584_s1 + $0x3b70] sm:$0xff]  ;;  %v2651_v45 = vcombine.high %v52_v44, %v52_v44  ;;  %v18144_v49 = vrot.slane %v52_v44, %v11989_v13  ;;  %v2013_v44 = vld [vmem:[%s18584_s1 + $0x3d38] sm:$0xff] }
 0x3ae   :  { %11562 = vmatprep.subr.bf16.mxu0 %v11561_v55  ;;  %v11609_v55 = vpack.c.bf16 %v1973_v41, %v1972_v40  ;;  %v11611_v58 = vpack.c.bf16 %v1957_v56, %v1956_v50  ;;  %v1980_v41 = vld [vmem:[%s18584_s1 + $0x3c30] sm:$0xff]  ;;  %v1983_v56 = vld [vmem:[%s18584_s1 + $0x3c48] sm:$0xff] }
 0x3af   :  { %11592 = vmatpush3.bf16.msra.mxu1 %v11591_v54  ;;  %v18153_v12 = vrot.slane %v2651_v45, %v11989_v13  ;;  %v2666_v18 = vcombine.high %v18144_v49, %v18144_v49  ;;  %v2001_v45 = vld [vmem:[%s18584_s1 + $0x3cd8] sm:$0xff] }
 0x3b0   :  { %11594 = vmatprep.subr.bf16.mxu1 %v11593_v35  ;;  %v2022_v35 = vld [vmem:[%s18584_s1 + $0x3d80] sm:$0xff] }
 0x3b1   :  { %11564 = vmatpush3.bf16.msra.mxu0 %v11563_v60  ;;  %v1974_v60 = vld [vmem:[%s18584_s1 + $0x3c00] sm:$0xff] }
 0x3b2   :  { %11566 = vmatprep.subr.bf16.mxu0 %v11565_v0  ;;  %v2006_v0 = vld [vmem:[%s18584_s1 + $0x3d00] sm:$0xff] }
 0x3b3   :  { %11596 = vmatpush3.bf16.msra.mxu1 %v11595_v62  ;;  %v1975_v62 = vld [vmem:[%s18584_s1 + $0x3c08] sm:$0xff] }
 0x3b4   :  { %11598 = vmatprep.subr.bf16.mxu1 %v11597_v3  ;;  %v1993_v3 = vld [vmem:[%s18584_s1 + $0x3c98] sm:$0xff]  ;;  %v11615_v5 = vpack.c.bf16 %v1975_v62, %v1974_v60 }
 0x3b5   :  { %11568 = vmatpush3.bf16.msra.mxu0 %v11567_v6  ;;  %v11647_v6 = vpack.c.bf16 %v2007_v2, %v2006_v0  ;;  %v1984_v0 = vld [vmem:[%s18584_s1 + $0x3c50] sm:$0xff] }
 0x3b6   :  { %11570 = vmatprep.subr.bf16.mxu0 %v11569_v11  ;;  %v1976_v11 = vld [vmem:[%s18584_s1 + $0x3c10] sm:$0xff] }
 0x3b7   :  { %11600 = vmatpush3.bf16.msra.mxu1 %v11599_v7  ;;  %v8973_v30 = vpop.f32.mrb[44].mxu0  ;;  %v11617_v7 = vpack.c.bf16 %v1993_v3, %v1992_v52  ;;  %v2016_v2 = vld [vmem:[%s18584_s1 + $0x3d50] sm:$0xff]  ;;  %v2017_v3 = vld [vmem:[%s18584_s1 + $0x3d58] sm:$0xff] }
 0x3b8   :  { %11602 = vmatprep.subr.bf16.mxu1 %v11601_v51  ;;  %v8974_v36 = vpop.f32.mrb[45].mxu0  ;;  %v2009_v51 = vld [vmem:[%s18584_s1 + $0x3d18] sm:$0xff] }
 0x3b9   :  { %v9008_v38 = vpop.f32.mrb[44].mxu1  ;;  %v8975_v9 = vadd.f32 %v8974_v36, %v8973_v30  ;;  %11572 = vmatpush3.bf16.msra.mxu0 %v11571_v22  ;;  %v2667_v22 = vcombine.high %v18153_v12, %v18153_v12  ;;  %v11653_v30 = vpack.c.bf16 %v2027_v20, %v2026_v19  ;;  %v2004_v19 = vld [vmem:[%s18584_s1 + $0x3cf0] sm:$0xff]  ;;  %v2005_v20 = vld [vmem:[%s18584_s1 + $0x3cf8] sm:$0xff] }
 0x3ba   :  { %v9009_v43 = vpop.f32.mrb[45].mxu1  ;;  %11574 = vmatprep.subr.bf16.mxu0 %v11573_v28  ;;  %v11651_v28 = vpack.c.bf16 %v2009_v51, %v2008_v15  ;;  %v1986_v15 = vld [vmem:[%s18584_s1 + $0x3c60] sm:$0xff] }
 0x3bb   :  { %v9010_v39 = vadd.f32 %v9009_v43, %v9008_v38  ;;  %11604 = vmatpush3.bf16.msra.mxu1 %v11603_v25  ;;  %v5960_v54 = vadd.f32 %v8975_v9, %v17913_v10  ;;  %v2023_v10 = vld [vmem:[%s18584_s1 + $0x3d88] sm:$0xff]  ;;  %v11619_v25 = vpack.c.bf16 %v1977_v14, %v1976_v11  ;;  %v1981_v9 = vld [vmem:[%s18584_s1 + $0x3c38] sm:$0xff]  ;;  %v2012_v43 = vld [vmem:[%s18584_s1 + $0x3d30] sm:$0xff]  ;;  %v11667_v11 = vpack.c.bf16 %v2017_v3, %v2016_v2 }
 0x3bc   :  { %11606 = vmatprep.subr.bf16.mxu1 %v11605_v37  ;;  %v11645_v1 = vpack.c.bf16 %v2023_v10, %v2022_v35  ;;  %v1996_v37 = vld [vmem:[%s18584_s1 + $0x3cb0] sm:$0xff]  ;;  %v11627_v48 = vpack.c.bf16 %v1981_v9, %v1980_v41  ;;  %v11659_v50 = vpack.c.bf16 %v2013_v44, %v2012_v43  ;;  %v2015_v35 = vld [vmem:[%s18584_s1 + $0x3d48] sm:$0xff]  ;;  %v11637_v14 = vpack.c.bf16 %v2003_v4, %v2002_v26  ;;  %v2018_v51 = vld [vmem:[%s18584_s1 + $0x3d60] sm:$0xff] }
 0x3bd   :  { %v18123_v33 = vadd.f32 %v9010_v39, %v5960_v54  ;;  %11576 = vmatpush3.bf16.msra.mxu0 %v11575_v21  ;;  %v11625_v40 = vpack.c.bf16 %v1997_v32, %v1996_v37  ;;  %v11657_v21 = vpack.c.bf16 %v2029_v34, %v2028_v42  ;;  %v1998_v39 = vld [vmem:[%s18584_s1 + $0x3cc0] sm:$0xff]  ;;  %v2000_v10 = vld [vmem:[%s18584_s1 + $0x3cd0] sm:$0xff]  ;;  %v11663_v60 = vpack.c.bf16 %v2015_v35, %v2014_v23  ;;  %v1989_v34 = vld [vmem:[%s18584_s1 + $0x3c78] sm:$0xff] }
 0x3be   :  { %11578 = vmatprep.subr.bf16.mxu0 %v11577_v46  ;;  %v2030_v46 = vld [vmem:[%s18584_s1 + $0x3dc0] sm:$0xff]  ;;  %v11633_v62 = vpack.c.bf16 %v2001_v45, %v2000_v10  ;;  %v11641_v32 = vpack.c.bf16 %v2005_v20, %v2004_v19  ;;  %v1988_v42 = vld [vmem:[%s18584_s1 + $0x3c70] sm:$0xff]  ;;  %v2021_v41 = vld [vmem:[%s18584_s1 + $0x3d78] sm:$0xff] }
 0x3bf   :  { %11608 = vmatpush3.bf16.msra.mxu1 %v11607_v53  ;;  %v1999_v53 = vld [vmem:[%s18584_s1 + $0x3cc8] sm:$0xff]  ;;  %v11661_v57 = vpack.c.bf16 %v2031_v47, %v2030_v46  ;;  %v2054_v9 = vld [vmem:[%s18584_s1 + $0x3e80] sm:$0xff]  ;;  %v2056_v23 = vld [vmem:[%s18584_s1 + $0x3e90] sm:$0xff] }
 0x3c0   :  { %11610 = vmatprep.subr.bf16.mxu1 %v11609_v55  ;;  %v11629_v54 = vpack.c.bf16 %v1999_v53, %v1998_v39  ;;  %v1982_v55 = vld [vmem:[%s18584_s1 + $0x3c40] sm:$0xff]  ;;  %v2055_v43 = vld [vmem:[%s18584_s1 + $0x3e88] sm:$0xff]  ;;  %v11643_v53 = vpack.c.bf16 %v1989_v34, %v1988_v42  ;;  %v2088_v10 = vld [vmem:[%s18584_s1 + $0x3f90] sm:$0xff] }
 0x3c1   :  { %11580 = vmatpush3.bf16.msra.mxu0 %v11579_v63  ;;  %v2032_v63 = vld [vmem:[%s18584_s1 + $0x3dd0] sm:$0xff]  ;;  %v11677_v47 = vpack.c.bf16 %v2055_v43, %v2054_v9  ;;  %v2089_v45 = vld [vmem:[%s18584_s1 + $0x3f98] sm:$0xff]  ;;  %v2059_v3 = vld [vmem:[%s18584_s1 + $0x3ea8] sm:$0xff] }
 0x3c2   :  { %11614 = vmatprep.subr.bf16.mxu0 %v11613_v59  ;;  %v11631_v59 = vpack.c.bf16 %v1983_v56, %v1982_v55  ;;  %v2071_v56 = vld [vmem:[%s18584_s1 + $0x3f08] sm:$0xff]  ;;  %v2073_v2 = vld [vmem:[%s18584_s1 + $0x3f18] sm:$0xff]  ;;  %v2090_v4 = vld [vmem:[%s18584_s1 + $0x3fa0] sm:$0xff] }
 0x3c3   :  { %11612 = vmatpush3.bf16.msra.mxu1 %v11611_v58  ;;  %v2033_v58 = vld [vmem:[%s18584_s1 + $0x3dd8] sm:$0xff]  ;;  %v2079_v43 = vld [vmem:[%s18584_s1 + $0x3f48] sm:$0xff] }
 0x3c4   :  { %11646 = vmatprep.subr.bf16.mxu1 %v11645_v1  ;;  %6938 = vmatmul.mubr.f32.vlgmr.msra.gmra.mrb[58].mxu0 %v17934_v61  ;;  %v1978_v61 = vld [vmem:[%s18584_s1 + $0x3c20] sm:$0xff]  ;;  %v1985_v1 = vld [vmem:[%s18584_s1 + $0x3c58] sm:$0xff]  ;;  %v11665_v52 = vpack.c.bf16 %v2033_v58, %v2032_v63 }
 0x3c5   :  { %11616 = vmatpush3.bf16.msra.mxu0 %v11615_v5  ;;  %7077 = vmatprep.mubr.f32.mxu0 %v2666_v18  ;;  %v11623_v36 = vpack.c.bf16 %v1979_v31, %v1978_v61  ;;  %v2034_v5 = vld [vmem:[%s18584_s1 + $0x3de0] sm:$0xff]  ;;  %v2019_v18 = vld [vmem:[%s18584_s1 + $0x3d68] sm:$0xff]  ;;  %v2093_v19 = vld [vmem:[%s18584_s1 + $0x3fb8] sm:$0xff] }
 0x3c6   :  { %7008 = vmatmul.mubr.f32.vlgmr.msra.gmra.mrb[58].mxu1 %v17943_v27  ;;  %11618 = vmatprep.subr.bf16.mxu0 %v11617_v7  ;;  %v2011_v27 = vld [vmem:[%s18584_s1 + $0x3d28] sm:$0xff]  ;;  %v11635_v7 = vpack.c.bf16 %v1985_v1, %v1984_v0  ;;  %v11671_v37 = vpack.c.bf16 %v2019_v18, %v2018_v51  ;;  %v2041_v0 = vld [vmem:[%s18584_s1 + $0x3e18] sm:$0xff]  ;;  %v2072_v1 = vld [vmem:[%s18584_s1 + $0x3f10] sm:$0xff] }
 0x3c7   :  { %11648 = vmatpush3.bf16.msra.mxu1 %v11647_v6  ;;  %7147 = vmatprep.mubr.f32.mxu1 %v2667_v22  ;;  %v11655_v38 = vpack.c.bf16 %v2011_v27, %v2010_v8  ;;  %v2035_v6 = vld [vmem:[%s18584_s1 + $0x3de8] sm:$0xff]  ;;  %v2092_v18 = vld [vmem:[%s18584_s1 + $0x3fb0] sm:$0xff] }
 0x3c8   :  { %11650 = vmatprep.subr.bf16.mxu1 %v11649_v16  ;;  %v1987_v16 = vld [vmem:[%s18584_s1 + $0x3c68] sm:$0xff]  ;;  %v11669_v24 = vpack.c.bf16 %v2035_v6, %v2034_v5 }
 0x3c9   :  { %11620 = vmatpush3.bf16.msra.mxu0 %v11619_v25  ;;  %v11639_v8 = vpack.c.bf16 %v1987_v16, %v1986_v15  ;;  %v2091_v5 = vld [vmem:[%s18584_s1 + $0x3fa8] sm:$0xff]  ;;  %v2074_v16 = vld [vmem:[%s18584_s1 + $0x3f20] sm:$0xff] }
 0x3ca   :  { %11622 = vmatprep.subr.bf16.mxu0 %v11621_v29  ;;  %v2037_v29 = vld [vmem:[%s18584_s1 + $0x3df8] sm:$0xff]  ;;  %v2043_v15 = vld [vmem:[%s18584_s1 + $0x3e28] sm:$0xff]  ;;  %v11717_v51 = vpack.c.bf16 %v2091_v5, %v2090_v4 }
 0x3cb   :  { %11652 = vmatpush3.bf16.msra.mxu1 %v11651_v28  ;;  %v2036_v28 = vld [vmem:[%s18584_s1 + $0x3df0] sm:$0xff]  ;;  %v2069_v4 = vld [vmem:[%s18584_s1 + $0x3ef8] sm:$0xff] }
 0x3cc   :  { %11654 = vmatprep.subr.bf16.mxu1 %v11653_v30  ;;  %v53_v30 = vld [vmem:[%s18585_s0 + $0xf8] sm:$0xff] }
 0x3cd   :  { %11624 = vmatpush3.bf16.msra.mxu0 %v11623_v36  ;;  %v2020_v36 = vld [vmem:[%s18584_s1 + $0x3d70] sm:$0xff]  ;;  %v2668_v44 = vcombine.high %v53_v30, %v53_v30  ;;  %v18354_v35 = vrot.slane %v53_v30, %v11989_v13  ;;  %v2062_v30 = vld [vmem:[%s18584_s1 + $0x3ec0] sm:$0xff] }
 0x3ce   :  { %11626 = vmatprep.subr.bf16.mxu0 %v11625_v40  ;;  %v11673_v40 = vpack.c.bf16 %v2037_v29, %v2036_v28  ;;  %v11675_v46 = vpack.c.bf16 %v2021_v41, %v2020_v36  ;;  %v2044_v28 = vld [vmem:[%s18584_s1 + $0x3e30] sm:$0xff]  ;;  %v2045_v29 = vld [vmem:[%s18584_s1 + $0x3e38] sm:$0xff]  ;;  %v2078_v41 = vld [vmem:[%s18584_s1 + $0x3f40] sm:$0xff] }
 0x3cf   :  { %11656 = vmatpush3.bf16.msra.mxu1 %v11655_v38  ;;  %v18363_v63 = vrot.slane %v2668_v44, %v11989_v13  ;;  %v11713_v13 = vpack.c.bf16 %v2089_v45, %v2088_v10  ;;  %v2683_v26 = vcombine.high %v18354_v35, %v18354_v35  ;;  %v11691_v42 = vpack.c.bf16 %v2045_v29, %v2044_v28  ;;  %v2096_v44 = vld [vmem:[%s18584_s1 + $0x3fd0] sm:$0xff]  ;;  %v2067_v10 = vld [vmem:[%s18584_s1 + $0x3ee8] sm:$0xff]  ;;  %v2098_v45 = vld [vmem:[%s18584_s1 + $0x3fe0] sm:$0xff] }
 0x3d0   :  { %11658 = vmatprep.subr.bf16.mxu1 %v11657_v21  ;;  %v2086_v21 = vld [vmem:[%s18584_s1 + $0x3f80] sm:$0xff] }
 0x3d1   :  { %11628 = vmatpush3.bf16.msra.mxu0 %v11627_v48  ;;  %v2038_v48 = vld [vmem:[%s18584_s1 + $0x3e00] sm:$0xff]  ;;  %v2684_v6 = vcombine.high %v18363_v63, %v18363_v63 }
 0x3d2   :  { %11630 = vmatprep.subr.bf16.mxu0 %v11629_v54  ;;  %v2070_v54 = vld [vmem:[%s18584_s1 + $0x3f00] sm:$0xff] }
 0x3d3   :  { %11660 = vmatpush3.bf16.msra.mxu1 %v11659_v50  ;;  %v2039_v50 = vld [vmem:[%s18584_s1 + $0x3e08] sm:$0xff] }
 0x3d4   :  { %11662 = vmatprep.subr.bf16.mxu1 %v11661_v57  ;;  %v2057_v57 = vld [vmem:[%s18584_s1 + $0x3e98] sm:$0xff]  ;;  %v11679_v58 = vpack.c.bf16 %v2039_v50, %v2038_v48  ;;  %v2048_v50 = vld [vmem:[%s18584_s1 + $0x3e50] sm:$0xff] }
 0x3d5   :  { %11632 = vmatpush3.bf16.msra.mxu0 %v11631_v59  ;;  %v11711_v59 = vpack.c.bf16 %v2071_v56, %v2070_v54  ;;  %v2049_v54 = vld [vmem:[%s18584_s1 + $0x3e58] sm:$0xff] }
 0x3d6   :  { %11634 = vmatprep.subr.bf16.mxu0 %v11633_v62  ;;  %v2040_v62 = vld [vmem:[%s18584_s1 + $0x3e10] sm:$0xff] }
 0x3d7   :  { %11664 = vmatpush3.bf16.msra.mxu1 %v11663_v60  ;;  %v9043_v17 = vpop.f32.mrb[46].mxu0  ;;  %v11681_v60 = vpack.c.bf16 %v2057_v57, %v2056_v23  ;;  %v2081_v23 = vld [vmem:[%s18584_s1 + $0x3f58] sm:$0xff]  ;;  %v2066_v57 = vld [vmem:[%s18584_s1 + $0x3ee0] sm:$0xff] }
 0x3d8   :  { %11666 = vmatprep.subr.bf16.mxu1 %v11665_v52  ;;  %v9044_v22 = vpop.f32.mrb[47].mxu0  ;;  %v2058_v52 = vld [vmem:[%s18584_s1 + $0x3ea0] sm:$0xff] }
 0x3d9   :  { %v9078_v25 = vpop.f32.mrb[46].mxu1  ;;  %v9045_v61 = vadd.f32 %v9044_v22, %v9043_v17  ;;  %11636 = vmatpush3.bf16.msra.mxu0 %v11635_v7  ;;  %v11683_v7 = vpack.c.bf16 %v2041_v0, %v2040_v62  ;;  %v2060_v17 = vld [vmem:[%s18584_s1 + $0x3eb0] sm:$0xff]  ;;  %v11701_v62 = vpack.c.bf16 %v2067_v10, %v2066_v57  ;;  %v2050_v0 = vld [vmem:[%s18584_s1 + $0x3e60] sm:$0xff]  ;;  %v7303_v57 = vld [vmem:[%s18587_s3 + $0x48] sm:$0xff] }
 0x3da   :  { %v9079_v31 = vpop.f32.mrb[47].mxu1  ;;  %11638 = vmatprep.subr.bf16.mxu0 %v11637_v14  ;;  %v11685_v14 = vpack.c.bf16 %v2059_v3, %v2058_v52  ;;  %v2083_v3 = vld [vmem:[%s18584_s1 + $0x3f68] sm:$0xff] }
 0x3db   :  { %v9080_v27 = vadd.f32 %v9079_v31, %v9078_v25  ;;  %11668 = vmatpush3.bf16.msra.mxu1 %v11667_v11  ;;  %v6100_v38 = vadd.f32 %v9045_v61, %v18123_v33  ;;  %v2087_v33 = vld [vmem:[%s18584_s1 + $0x3f88] sm:$0xff]  ;;  %v11715_v11 = vpack.c.bf16 %v2073_v2, %v2072_v1  ;;  %v2076_v61 = vld [vmem:[%s18584_s1 + $0x3f30] sm:$0xff]  ;;  %v11721_v31 = vpack.c.bf16 %v2093_v19, %v2092_v18 }
 0x3dc   :  { %11670 = vmatprep.subr.bf16.mxu1 %v11669_v24  ;;  %v11709_v55 = vpack.c.bf16 %v2087_v33, %v2086_v21  ;;  %v2061_v24 = vld [vmem:[%s18584_s1 + $0x3eb8] sm:$0xff]  ;;  %v2064_v21 = vld [vmem:[%s18584_s1 + $0x3ed0] sm:$0xff]  ;;  %v2051_v1 = vld [vmem:[%s18584_s1 + $0x3e68] sm:$0xff] }
 0x3dd   :  { %v18333_v39 = vadd.f32 %v9080_v27, %v6100_v38  ;;  %11640 = vmatpush3.bf16.msra.mxu0 %v11639_v8  ;;  %v11689_v25 = vpack.c.bf16 %v2061_v24, %v2060_v17  ;;  %v2077_v8 = vld [vmem:[%s18584_s1 + $0x3f38] sm:$0xff]  ;;  %v2063_v27 = vld [vmem:[%s18584_s1 + $0x3ec8] sm:$0xff]  ;;  %v2046_v38 = vld [vmem:[%s18584_s1 + $0x3e40] sm:$0xff] }
 0x3de   :  { %11642 = vmatprep.subr.bf16.mxu0 %v11641_v32  ;;  %v2095_v32 = vld [vmem:[%s18584_s1 + $0x3fc8] sm:$0xff]  ;;  %v11723_v34 = vpack.c.bf16 %v2077_v8, %v2076_v61  ;;  %v11693_v36 = vpack.c.bf16 %v2063_v27, %v2062_v30  ;;  %v2065_v33 = vld [vmem:[%s18584_s1 + $0x3ed8] sm:$0xff]  ;;  %v2052_v17 = vld [vmem:[%s18584_s1 + $0x3e70] sm:$0xff] }
 0x3df   :  { %11672 = vmatpush3.bf16.msra.mxu1 %v11671_v37  ;;  %v2094_v37 = vld [vmem:[%s18584_s1 + $0x3fc0] sm:$0xff]  ;;  %v11697_v48 = vpack.c.bf16 %v2065_v33, %v2064_v21  ;;  %v2053_v24 = vld [vmem:[%s18584_s1 + $0x3e78] sm:$0xff]  ;;  %v11806_v21 = vmov 0.0|0.0   ;;  %v7296_v33 = vld [vmem:[%s18587_s3 + $0x10] sm:$0xff] }
 0x3e0   :  { %11674 = vmatprep.subr.bf16.mxu1 %v11673_v40  ;;  %v2047_v40 = vld [vmem:[%s18584_s1 + $0x3e48] sm:$0xff]  ;;  %v11725_v9 = vpack.c.bf16 %v2095_v32, %v2094_v37  ;;  %v11707_v28 = vpack.c.bf16 %v2053_v24, %v2052_v17 }
 0x3e1   :  { %11644 = vmatpush3.bf16.msra.mxu0 %v11643_v53  ;;  %v2097_v53 = vld [vmem:[%s18584_s1 + $0x3fd8] sm:$0xff] }
 0x3e2   :  { %11678 = vmatprep.subr.bf16.mxu0 %v11677_v47  ;;  %v11727_v47 = vpack.c.bf16 %v2079_v43, %v2078_v41  ;;  %v11729_v56 = vpack.c.bf16 %v2097_v53, %v2096_v44  ;;  %v7297_v53 = vld [vmem:[%s18587_s3 + $0x18] sm:$0xff] }
 0x3e3   :  { %11676 = vmatpush3.bf16.msra.mxu1 %v11675_v46  ;;  %v11695_v46 = vpack.c.bf16 %v2047_v40, %v2046_v38 }
 0x3e4   :  { %11710 = vmatprep.subr.bf16.mxu1 %v11709_v55  ;;  %7078 = vmatmul.mubr.f32.vlgmr.msra.gmra.mrb[60].mxu0 %v18144_v49  ;;  %v2042_v49 = vld [vmem:[%s18584_s1 + $0x3e20] sm:$0xff]  ;;  %v2080_v55 = vld [vmem:[%s18584_s1 + $0x3f50] sm:$0xff] }
 0x3e5   :  { %11680 = vmatpush3.bf16.msra.mxu0 %v11679_v58  ;;  %7217 = vmatprep.mubr.f32.mxu0 %v2683_v26  ;;  %v11687_v20 = vpack.c.bf16 %v2043_v15, %v2042_v49  ;;  %v2099_v58 = vld [vmem:[%s18584_s1 + $0x3fe8] sm:$0xff]  ;;  %v2068_v26 = vld [vmem:[%s18584_s1 + $0x3ef0] sm:$0xff]  ;;  %v11703_v15 = vpack.c.bf16 %v2051_v1, %v2050_v0 }
 0x3e6   :  { %7148 = vmatmul.mubr.f32.vlgmr.msra.gmra.mrb[60].mxu1 %v18153_v12  ;;  %11682 = vmatprep.subr.bf16.mxu0 %v11681_v60  ;;  %v2075_v12 = vld [vmem:[%s18584_s1 + $0x3f28] sm:$0xff]  ;;  %v11731_v60 = vpack.c.bf16 %v2081_v23, %v2080_v55  ;;  %v11733_v52 = vpack.c.bf16 %v2099_v58, %v2098_v45  ;;  %v7301_v55 = vld [vmem:[%s18587_s3 + $0x38] sm:$0xff]  ;;  %v7302_v23 = vld [vmem:[%s18587_s3 + $0x40] sm:$0xff] }
 0x3e7   :  { %11712 = vmatpush3.bf16.msra.mxu1 %v11711_v59  ;;  %7287 = vmatprep.mubr.f32.mxu1 %v2684_v6  ;;  %v11719_v22 = vpack.c.bf16 %v2075_v12, %v2074_v16  ;;  %v11699_v59 = vpack.c.bf16 %v2049_v54, %v2048_v50  ;;  %v11705_v12 = vpack.c.bf16 %v2069_v4, %v2068_v26  ;;  %v7300_v54 = vld [vmem:[%s18587_s3 + $0x30] sm:$0xff]  ;;  %v7305_v58 = vld [vmem:[%s18587_s3 + $0x58] sm:$0xff]  ;;  %v7307_v0 = vld [vmem:[%s18587_s3 + $0x68] sm:$0xff] }
 0x3e8   :  { %11714 = vmatprep.subr.bf16.mxu1 %v11713_v13  ;;  %v2082_v13 = vld [vmem:[%s18584_s1 + $0x3f60] sm:$0xff]  ;;  %v11754_v10 = vpack.c.bf16 %v7303_v57, %v7302_v23  ;;  %v7304_v45 = vld [vmem:[%s18587_s3 + $0x50] sm:$0xff] }
 0x3e9   :  { %11684 = vmatpush3.bf16.msra.mxu0 %v11683_v7  ;;  %v2100_v7 = vld [vmem:[%s18584_s1 + $0x3ff0] sm:$0xff] }
 0x3ea   :  { %11686 = vmatprep.subr.bf16.mxu0 %v11685_v14 }
 0x3eb   :  { %11716 = vmatpush3.bf16.msra.mxu1 %v11715_v11  ;;  %v2101_v11 = vld [vmem:[%s18584_s1 + $0x3ff8] sm:$0xff] }
 0x3ec   :  { %11718 = vmatprep.subr.bf16.mxu1 %v11717_v51  ;;  %v11735_v51 = vpack.c.bf16 %v2083_v3, %v2082_v13  ;;  %v11737_v19 = vpack.c.bf16 %v2101_v11, %v2100_v7 }
 0x3ed   :  { %11688 = vmatpush3.bf16.msra.mxu0 %v11687_v20  ;;  %v2084_v20 = vld [vmem:[%s18584_s1 + $0x3f70] sm:$0xff] }
 0x3ee   :  { %11690 = vmatprep.subr.bf16.mxu0 %v11689_v25 }
 0x3ef   :  { %11720 = vmatpush3.bf16.msra.mxu1 %v11719_v22  ;;  %v2085_v22 = vld [vmem:[%s18584_s1 + $0x3f78] sm:$0xff] }
 0x3f0   :  { %11722 = vmatprep.subr.bf16.mxu1 %v11721_v31  ;;  %v11739_v29 = vpack.c.bf16 %v2085_v22, %v2084_v20 }
 0x3f1   :  { %11692 = vmatpush3.bf16.msra.mxu0 %v11691_v42 }
 0x3f2   :  { %11694 = vmatprep.subr.bf16.mxu0 %v11693_v36 }
 0x3f3   :  { %11724 = vmatpush3.bf16.msra.mxu1 %v11723_v34 }
 0x3f4   :  { %11726 = vmatprep.subr.bf16.mxu1 %v11725_v9 }
 0x3f5   :  { %11696 = vmatpush3.bf16.msra.mxu0 %v11695_v46  ;;  %v11745_v46 = vpack.c.bf16 %v7297_v53, %v7296_v33 }
 0x3f6   :  { %11698 = vmatprep.subr.bf16.mxu0 %v11697_v48  ;;  %v7299_v48 = vld [vmem:[%s18587_s3 + $0x28] sm:$0xff] }
 0x3f7   :  { %11728 = vmatpush3.bf16.msra.mxu1 %v11727_v47  ;;  %v9113_v2 = vpop.f32.mrb[48].mxu0  ;;  %v7298_v47 = vld [vmem:[%s18587_s3 + $0x20] sm:$0xff] }
 0x3f8   :  { %11730 = vmatprep.subr.bf16.mxu1 %v11729_v56  ;;  %v9114_v5 = vpop.f32.mrb[49].mxu0  ;;  %v11748_v50 = vpack.c.bf16 %v7299_v48, %v7298_v47  ;;  %v11751_v56 = vpack.c.bf16 %v7301_v55, %v7300_v54 }
 0x3f9   :  { %v9148_v6 = vpop.f32.mrb[48].mxu1  ;;  %v9115_v14 = vadd.f32 %v9114_v5, %v9113_v2  ;;  %11700 = vmatpush3.bf16.msra.mxu0 %v11699_v59  ;;  %v11757_v59 = vpack.c.bf16 %v7305_v58, %v7304_v45  ;;  %v7308_v5 = vld [vmem:[%s18587_s3 + $0x70] sm:$0xff] }
 0x3fa   :  { %v9149_v49 = vpop.f32.mrb[49].mxu1  ;;  %11702 = vmatprep.subr.bf16.mxu0 %v11701_v62  ;;  %v7306_v62 = vld [vmem:[%s18587_s3 + $0x60] sm:$0xff] }
 0x3fb   :  { %v9150_v16 = vadd.f32 %v9149_v49, %v9148_v6  ;;  %11732 = vmatpush3.bf16.msra.mxu1 %v11731_v60  ;;  %v6240_v18 = vadd.f32 %v9115_v14, %v18333_v39  ;;  %v11760_v2 = vpack.c.bf16 %v7307_v0, %v7306_v62  ;;  %v7309_v6 = vld [vmem:[%s18587_s3 + $0x78] sm:$0xff]  ;;  %v11808_v14 = vmov 0.0  }
 0x3fc   :  { %11734 = vmatprep.subr.bf16.mxu1 %v11733_v52  ;;  %v11763_v7 = vpack.c.bf16 %v7309_v6, %v7308_v5  ;;  %v10_v49 = vstv %s18588_s4 }
 0x3fd   :  { %v6310_v25 = vadd.f32 %v9150_v16, %v6240_v18  ;;  %11704 = vmatpush3.bf16.msra.mxu0 %v11703_v15  ;;  %11 = vst [vmem:[#allocation2] sm:$0x1] %v10_v49 }
 0x3fe   :  { %11706 = vmatprep.subr.bf16.mxu0 %v11705_v12 }
 0x3ff   :  { %11736 = vmatpush3.bf16.msra.mxu1 %v11735_v51 }
 0x400   :  { %11738 = vmatprep.subr.bf16.mxu1 %v11737_v19 }
 0x401   :  { %11708 = vmatpush3.bf16.msra.mxu0 %v11707_v28 }
 0x402   :  { %11741 = vmatprep.subr.bf16.mxu0 %v11806_v21 }
 0x403   :  { %11740 = vmatpush3.bf16.msra.mxu1 %v11739_v29 }
 0x404   :  { %7218 = vmatmul.mubr.f32.vlgmr.msra.gmra.mrb[62].mxu0 %v18354_v35  ;;  %v7294_v35 = vld [vmem:[%s18587_s3] sm:$0xff] }
 0x405   :  { %9690 = vmatprep.mubr.msk.f32.mxu0 %vm11807_vm0, %v11808_v14 }
 0x406   :  { %7288 = vmatmul.mubr.f32.vlgmr.msra.gmra.mrb[62].mxu1 %v18363_v63  ;;  %v7295_v63 = vld [vmem:[%s18587_s3 + $0x8] sm:$0xff] }
 0x407   :  { %v11742_v44 = vpack.c.bf16 %v7295_v63, %v7294_v35 }
 0x409   :  { %11743 = vmatpush3.bf16.msra.mxu0 %v11742_v44  ;;  %v7400_v44 = vld [vmem:[#allocation2] ss:$0 sm:$0xff] }
 0x40a   :  { %11744 = vmatprep.subr.bf16.mxu0 %v11806_v21 }
 0x40d   :  { %11746 = vmatpush3.bf16.msra.mxu0 %v11745_v46 }
 0x40e   :  { %11747 = vmatprep.subr.bf16.mxu0 %v11806_v21 }
 0x411   :  { %11749 = vmatpush3.bf16.msra.mxu0 %v11748_v50 }
 0x412   :  { %11750 = vmatprep.subr.bf16.mxu0 %v11806_v21 }
 0x415   :  { %11752 = vmatpush3.bf16.msra.mxu0 %v11751_v56 }
 0x416   :  { %11753 = vmatprep.subr.bf16.mxu0 %v11806_v21 }
 0x417   :  { %v9183_v39 = vpop.f32.mrb[50].mxu0 }
 0x418   :  { %v9184_v61 = vpop.f32.mrb[51].mxu0 }
 0x419   :  { %v9218_v31 = vpop.f32.mrb[50].mxu1  ;;  %v9185_v8 = vadd.f32 %v9184_v61, %v9183_v39  ;;  %11755 = vmatpush3.bf16.msra.mxu0 %v11754_v10 }
 0x41a   :  { %v9219_v30 = vpop.f32.mrb[51].mxu1  ;;  %11756 = vmatprep.subr.bf16.mxu0 %v11806_v21 }
 0x41b   :  { %v9220_v27 = vadd.f32 %v9219_v30, %v9218_v31  ;;  %v6380_v37 = vadd.f32 %v9185_v8, %v6310_v25 }
 0x41d   :  { %v6450_v32 = vadd.f32 %v9220_v27, %v6380_v37  ;;  %11758 = vmatpush3.bf16.msra.mxu0 %v11757_v59 }
 0x41e   :  { %11759 = vmatprep.subr.bf16.mxu0 %v11806_v21 }
 0x421   :  { %11761 = vmatpush3.bf16.msra.mxu0 %v11760_v2 }
 0x422   :  { %11762 = vmatprep.subr.bf16.mxu0 %v11806_v21 }
 0x425   :  { %11764 = vmatpush3.bf16.msra.mxu0 %v11763_v7 }
 0x437   :  { %v9253_v42 = vpop.f32.mrb[52].mxu0 }
 0x438   :  { %v9254_v34 = vpop.f32.mrb[53].mxu0 }
 0x439   :  { %v9288_v36 = vpop.f32.mrb[52].mxu1  ;;  %v9255_v38 = vadd.f32 %v9254_v34, %v9253_v42 }
 0x43a   :  { %v9289_v40 = vpop.f32.mrb[53].mxu1 }
 0x43b   :  { %v9290_v41 = vadd.f32 %v9289_v40, %v9288_v36  ;;  %v6520_v9 = vadd.f32 %v9255_v38, %v6450_v32 }
 0x43d   :  { %v6590_v43 = vadd.f32 %v9290_v41, %v6520_v9 }
 0x457   :  { %v9323_v60 = vpop.f32.mrb[54].mxu0 }
 0x458   :  { %v9324_v1 = vpop.f32.mrb[55].mxu0 }
 0x459   :  { %v9358_v13 = vpop.f32.mrb[54].mxu1  ;;  %v9325_v52 = vadd.f32 %v9324_v1, %v9323_v60 }
 0x45a   :  { %v9359_v3 = vpop.f32.mrb[55].mxu1 }
 0x45b   :  { %v9360_v26 = vadd.f32 %v9359_v3, %v9358_v13  ;;  %v6660_v4 = vadd.f32 %v9325_v52, %v6590_v43 }
 0x45d   :  { %v6730_v11 = vadd.f32 %v9360_v26, %v6660_v4 }
 0x477   :  { %v9393_v15 = vpop.f32.mrb[56].mxu0 }
 0x478   :  { %v9394_v16 = vpop.f32.mrb[57].mxu0 }
 0x479   :  { %v9428_v51 = vpop.f32.mrb[56].mxu1  ;;  %v9395_v12 = vadd.f32 %v9394_v16, %v9393_v15 }
 0x47a   :  { %v9429_v17 = vpop.f32.mrb[57].mxu1 }
 0x47b   :  { %v9430_v24 = vadd.f32 %v9429_v17, %v9428_v51  ;;  %v6800_v18 = vadd.f32 %v9395_v12, %v6730_v11 }
 0x47d   :  { %v6870_v19 = vadd.f32 %v9430_v24, %v6800_v18 }
 0x497   :  { %v9463_v20 = vpop.f32.mrb[58].mxu0 }
 0x498   :  { %v9464_v22 = vpop.f32.mrb[59].mxu0 }
 0x499   :  { %v9498_v25 = vpop.f32.mrb[58].mxu1  ;;  %v9465_v28 = vadd.f32 %v9464_v22, %v9463_v20 }
 0x49a   :  { %v9499_v29 = vpop.f32.mrb[59].mxu1 }
 0x49b   :  { %v9500_v39 = vadd.f32 %v9499_v29, %v9498_v25  ;;  %v6940_v61 = vadd.f32 %v9465_v28, %v6870_v19 }
 0x49d   :  { %v7010_v31 = vadd.f32 %v9500_v39, %v6940_v61 }
 0x4b7   :  { %v9533_v8 = vpop.f32.mrb[60].mxu0 }
 0x4b8   :  { %v9534_v30 = vpop.f32.mrb[61].mxu0 }
 0x4b9   :  { %v9568_v27 = vpop.f32.mrb[60].mxu1  ;;  %v9535_v37 = vadd.f32 %v9534_v30, %v9533_v8 }
 0x4ba   :  { %v9569_v32 = vpop.f32.mrb[61].mxu1 }
 0x4bb   :  { %v9570_v42 = vadd.f32 %v9569_v32, %v9568_v27  ;;  %v7080_v34 = vadd.f32 %v9535_v37, %v7010_v31 }
 0x4bd   :  { %v7150_v36 = vadd.f32 %v9570_v42, %v7080_v34 }
 0x4d7   :  { %v9603_v38 = vpop.f32.mrb[62].mxu0 }
 0x4d8   :  { %v9604_v40 = vpop.f32.mrb[63].mxu0 }
 0x4d9   :  { %v9638_v41 = vpop.f32.mrb[62].mxu1  ;;  %v9605_v9 = vadd.f32 %v9604_v40, %v9603_v38 }
 0x4da   :  { %v9639_v43 = vpop.f32.mrb[63].mxu1 }
 0x4db   :  { %v9640_v21 = vadd.f32 %v9639_v43, %v9638_v41  ;;  %v7220_v35 = vadd.f32 %v9605_v9, %v7150_v36 }
 0x4dd   :  { %v7290_v63 = vadd.f32 %v9640_v21, %v7220_v35 }
 0x4df   :  { %v7293_v33 = vmax.f32 %v7290_v63, 0.0 }
 0x4e1   :  { %9691 = vmatmul.mubr.f32.vlgmr.msra.gmra.mrb[64].mxu0 %v7293_v33 }
 0x5b4   :  { %v7383_v53 = vpop.f32.mrb[64].mxu0 }
 0x5b5   :  { %v7384_v46 = vadd.f32 %v7400_v44, %v7383_v53  ;;  %v9692_v47 = vpop.f32.mrb[65].mxu0 }
 0x5b7   :  { %v7387_v48 = vsub.f32 0.0, %v7384_v46 }
 0x5b9   :  { %v7388_v50 = vmul.f32 1.442695, %v7387_v48 }
 0x5bb   :  { %11801 = vpow2.f32 %v7388_v50 }
 0x5c5   :  { %v11802_v54 = vpop.eup %11801 }
 0x5c6   :  { %v7390_v55 = vadd.f32 1.0, %v11802_v54 }
 0x5c8   :  { %11803 = vrcp.f32 %v7390_v55 }
 0x5d2   :  { %v11804_v56 = vpop.eup %11803 }
 0x5d3   :  { %7394 = vst.msk [vmem:[%s18589_s5] sm:$0x3] %vm7393_vm1, %v11804_v56 }

</bundles_post_ra>
